<compile_context>
chip_gen: v7x
topology: tpu7x:2x2x1
jax: 0.10.0
libtpu: 0.0.40
codegen_flags: <defaults>
</compile_context>

<pallas_src>
import jax
import jax.numpy as jnp
from jax.experimental import pallas as pl
from jax.experimental.pallas import tpu as pltpu

C_IN = 512       # channel dim fixed by Linear(512, 32)
C_HID = 32       # hidden dim of the attention MLP
BN_EPS = 1e-5

_LANE = 128
_TILE_BUDGET_BYTES = 4 * 1024 * 1024     # per-buffer activation tile target (~4 MiB)
_VMEM_LIMIT_BYTES = 32 * 1024 * 1024     # safe on v5e/v6e (128 MiB) and v7x (64 MiB)


# --------------------------------------------------------------------------- #
# Host-side helpers
# --------------------------------------------------------------------------- #
def _fold_bn_into_linear1(params):
    """Fold eval-mode BatchNorm1d(32) into Linear(512,32) (row form x @ W)."""
    scale = params["bn_gamma"] * jax.lax.rsqrt(params["bn_var"] + BN_EPS)        # (32,)
    w1f = params["w1"] * scale[None, :]                                           # (512, 32)
    b1f = params["b1"] * scale + params["bn_beta"] - params["bn_mean"] * scale    # (32,)
    return w1f, b1f


def _choose_spatial_tile(hw: int, max_lanes: int) -> int:
    """Largest multiple-of-128 tile <= max_lanes; prefer exact divisors of H*W
    unless that would increase the step count vs a ragged max-size tile."""
    best = None
    for t in range(_LANE, max_lanes + 1, _LANE):
        if hw % t == 0:
            best = t
    n_ragged = -(-hw // max_lanes)
    if best is not None and hw // best <= n_ragged:
        return best
    return max_lanes


def _pick_batch_block(B: int, cap: int) -> int:
    """Batch block size for the single-tile path: whole batch if it fits,
    else prefer a multiple-of-8 divisor (sublane-aligned output block)."""
    cap = max(1, min(cap, B))
    if B <= cap:
        return B
    divisors = [d for d in range(1, cap + 1) if B % d == 0]
    mult8 = [d for d in divisors if d % 8 == 0]
    return max(mult8) if mult8 else max(divisors)


def _cost(B, hw, itemsize, param_bytes):
    return pl.CostEstimate(
        flops=int(B * C_IN * hw + 4 * B * C_IN * C_HID + 4 * B * C_IN),
        transcendentals=int(B * C_IN),
        bytes_accessed=int(B * C_IN * hw * itemsize + param_bytes + B * C_IN * 4),
    )


# --------------------------------------------------------------------------- #
# Path A: H*W fits one tile -> block several batch elements per grid step
# --------------------------------------------------------------------------- #
def _ca_batched(x, w1f, b1f, w2, b2, *, hw, inv_hw, bt):
    B = x.shape[0]
    itemsize = jnp.dtype(x.dtype).itemsize

    def kernel(x_ref, w1_ref, b1_ref, w2_ref, b2_ref, out_ref):
        xt = x_ref[...].astype(jnp.float32)                      # (bt, C, hw)
        pooled = jnp.sum(xt, axis=-1) * inv_hw                   # (bt, C)  == GAP
        # Linear(512->32) with BN pre-folded, batched on the MXU.
        h = jnp.dot(pooled, w1_ref[...],
                    preferred_element_type=jnp.float32) + b1_ref[...]   # (bt, 32)
        h = jnp.maximum(h, 0.0)                                  # ReLU
        y = jnp.dot(h, w2_ref[...],
                    preferred_element_type=jnp.float32) + b2_ref[...]   # (bt, C)
        y = jax.nn.sigmoid(y)
        out_ref[...] = (pooled * y).astype(out_ref.dtype)        # lane-dense (bt, C)

    param_bytes = 4 * (w1f.size + b1f.size + w2.size + b2.size)
    out = pl.pallas_call(
        kernel,
        out_shape=jax.ShapeDtypeStruct((B, C_IN), jnp.float32),
        grid_spec=pltpu.PrefetchScalarGridSpec(
            num_scalar_prefetch=0,
            grid=(B // bt,),
            in_specs=[
                pl.BlockSpec((bt, C_IN, hw), lambda b: (b, 0, 0)),   # activations
                pl.BlockSpec((C_IN, C_HID), lambda b: (0, 0)),       # w1 (BN-folded)
                pl.BlockSpec((1, C_HID), lambda b: (0, 0)),          # b1 (BN-folded)
                pl.BlockSpec((C_HID, C_IN), lambda b: (0, 0)),       # w2
                pl.BlockSpec((1, C_IN), lambda b: (0, 0)),           # b2
            ],
            out_specs=pl.BlockSpec((bt, C_IN), lambda b: (b, 0)),
        ),
        compiler_params=pltpu.CompilerParams(
            dimension_semantics=("parallel",),
            vmem_limit_bytes=_VMEM_LIMIT_BYTES,
        ),
        cost_estimate=_cost(B, hw, itemsize, param_bytes),
    )(x, w1f, b1f[None, :], w2, b2[None, :])
    return out


# --------------------------------------------------------------------------- #
# Path B: H*W spans multiple tiles -> pipelined spatial reduction per image
# --------------------------------------------------------------------------- #
def _ca_tiled(x, w1t, b1c, w2t, b2c, *, hw, t_hw, n_k, needs_mask, inv_hw):
    B = x.shape[0]
    itemsize = jnp.dtype(x.dtype).itemsize
    grp = t_hw // _LANE                      # 128-lane groups per tile (static)

    def kernel(x_ref, w1_ref, b1_ref, w2_ref, b2_ref, out_ref, acc_ref):
        k = pl.program_id(1)

        @pl.when(k == 0)
        def _init():
            acc_ref[...] = jnp.zeros_like(acc_ref)

        xt = x_ref[0].astype(jnp.float32)                        # (C, t_hw)

        def accumulate(tile):
            # VPU-only accumulation into the lane-dense (C, 128) scratch; the
            # single cross-lane reduce happens once, at finalize.
            s = tile[:, 0:_LANE]
            for g in range(1, grp):
                s = s + tile[:, g * _LANE:(g + 1) * _LANE]
            acc_ref[...] += s

        if needs_mask:
            last = n_k - 1

            @pl.when(k == last)
            def _ragged():
                valid = hw - k * t_hw                            # traced scalar
                lane = jax.lax.broadcasted_iota(jnp.int32, xt.shape, 1)
                accumulate(jnp.where(lane < valid, xt, 0.0))     # mask before any sum

            @pl.when(k < last)
            def _full():
                accumulate(xt)
        else:
            accumulate(xt)

        @pl.when(k == n_k - 1)
        def _finalize():
            pooled = jnp.sum(acc_ref[...], axis=-1, keepdims=True) * inv_hw   # (C, 1)
            h = jnp.dot(w1_ref[...], pooled,
                        preferred_element_type=jnp.float32) + b1_ref[...]     # (32, 1)
            h = jnp.maximum(h, 0.0)
            y = jnp.dot(w2_ref[...], h,
                        preferred_element_type=jnp.float32) + b2_ref[...]     # (C, 1)
            y = jax.nn.sigmoid(y)
            # Column-form write (512 floats, once per image): a transpose to a
            # lane-dense row here would cost more than the masked store it saves.
            out_ref[0] = (pooled * y).astype(out_ref.dtype)

    param_bytes = 4 * (w1t.size + b1c.size + w2t.size + b2c.size)
    out = pl.pallas_call(
        kernel,
        out_shape=jax.ShapeDtypeStruct((B, C_IN, 1), jnp.float32),
        grid_spec=pltpu.PrefetchScalarGridSpec(
            num_scalar_prefetch=0,
            grid=(B, n_k),
            in_specs=[
                pl.BlockSpec((1, C_IN, t_hw), lambda b, k: (b, 0, k)),   # activations
                pl.BlockSpec((C_HID, C_IN), lambda b, k: (0, 0)),        # w1 (BN-folded)
                pl.BlockSpec((C_HID, 1), lambda b, k: (0, 0)),           # b1 (BN-folded)
                pl.BlockSpec((C_IN, C_HID), lambda b, k: (0, 0)),        # w2
                pl.BlockSpec((C_IN, 1), lambda b, k: (0, 0)),            # b2
            ],
            out_specs=pl.BlockSpec((1, C_IN, 1), lambda b, k: (b, 0, 0)),
            scratch_shapes=[pltpu.VMEM((C_IN, _LANE), jnp.float32)],     # pooled-sum acc
        ),
        compiler_params=pltpu.CompilerParams(
            dimension_semantics=("parallel", "arbitrary"),
            vmem_limit_bytes=_VMEM_LIMIT_BYTES,
        ),
        cost_estimate=_cost(B, hw, itemsize, param_bytes),
    )(x, w1t, b1c, w2t, b2c)
    return out[:, :, 0]


# --------------------------------------------------------------------------- #
# Public wrapper
# --------------------------------------------------------------------------- #
def channel_attention_pallas(x_nchw, params):
    """x_nchw: (B, 512, H, W), f32 or bf16.  Returns (B, 512) float32."""
    B, C, H, W = x_nchw.shape
    assert C == C_IN
    hw = H * W
    inv_hw = 1.0 / float(hw)
    itemsize = jnp.dtype(x_nchw.dtype).itemsize

    # Free, layout-preserving reshape: native NCHW layout, spatial on lanes.
    x = x_nchw.reshape(B, C, hw)

    w1f, b1f = _fold_bn_into_linear1(params)     # row form: (512, 32), (32,)
    w2, b2 = params["w2"], params["b2"]          # (32, 512), (512,)

    # Biggest spatial tile (multiple of 128 lanes) within the ~4 MiB budget.
    max_lanes = max(_LANE, (_TILE_BUDGET_BYTES // (C_IN * itemsize)) // _LANE * _LANE)

    if hw <= max_lanes:
        # Single-tile path: block batch elements together, batched MLP.
        per_sample = C_IN * hw * itemsize
        cap = max(1, min(16, _TILE_BUDGET_BYTES // max(per_sample, 1)))
        bt = _pick_batch_block(B, cap)
        return _ca_batched(x, w1f, b1f, w2, b2, hw=hw, inv_hw=inv_hw, bt=bt)

    # Multi-tile path: pipelined spatial reduction per image (reduction axis last).
    t_hw = _choose_spatial_tile(hw, max_lanes)
    n_k = -(-hw // t_hw)
    needs_mask = (hw % t_hw) != 0
    return _ca_tiled(x, w1f.T, b1f[:, None], w2.T, b2[:, None],
                     hw=hw, t_hw=t_hw, n_k=n_k, needs_mask=needs_mask, inv_hw=inv_hw)


# --------------------------------------------------------------------------- #
# Reference + params
# --------------------------------------------------------------------------- #
def channel_attention_ref(x_nchw, params):
    """Pure-JAX reference mirroring the PyTorch forward (eval-mode BN)."""
    pooled = jnp.mean(x_nchw.astype(jnp.float32), axis=(2, 3))           # (B, 512)
    h = pooled @ params["w1"] + params["b1"]
    scale = params["bn_gamma"] / jnp.sqrt(params["bn_var"] + BN_EPS)
    shift = params["bn_beta"] - params["bn_mean"] * scale
    h = jnp.maximum(h * scale + shift, 0.0)
    y = jax.nn.sigmoid(h @ params["w2"] + params["b2"])
    return pooled * y


def init_params(key):
    """Deterministic synthetic parameters matching the PyTorch module shapes."""
    k1, k2, k3, k4, k5, k6 = jax.random.split(key, 6)
    lim1 = 1.0 / jnp.sqrt(jnp.float32(C_IN))
    lim2 = 1.0 / jnp.sqrt(jnp.float32(C_HID))
    return {
        # Linear(512, 32): torch weight is (32, 512); we store its transpose.
        "w1": jax.random.uniform(k1, (C_IN, C_HID), jnp.float32, -lim1, lim1),
        "b1": jax.random.uniform(k2, (C_HID,), jnp.float32, -lim1, lim1),
        # BatchNorm1d(32) (eval-mode running statistics)
        "bn_gamma": jnp.ones((C_HID,), jnp.float32),
        "bn_beta": jnp.zeros((C_HID,), jnp.float32),
        "bn_mean": 0.1 * jax.random.normal(k3, (C_HID,), jnp.float32),
        "bn_var": jnp.abs(jax.random.normal(k4, (C_HID,), jnp.float32)) + 0.5,
        # Linear(32, 512): torch weight is (512, 32); we store its transpose.
        "w2": jax.random.uniform(k5, (C_HID, C_IN), jnp.float32, -lim2, lim2),
        "b2": jax.random.uniform(k6, (C_IN,), jnp.float32, -lim2, lim2),
    }


if __name__ == "__main__":
    key = jax.random.PRNGKey(0)
    k_params, k_x1, k_x2 = jax.random.split(key, 3)
    params = init_params(k_params)

    # Path A: small spatial map -> single-tile, batch-blocked, lane-dense output.
    x_small = jax.random.normal(k_x1, (2, C_IN, 16, 16), jnp.float32)
    out_a = jax.block_until_ready(channel_attention_pallas(x_small, params))
    ref_a = channel_attention_ref(x_small, params)
    assert out_a.shape == (2, C_IN)
    assert jnp.allclose(out_a, ref_a, atol=1e-5, rtol=1e-5), "small-spatial mismatch"

    # Path B: larger spatial map -> multi-tile spatial reduction with a ragged
    # (masked) last tile: 47*47 = 2209 > 2048-lane f32 tile -> 2 tiles (2048 + 161).
    x_big = jax.random.normal(k_x2, (2, C_IN, 47, 47), jnp.float32)
    out_b = jax.block_until_ready(channel_attention_pallas(x_big, params))
    ref_b = channel_attention_ref(x_big, params)
    assert out_b.shape == (2, C_IN)
    assert jnp.allclose(out_b, ref_b, atol=1e-5, rtol=1e-5), "large-spatial mismatch"

    # bf16 activations (halves the HBM read; kernel upcasts per tile to f32).
    x_bf16 = x_small.astype(jnp.bfloat16)
    out_c = jax.block_until_ready(channel_attention_pallas(x_bf16, params))
    ref_c = channel_attention_ref(x_bf16, params)
    assert jnp.allclose(out_c, ref_c, atol=1e-4, rtol=1e-4), "bf16 mismatch"

    print("KERNEL_OK")
</pallas_src>

<mosaic_0001>
module attributes {stable_mosaic.version = 11 : i64} {
  func.func @kernel(%arg0: i32, %arg1: memref<2x512x256xf32, #tpu.memory_space<vmem>>, %arg2: memref<512x32xf32, #tpu.memory_space<vmem>>, %arg3: memref<1x32xf32, #tpu.memory_space<vmem>>, %arg4: memref<32x512xf32, #tpu.memory_space<vmem>>, %arg5: memref<1x512xf32, #tpu.memory_space<vmem>>, %arg6: memref<2x512xf32, #tpu.memory_space<vmem>>) attributes {dimension_semantics = [#tpu.dimension_semantics<parallel>], iteration_bounds = array<i64: 1>, scalar_prefetch = 0 : i64, scratch_operands = 0 : i64, tpu.core_type = #tpu.core_type<tc>, window_params = [{transform_indices = @transform_0, window_bounds = array<i64: 2, 512, 256>}, {pipeline_mode = #tpu.pipeline_mode<synchronous>, transform_indices = @transform_1, window_bounds = array<i64: 512, 32>}, {pipeline_mode = #tpu.pipeline_mode<synchronous>, transform_indices = @transform_2, window_bounds = array<i64: 1, 32>}, {pipeline_mode = #tpu.pipeline_mode<synchronous>, transform_indices = @transform_3, window_bounds = array<i64: 32, 512>}, {pipeline_mode = #tpu.pipeline_mode<synchronous>, transform_indices = @transform_4, window_bounds = array<i64: 1, 512>}, {transform_indices = @transform_5, window_bounds = array<i64: 2, 512>}]} {
    %c0 = arith.constant 0 : index
    %c0_0 = arith.constant 0 : index
    %c0_1 = arith.constant 0 : index
    %0 = vector.load %arg1[%c0, %c0_0, %c0_1] : memref<2x512x256xf32, #tpu.memory_space<vmem>>, vector<2x512x256xf32>
    %cst = arith.constant dense<0.000000e+00> : vector<2x512xf32>
    %1 = vector.multi_reduction <add>, %0, %cst [2] : vector<2x512x256xf32> to vector<2x512xf32>
    %cst_2 = arith.constant 3.906250e-03 : f32
    %2 = vector.broadcast %cst_2 : f32 to vector<2x512xf32>
    %3 = arith.mulf %1, %2 : vector<2x512xf32>
    %c0_3 = arith.constant 0 : index
    %c0_4 = arith.constant 0 : index
    %4 = vector.load %arg2[%c0_3, %c0_4] : memref<512x32xf32, #tpu.memory_space<vmem>>, vector<512x32xf32>
    %cst_5 = arith.constant dense<0.000000e+00> : vector<2x32xf32>
    %5 = tpu.matmul %3, %4, %cst_5 {dimension_numbers = #tpu.dot_dimension_numbers<[1], [0], [0], [1], [0, 0, 1, 1], [], []>} : vector<2x512xf32>, vector<512x32xf32>, vector<2x32xf32> -> vector<2x32xf32>
    %c0_6 = arith.constant 0 : index
    %c0_7 = arith.constant 0 : index
    %6 = vector.load %arg3[%c0_6, %c0_7] : memref<1x32xf32, #tpu.memory_space<vmem>>, vector<1x32xf32>
    %7 = vector.broadcast %6 : vector<1x32xf32> to vector<2x32xf32>
    %8 = arith.addf %5, %7 : vector<2x32xf32>
    %cst_8 = arith.constant 0.000000e+00 : f32
    %9 = vector.broadcast %cst_8 : f32 to vector<2x32xf32>
    %10 = arith.maximumf %8, %9 : vector<2x32xf32>
    %c0_9 = arith.constant 0 : index
    %c0_10 = arith.constant 0 : index
    %11 = vector.load %arg4[%c0_9, %c0_10] : memref<32x512xf32, #tpu.memory_space<vmem>>, vector<32x512xf32>
    %cst_11 = arith.constant dense<0.000000e+00> : vector<2x512xf32>
    %12 = tpu.matmul %10, %11, %cst_11 {dimension_numbers = #tpu.dot_dimension_numbers<[1], [0], [0], [1], [0, 0, 1, 1], [], []>} : vector<2x32xf32>, vector<32x512xf32>, vector<2x512xf32> -> vector<2x512xf32>
    %c0_12 = arith.constant 0 : index
    %c0_13 = arith.constant 0 : index
    %13 = vector.load %arg5[%c0_12, %c0_13] : memref<1x512xf32, #tpu.memory_space<vmem>>, vector<1x512xf32>
    %14 = vector.broadcast %13 : vector<1x512xf32> to vector<2x512xf32>
    %15 = arith.addf %12, %14 : vector<2x512xf32>
    %16 = arith.negf %15 : vector<2x512xf32>
    %17 = math.exp %16 : vector<2x512xf32>
    %cst_14 = arith.constant 1.000000e+00 : f32
    %18 = vector.broadcast %cst_14 : f32 to vector<2x512xf32>
    %19 = arith.addf %18, %17 : vector<2x512xf32>
    %20 = arith.divf %18, %19 : vector<2x512xf32>
    %21 = arith.mulf %3, %20 : vector<2x512xf32>
    %c0_15 = arith.constant 0 : index
    %c0_16 = arith.constant 0 : index
    %22 = vector.load %arg6[%c0_15, %c0_16] : memref<2x512xf32, #tpu.memory_space<vmem>>, vector<2x512xf32>
    tpu.vector_store %arg6[%c0_15, %c0_16], %21 {strides = array<i32>} : memref<2x512xf32, #tpu.memory_space<vmem>>, vector<2x512xf32>,
    return
  }
  func.func @transform_0(%arg0: i32) -> (i32, i32, i32) {
    %c0_i32 = arith.constant 0 : i32
    %c0_i32_0 = arith.constant 0 : i32
    %c0_i32_1 = arith.constant 0 : i32
    return %arg0, %c0_i32, %c0_i32_0 : i32, i32, i32
  }
  func.func @transform_1(%arg0: i32) -> (i32, i32) {
    %c0_i32 = arith.constant 0 : i32
    %c0_i32_0 = arith.constant 0 : i32
    %c0_i32_1 = arith.constant 0 : i32
    return %c0_i32, %c0_i32_0 : i32, i32
  }
  func.func @transform_2(%arg0: i32) -> (i32, i32) {
    %c0_i32 = arith.constant 0 : i32
    %c0_i32_0 = arith.constant 0 : i32
    %c0_i32_1 = arith.constant 0 : i32
    return %c0_i32, %c0_i32_0 : i32, i32
  }
  func.func @transform_3(%arg0: i32) -> (i32, i32) {
    %c0_i32 = arith.constant 0 : i32
    %c0_i32_0 = arith.constant 0 : i32
    %c0_i32_1 = arith.constant 0 : i32
    return %c0_i32, %c0_i32_0 : i32, i32
  }
  func.func @transform_4(%arg0: i32) -> (i32, i32) {
    %c0_i32 = arith.constant 0 : i32
    %c0_i32_0 = arith.constant 0 : i32
    %c0_i32_1 = arith.constant 0 : i32
    return %c0_i32, %c0_i32_0 : i32, i32
  }
  func.func @transform_5(%arg0: i32) -> (i32, i32) {
    %c0_i32 = arith.constant 0 : i32
    %c0_i32_0 = arith.constant 0 : i32
    return %arg0, %c0_i32 : i32, i32
  }
}

</mosaic_0001>

<bundles_post_ra>
// kernel: tpu_custom_call.1
= control target key start
LH: loop header
LB: loop body
LE: loop exit
PB: predicated region body
PF: predicated region fallthrough
CT: control target
= control target key end

     0   :  { %10 = vsyncpa [#allocation3], 0  ;;  %s12435_s0 = inlined_call_operand.hbm [shape: f32[2,512,256], index: 0, kind: input, shape index: {}]   ;;  %s12436_s1 = inlined_call_operand.vmem [shape: f32[512,32], index: 1, kind: input, shape index: {}]   ;;  %s12437_s2 = inlined_call_operand.vmem [shape: f32[1,32], index: 2, kind: input, shape index: {}]   ;;  %s12438_s3 = inlined_call_operand.vmem [shape: f32[32,512], index: 3, kind: input, shape index: {}]   ;;  %s12439_s4 = inlined_call_operand.vmem [shape: f32[1,512], index: 4, kind: input, shape index: {}]   ;;  %s12440_s5 = inlined_call_operand.hbm [shape: f32[2,512], index: 5, kind: output, shape index: {}]  }
   0x1   :  { %11 = vsyncpa [#allocation4], 0  ;;  %s8584_s18 = smov [#allocation2]   ;;  %s8536_s22 = scalar_lea.hbm %s12435_s0, 32768 }
   0x2   :  { %s17_s19 = sshll.u32 %s8584_s18, 4  ;;  %p8537_p0 = scmp.ne.s32.totalorder %s12435_s0, %s8536_s22  ;;  %s18_s19 = int_to_ptr.vmem [resolvable:$true] %s17_s19 }
   0x3   :  { %p8540_p1 = scmp.lt.u32.totalorder %s8536_s22, %s12435_s0 }
   0x5   :  { %p8542_p2 = pnand %p8540_p1, %p8537_p0 }
   0x7   :  { %8545 = shalt.err (!%p8542_p2)
}
   0x8   :  { %s8546_s27 = scalar_lea.vmem %s18_s19, 32768  ;;  %p8551_p4 = scmp.lt.s32.totalorder %s18_s19, %s18_s19 }
   0x9   :  { %p8547_p3 = scmp.ne.s32.totalorder %s18_s19, %s8546_s27  ;;  %p8552_p5 = scmp.lt.s32.totalorder %s8546_s27, %s8546_s27 }
   0xb   :  { %p8553_p6 = por %p8552_p5, %p8551_p4 }
   0xd   :  { %p8554_p7 = pnand %p8553_p6, %p8547_p3 }
   0xf   :  { %8557 = shalt.err (!%p8554_p7)
}
  0x10   :  { %s8585_s28 = smov 256   ;;  %s8586_s29 = smov 16  }
  0x11   :  { %23 = dma.hbm_to_vmem [thread:$0]  %s12435_s0, 32768, %s18_s19, [#allocation3], %s8585_s28, %s8585_s28, %s8586_s29  }
  0x12   :  { %8580 = dma.done.wait [#allocation3], 32768  }
  0x13   :  { %8581 = vsyncadd [#allocation3], 4294934528  ;;  %v39_v0 = vld [vmem:[#allocation2 + $0x20] sm:$0xff]  ;;  %v40_v1 = vld [vmem:[#allocation2 + $0x28] sm:$0xff]  ;;  %vm1013_vm0 = vcmask 130112   ;;  %vm1020_vm1 = vcmask 195712  }
  0x14   :  { %v35_v2 = vld [vmem:[#allocation2] sm:$0xff]  ;;  %v297_v3 = vadd.f32 %v40_v1, %v39_v0  ;;  %v36_v4 = vld [vmem:[#allocation2 + $0x8] sm:$0xff]  ;;  %v41_v5 = vld [vmem:[#allocation2 + $0x30] sm:$0xff]  ;;  %vm1027_vm2 = vcmask 261312   ;;  %vm1034_vm3 = vcmask 326912   ;;  %vm1041_vm4 = vcmask 392512  }
  0x15   :  { %v42_v6 = vld [vmem:[#allocation2 + $0x38] sm:$0xff]  ;;  %v291_v7 = vadd.f32 %v36_v4, %v35_v2  ;;  %v37_v8 = vld [vmem:[#allocation2 + $0x10] sm:$0xff]  ;;  %v43_v14 = vld [vmem:[#allocation2 + $0x40] sm:$0xff]  ;;  %vm1048_vm5 = vcmask 458112   ;;  %vm1055_vm6 = vcmask 523712   ;;  %vm1062_vm7 = vcmask 589312  }
  0x16   :  { %v38_v9 = vld [vmem:[#allocation2 + $0x18] sm:$0xff]  ;;  %298 = vadd.xlane.f32.xlu1 %v297_v3  ;;  %v300_v10 = vadd.f32 %v42_v6, %v41_v5  ;;  %v45_v12 = vld [vmem:[#allocation2 + $0x50] sm:$0xff]  ;;  %v44_v15 = vld [vmem:[#allocation2 + $0x48] sm:$0xff]  ;;  %vm1069_vm8 = vcmask 654912   ;;  %vm1076_vm9 = vcmask 720512   ;;  %vm1083_vm10 = vcmask 786112  }
  0x17   :  { %292 = vadd.xlane.f32.xlu0 %v291_v7  ;;  %v294_v11 = vadd.f32 %v38_v9, %v37_v8  ;;  %v46_v13 = vld [vmem:[#allocation2 + $0x58] sm:$0xff]  ;;  %v303_v17 = vadd.f32 %v44_v15, %v43_v14  ;;  %v49_v18 = vld [vmem:[#allocation2 + $0x70] sm:$0xff]  ;;  %v47_v20 = vld [vmem:[#allocation2 + $0x60] sm:$0xff]  ;;  %vm12649_vm11 = vcmask 851712   ;;  %vm1097_vm12 = vcmask 917312  }
  0x18   :  { %v306_v16 = vadd.f32 %v46_v13, %v45_v12  ;;  %v50_v19 = vld [vmem:[#allocation2 + $0x78] sm:$0xff]  ;;  %v48_v21 = vld [vmem:[#allocation2 + $0x68] sm:$0xff]  ;;  %v53_v24 = vld [vmem:[#allocation2 + $0x90] sm:$0xff]  ;;  %vm1104_vm13 = vcmask 982912   ;;  %vm1111_vm14 = vcmask 1048512   ;;  %vm12555_vm15 = vcmask 1041409  }
  0x19   :  { %v312_v22 = vadd.f32 %v50_v19, %v49_v18  ;;  %v309_v23 = vadd.f32 %v48_v21, %v47_v20  ;;  %v54_v25 = vld [vmem:[#allocation2 + $0x98] sm:$0xff]  ;;  %v51_v26 = vld [vmem:[#allocation2 + $0x80] sm:$0xff]  ;;  %v52_v27 = vld [vmem:[#allocation2 + $0x88] sm:$0xff] }
  0x1a   :  { %301 = vadd.xlane.f32.xlu1 %v300_v10  ;;  %v318_v28 = vadd.f32 %v54_v25, %v53_v24  ;;  %v315_v29 = vadd.f32 %v52_v27, %v51_v26  ;;  %v57_v30 = vld [vmem:[#allocation2 + $0xb0] sm:$0xff]  ;;  %v58_v31 = vld [vmem:[#allocation2 + $0xb8] sm:$0xff]  ;;  %v55_v32 = vld [vmem:[#allocation2 + $0xa0] sm:$0xff] }
  0x1b   :  { %295 = vadd.xlane.f32.xlu0 %v294_v11  ;;  %v56_v33 = vld [vmem:[#allocation2 + $0xa8] sm:$0xff]  ;;  %v324_v34 = vadd.f32 %v58_v31, %v57_v30  ;;  %v61_v36 = vld [vmem:[#allocation2 + $0xd0] sm:$0xff]  ;;  %v62_v37 = vld [vmem:[#allocation2 + $0xd8] sm:$0xff] }
  0x1c   :  { %v321_v35 = vadd.f32 %v56_v33, %v55_v32  ;;  %v59_v38 = vld [vmem:[#allocation2 + $0xc0] sm:$0xff]  ;;  %v60_v39 = vld [vmem:[#allocation2 + $0xc8] sm:$0xff]  ;;  %v330_v40 = vadd.f32 %v62_v37, %v61_v36  ;;  %v65_v42 = vld [vmem:[#allocation2 + $0xf0] sm:$0xff] }
  0x1d   :  { %v327_v41 = vadd.f32 %v60_v39, %v59_v38  ;;  %v66_v43 = vld [vmem:[#allocation2 + $0xf8] sm:$0xff]  ;;  %v63_v44 = vld [vmem:[#allocation2 + $0xe0] sm:$0xff]  ;;  %v64_v45 = vld [vmem:[#allocation2 + $0xe8] sm:$0xff] }
  0x1e   :  { %307 = vadd.xlane.f32.xlu1 %v306_v16  ;;  %v336_v46 = vadd.f32 %v66_v43, %v65_v42  ;;  %v333_v47 = vadd.f32 %v64_v45, %v63_v44  ;;  %v69_v48 = vld [vmem:[#allocation2 + $0x110] sm:$0xff]  ;;  %v70_v49 = vld [vmem:[#allocation2 + $0x118] sm:$0xff]  ;;  %v67_v50 = vld [vmem:[#allocation2 + $0x100] sm:$0xff] }
  0x1f   :  { %304 = vadd.xlane.f32.xlu0 %v303_v17  ;;  %v68_v51 = vld [vmem:[#allocation2 + $0x108] sm:$0xff]  ;;  %v342_v52 = vadd.f32 %v70_v49, %v69_v48  ;;  %v73_v54 = vld [vmem:[#allocation2 + $0x130] sm:$0xff]  ;;  %v74_v55 = vld [vmem:[#allocation2 + $0x138] sm:$0xff] }
  0x20   :  { %v339_v53 = vadd.f32 %v68_v51, %v67_v50  ;;  %v71_v56 = vld [vmem:[#allocation2 + $0x120] sm:$0xff]  ;;  %v72_v57 = vld [vmem:[#allocation2 + $0x128] sm:$0xff]  ;;  %v348_v58 = vadd.f32 %v74_v55, %v73_v54  ;;  %v77_v60 = vld [vmem:[#allocation2 + $0x150] sm:$0xff] }
  0x21   :  { %v345_v59 = vadd.f32 %v72_v57, %v71_v56  ;;  %v78_v61 = vld [vmem:[#allocation2 + $0x158] sm:$0xff]  ;;  %v75_v62 = vld [vmem:[#allocation2 + $0x140] sm:$0xff]  ;;  %v76_v63 = vld [vmem:[#allocation2 + $0x148] sm:$0xff] }
  0x22   :  { %313 = vadd.xlane.f32.xlu1 %v312_v22  ;;  %v354_v0 = vadd.f32 %v78_v61, %v77_v60  ;;  %v351_v1 = vadd.f32 %v76_v63, %v75_v62  ;;  %v81_v2 = vld [vmem:[#allocation2 + $0x170] sm:$0xff]  ;;  %v82_v3 = vld [vmem:[#allocation2 + $0x178] sm:$0xff]  ;;  %v79_v4 = vld [vmem:[#allocation2 + $0x160] sm:$0xff] }
  0x23   :  { %310 = vadd.xlane.f32.xlu0 %v309_v23  ;;  %v80_v5 = vld [vmem:[#allocation2 + $0x168] sm:$0xff]  ;;  %v360_v6 = vadd.f32 %v82_v3, %v81_v2  ;;  %v85_v8 = vld [vmem:[#allocation2 + $0x190] sm:$0xff]  ;;  %v86_v9 = vld [vmem:[#allocation2 + $0x198] sm:$0xff] }
  0x24   :  { %v357_v7 = vadd.f32 %v80_v5, %v79_v4  ;;  %v83_v10 = vld [vmem:[#allocation2 + $0x180] sm:$0xff]  ;;  %v84_v11 = vld [vmem:[#allocation2 + $0x188] sm:$0xff]  ;;  %v366_v12 = vadd.f32 %v86_v9, %v85_v8  ;;  %v89_v14 = vld [vmem:[#allocation2 + $0x1b0] sm:$0xff] }
  0x25   :  { %v363_v13 = vadd.f32 %v84_v11, %v83_v10  ;;  %v90_v15 = vld [vmem:[#allocation2 + $0x1b8] sm:$0xff]  ;;  %v87_v16 = vld [vmem:[#allocation2 + $0x1a0] sm:$0xff]  ;;  %v88_v17 = vld [vmem:[#allocation2 + $0x1a8] sm:$0xff] }
  0x26   :  { %319 = vadd.xlane.f32.xlu1 %v318_v28  ;;  %v372_v18 = vadd.f32 %v90_v15, %v89_v14  ;;  %v369_v19 = vadd.f32 %v88_v17, %v87_v16  ;;  %v93_v20 = vld [vmem:[#allocation2 + $0x1d0] sm:$0xff]  ;;  %v94_v21 = vld [vmem:[#allocation2 + $0x1d8] sm:$0xff]  ;;  %v91_v22 = vld [vmem:[#allocation2 + $0x1c0] sm:$0xff] }
  0x27   :  { %316 = vadd.xlane.f32.xlu0 %v315_v29  ;;  %v92_v23 = vld [vmem:[#allocation2 + $0x1c8] sm:$0xff]  ;;  %v378_v24 = vadd.f32 %v94_v21, %v93_v20  ;;  %v97_v26 = vld [vmem:[#allocation2 + $0x1f0] sm:$0xff]  ;;  %v98_v27 = vld [vmem:[#allocation2 + $0x1f8] sm:$0xff] }
  0x28   :  { %v375_v25 = vadd.f32 %v92_v23, %v91_v22  ;;  %v95_v28 = vld [vmem:[#allocation2 + $0x1e0] sm:$0xff]  ;;  %v96_v29 = vld [vmem:[#allocation2 + $0x1e8] sm:$0xff]  ;;  %v384_v30 = vadd.f32 %v98_v27, %v97_v26  ;;  %v101_v32 = vld [vmem:[#allocation2 + $0x210] sm:$0xff] }
  0x29   :  { %v381_v31 = vadd.f32 %v96_v29, %v95_v28  ;;  %v102_v33 = vld [vmem:[#allocation2 + $0x218] sm:$0xff]  ;;  %v105_v38 = vld [vmem:[#allocation2 + $0x230] sm:$0xff] }
  0x2a   :  { %325 = vadd.xlane.f32.xlu1 %v324_v34  ;;  %v99_v34 = vld [vmem:[#allocation2 + $0x200] sm:$0xff]  ;;  %v390_v36 = vadd.f32 %v102_v33, %v101_v32  ;;  %v106_v39 = vld [vmem:[#allocation2 + $0x238] sm:$0xff]  ;;  %v109_v44 = vld [vmem:[#allocation2 + $0x250] sm:$0xff] }
  0x2b   :  { %322 = vadd.xlane.f32.xlu0 %v321_v35  ;;  %v100_v35 = vld [vmem:[#allocation2 + $0x208] sm:$0xff]  ;;  %v396_v42 = vadd.f32 %v106_v39, %v105_v38  ;;  %v110_v45 = vld [vmem:[#allocation2 + $0x258] sm:$0xff]  ;;  %v113_v50 = vld [vmem:[#allocation2 + $0x270] sm:$0xff] }
  0x2c   :  { %v387_v37 = vadd.f32 %v100_v35, %v99_v34  ;;  %v402_v48 = vadd.f32 %v110_v45, %v109_v44  ;;  %v114_v51 = vld [vmem:[#allocation2 + $0x278] sm:$0xff]  ;;  %v117_v56 = vld [vmem:[#allocation2 + $0x290] sm:$0xff] }
  0x2d   :  { %v408_v54 = vadd.f32 %v114_v51, %v113_v50  ;;  %v118_v57 = vld [vmem:[#allocation2 + $0x298] sm:$0xff]  ;;  %v121_v62 = vld [vmem:[#allocation2 + $0x2b0] sm:$0xff] }
  0x2e   :  { %331 = vadd.xlane.f32.xlu1 %v330_v40  ;;  %v103_v40 = vld [vmem:[#allocation2 + $0x220] sm:$0xff]  ;;  %v414_v60 = vadd.f32 %v118_v57, %v117_v56  ;;  %v122_v63 = vld [vmem:[#allocation2 + $0x2b8] sm:$0xff]  ;;  %v125_v4 = vld [vmem:[#allocation2 + $0x2d0] sm:$0xff] }
  0x2f   :  { %328 = vadd.xlane.f32.xlu0 %v327_v41  ;;  %v104_v41 = vld [vmem:[#allocation2 + $0x228] sm:$0xff]  ;;  %v420_v2 = vadd.f32 %v122_v63, %v121_v62  ;;  %v126_v5 = vld [vmem:[#allocation2 + $0x2d8] sm:$0xff]  ;;  %v129_v10 = vld [vmem:[#allocation2 + $0x2f0] sm:$0xff] }
  0x30   :  { %v393_v43 = vadd.f32 %v104_v41, %v103_v40  ;;  %v426_v8 = vadd.f32 %v126_v5, %v125_v4  ;;  %v130_v11 = vld [vmem:[#allocation2 + $0x2f8] sm:$0xff]  ;;  %v133_v16 = vld [vmem:[#allocation2 + $0x310] sm:$0xff] }
  0x31   :  { %v432_v14 = vadd.f32 %v130_v11, %v129_v10  ;;  %v134_v17 = vld [vmem:[#allocation2 + $0x318] sm:$0xff]  ;;  %v137_v22 = vld [vmem:[#allocation2 + $0x330] sm:$0xff] }
  0x32   :  { %337 = vadd.xlane.f32.xlu1 %v336_v46  ;;  %v107_v46 = vld [vmem:[#allocation2 + $0x240] sm:$0xff]  ;;  %v438_v20 = vadd.f32 %v134_v17, %v133_v16  ;;  %v138_v23 = vld [vmem:[#allocation2 + $0x338] sm:$0xff]  ;;  %v141_v28 = vld [vmem:[#allocation2 + $0x350] sm:$0xff] }
  0x33   :  { %334 = vadd.xlane.f32.xlu0 %v333_v47  ;;  %v108_v47 = vld [vmem:[#allocation2 + $0x248] sm:$0xff]  ;;  %v444_v26 = vadd.f32 %v138_v23, %v137_v22  ;;  %v142_v29 = vld [vmem:[#allocation2 + $0x358] sm:$0xff]  ;;  %v145_v34 = vld [vmem:[#allocation2 + $0x370] sm:$0xff] }
  0x34   :  { %v399_v49 = vadd.f32 %v108_v47, %v107_v46  ;;  %v450_v32 = vadd.f32 %v142_v29, %v141_v28  ;;  %v146_v35 = vld [vmem:[#allocation2 + $0x378] sm:$0xff]  ;;  %v149_v40 = vld [vmem:[#allocation2 + $0x390] sm:$0xff] }
  0x35   :  { %v456_v38 = vadd.f32 %v146_v35, %v145_v34  ;;  %v150_v41 = vld [vmem:[#allocation2 + $0x398] sm:$0xff]  ;;  %v153_v46 = vld [vmem:[#allocation2 + $0x3b0] sm:$0xff]  ;;  %v183_v34 = vld [vmem:[#allocation2 + $0x4a0] sm:$0xff] }
  0x36   :  { %343 = vadd.xlane.f32.xlu1 %v342_v52  ;;  %v111_v52 = vld [vmem:[#allocation2 + $0x260] sm:$0xff]  ;;  %v462_v44 = vadd.f32 %v150_v41, %v149_v40  ;;  %v154_v47 = vld [vmem:[#allocation2 + $0x3b8] sm:$0xff]  ;;  %v184_v35 = vld [vmem:[#allocation2 + $0x4a8] sm:$0xff] }
  0x37   :  { %340 = vadd.xlane.f32.xlu0 %v339_v53  ;;  %v112_v53 = vld [vmem:[#allocation2 + $0x268] sm:$0xff]  ;;  %v468_v50 = vadd.f32 %v154_v47, %v153_v46  ;;  %v190_v40 = vld [vmem:[#allocation2 + $0x4d8] sm:$0xff]  ;;  %v193_v47 = vld [vmem:[#allocation2 + $0x4f0] sm:$0xff] }
  0x38   :  { %v405_v55 = vadd.f32 %v112_v53, %v111_v52  ;;  %v157_v52 = vld [vmem:[#allocation2 + $0x3d0] sm:$0xff]  ;;  %v158_v53 = vld [vmem:[#allocation2 + $0x3d8] sm:$0xff] }
  0x39   :  { %v474_v56 = vadd.f32 %v158_v53, %v157_v52 }
  0x3a   :  { %349 = vadd.xlane.f32.xlu1 %v348_v58  ;;  %v115_v58 = vld [vmem:[#allocation2 + $0x280] sm:$0xff] }
  0x3b   :  { %346 = vadd.xlane.f32.xlu0 %v345_v59  ;;  %v116_v59 = vld [vmem:[#allocation2 + $0x288] sm:$0xff] }
  0x3c   :  { %v411_v61 = vadd.f32 %v116_v59, %v115_v58  ;;  %v161_v58 = vld [vmem:[#allocation2 + $0x3f0] sm:$0xff]  ;;  %v162_v59 = vld [vmem:[#allocation2 + $0x3f8] sm:$0xff] }
  0x3d   :  { %v480_v62 = vadd.f32 %v162_v59, %v161_v58  ;;  %v195_v58 = vld [vmem:[#allocation2 + $0x500] sm:$0xff]  ;;  %v196_v59 = vld [vmem:[#allocation2 + $0x508] sm:$0xff] }
  0x3e   :  { %355 = vadd.xlane.f32.xlu1 %v354_v0  ;;  %v119_v0 = vld [vmem:[#allocation2 + $0x2a0] sm:$0xff] }
  0x3f   :  { %352 = vadd.xlane.f32.xlu0 %v351_v1  ;;  %v120_v1 = vld [vmem:[#allocation2 + $0x2a8] sm:$0xff] }
  0x40   :  { %v417_v3 = vadd.f32 %v120_v1, %v119_v0  ;;  %v165_v0 = vld [vmem:[#allocation2 + $0x410] sm:$0xff]  ;;  %v166_v1 = vld [vmem:[#allocation2 + $0x418] sm:$0xff] }
  0x41   :  { %v486_v4 = vadd.f32 %v166_v1, %v165_v0  ;;  %v202_v0 = vld [vmem:[#allocation2 + $0x538] sm:$0xff] }
  0x42   :  { %361 = vadd.xlane.f32.xlu1 %v360_v6  ;;  %v123_v6 = vld [vmem:[#allocation2 + $0x2c0] sm:$0xff] }
  0x43   :  { %358 = vadd.xlane.f32.xlu0 %v357_v7  ;;  %v124_v7 = vld [vmem:[#allocation2 + $0x2c8] sm:$0xff] }
  0x44   :  { %v423_v9 = vadd.f32 %v124_v7, %v123_v6  ;;  %v169_v6 = vld [vmem:[#allocation2 + $0x430] sm:$0xff]  ;;  %v170_v7 = vld [vmem:[#allocation2 + $0x438] sm:$0xff] }
  0x45   :  { %v492_v10 = vadd.f32 %v170_v7, %v169_v6  ;;  %v205_v7 = vld [vmem:[#allocation2 + $0x550] sm:$0xff] }
  0x46   :  { %367 = vadd.xlane.f32.xlu1 %v366_v12  ;;  %v127_v12 = vld [vmem:[#allocation2 + $0x2e0] sm:$0xff] }
  0x47   :  { %364 = vadd.xlane.f32.xlu0 %v363_v13  ;;  %v128_v13 = vld [vmem:[#allocation2 + $0x2e8] sm:$0xff] }
  0x48   :  { %v429_v15 = vadd.f32 %v128_v13, %v127_v12  ;;  %v173_v12 = vld [vmem:[#allocation2 + $0x450] sm:$0xff]  ;;  %v174_v13 = vld [vmem:[#allocation2 + $0x458] sm:$0xff] }
  0x49   :  { %v498_v16 = vadd.f32 %v174_v13, %v173_v12 }
  0x4a   :  { %373 = vadd.xlane.f32.xlu1 %v372_v18  ;;  %v131_v18 = vld [vmem:[#allocation2 + $0x300] sm:$0xff] }
  0x4b   :  { %370 = vadd.xlane.f32.xlu0 %v369_v19  ;;  %v132_v19 = vld [vmem:[#allocation2 + $0x308] sm:$0xff] }
  0x4c   :  { %v435_v21 = vadd.f32 %v132_v19, %v131_v18  ;;  %v177_v18 = vld [vmem:[#allocation2 + $0x470] sm:$0xff]  ;;  %v178_v19 = vld [vmem:[#allocation2 + $0x478] sm:$0xff] }
  0x4d   :  { %v504_v22 = vadd.f32 %v178_v19, %v177_v18  ;;  %v207_v18 = vld [vmem:[#allocation2 + $0x560] sm:$0xff]  ;;  %v208_v19 = vld [vmem:[#allocation2 + $0x568] sm:$0xff] }
  0x4e   :  { %379 = vadd.xlane.f32.xlu1 %v378_v24  ;;  %v135_v24 = vld [vmem:[#allocation2 + $0x320] sm:$0xff] }
  0x4f   :  { %376 = vadd.xlane.f32.xlu0 %v375_v25  ;;  %v136_v25 = vld [vmem:[#allocation2 + $0x328] sm:$0xff] }
  0x50   :  { %v441_v27 = vadd.f32 %v136_v25, %v135_v24  ;;  %v181_v24 = vld [vmem:[#allocation2 + $0x490] sm:$0xff]  ;;  %v182_v25 = vld [vmem:[#allocation2 + $0x498] sm:$0xff] }
  0x51   :  { %v510_v28 = vadd.f32 %v182_v25, %v181_v24  ;;  %v214_v24 = vld [vmem:[#allocation2 + $0x598] sm:$0xff] }
  0x52   :  { %385 = vadd.xlane.f32.xlu1 %v384_v30  ;;  %v139_v30 = vld [vmem:[#allocation2 + $0x340] sm:$0xff] }
  0x53   :  { %382 = vadd.xlane.f32.xlu0 %v381_v31  ;;  %v140_v31 = vld [vmem:[#allocation2 + $0x348] sm:$0xff] }
  0x54   :  { %v447_v33 = vadd.f32 %v140_v31, %v139_v30  ;;  %v185_v31 = vld [vmem:[#allocation2 + $0x4b0] sm:$0xff] }
  0x56   :  { %391 = vadd.xlane.f32.xlu1 %v390_v36  ;;  %v143_v36 = vld [vmem:[#allocation2 + $0x360] sm:$0xff] }
  0x57   :  { %388 = vadd.xlane.f32.xlu0 %v387_v37  ;;  %v144_v37 = vld [vmem:[#allocation2 + $0x368] sm:$0xff] }
  0x58   :  { %v453_v39 = vadd.f32 %v144_v37, %v143_v36 }
  0x5a   :  { %397 = vadd.xlane.f32.xlu1 %v396_v42  ;;  %v147_v42 = vld [vmem:[#allocation2 + $0x380] sm:$0xff] }
  0x5b   :  { %394 = vadd.xlane.f32.xlu0 %v393_v43  ;;  %v148_v43 = vld [vmem:[#allocation2 + $0x388] sm:$0xff] }
  0x5c   :  { %v459_v45 = vadd.f32 %v148_v43, %v147_v42  ;;  %v187_v42 = vld [vmem:[#allocation2 + $0x4c0] sm:$0xff]  ;;  %v188_v43 = vld [vmem:[#allocation2 + $0x4c8] sm:$0xff] }
  0x5d   :  { %v519_v46 = vadd.f32 %v188_v43, %v187_v42  ;;  %v819_v42 = vld [vmem:[%s12436_s1 + $0x80] sm:$0xff]  ;;  %v820_v43 = vld [vmem:[%s12436_s1 + $0x88] sm:$0xff] }
  0x5e   :  { %403 = vadd.xlane.f32.xlu1 %v402_v48  ;;  %v151_v48 = vld [vmem:[#allocation2 + $0x3a0] sm:$0xff] }
  0x5f   :  { %400 = vadd.xlane.f32.xlu0 %v399_v49  ;;  %v152_v49 = vld [vmem:[#allocation2 + $0x3a8] sm:$0xff] }
  0x60   :  { %v465_v51 = vadd.f32 %v152_v49, %v151_v48  ;;  %v194_v48 = vld [vmem:[#allocation2 + $0x4f8] sm:$0xff] }
  0x61   :  { %v528_v52 = vadd.f32 %v194_v48, %v193_v47  ;;  %v222_v47 = vld [vmem:[#allocation2 + $0x5d8] sm:$0xff]  ;;  %v8431_v48 = vpack.c.bf16 %v820_v43, %v819_v42 }
  0x62   :  { %409 = vadd.xlane.f32.xlu1 %v408_v54  ;;  %v155_v54 = vld [vmem:[#allocation2 + $0x3c0] sm:$0xff]  ;;  %v234_v42 = vld [vmem:[#allocation2 + $0x638] sm:$0xff] }
  0x63   :  { %406 = vadd.xlane.f32.xlu0 %v405_v55  ;;  %v156_v55 = vld [vmem:[#allocation2 + $0x3c8] sm:$0xff]  ;;  %8432 = vmatprep.subr.bf16.mxu0 %v8431_v48 }
  0x64   :  { %v471_v57 = vadd.f32 %v156_v55, %v155_v54  ;;  %v197_v55 = vld [vmem:[#allocation2 + $0x510] sm:$0xff] }
  0x66   :  { %415 = vadd.xlane.f32.xlu1 %v414_v60  ;;  %v159_v60 = vld [vmem:[#allocation2 + $0x3e0] sm:$0xff] }
  0x67   :  { %412 = vadd.xlane.f32.xlu0 %v411_v61  ;;  %v160_v61 = vld [vmem:[#allocation2 + $0x3e8] sm:$0xff] }
  0x68   :  { %v477_v63 = vadd.f32 %v160_v61, %v159_v60 }
  0x6a   :  { %421 = vadd.xlane.f32.xlu1 %v420_v2  ;;  %v163_v2 = vld [vmem:[#allocation2 + $0x400] sm:$0xff] }
  0x6b   :  { %418 = vadd.xlane.f32.xlu0 %v417_v3  ;;  %v164_v3 = vld [vmem:[#allocation2 + $0x408] sm:$0xff] }
  0x6c   :  { %v483_v5 = vadd.f32 %v164_v3, %v163_v2  ;;  %v199_v2 = vld [vmem:[#allocation2 + $0x520] sm:$0xff]  ;;  %v200_v3 = vld [vmem:[#allocation2 + $0x528] sm:$0xff] }
  0x6d   :  { %v537_v6 = vadd.f32 %v200_v3, %v199_v2  ;;  %v226_v2 = vld [vmem:[#allocation2 + $0x5f8] sm:$0xff] }
  0x6e   :  { %427 = vadd.xlane.f32.xlu1 %v426_v8  ;;  %v167_v8 = vld [vmem:[#allocation2 + $0x420] sm:$0xff] }
  0x6f   :  { %424 = vadd.xlane.f32.xlu0 %v423_v9  ;;  %v168_v9 = vld [vmem:[#allocation2 + $0x428] sm:$0xff] }
  0x70   :  { %v489_v11 = vadd.f32 %v168_v9, %v167_v8  ;;  %v206_v8 = vld [vmem:[#allocation2 + $0x558] sm:$0xff] }
  0x71   :  { %v546_v12 = vadd.f32 %v206_v8, %v205_v7  ;;  %v223_v8 = vld [vmem:[#allocation2 + $0x5e0] sm:$0xff] }
  0x72   :  { %433 = vadd.xlane.f32.xlu1 %v432_v14  ;;  %v171_v14 = vld [vmem:[#allocation2 + $0x440] sm:$0xff] }
  0x73   :  { %430 = vadd.xlane.f32.xlu0 %v429_v15  ;;  %v172_v15 = vld [vmem:[#allocation2 + $0x448] sm:$0xff] }
  0x74   :  { %v495_v17 = vadd.f32 %v172_v15, %v171_v14  ;;  %v209_v15 = vld [vmem:[#allocation2 + $0x570] sm:$0xff] }
  0x76   :  { %439 = vadd.xlane.f32.xlu1 %v438_v20  ;;  %v175_v20 = vld [vmem:[#allocation2 + $0x460] sm:$0xff] }
  0x77   :  { %436 = vadd.xlane.f32.xlu0 %v435_v21  ;;  %v176_v21 = vld [vmem:[#allocation2 + $0x468] sm:$0xff] }
  0x78   :  { %v501_v23 = vadd.f32 %v176_v21, %v175_v20 }
  0x7a   :  { %445 = vadd.xlane.f32.xlu1 %v444_v26  ;;  %v179_v26 = vld [vmem:[#allocation2 + $0x480] sm:$0xff] }
  0x7b   :  { %442 = vadd.xlane.f32.xlu0 %v441_v27  ;;  %v180_v27 = vld [vmem:[#allocation2 + $0x488] sm:$0xff] }
  0x7c   :  { %v507_v30 = vadd.f32 %v180_v27, %v179_v26  ;;  %v211_v26 = vld [vmem:[#allocation2 + $0x580] sm:$0xff]  ;;  %v212_v27 = vld [vmem:[#allocation2 + $0x588] sm:$0xff] }
  0x7e   :  { %451 = vadd.xlane.f32.xlu1 %v450_v32  ;;  %v186_v32 = vld [vmem:[#allocation2 + $0x4b8] sm:$0xff] }
  0x7f   :  { %448 = vadd.xlane.f32.xlu0 %v447_v33  ;;  %v516_v36 = vadd.f32 %v186_v32, %v185_v31  ;;  %v555_v31 = vadd.f32 %v212_v27, %v211_v26  ;;  %v217_v32 = vld [vmem:[#allocation2 + $0x5b0] sm:$0xff]  ;;  %v227_v27 = vld [vmem:[#allocation2 + $0x600] sm:$0xff] }
  0x82   :  { %457 = vadd.xlane.f32.xlu1 %v456_v38  ;;  %v513_v38 = vadd.f32 %v184_v35, %v183_v34  ;;  %v218_v34 = vld [vmem:[#allocation2 + $0x5b8] sm:$0xff] }
  0x83   :  { %454 = vadd.xlane.f32.xlu0 %v453_v39  ;;  %v189_v39 = vld [vmem:[#allocation2 + $0x4d0] sm:$0xff] }
  0x86   :  { %463 = vadd.xlane.f32.xlu1 %v462_v44  ;;  %v522_v44 = vadd.f32 %v190_v40, %v189_v39  ;;  %v564_v39 = vadd.f32 %v218_v34, %v217_v32  ;;  %v221_v40 = vld [vmem:[#allocation2 + $0x5d0] sm:$0xff] }
  0x87   :  { %460 = vadd.xlane.f32.xlu0 %v459_v45  ;;  %v233_v34 = vld [vmem:[#allocation2 + $0x630] sm:$0xff] }
  0x8a   :  { %469 = vadd.xlane.f32.xlu1 %v468_v50  ;;  %v191_v50 = vld [vmem:[#allocation2 + $0x4e0] sm:$0xff] }
  0x8b   :  { %466 = vadd.xlane.f32.xlu0 %v465_v51  ;;  %v192_v51 = vld [vmem:[#allocation2 + $0x4e8] sm:$0xff] }
  0x8c   :  { %v525_v54 = vadd.f32 %v192_v51, %v191_v50  ;;  %v803_v50 = vld [vmem:[%s12436_s1] sm:$0xff]  ;;  %v804_v51 = vld [vmem:[%s12436_s1 + $0x8] sm:$0xff] }
  0x8e   :  { %475 = vadd.xlane.f32.xlu1 %v474_v56  ;;  %v198_v56 = vld [vmem:[#allocation2 + $0x518] sm:$0xff] }
  0x8f   :  { %472 = vadd.xlane.f32.xlu0 %v471_v57  ;;  %v534_v60 = vadd.f32 %v198_v56, %v197_v55  ;;  %v220_v55 = vld [vmem:[#allocation2 + $0x5c8] sm:$0xff]  ;;  %v8433_v56 = vpack.c.bf16 %v804_v51, %v803_v50  ;;  %v231_v50 = vld [vmem:[#allocation2 + $0x620] sm:$0xff] }
  0x90   :  { %v232_v51 = vld [vmem:[#allocation2 + $0x628] sm:$0xff] }
  0x91   :  { %8434 = vmatpush3.bf16.msra.mxu0 %v8433_v56  ;;  %v237_v56 = vld [vmem:[#allocation2 + $0x650] sm:$0xff] }
  0x92   :  { %481 = vadd.xlane.f32.xlu1 %v480_v62  ;;  %v531_v62 = vadd.f32 %v196_v59, %v195_v58  ;;  %v570_v58 = vadd.f32 %v222_v47, %v221_v40  ;;  %v225_v59 = vld [vmem:[#allocation2 + $0x5f0] sm:$0xff]  ;;  %v810_v47 = vld [vmem:[%s12436_s1 + $0x38] sm:$0xff] }
  0x93   :  { %478 = vadd.xlane.f32.xlu0 %v477_v63  ;;  %v201_v63 = vld [vmem:[#allocation2 + $0x530] sm:$0xff] }
  0x96   :  { %487 = vadd.xlane.f32.xlu1 %v486_v4  ;;  %v540_v4 = vadd.f32 %v202_v0, %v201_v63 }
  0x97   :  { %484 = vadd.xlane.f32.xlu0 %v483_v5 }
  0x9a   :  { %493 = vadd.xlane.f32.xlu1 %v492_v10  ;;  %v203_v10 = vld [vmem:[#allocation2 + $0x540] sm:$0xff] }
  0x9b   :  { %490 = vadd.xlane.f32.xlu0 %v489_v11  ;;  %v204_v11 = vld [vmem:[#allocation2 + $0x548] sm:$0xff] }
  0x9c   :  { %v543_v14 = vadd.f32 %v204_v11, %v203_v10  ;;  %v224_v10 = vld [vmem:[#allocation2 + $0x5e8] sm:$0xff] }
  0x9e   :  { %499 = vadd.xlane.f32.xlu1 %v498_v16  ;;  %v210_v16 = vld [vmem:[#allocation2 + $0x578] sm:$0xff] }
  0x9f   :  { %496 = vadd.xlane.f32.xlu0 %v495_v17  ;;  %v552_v20 = vadd.f32 %v210_v16, %v209_v15  ;;  %v823_v15 = vld [vmem:[%s12436_s1 + $0xa0] sm:$0xff]  ;;  %v824_v16 = vld [vmem:[%s12436_s1 + $0xa8] sm:$0xff] }
  0xa2   :  { %505 = vadd.xlane.f32.xlu1 %v504_v22  ;;  %v549_v22 = vadd.f32 %v208_v19, %v207_v18  ;;  %v573_v19 = vadd.f32 %v224_v10, %v223_v8  ;;  %v235_v8 = vld [vmem:[#allocation2 + $0x640] sm:$0xff]  ;;  %v236_v10 = vld [vmem:[#allocation2 + $0x648] sm:$0xff] }
  0xa3   :  { %502 = vadd.xlane.f32.xlu0 %v501_v23  ;;  %v8633_v29 = vpop.xlane.xlu1 %298  ;;  %v213_v23 = vld [vmem:[#allocation2 + $0x590] sm:$0xff] }
  0xa4   :  { %v8635_v33 = vpop.xlane.xlu0 %292 }
  0xa6   :  { %511 = vadd.xlane.f32.xlu1 %v510_v28  ;;  %v558_v28 = vadd.f32 %v214_v24, %v213_v23  ;;  %v807_v23 = vld [vmem:[%s12436_s1 + $0x20] sm:$0xff]  ;;  %v808_v24 = vld [vmem:[%s12436_s1 + $0x28] sm:$0xff] }
  0xa7   :  { %508 = vadd.xlane.f32.xlu0 %v507_v30  ;;  %v8637_v37 = vpop.xlane.xlu1 %301 }
  0xa8   :  { %v8639_v41 = vpop.xlane.xlu0 %295 }
  0xaa   :  { %517 = vadd.xlane.f32.xlu1 %v516_v36  ;;  %v215_v36 = vld [vmem:[#allocation2 + $0x5a0] sm:$0xff] }
  0xab   :  { %514 = vadd.xlane.f32.xlu0 %v513_v38  ;;  %v8641_v45 = vpop.xlane.xlu1 %307  ;;  %v216_v38 = vld [vmem:[#allocation2 + $0x5a8] sm:$0xff] }
  0xac   :  { %v8643_v49 = vpop.xlane.xlu0 %304 }
  0xae   :  { %523 = vadd.xlane.f32.xlu1 %v522_v44 }
  0xaf   :  { %520 = vadd.xlane.f32.xlu0 %v519_v46  ;;  %v8645_v53 = vpop.xlane.xlu1 %313  ;;  %v561_v46 = vadd.f32 %v216_v38, %v215_v36  ;;  %v825_v36 = vld [vmem:[%s12436_s1 + $0xb0] sm:$0xff]  ;;  %v826_v38 = vld [vmem:[%s12436_s1 + $0xb8] sm:$0xff] }
  0xb0   :  { %v8647_v57 = vpop.xlane.xlu0 %310  ;;  %v8443_v43 = vpack.c.bf16 %v826_v38, %v825_v36  ;;  %v245_v38 = vld [vmem:[#allocation2 + $0x690] sm:$0xff] }
  0xb2   :  { %529 = vadd.xlane.f32.xlu1 %v528_v52 }
  0xb3   :  { %526 = vadd.xlane.f32.xlu0 %v525_v54  ;;  %v8649_v61 = vpop.xlane.xlu1 %319  ;;  %v219_v54 = vld [vmem:[#allocation2 + $0x5c0] sm:$0xff] }
  0xb4   :  { %v8651_v1 = vpop.xlane.xlu0 %316  ;;  %v567_v0 = vadd.f32 %v220_v55, %v219_v54  ;;  %v588_v55 = vadd.f32 %v234_v42, %v233_v34  ;;  %v832_v42 = vld [vmem:[%s12436_s1 + $0xe8] sm:$0xff] }
  0xb6   :  { %535 = vadd.xlane.f32.xlu1 %v534_v60  ;;  %v821_v60 = vld [vmem:[%s12436_s1 + $0x90] sm:$0xff] }
  0xb7   :  { %532 = vadd.xlane.f32.xlu0 %v531_v62  ;;  %v8653_v5 = vpop.xlane.xlu1 %325  ;;  %v822_v62 = vld [vmem:[%s12436_s1 + $0x98] sm:$0xff] }
  0xb8   :  { %v8655_v9 = vpop.xlane.xlu0 %322  ;;  %v8435_v3 = vpack.c.bf16 %v822_v62, %v821_v60  ;;  %v585_v62 = vadd.f32 %v232_v51, %v231_v50  ;;  %v815_v51 = vld [vmem:[%s12436_s1 + $0x60] sm:$0xff] }
  0xba   :  { %541 = vadd.xlane.f32.xlu1 %v540_v4  ;;  %v805_v4 = vld [vmem:[%s12436_s1 + $0x10] sm:$0xff]  ;;  %8436 = vmatprep.subr.bf16.mxu0 %v8435_v3  ;;  %v811_v3 = vld [vmem:[%s12436_s1 + $0x40] sm:$0xff] }
  0xbb   :  { %538 = vadd.xlane.f32.xlu0 %v537_v6  ;;  %v8657_v13 = vpop.xlane.xlu1 %331  ;;  %v806_v6 = vld [vmem:[%s12436_s1 + $0x18] sm:$0xff] }
  0xbc   :  { %v8659_v17 = vpop.xlane.xlu0 %328  ;;  %v8437_v11 = vpack.c.bf16 %v806_v6, %v805_v4  ;;  %v812_v4 = vld [vmem:[%s12436_s1 + $0x48] sm:$0xff] }
  0xbe   :  { %547 = vadd.xlane.f32.xlu1 %v546_v12  ;;  %v576_v12 = vadd.f32 %v226_v2, %v225_v59  ;;  %8438 = vmatpush3.bf16.msra.mxu0 %v8437_v11  ;;  %v828_v59 = vld [vmem:[%s12436_s1 + $0xc8] sm:$0xff]  ;;  %v8449_v11 = vpack.c.bf16 %v812_v4, %v811_v3  ;;  %v834_v3 = vld [vmem:[%s12436_s1 + $0xf8] sm:$0xff] }
  0xbf   :  { %544 = vadd.xlane.f32.xlu0 %v543_v14  ;;  %v8661_v21 = vpop.xlane.xlu1 %337  ;;  %v229_v14 = vld [vmem:[#allocation2 + $0x610] sm:$0xff] }
  0xc0   :  { %v8663_v25 = vpop.xlane.xlu0 %334 }
  0xc2   :  { %553 = vadd.xlane.f32.xlu1 %v552_v20  ;;  %v230_v20 = vld [vmem:[#allocation2 + $0x618] sm:$0xff] }
  0xc3   :  { %550 = vadd.xlane.f32.xlu0 %v549_v22  ;;  %v8665_v30 = vpop.xlane.xlu1 %343  ;;  %v8439_v22 = vpack.c.bf16 %v824_v16, %v823_v15  ;;  %v582_v32 = vadd.f32 %v230_v20, %v229_v14  ;;  %v241_v14 = vld [vmem:[#allocation2 + $0x670] sm:$0xff]  ;;  %v830_v16 = vld [vmem:[%s12436_s1 + $0xd8] sm:$0xff]  ;;  %v591_v20 = vadd.f32 %v236_v10, %v235_v8 }
  0xc4   :  { %v8667_v35 = vpop.xlane.xlu0 %340  ;;  %v829_v15 = vld [vmem:[%s12436_s1 + $0xd0] sm:$0xff]  ;;  %v250_v10 = vld [vmem:[#allocation2 + $0x6b8] sm:$0xff] }
  0xc5   :  { %8440 = vmatprep.subr.bf16.mxu0 %v8439_v22  ;;  %v242_v22 = vld [vmem:[#allocation2 + $0x678] sm:$0xff] }
  0xc6   :  { %559 = vadd.xlane.f32.xlu1 %v558_v28  ;;  %v228_v28 = vld [vmem:[#allocation2 + $0x608] sm:$0xff]  ;;  %v600_v36 = vadd.f32 %v242_v22, %v241_v14  ;;  %v818_v14 = vld [vmem:[%s12436_s1 + $0x78] sm:$0xff] }
  0xc7   :  { %556 = vadd.xlane.f32.xlu0 %v555_v31  ;;  %v8675_v44 = vpop.xlane.xlu1 %349  ;;  %v8441_v31 = vpack.c.bf16 %v808_v24, %v807_v23  ;;  %v579_v40 = vadd.f32 %v228_v28, %v227_v27  ;;  %v8451_v23 = vpack.c.bf16 %v830_v16, %v829_v15  ;;  %v813_v24 = vld [vmem:[%s12436_s1 + $0x50] sm:$0xff]  ;;  %v814_v27 = vld [vmem:[%s12436_s1 + $0x58] sm:$0xff]  ;;  %v247_v16 = vld [vmem:[#allocation2 + $0x6a0] sm:$0xff] }
  0xc8   :  { %v8683_v52 = vpop.xlane.xlu0 %346  ;;  %v8453_v34 = vpack.c.bf16 %v814_v27, %v813_v24 }
  0xc9   :  { %8442 = vmatpush3.bf16.msra.mxu0 %v8441_v31  ;;  %v239_v31 = vld [vmem:[#allocation2 + $0x660] sm:$0xff] }
  0xca   :  { %565 = vadd.xlane.f32.xlu1 %v564_v39  ;;  %8444 = vmatprep.subr.bf16.mxu0 %v8443_v43 }
  0xcb   :  { %562 = vadd.xlane.f32.xlu0 %v561_v46  ;;  %v8691_v63 = vpop.xlane.xlu1 %355  ;;  %v809_v46 = vld [vmem:[%s12436_s1 + $0x30] sm:$0xff] }
  0xcc   :  { %v8699_v7 = vpop.xlane.xlu0 %352  ;;  %v8445_v54 = vpack.c.bf16 %v810_v47, %v809_v46  ;;  %v246_v47 = vld [vmem:[#allocation2 + $0x698] sm:$0xff] }
  0xce   :  { %571 = vadd.xlane.f32.xlu1 %v570_v58  ;;  %8446 = vmatpush3.bf16.msra.mxu0 %v8445_v54  ;;  %v827_v58 = vld [vmem:[%s12436_s1 + $0xc0] sm:$0xff]  ;;  %v816_v54 = vld [vmem:[%s12436_s1 + $0x68] sm:$0xff] }
  0xcf   :  { %568 = vadd.xlane.f32.xlu0 %v567_v0  ;;  %v8707_v18 = vpop.xlane.xlu1 %361  ;;  %v238_v0 = vld [vmem:[#allocation2 + $0x658] sm:$0xff]  ;;  %v8447_v2 = vpack.c.bf16 %v828_v59, %v827_v58  ;;  %v244_v58 = vld [vmem:[#allocation2 + $0x688] sm:$0xff]  ;;  %v8457_v59 = vpack.c.bf16 %v816_v54, %v815_v51  ;;  %v255_v54 = vld [vmem:[#allocation2 + $0x6e0] sm:$0xff] }
  0xd0   :  { %v8715_v26 = vpop.xlane.xlu0 %358 }
  0xd1   :  { %8448 = vmatprep.subr.bf16.mxu0 %v8447_v2  ;;  %v833_v2 = vld [vmem:[%s12436_s1 + $0xf0] sm:$0xff] }
  0xd2   :  { %577 = vadd.xlane.f32.xlu1 %v576_v12  ;;  %v594_v12 = vadd.f32 %v238_v0, %v237_v56  ;;  %8450 = vmatpush3.bf16.msra.mxu0 %v8449_v11  ;;  %v243_v56 = vld [vmem:[#allocation2 + $0x680] sm:$0xff]  ;;  %v249_v0 = vld [vmem:[#allocation2 + $0x6b0] sm:$0xff]  ;;  %v8459_v11 = vpack.c.bf16 %v834_v3, %v833_v2  ;;  %v262_v2 = vld [vmem:[#allocation2 + $0x718] sm:$0xff] }
  0xd3   :  { %574 = vadd.xlane.f32.xlu0 %v573_v19  ;;  %v8723_v39 = vpop.xlane.xlu1 %367  ;;  %8452 = vmatprep.subr.bf16.mxu0 %v8451_v23  ;;  %v603_v8 = vadd.f32 %v244_v58, %v243_v56  ;;  %v612_v23 = vadd.f32 %v250_v10, %v249_v0  ;;  %v256_v56 = vld [vmem:[#allocation2 + $0x6e8] sm:$0xff]  ;;  %v261_v0 = vld [vmem:[#allocation2 + $0x710] sm:$0xff] }
  0xd4   :  { %v8731_v48 = vpop.xlane.xlu0 %364  ;;  %v260_v10 = vld [vmem:[#allocation2 + $0x708] sm:$0xff] }
  0xd6   :  { %583 = vadd.xlane.f32.xlu1 %v582_v32  ;;  %v240_v32 = vld [vmem:[#allocation2 + $0x668] sm:$0xff]  ;;  %8454 = vmatpush3.bf16.msra.mxu0 %v8453_v34 }
  0xd7   :  { %580 = vadd.xlane.f32.xlu0 %v579_v40  ;;  %v8739_v60 = vpop.xlane.xlu1 %373  ;;  %v831_v40 = vld [vmem:[%s12436_s1 + $0xe0] sm:$0xff]  ;;  %v597_v46 = vadd.f32 %v240_v32, %v239_v31  ;;  %v253_v31 = vld [vmem:[#allocation2 + $0x6d0] sm:$0xff]  ;;  %v254_v32 = vld [vmem:[#allocation2 + $0x6d8] sm:$0xff] }
  0xd8   :  { %v8747_v6 = vpop.xlane.xlu0 %370  ;;  %v8455_v50 = vpack.c.bf16 %v832_v42, %v831_v40  ;;  %v618_v40 = vadd.f32 %v254_v32, %v253_v31 }
  0xda   :  { %589 = vadd.xlane.f32.xlu1 %v588_v55  ;;  %8456 = vmatprep.subr.bf16.mxu0 %v8455_v50  ;;  %v258_v50 = vld [vmem:[#allocation2 + $0x6f8] sm:$0xff] }
  0xdb   :  { %586 = vadd.xlane.f32.xlu0 %v585_v62  ;;  %v8755_v19 = vpop.xlane.xlu1 %379  ;;  %v606_v62 = vadd.f32 %v246_v47, %v245_v38  ;;  %8458 = vmatpush3.bf16.msra.mxu0 %v8457_v59  ;;  %v252_v38 = vld [vmem:[#allocation2 + $0x6c8] sm:$0xff]  ;;  %v257_v47 = vld [vmem:[#allocation2 + $0x6f0] sm:$0xff] }
  0xdc   :  { %v8763_v28 = vpop.xlane.xlu0 %376  ;;  %8460 = vmatprep.subr.bf16.mxu0 %v8459_v11  ;;  %v624_v58 = vadd.f32 %v258_v50, %v257_v47  ;;  %v630_v11 = vadd.f32 %v262_v2, %v261_v0  ;;  %v267_v47 = vld [vmem:[#allocation2 + $0x740] sm:$0xff]  ;;  %v268_v50 = vld [vmem:[#allocation2 + $0x748] sm:$0xff]  ;;  %v274_v0 = vld [vmem:[#allocation2 + $0x778] sm:$0xff] }
  0xde   :  { %595 = vadd.xlane.f32.xlu1 %v594_v12  ;;  %v817_v12 = vld [vmem:[%s12436_s1 + $0x70] sm:$0xff] }
  0xdf   :  { %592 = vadd.xlane.f32.xlu0 %v591_v20  ;;  %v8771_v43 = vpop.xlane.xlu1 %385  ;;  %v248_v20 = vld [vmem:[#allocation2 + $0x6a8] sm:$0xff]  ;;  %v8461_v22 = vpack.c.bf16 %v818_v14, %v817_v12 }
  0xe0   :  { %v8779_v55 = vpop.xlane.xlu0 %382  ;;  %v609_v27 = vadd.f32 %v248_v20, %v247_v16  ;;  %v265_v16 = vld [vmem:[#allocation2 + $0x730] sm:$0xff]  ;;  %v266_v20 = vld [vmem:[#allocation2 + $0x738] sm:$0xff] }
  0xe1   :  { %8462 = vmatpush3.bf16.msra.mxu0 %v8461_v22  ;;  %v636_v31 = vadd.f32 %v266_v20, %v265_v16  ;;  %v277_v20 = vld [vmem:[#allocation2 + $0x790] sm:$0xff] }
  0xe2   :  { %601 = vadd.xlane.f32.xlu1 %v600_v36  ;;  %v251_v36 = vld [vmem:[#allocation2 + $0x6c0] sm:$0xff] }
  0xe3   :  { %598 = vadd.xlane.f32.xlu0 %v597_v46  ;;  %v8787_v4 = vpop.xlane.xlu1 %391  ;;  %v615_v46 = vadd.f32 %v252_v38, %v251_v36  ;;  %v269_v38 = vld [vmem:[#allocation2 + $0x750] sm:$0xff] }
  0xe4   :  { %12650 = vst [vmem:[#allocation8_spill] sm:$0xff] %v8787_v4  ;;  %v8795_v15 = vpop.xlane.xlu0 %388 }
  0xe5   :  { %12651 = vst [vmem:[#allocation9_spill] sm:$0xff] %v8795_v15 }
  0xe6   :  { %607 = vadd.xlane.f32.xlu1 %v606_v62  ;;  %v621_v62 = vadd.f32 %v256_v56, %v255_v54 }
  0xe7   :  { %604 = vadd.xlane.f32.xlu0 %v603_v8  ;;  %v8797_v24 = vpop.xlane.xlu1 %397  ;;  %v259_v8 = vld [vmem:[#allocation2 + $0x700] sm:$0xff] }
  0xe8   :  { %12652 = vst [vmem:[#allocation10_spill] sm:$0xff] %v8797_v24  ;;  %v8799_v34 = vpop.xlane.xlu0 %394  ;;  %v627_v14 = vadd.f32 %v260_v10, %v259_v8  ;;  %v271_v8 = vld [vmem:[#allocation2 + $0x760] sm:$0xff]  ;;  %v272_v10 = vld [vmem:[#allocation2 + $0x768] sm:$0xff] }
  0xe9   :  { %12653 = vst [vmem:[#allocation11_spill] sm:$0xff] %v8799_v34  ;;  %v645_v16 = vadd.f32 %v272_v10, %v271_v8  ;;  %v285_v8 = vld [vmem:[#allocation2 + $0x7d0] sm:$0xff]  ;;  %v851_v10 = vld [vmem:[%s12436_s1 + $0x180] sm:$0xff] }
  0xea   :  { %613 = vadd.xlane.f32.xlu1 %v612_v23  ;;  %v263_v23 = vld [vmem:[#allocation2 + $0x720] sm:$0xff] }
  0xeb   :  { %610 = vadd.xlane.f32.xlu0 %v609_v27  ;;  %v8801_v42 = vpop.xlane.xlu1 %403  ;;  %v264_v27 = vld [vmem:[#allocation2 + $0x728] sm:$0xff] }
  0xec   :  { %12654 = vst [vmem:[#allocation12_spill] sm:$0xff] %v8801_v42  ;;  %v8803_v51 = vpop.xlane.xlu0 %400  ;;  %v633_v36 = vadd.f32 %v264_v27, %v263_v23  ;;  %v278_v23 = vld [vmem:[#allocation2 + $0x798] sm:$0xff] }
  0xed   :  { %12655 = vst [vmem:[#allocation13_spill] sm:$0xff] %v8803_v51 }
  0xee   :  { %619 = vadd.xlane.f32.xlu1 %v618_v40  ;;  %v270_v40 = vld [vmem:[#allocation2 + $0x758] sm:$0xff] }
  0xef   :  { %616 = vadd.xlane.f32.xlu0 %v615_v46  ;;  %v8805_v59 = vpop.xlane.xlu1 %409  ;;  %v642_v54 = vadd.f32 %v270_v40, %v269_v38  ;;  %v654_v38 = vadd.f32 %v278_v23, %v277_v20  ;;  %v286_v23 = vld [vmem:[#allocation2 + $0x7d8] sm:$0xff] }
  0xf0   :  { %12656 = vst [vmem:[#allocation14_spill] sm:$0xff] %v8805_v59  ;;  %v8807_v3 = vpop.xlane.xlu0 %406 }
  0xf1   :  { %12657 = vst [vmem:[#allocation15_spill] sm:$0xff] %v8807_v3 }
  0xf2   :  { %625 = vadd.xlane.f32.xlu1 %v624_v58  ;;  %v639_v58 = vadd.f32 %v268_v50, %v267_v47  ;;  %v281_v50 = vld [vmem:[#allocation2 + $0x7b0] sm:$0xff] }
  0xf3   :  { %622 = vadd.xlane.f32.xlu0 %v621_v62  ;;  %v8809_v12 = vpop.xlane.xlu1 %415  ;;  %v273_v62 = vld [vmem:[#allocation2 + $0x770] sm:$0xff] }
  0xf4   :  { %12658 = vst [vmem:[#allocation16_spill] sm:$0xff] %v8809_v12  ;;  %v8811_v22 = vpop.xlane.xlu0 %412 }
  0xf5   :  { %12659 = vst [vmem:[#allocation17_spill] sm:$0xff] %v8811_v22 }
  0xf6   :  { %631 = vadd.xlane.f32.xlu1 %v630_v11  ;;  %v648_v11 = vadd.f32 %v274_v0, %v273_v62  ;;  %v280_v62 = vld [vmem:[#allocation2 + $0x7a8] sm:$0xff] }
  0xf7   :  { %628 = vadd.xlane.f32.xlu0 %v627_v14  ;;  %v8813_v32 = vpop.xlane.xlu1 %421 }
  0xf8   :  { %12660 = vst [vmem:[#allocation18_spill] sm:$0xff] %v8813_v32  ;;  %v8815_v46 = vpop.xlane.xlu0 %418 }
  0xf9   :  { %12661 = vst [vmem:[#allocation19_spill] sm:$0xff] %v8815_v46 }
  0xfa   :  { %637 = vadd.xlane.f32.xlu1 %v636_v31  ;;  %v275_v31 = vld [vmem:[#allocation2 + $0x780] sm:$0xff] }
  0xfb   :  { %634 = vadd.xlane.f32.xlu0 %v633_v36  ;;  %v8817_v56 = vpop.xlane.xlu1 %427  ;;  %v276_v36 = vld [vmem:[#allocation2 + $0x788] sm:$0xff] }
  0xfc   :  { %12662 = vst [vmem:[#allocation20_spill] sm:$0xff] %v8817_v56  ;;  %v8819_v2 = vpop.xlane.xlu0 %424  ;;  %v651_v47 = vadd.f32 %v276_v36, %v275_v31  ;;  %v835_v36 = vld [vmem:[%s12436_s1 + $0x100] sm:$0xff]  ;;  %v289_v56 = vld [vmem:[#allocation2 + $0x7f0] sm:$0xff] }
  0xfd   :  { %12663 = vst [vmem:[#allocation21_spill] sm:$0xff] %v8819_v2  ;;  %v282_v2 = vld [vmem:[#allocation2 + $0x7b8] sm:$0xff] }
  0xfe   :  { %643 = vadd.xlane.f32.xlu1 %v642_v54  ;;  %v660_v0 = vadd.f32 %v282_v2, %v281_v50  ;;  %v836_v2 = vld [vmem:[%s12436_s1 + $0x108] sm:$0xff]  ;;  %v283_v50 = vld [vmem:[#allocation2 + $0x7c0] sm:$0xff] }
  0xff   :  { %640 = vadd.xlane.f32.xlu0 %v639_v58  ;;  %v8821_v14 = vpop.xlane.xlu1 %433  ;;  %v279_v58 = vld [vmem:[#allocation2 + $0x7a0] sm:$0xff] }
 0x100   :  { %12664 = vst [vmem:[#allocation22_spill] sm:$0xff] %v8821_v14  ;;  %v8823_v27 = vpop.xlane.xlu0 %430  ;;  %v657_v20 = vadd.f32 %v280_v62, %v279_v58  ;;  %v8465_v14 = vpack.c.bf16 %v836_v2, %v835_v36  ;;  %v853_v58 = vld [vmem:[%s12436_s1 + $0x190] sm:$0xff]  ;;  %v854_v62 = vld [vmem:[%s12436_s1 + $0x198] sm:$0xff]  ;;  %v856_v2 = vld [vmem:[%s12436_s1 + $0x1a8] sm:$0xff] }
 0x101   :  { %12665 = vst [vmem:[#allocation23_spill] sm:$0xff] %v8823_v27  ;;  %v284_v27 = vld [vmem:[#allocation2 + $0x7c8] sm:$0xff]  ;;  %v8467_v32 = vpack.c.bf16 %v854_v62, %v853_v58 }
 0x102   :  { %649 = vadd.xlane.f32.xlu1 %v648_v11  ;;  %v852_v11 = vld [vmem:[%s12436_s1 + $0x188] sm:$0xff] }
 0x103   :  { %646 = vadd.xlane.f32.xlu0 %v645_v16  ;;  %v8825_v40 = vpop.xlane.xlu1 %439  ;;  %v8463_v31 = vpack.c.bf16 %v852_v11, %v851_v10  ;;  %v663_v11 = vadd.f32 %v284_v27, %v283_v50  ;;  %v855_v27 = vld [vmem:[%s12436_s1 + $0x1a0] sm:$0xff] }
 0x104   :  { %12666 = vst [vmem:[#allocation24_spill] sm:$0xff] %v8825_v40  ;;  %v8827_v54 = vpop.xlane.xlu0 %436  ;;  %v8471_v62 = vpack.c.bf16 %v856_v2, %v855_v27  ;;  %v859_v2 = vld [vmem:[%s12436_s1 + $0x1c0] sm:$0xff] }
 0x105   :  { %12667 = vst [vmem:[#allocation25_spill] sm:$0xff] %v8827_v54  ;;  %8464 = vmatprep.subr.bf16.mxu1 %v8463_v31  ;;  %v288_v31 = vld [vmem:[#allocation2 + $0x7e8] sm:$0xff] }
 0x106   :  { %655 = vadd.xlane.f32.xlu1 %v654_v38  ;;  %8466 = vmatpush3.bf16.msra.mxu1 %v8465_v14  ;;  %v838_v14 = vld [vmem:[%s12436_s1 + $0x118] sm:$0xff] }
 0x107   :  { %652 = vadd.xlane.f32.xlu0 %v651_v47  ;;  %v8835_v16 = vpop.xlane.xlu1 %445  ;;  %v666_v47 = vadd.f32 %v286_v23, %v285_v8  ;;  %v287_v23 = vld [vmem:[#allocation2 + $0x7e0] sm:$0xff]  ;;  %8468 = vmatprep.subr.bf16.mxu1 %v8467_v32 }
 0x108   :  { %12668 = vst [vmem:[#allocation26_spill] sm:$0xff] %v8835_v16  ;;  %v8843_v38 = vpop.xlane.xlu0 %442  ;;  %v290_v16 = vld [vmem:[#allocation2 + $0x7f8] sm:$0xff]  ;;  %v669_v58 = vadd.f32 %v288_v31, %v287_v23  ;;  %v839_v32 = vld [vmem:[%s12436_s1 + $0x120] sm:$0xff]  ;;  %v841_v31 = vld [vmem:[%s12436_s1 + $0x130] sm:$0xff] }
 0x109   :  { %12669 = vst [vmem:[#allocation27_spill] sm:$0xff] %v8843_v38 }
 0x10a   :  { %661 = vadd.xlane.f32.xlu1 %v660_v0  ;;  %v837_v0 = vld [vmem:[%s12436_s1 + $0x110] sm:$0xff] }
 0x10b   :  { %658 = vadd.xlane.f32.xlu0 %v657_v20  ;;  %v8851_v10 = vpop.xlane.xlu1 %451  ;;  %v8469_v36 = vpack.c.bf16 %v838_v14, %v837_v0  ;;  %v672_v20 = vadd.f32 %v290_v16, %v289_v56  ;;  %v840_v56 = vld [vmem:[%s12436_s1 + $0x128] sm:$0xff]  ;;  %v858_v0 = vld [vmem:[%s12436_s1 + $0x1b8] sm:$0xff] }
 0x10c   :  { %12670 = vst [vmem:[#allocation28_spill] sm:$0xff] %v8851_v10  ;;  %v8859_v8 = vpop.xlane.xlu0 %448  ;;  %v8996_v10 = vmul.f32 0.00390625, %v8637_v37 }
 0x10d   :  { %12671 = vst [vmem:[#allocation29_spill] sm:$0xff] %v8859_v8  ;;  %8470 = vmatpush3.bf16.msra.mxu1 %v8469_v36  ;;  %v842_v36 = vld [vmem:[%s12436_s1 + $0x138] sm:$0xff] }
 0x10e   :  { %667 = vadd.xlane.f32.xlu1 %v666_v47  ;;  %v8473_v47 = vpack.c.bf16 %v840_v56, %v839_v32  ;;  %8472 = vmatprep.subr.bf16.mxu1 %v8471_v62  ;;  %v8477_v27 = vpack.c.bf16 %v842_v36, %v841_v31  ;;  %v843_v56 = vld [vmem:[%s12436_s1 + $0x140] sm:$0xff]  ;;  %v861_v31 = vld [vmem:[%s12436_s1 + $0x1d0] sm:$0xff]  ;;  %v862_v36 = vld [vmem:[%s12436_s1 + $0x1d8] sm:$0xff]  ;;  %12689 = vst [vmem:[#allocation47_spill] sm:$0xff] %v8996_v10 }
 0x10f   :  { %664 = vadd.xlane.f32.xlu0 %v663_v11  ;;  %v8867_v50 = vpop.xlane.xlu1 %457  ;;  %v857_v11 = vld [vmem:[%s12436_s1 + $0x1b0] sm:$0xff] }
 0x110   :  { %12672 = vst [vmem:[#allocation30_spill] sm:$0xff] %v8867_v50  ;;  %v8875_v16 = vpop.xlane.xlu0 %454  ;;  %v8475_v23 = vpack.c.bf16 %v858_v0, %v857_v11 }
 0x111   :  { %12673 = vst [vmem:[#allocation31_spill] sm:$0xff] %v8875_v16  ;;  %8474 = vmatpush3.bf16.msra.mxu1 %v8473_v47  ;;  %v844_v47 = vld [vmem:[%s12436_s1 + $0x148] sm:$0xff] }
 0x112   :  { %673 = vadd.xlane.f32.xlu1 %v672_v20  ;;  %8476 = vmatprep.subr.bf16.mxu1 %v8475_v23  ;;  %v8481_v0 = vpack.c.bf16 %v844_v47, %v843_v56  ;;  %v1002_v23 = vlaneseq }
 0x113   :  { %670 = vadd.xlane.f32.xlu0 %v669_v58  ;;  %v8883_v14 = vpop.xlane.xlu1 %463  ;;  %v860_v58 = vld [vmem:[%s12436_s1 + $0x1c8] sm:$0xff] }
 0x114   :  { %12674 = vst [vmem:[#allocation32_spill] sm:$0xff] %v8883_v14  ;;  %v8891_v20 = vpop.xlane.xlu0 %460  ;;  %v8479_v32 = vpack.c.bf16 %v860_v58, %v859_v2  ;;  %v8483_v2 = vpack.c.bf16 %v862_v36, %v861_v31  ;;  %v845_v58 = vld [vmem:[%s12436_s1 + $0x150] sm:$0xff]  ;;  %v864_v31 = vld [vmem:[%s12436_s1 + $0x1e8] sm:$0xff] }
 0x115   :  { %12675 = vst [vmem:[#allocation33_spill] sm:$0xff] %v8891_v20  ;;  %8478 = vmatpush3.bf16.msra.mxu1 %v8477_v27 }
 0x116   :  { %8480 = vmatprep.subr.bf16.mxu1 %v8479_v32  ;;  %v846_v32 = vld [vmem:[%s12436_s1 + $0x158] sm:$0xff] }
 0x117   :  { %v8899_v62 = vpop.xlane.xlu1 %469  ;;  %v8485_v47 = vpack.c.bf16 %v846_v32, %v845_v58 }
 0x118   :  { %12676 = vst [vmem:[#allocation34_spill] sm:$0xff] %v8899_v62  ;;  %v8907_v11 = vpop.xlane.xlu0 %466  ;;  %v8944_v62 = vshrl.u32 %v1002_v23, 7 }
 0x119   :  { %12677 = vst [vmem:[#allocation35_spill] sm:$0xff] %v8907_v11  ;;  %8482 = vmatpush3.bf16.msra.mxu1 %v8481_v0  ;;  %v8925_v0 = vand.u32 127, %v1002_v23 }
 0x11a   :  { %8484 = vmatprep.subr.bf16.mxu1 %v8483_v2  ;;  %v848_v2 = vld [vmem:[%s12436_s1 + $0x168] sm:$0xff] }
 0x11b   :  { %v8915_v27 = vpop.xlane.xlu1 %475  ;;  %v1008_v58 = vadd.s32 4294967288, %v8925_v0  ;;  %v1015_v20 = vadd.s32 4294967280, %v8925_v0  ;;  %v1022_v50 = vadd.s32 4294967272, %v8925_v0  ;;  %v1043_v37 = vadd.s32 4294967248, %v8925_v0 }
 0x11c   :  { %12678 = vst [vmem:[#allocation36_spill] sm:$0xff] %v8915_v27  ;;  %v8923_v56 = vpop.xlane.xlu0 %472  ;;  %v863_v27 = vld [vmem:[%s12436_s1 + $0x1e0] sm:$0xff] }
 0x11d   :  { %12679 = vst [vmem:[#allocation37_spill] sm:$0xff] %v8923_v56  ;;  %8486 = vmatpush3.bf16.msra.mxu1 %v8485_v47  ;;  %v8487_v11 = vpack.c.bf16 %v864_v31, %v863_v27  ;;  %v847_v56 = vld [vmem:[%s12436_s1 + $0x160] sm:$0xff]  ;;  %v865_v27 = vld [vmem:[%s12436_s1 + $0x1f0] sm:$0xff]  ;;  %v866_v31 = vld [vmem:[%s12436_s1 + $0x1f8] sm:$0xff]  ;;  %v8961_v23 = vsub.s32 %v1008_v58, %v8944_v62 }
 0x11e   :  { %v8489_v47 = vpack.c.bf16 %v848_v2, %v847_v56  ;;  %v8491_v14 = vpack.c.bf16 %v866_v31, %v865_v27  ;;  %v8964_v56 = vmul.f32 0.00390625, %v8639_v41  ;;  %v8971_v27 = vsub.s32 %v8925_v0, %v8944_v62 }
 0x11f   :  { %v8933_v36 = vpop.xlane.xlu1 %481  ;;  %8488 = vmatprep.subr.bf16.mxu1 %v8487_v11  ;;  %v850_v11 = vld [vmem:[%s12436_s1 + $0x178] sm:$0xff]  ;;  %12682 = vst [vmem:[#allocation40_spill] sm:$0xff] %v8961_v23  ;;  %v8974_v31 = vmul.f32 0.00390625, %v8635_v33  ;;  %v1029_v33 = vadd.s32 4294967264, %v8925_v0 }
 0x120   :  { %12680 = vst [vmem:[#allocation38_spill] sm:$0xff] %v8933_v36  ;;  %v8942_v32 = vpop.xlane.xlu0 %478  ;;  %12683 = vst [vmem:[#allocation41_spill] sm:$0xff] %v8964_v56  ;;  %v1012_v41 = vrot.slane %v8964_v56, %v8961_v23 }
 0x121   :  { %12681 = vst [vmem:[#allocation39_spill] sm:$0xff] %v8942_v32  ;;  %8490 = vmatpush3.bf16.msra.mxu1 %v8489_v47  ;;  %v849_v32 = vld [vmem:[%s12436_s1 + $0x170] sm:$0xff]  ;;  %12684 = vst [vmem:[#allocation42_spill] sm:$0xff] %v8971_v27 }
 0x122   :  { %v8493_v47 = vpack.c.bf16 %v850_v11, %v849_v32  ;;  %8492 = vmatprep.subr.bf16.mxu1 %v8491_v14  ;;  %12685 = vst [vmem:[#allocation43_spill] sm:$0xff] %v8974_v31  ;;  %v8984_v32 = vsub.s32 %v1015_v20, %v8944_v62  ;;  %v8987_v14 = vmul.f32 0.00390625, %v8633_v29  ;;  %v1007_v11 = vrot.slane %v8974_v31, %v8971_v27 }
 0x123   :  { %v8952_v36 = vpop.xlane.xlu1 %487  ;;  %v1036_v29 = vadd.s32 4294967256, %v8925_v0  ;;  %v9007_v31 = vsub.s32 %v1029_v33, %v8944_v62  ;;  %v9023_v33 = vmul.f32 0.00390625, %v8641_v45 }
 0x124   :  { %v8966_v2 = vpop.xlane.xlu0 %484  ;;  %12686 = vst [vmem:[#allocation44_spill] sm:$0xff] %v8984_v32  ;;  %12687 = vst [vmem:[#allocation45_spill] sm:$0xff] %v8987_v14  ;;  %v1014_v20 = vsel %vm1013_vm0, %v1012_v41, %v1007_v11  ;;  %v1019_v38 = vrot.slane %v8987_v14, %v8984_v32  ;;  %v1050_v11 = vadd.s32 4294967240, %v8925_v0  ;;  %v9148_v4 = vmul.f32 0.00390625, %v8952_v36 }
 0x125   :  { %8494 = vmatpush3.bf16.msra.mxu1 %v8493_v47  ;;  %v8993_v47 = vsub.s32 %v1022_v50, %v8944_v62  ;;  %12690 = vst [vmem:[#allocation48_spill] sm:$0xff] %v9007_v31  ;;  %v9010_v50 = vmul.f32 0.00390625, %v8643_v49  ;;  %v9020_v14 = vsub.s32 %v1036_v29, %v8944_v62  ;;  %12693 = vst [vmem:[#allocation51_spill] sm:$0xff] %v9023_v33  ;;  %v1057_v49 = vadd.s32 4294967232, %v8925_v0 }
 0x126   :  { %v1021_v41 = vsel %vm1020_vm1, %v1019_v38, %v1014_v20  ;;  %v9031_v38 = vsub.s32 %v1043_v37, %v8944_v62  ;;  %v9034_v20 = vmul.f32 0.00390625, %v8647_v57  ;;  %v9038_v29 = vsub.s32 %v1050_v11, %v8944_v62  ;;  %12714 = vst [vmem:[#allocation72_spill] sm:$0xff] %v9148_v4 }
 0x127   :  { %v8977_v58 = vpop.xlane.xlu1 %493  ;;  %12688 = vst [vmem:[#allocation46_spill] sm:$0xff] %v8993_v47  ;;  %12691 = vst [vmem:[#allocation49_spill] sm:$0xff] %v9010_v50  ;;  %v1026_v54 = vrot.slane %v8996_v10, %v8993_v47  ;;  %v1033_v10 = vrot.slane %v9010_v50, %v9007_v31  ;;  %v1040_v22 = vrot.slane %v9023_v33, %v9020_v14  ;;  %v9045_v50 = vmul.f32 0.00390625, %v8645_v53 }
 0x128   :  { %v8981_v16 = vpop.xlane.xlu0 %490  ;;  %12692 = vst [vmem:[#allocation50_spill] sm:$0xff] %v9020_v14  ;;  %12694 = vst [vmem:[#allocation52_spill] sm:$0xff] %v9031_v38  ;;  %v1064_v37 = vadd.s32 4294967224, %v8925_v0  ;;  %v9049_v57 = vsub.s32 %v1057_v49, %v8944_v62  ;;  %v9057_v11 = vmul.f32 0.00390625, %v8651_v1  ;;  %v1071_v33 = vadd.s32 4294967216, %v8925_v0 }
 0x129   :  { %12695 = vst [vmem:[#allocation53_spill] sm:$0xff] %v9034_v20  ;;  %v1028_v12 = vsel %vm1027_vm2, %v1026_v54, %v1021_v41  ;;  %12696 = vst [vmem:[#allocation54_spill] sm:$0xff] %v9038_v29  ;;  %v1047_v41 = vrot.slane %v9034_v20, %v9031_v38  ;;  %v1078_v53 = vadd.s32 4294967208, %v8925_v0  ;;  %v1054_v49 = vrot.slane %v9045_v50, %v9038_v29 }
 0x12a   :  { %12697 = vst [vmem:[#allocation55_spill] sm:$0xff] %v9045_v50  ;;  %12698 = vst [vmem:[#allocation56_spill] sm:$0xff] %v9049_v57  ;;  %v1035_v54 = vsel %vm1034_vm3, %v1033_v10, %v1028_v12  ;;  %v9067_v12 = vsub.s32 %v1064_v37, %v8944_v62  ;;  %v9070_v10 = vmul.f32 0.00390625, %v8649_v61  ;;  %v1061_v51 = vrot.slane %v9057_v11, %v9049_v57 }
 0x12b   :  { %v8998_v56 = vpop.xlane.xlu1 %499  ;;  %12699 = vst [vmem:[#allocation57_spill] sm:$0xff] %v9057_v11  ;;  %v1042_v42 = vsel %vm1041_vm4, %v1040_v22, %v1035_v54  ;;  %v9078_v24 = vsub.s32 %v1071_v33, %v8944_v62  ;;  %v9081_v50 = vmul.f32 0.00390625, %v8655_v9  ;;  %v1085_v22 = vadd.s32 4294967200, %v8925_v0 }
 0x12c   :  { %v9002_v8 = vpop.xlane.xlu0 %496  ;;  %12700 = vst [vmem:[#allocation58_spill] sm:$0xff] %v9067_v12  ;;  %12701 = vst [vmem:[#allocation59_spill] sm:$0xff] %v9070_v10  ;;  %v1049_v20 = vsel %vm1048_vm5, %v1047_v41, %v1042_v42  ;;  %v9085_v37 = vmul.f32 0.00390625, %v8665_v30  ;;  %v9088_v61 = vmul.f32 0.00390625, %v8667_v35  ;;  %v9091_v42 = vsub.s32 %v1078_v53, %v8944_v62 }
 0x12d   :  { %12702 = vst [vmem:[#allocation60_spill] sm:$0xff] %v9078_v24  ;;  %12703 = vst [vmem:[#allocation61_spill] sm:$0xff] %v9081_v50  ;;  %v1092_v54 = vadd.s32 4294967192, %v8925_v0  ;;  %v9095_v33 = vmul.f32 0.00390625, %v8683_v52  ;;  %v1068_v41 = vrot.slane %v9070_v10, %v9067_v12  ;;  %v1056_v30 = vsel %vm1055_vm6, %v1054_v49, %v1049_v20 }
 0x12e   :  { %12704 = vst [vmem:[#allocation62_spill] sm:$0xff] %v9085_v37  ;;  %12705 = vst [vmem:[#allocation63_spill] sm:$0xff] %v9088_v61  ;;  %v9103_v11 = vmul.f32 0.00390625, %v8653_v5  ;;  %v1063_v53 = vsel %vm1062_vm7, %v1061_v51, %v1056_v30  ;;  %v1075_v34 = vrot.slane %v9081_v50, %v9078_v24  ;;  %v1099_v52 = vadd.s32 4294967184, %v8925_v0 }
 0x12f   :  { %v9017_v40 = vpop.xlane.xlu1 %505  ;;  %12706 = vst [vmem:[#allocation64_spill] sm:$0xff] %v9091_v42  ;;  %12707 = vst [vmem:[#allocation65_spill] sm:$0xff] %v9095_v33  ;;  %v9112_v15 = vsub.s32 %v1085_v22, %v8944_v62  ;;  %v1120_v20 = vrot.slane %v9085_v37, %v8961_v23  ;;  %v1116_v5 = vrot.slane %v9088_v61, %v8971_v27  ;;  %v9119_v49 = vmul.f32 0.00390625, %v8675_v44 }
 0x130   :  { %v9026_v46 = vpop.xlane.xlu0 %502  ;;  %12708 = vst [vmem:[#allocation66_spill] sm:$0xff] %v9103_v11  ;;  %v9122_v51 = vsub.s32 %v1092_v54, %v8944_v62  ;;  %v1106_v30 = vadd.s32 4294967176, %v8925_v0  ;;  %v1125_v10 = vrot.slane %v9095_v33, %v8984_v32  ;;  %v9128_v22 = vmul.f32 0.00390625, %v8699_v7 }
 0x131   :  { %12709 = vst [vmem:[#allocation67_spill] sm:$0xff] %v9112_v15  ;;  %12710 = vst [vmem:[#allocation68_spill] sm:$0xff] %v9119_v49  ;;  %v1082_v37 = vrot.slane %v9103_v11, %v9091_v42  ;;  %v1070_v61 = vsel %vm1069_vm8, %v1068_v41, %v1063_v53  ;;  %v9136_v44 = vmul.f32 0.00390625, %v8657_v13  ;;  %v9139_v54 = vmul.f32 0.00390625, %v8659_v17 }
 0x132   :  { %12711 = vst [vmem:[#allocation69_spill] sm:$0xff] %v9122_v51  ;;  %12712 = vst [vmem:[#allocation70_spill] sm:$0xff] %v9128_v22  ;;  %v1077_v33 = vsel %vm1076_vm9, %v1075_v34, %v1070_v61  ;;  %v9145_v7 = vsub.s32 %v1099_v52, %v8944_v62  ;;  %v9151_v11 = vmul.f32 0.00390625, %v8966_v2  ;;  %v1121_v41 = vsel %vm1013_vm0, %v1120_v20, %v1116_v5 }
 0x133   :  { %v9040_v45 = vpop.xlane.xlu1 %511  ;;  %v1130_v13 = vrot.slane %v9119_v49, %v8993_v47  ;;  %v9157_v17 = vmul.f32 0.00390625, %v8691_v63  ;;  %v9160_v53 = vmul.f32 0.00390625, %v8981_v16  ;;  %v9163_v34 = vsub.s32 %v1106_v30, %v8944_v62 }
 0x134   :  { %v9051_v59 = vpop.xlane.xlu0 %508  ;;  %12713 = vst [vmem:[#allocation71_spill] sm:$0xff] %v9145_v7  ;;  %12715 = vst [vmem:[#allocation73_spill] sm:$0xff] %v9151_v11  ;;  %v1126_v36 = vsel %vm1020_vm1, %v1125_v10, %v1121_v41  ;;  %v1135_v2 = vrot.slane %v9128_v22, %v9007_v31  ;;  %v9169_v61 = vmul.f32 0.00390625, %v8715_v26  ;;  %v9174_v63 = vsel %vm1083_vm10, %v1082_v37, %v1077_v33 }
 0x135   :  { %12716 = vst [vmem:[#allocation74_spill] sm:$0xff] %v9157_v17  ;;  %12717 = vst [vmem:[#allocation75_spill] sm:$0xff] %v9160_v53  ;;  %v1357_v10 = vrot.slane %v9148_v4, %v8961_v23  ;;  %v1353_v26 = vrot.slane %v9151_v11, %v8971_v27  ;;  %v9185_v41 = vmul.f32 0.00390625, %v8977_v58  ;;  %v1140_v37 = vrot.slane %v9157_v17, %v9020_v14 }
 0x136   :  { %12718 = vst [vmem:[#allocation76_spill] sm:$0xff] %v9163_v34  ;;  %12719 = vst [vmem:[#allocation77_spill] sm:$0xff] %v9169_v61  ;;  %v1131_v33 = vsel %vm1027_vm2, %v1130_v13, %v1126_v36  ;;  %v9195_v20 = vmul.f32 0.00390625, %v9002_v8  ;;  %v9198_v16 = vmul.f32 0.00390625, %v8661_v21  ;;  %v9202_v58 = vmul.f32 0.00390625, %v8707_v18 }
 0x137   :  { %v9061_v3 = vpop.xlane.xlu1 %517  ;;  %12721 = vst [vmem:[#allocation79_spill] sm:$0xff] %v9185_v41  ;;  %v1136_v22 = vsel %vm1034_vm3, %v1135_v2, %v1131_v33  ;;  %v9207_v13 = vmul.f32 0.00390625, %v8998_v56  ;;  %v9216_v2 = vmul.f32 0.00390625, %v8663_v25  ;;  %v1358_v18 = vsel %vm1013_vm0, %v1357_v10, %v1353_v26 }
 0x138   :  { %v9072_v1 = vpop.xlane.xlu0 %514  ;;  %12723 = vst [vmem:[#allocation81_spill] sm:$0xff] %v9195_v20  ;;  %12724 = vst [vmem:[#allocation82_spill] sm:$0xff] %v9202_v58  ;;  %v1367_v33 = vrot.slane %v9185_v41, %v8993_v47  ;;  %v1141_v56 = vsel %vm1041_vm4, %v1140_v37, %v1136_v22  ;;  %v1150_v25 = vrot.slane %v9202_v58, %v9038_v29  ;;  %v9234_v26 = vmul.f32 0.00390625, %v8731_v48 }
 0x139   :  { %12725 = vst [vmem:[#allocation83_spill] sm:$0xff] %v9207_v13  ;;  %v1377_v37 = vrot.slane %v9207_v13, %v9020_v14  ;;  %v9247_v48 = vmul.f32 0.00390625, %v9017_v40  ;;  %v9253_v41 = vmul.f32 0.00390625, %v8723_v39 }
 0x13a   :  { %12729 = vst [vmem:[#allocation87_spill] sm:$0xff] %v9234_v26  ;;  %v1155_v40 = vrot.slane %v9234_v26, %v9049_v57 }
 0x13b   :  { %v9097_v9 = vpop.xlane.xlu1 %523  ;;  %12731 = vst [vmem:[#allocation89_spill] sm:$0xff] %v9247_v48  ;;  %12733 = vst [vmem:[#allocation91_spill] sm:$0xff] %v9253_v41 }
 0x13c   :  { %v9105_v35 = vpop.xlane.xlu0 %520 }
 0x13f   :  { %v9130_v50 = vpop.xlane.xlu1 %529 }
 0x140   :  { %v9141_v0 = vpop.xlane.xlu0 %526 }
 0x143   :  { %v536_v52 = vpop.xlane.xlu1 %535 }
 0x144   :  { %v9178_v5 = vmul.f32 0.00390625, %v536_v52  ;;  %v533_v30 = vpop.xlane.xlu0 %532  ;;  %v1362_v52 = vrot.slane %v9160_v53, %v8984_v32 }
 0x145   :  { %v9187_v49 = vmul.f32 0.00390625, %v533_v30  ;;  %v1145_v30 = vrot.slane %v9169_v61, %v9031_v38 }
 0x146   :  { %12720 = vst [vmem:[#allocation78_spill] sm:$0xff] %v9178_v5  ;;  %v1436_v36 = vrot.slane %v9178_v5, %v8961_v23  ;;  %v1363_v5 = vsel %vm1020_vm1, %v1362_v52, %v1358_v18 }
 0x147   :  { %12722 = vst [vmem:[#allocation80_spill] sm:$0xff] %v9187_v49  ;;  %v542_v17 = vpop.xlane.xlu1 %541  ;;  %v1432_v8 = vrot.slane %v9187_v49, %v8971_v27  ;;  %v1372_v49 = vrot.slane %v9195_v20, %v9007_v31  ;;  %v1146_v10 = vsel %vm1048_vm5, %v1145_v30, %v1141_v56  ;;  %v1368_v30 = vsel %vm1027_vm2, %v1367_v33, %v1363_v5 }
 0x148   :  { %v9213_v21 = vmul.f32 0.00390625, %v542_v17  ;;  %v539_v4 = vpop.xlane.xlu0 %538  ;;  %v9228_v17 = vmul.f32 0.00390625, %v9026_v46  ;;  %v1151_v5 = vsel %vm1055_vm6, %v1150_v25, %v1146_v10  ;;  %v9265_v33 = vmul.f32 0.00390625, %v8739_v60 }
 0x149   :  { %v9221_v61 = vmul.f32 0.00390625, %v539_v4  ;;  %v1437_v52 = vsel %vm1013_vm0, %v1436_v36, %v1432_v8  ;;  %v1373_v36 = vsel %vm1034_vm3, %v1372_v49, %v1368_v30  ;;  %v9270_v49 = vmul.f32 0.00390625, %v9040_v45 }
 0x14a   :  { %12726 = vst [vmem:[#allocation84_spill] sm:$0xff] %v9213_v21  ;;  %12728 = vst [vmem:[#allocation86_spill] sm:$0xff] %v9228_v17  ;;  %v1446_v46 = vrot.slane %v9213_v21, %v8993_v47  ;;  %v1382_v8 = vrot.slane %v9228_v17, %v9031_v38  ;;  %v1387_v10 = vrot.slane %v9247_v48, %v9038_v29  ;;  %v9284_v45 = vmul.f32 0.00390625, %v8747_v6  ;;  %v12782_v48 = vld [vmem:[#allocation18_spill] sm:$0xff] }
 0x14b   :  { %12727 = vst [vmem:[#allocation85_spill] sm:$0xff] %v9221_v61  ;;  %v1441_v4 = vrot.slane %v9221_v61, %v8984_v32  ;;  %v548_v22 = vpop.xlane.xlu1 %547  ;;  %12735 = vst [vmem:[#allocation93_spill] sm:$0xff] %v9265_v33  ;;  %v1378_v60 = vsel %vm1041_vm4, %v1377_v37, %v1373_v36  ;;  %v1156_v37 = vsel %vm1062_vm7, %v1155_v40, %v1151_v5  ;;  %v9308_v40 = vmul.f32 0.00390625, %v9061_v3  ;;  %v12784_v17 = vld [vmem:[#allocation26_spill] sm:$0xff] }
 0x14c   :  { %v9243_v18 = vmul.f32 0.00390625, %v548_v22  ;;  %v545_v58 = vpop.xlane.xlu0 %544  ;;  %v9259_v22 = vmul.f32 0.00390625, %v9051_v59  ;;  %12736 = vst [vmem:[#allocation94_spill] sm:$0xff] %v9270_v49  ;;  %12739 = vst [vmem:[#allocation97_spill] sm:$0xff] %v9284_v45  ;;  %v1170_v36 = vrot.slane %v9265_v33, %v9091_v42  ;;  %v1165_v33 = vrot.slane %v9284_v45, %v9078_v24  ;;  %v12770_v45 = vld [vmem:[#allocation17_spill] sm:$0xff] }
 0x14d   :  { %v1442_v56 = vsel %vm1020_vm1, %v1441_v4, %v1437_v52  ;;  %v9250_v61 = vmul.f32 0.00390625, %v545_v58  ;;  %12742 = vst [vmem:[#allocation100_spill] sm:$0xff] %v9308_v40  ;;  %v9323_v3 = vmul.f32 0.00390625, %v8755_v19  ;;  %v1407_v19 = vrot.slane %v9308_v40, %v9091_v42  ;;  %v12776_v40 = vld [vmem:[#allocation24_spill] sm:$0xff] }
 0x14e   :  { %12730 = vst [vmem:[#allocation88_spill] sm:$0xff] %v9243_v18  ;;  %12734 = vst [vmem:[#allocation92_spill] sm:$0xff] %v9259_v22  ;;  %v1456_v4 = vrot.slane %v9243_v18, %v9020_v14  ;;  %v1447_v59 = vsel %vm1027_vm2, %v1446_v46, %v1442_v56  ;;  %v1392_v46 = vrot.slane %v9259_v22, %v9049_v57  ;;  %v9290_v56 = vmul.f32 0.00390625, %v9072_v1 }
 0x14f   :  { %12732 = vst [vmem:[#allocation90_spill] sm:$0xff] %v9250_v61  ;;  %v1451_v39 = vrot.slane %v9250_v61, %v9007_v31  ;;  %v554_v58 = vpop.xlane.xlu1 %553  ;;  %v1383_v61 = vsel %vm1048_vm5, %v1382_v8, %v1378_v60  ;;  %v1397_v8 = vrot.slane %v9270_v49, %v9067_v12  ;;  %12745 = vst [vmem:[#allocation103_spill] sm:$0xff] %v9323_v3  ;;  %v12778_v49 = vld [vmem:[#allocation25_spill] sm:$0xff]  ;;  %v9522_v22 = vmul.f32 0.00390625, %v12782_v48 }
 0x150   :  { %v9275_v52 = vmul.f32 0.00390625, %v554_v58  ;;  %v551_v25 = vpop.xlane.xlu0 %550  ;;  %12740 = vst [vmem:[#allocation98_spill] sm:$0xff] %v9290_v56  ;;  %v1160_v58 = vrot.slane %v9253_v41, %v9067_v12  ;;  %v1388_v5 = vsel %vm1055_vm6, %v1387_v10, %v1383_v61  ;;  %v9326_v10 = vmul.f32 0.00390625, %v8763_v28 }
 0x151   :  { %v1452_v30 = vsel %vm1034_vm3, %v1451_v39, %v1447_v59  ;;  %v9281_v21 = vmul.f32 0.00390625, %v551_v25  ;;  %v1393_v41 = vsel %vm1062_vm7, %v1392_v46, %v1388_v5  ;;  %v9331_v46 = vmul.f32 0.00390625, %v9097_v9  ;;  %12783 = vst [vmem:[#allocation17_spill] sm:$0xff] %v9522_v22 }
 0x152   :  { %12737 = vst [vmem:[#allocation95_spill] sm:$0xff] %v9275_v52  ;;  %v1466_v1 = vrot.slane %v9275_v52, %v9038_v29  ;;  %v1457_v59 = vsel %vm1041_vm4, %v1456_v4, %v1452_v30  ;;  %v1402_v4 = vrot.slane %v9290_v56, %v9078_v24  ;;  %v9319_v30 = vmul.f32 0.00390625, %v9105_v35  ;;  %12746 = vst [vmem:[#allocation104_spill] sm:$0xff] %v9326_v10 }
 0x153   :  { %12738 = vst [vmem:[#allocation96_spill] sm:$0xff] %v9281_v21  ;;  %v1461_v6 = vrot.slane %v9281_v21, %v9031_v38  ;;  %v560_v39 = vpop.xlane.xlu1 %559  ;;  %v1161_v61 = vsel %vm1069_vm8, %v1160_v58, %v1156_v37  ;;  %12747 = vst [vmem:[#allocation105_spill] sm:$0xff] %v9331_v46  ;;  %v1398_v28 = vsel %vm1069_vm8, %v1397_v8, %v1393_v41  ;;  %v9356_v8 = vmul.f32 0.00390625, %v8779_v55 }
 0x154   :  { %v9304_v25 = vmul.f32 0.00390625, %v560_v39  ;;  %v557_v60 = vpop.xlane.xlu0 %556  ;;  %12744 = vst [vmem:[#allocation102_spill] sm:$0xff] %v9319_v30  ;;  %v1166_v9 = vsel %vm1076_vm9, %v1165_v33, %v1161_v61  ;;  %v1175_v41 = vrot.slane %v9326_v10, %v9112_v15  ;;  %v9369_v55 = vmul.f32 0.00390625, %v9130_v50 }
 0x155   :  { %v1462_v18 = vsel %vm1048_vm5, %v1461_v6, %v1457_v59  ;;  %v9311_v21 = vmul.f32 0.00390625, %v557_v60  ;;  %12751 = vst [vmem:[#allocation109_spill] sm:$0xff] %v9356_v8  ;;  %v9511_v56 = vmul.f32 0.00390625, %v12778_v49  ;;  %v9534_v20 = vmul.f32 0.00390625, %v12784_v17 }
 0x156   :  { %12741 = vst [vmem:[#allocation99_spill] sm:$0xff] %v9304_v25  ;;  %v1476_v59 = vrot.slane %v9304_v25, %v9067_v12  ;;  %v1467_v35 = vsel %vm1055_vm6, %v1466_v1, %v1462_v18  ;;  %v1403_v25 = vsel %vm1076_vm9, %v1402_v4, %v1398_v28  ;;  %v1412_v18 = vrot.slane %v9319_v30, %v9112_v15 }
 0x157   :  { %12743 = vst [vmem:[#allocation101_spill] sm:$0xff] %v9311_v21  ;;  %v1471_v6 = vrot.slane %v9311_v21, %v9049_v57  ;;  %v566_v39 = vpop.xlane.xlu1 %565  ;;  %v9349_v1 = vmul.f32 0.00390625, %v9141_v0  ;;  %v1417_v4 = vrot.slane %v9331_v46, %v9122_v51  ;;  %v1408_v28 = vsel %vm1083_vm10, %v1407_v19, %v1403_v25  ;;  %12753 = vst [vmem:[#allocation111_spill] sm:$0xff] %v9369_v55 }
 0x158   :  { %v9336_v60 = vmul.f32 0.00390625, %v566_v39  ;;  %v563_v58 = vpop.xlane.xlu0 %562  ;;  %v1180_v39 = vrot.slane %v9323_v3, %v9122_v51  ;;  %v1171_v21 = vsel %vm1083_vm10, %v1170_v36, %v1166_v9  ;;  %v9376_v3 = vmul.f32 0.00390625, %v8771_v43 }
 0x159   :  { %v1472_v37 = vsel %vm1062_vm7, %v1471_v6, %v1467_v35  ;;  %v9342_v5 = vmul.f32 0.00390625, %v563_v58  ;;  %12750 = vst [vmem:[#allocation108_spill] sm:$0xff] %v9349_v1  ;;  %v12756_v25 = vrot.slane %v9139_v54, %v9112_v15  ;;  %v1176_v19 = vsel %vm12649_vm11, %v1175_v41, %v1171_v21 }
 0x15a   :  { %12748 = vst [vmem:[#allocation106_spill] sm:$0xff] %v9336_v60  ;;  %v1486_v0 = vrot.slane %v9336_v60, %v9091_v42  ;;  %v1477_v6 = vsel %vm1069_vm8, %v1476_v59, %v1472_v37  ;;  %12755 = vst [vmem:[#allocation113_spill] sm:$0xff] %v9376_v3  ;;  %v1413_v60 = vsel %vm12649_vm11, %v1412_v18, %v1408_v28  ;;  %v9508_v30 = vmul.f32 0.00390625, %v12776_v40 }
 0x15b   :  { %12749 = vst [vmem:[#allocation107_spill] sm:$0xff] %v9342_v5  ;;  %v1481_v33 = vrot.slane %v9342_v5, %v9078_v24  ;;  %v572_v61 = vpop.xlane.xlu1 %571  ;;  %v1422_v59 = vrot.slane %v9349_v1, %v9145_v7  ;;  %v1091_v50 = vsel %vm12649_vm11, %v12756_v25, %v9174_v63  ;;  %v1185_v37 = vrot.slane %v9356_v8, %v9145_v7  ;;  %v12768_v8 = vld [vmem:[#allocation14_spill] sm:$0xff]  ;;  %v12774_v1 = vld [vmem:[#allocation19_spill] sm:$0xff] }
 0x15c   :  { %v9365_v35 = vmul.f32 0.00390625, %v572_v61  ;;  %v569_v58 = vpop.xlane.xlu0 %568  ;;  %v1103_v9 = vrot.slane %v9216_v2, %v9145_v7  ;;  %v1427_v21 = vrot.slane %v9369_v55, %v9163_v34  ;;  %v1190_v28 = vrot.slane %v9376_v3, %v9163_v34 }
 0x15d   :  { %v1482_v52 = vsel %vm1076_vm9, %v1481_v33, %v1477_v6  ;;  %v9372_v5 = vmul.f32 0.00390625, %v569_v58  ;;  %v1418_v58 = vsel %vm1097_vm12, %v1417_v4, %v1413_v60  ;;  %v12759_v4 = vrot.slane %v9136_v44, %v9122_v51 }
 0x15e   :  { %12752 = vst [vmem:[#allocation110_spill] sm:$0xff] %v9365_v35  ;;  %v1496_v18 = vrot.slane %v9365_v35, %v9122_v51  ;;  %v1487_v33 = vsel %vm1083_vm10, %v1486_v0, %v1482_v52  ;;  %v1181_v52 = vsel %vm1097_vm12, %v1180_v39, %v1176_v19  ;;  %v1423_v0 = vsel %vm1104_vm13, %v1422_v59, %v1418_v58 }
 0x15f   :  { %12754 = vst [vmem:[#allocation112_spill] sm:$0xff] %v9372_v5  ;;  %v1491_v43 = vrot.slane %v9372_v5, %v9112_v15  ;;  %v578_v36 = vpop.xlane.xlu1 %577  ;;  %v1186_v60 = vsel %vm1104_vm13, %v1185_v37, %v1181_v52  ;;  %v1428_v58 = vsel %vm1111_vm14, %v1427_v21, %v1423_v0  ;;  %v12762_v0 = vld [vmem:[#allocation11_spill] sm:$0xff]  ;;  %v1274_v13 = vrot.slane %v9511_v56, %v8971_v27 }
 0x160   :  { %v9396_v61 = vmul.f32 0.00390625, %v578_v36  ;;  %v575_v63 = vpop.xlane.xlu0 %574  ;;  %v1110_v36 = vrot.slane %v9198_v16, %v9163_v34  ;;  %v1191_v35 = vsel %vm1111_vm14, %v1190_v28, %v1186_v60  ;;  %v9441_v28 = vmul.f32 0.00390625, %v12762_v0 }
 0x161   :  { %v1492_v41 = vsel %vm12649_vm11, %v1491_v43, %v1487_v33  ;;  %v9401_v6 = vmul.f32 0.00390625, %v575_v63  ;;  %v1098_v63 = vsel %vm1097_vm12, %v12759_v4, %v1091_v50 }
 0x162   :  { %12757 = vst [vmem:[#allocation114_spill] sm:$0xff] %v9396_v61  ;;  %v1506_v25 = vrot.slane %v9396_v61, %v9163_v34  ;;  %v1497_v39 = vsel %vm1097_vm12, %v1496_v18, %v1492_v41  ;;  %v1105_v59 = vsel %vm1104_vm13, %v1103_v9, %v1098_v63  ;;  %v12761_v18 = vld [vmem:[#allocation9_spill] sm:$0xff]  ;;  %v1204_v63 = vrot.slane %v9441_v28, %v8984_v32 }
 0x163   :  { %12758 = vst [vmem:[#allocation115_spill] sm:$0xff] %v9401_v6  ;;  %v1501_v43 = vrot.slane %v9401_v6, %v9145_v7  ;;  %v9414_v33 = vpop.xlane.xlu1 %583  ;;  %v1112_v4 = vsel %vm1111_vm14, %v1110_v36, %v1105_v59  ;;  %v12760_v6 = vld [vmem:[#allocation8_spill] sm:$0xff]  ;;  %v9437_v9 = vmul.f32 0.00390625, %v12761_v18  ;;  %v12763_v36 = vld [vmem:[#allocation10_spill] sm:$0xff] }
 0x164   :  { %v9421_v61 = vpop.xlane.xlu0 %580  ;;  %v9434_v5 = vmul.f32 0.00390625, %v12760_v6  ;;  %v1667_v21 = vsel %vm12555_vm15, %v1428_v58, %v1112_v4 }
 0x165   :  { %v1502_v19 = vsel %vm1104_vm13, %v1501_v43, %v1497_v39  ;;  %v1195_v6 = vrot.slane %v9437_v9, %v8971_v27  ;;  %v9450_v43 = vmul.f32 0.00390625, %v12763_v36  ;;  %v12764_v39 = vld [vmem:[#allocation13_spill] sm:$0xff]  ;;  %v12767_v36 = vld [vmem:[#allocation15_spill] sm:$0xff] }
 0x166   :  { %v1507_v37 = vsel %vm1111_vm14, %v1506_v25, %v1502_v19  ;;  %v9457_v59 = vmul.f32 0.00390625, %v12764_v39  ;;  %v9473_v39 = vmul.f32 0.00390625, %v12767_v36  ;;  %v9489_v36 = vmul.f32 0.00390625, %v12770_v45  ;;  %12779 = vst [vmem:[#allocation15_spill] sm:$0xff] %v9511_v56  ;;  %v12790_v56 = vld [vmem:[#allocation21_spill] sm:$0xff] }
 0x167   :  { %v9429_v52 = vpop.xlane.xlu1 %589  ;;  %v1668_v50 = vsel %vm12555_vm15, %v1507_v37, %v1191_v35  ;;  %v1199_v35 = vrot.slane %v9434_v5, %v8961_v23  ;;  %v1209_v37 = vrot.slane %v9450_v43, %v8993_v47  ;;  %v9505_v45 = vmul.f32 0.00390625, %v12774_v1 }
 0x168   :  { %1739 = vmatprep.mubr.f32.mxu0 %v1668_v50  ;;  %v587_v41 = vpop.xlane.xlu0 %586  ;;  %v12765_v50 = vld [vmem:[#allocation12_spill] sm:$0xff]  ;;  %v1214_v0 = vrot.slane %v9457_v59, %v9007_v31  ;;  %12771 = vst [vmem:[#allocation11_spill] sm:$0xff] %v9489_v36 }
 0x169   :  { %1740 = vmatmul.mubr.f32.vlgmr.msra.gmra.mrb[0].mxu0 %v1667_v21  ;;  %v1200_v58 = vsel %vm1013_vm0, %v1199_v35, %v1195_v6  ;;  %v9465_v4 = vmul.f32 0.00390625, %v12765_v50  ;;  %v9481_v50 = vmul.f32 0.00390625, %v12768_v8  ;;  %12775 = vst [vmem:[#allocation13_spill] sm:$0xff] %v9505_v45  ;;  %12777 = vst [vmem:[#allocation12_spill] sm:$0xff] %v9508_v30  ;;  %v1244_v49 = vrot.slane %v9505_v45, %v9078_v24 }
 0x16a   :  { %v1205_v21 = vsel %vm1020_vm1, %v1204_v63, %v1200_v58  ;;  %v1224_v58 = vrot.slane %v9473_v39, %v9031_v38  ;;  %v9559_v45 = vmul.f32 0.00390625, %v9421_v61 }
 0x16b   :  { %v9443_v25 = vpop.xlane.xlu1 %595  ;;  %12766 = vst [vmem:[#allocation8_spill] sm:$0xff] %v9465_v4  ;;  %v1219_v35 = vrot.slane %v9465_v4, %v9020_v14  ;;  %v1210_v6 = vsel %vm1027_vm2, %v1209_v37, %v1205_v21  ;;  %12769 = vst [vmem:[#allocation9_spill] sm:$0xff] %v9481_v50  ;;  %v1229_v55 = vrot.slane %v9481_v50, %v9038_v29  ;;  %v12772_v21 = vld [vmem:[#allocation16_spill] sm:$0xff] }
 0x16c   :  { %v9452_v60 = vpop.xlane.xlu0 %592  ;;  %v1215_v63 = vsel %vm1034_vm3, %v1214_v0, %v1210_v6  ;;  %v9497_v8 = vmul.f32 0.00390625, %v12772_v21  ;;  %v1234_v6 = vrot.slane %v9489_v36, %v9049_v57  ;;  %12785 = vst [vmem:[#allocation16_spill] sm:$0xff] %v9534_v20 }
 0x16d   :  { %v1220_v37 = vsel %vm1041_vm4, %v1219_v35, %v1215_v63  ;;  %v12780_v35 = vld [vmem:[#allocation27_spill] sm:$0xff] }
 0x16e   :  { %12773 = vst [vmem:[#allocation10_spill] sm:$0xff] %v9497_v8  ;;  %v1225_v0 = vsel %vm1048_vm5, %v1224_v58, %v1220_v37  ;;  %v9514_v63 = vmul.f32 0.00390625, %v12780_v35  ;;  %v1239_v58 = vrot.slane %v9497_v8, %v9067_v12  ;;  %v1278_v35 = vrot.slane %v9508_v30, %v8961_v23  ;;  %v12788_v30 = vld [vmem:[#allocation20_spill] sm:$0xff]  ;;  %12792 = vst [vmem:[#allocation27_spill] sm:$0xff] %v9559_v45 }
 0x16f   :  { %v9459_v19 = vpop.xlane.xlu1 %601  ;;  %v1230_v37 = vsel %vm1055_vm6, %v1229_v55, %v1225_v0  ;;  %v12786_v55 = vld [vmem:[#allocation29_spill] sm:$0xff]  ;;  %v9547_v11 = vmul.f32 0.00390625, %v12788_v30  ;;  %v9550_v8 = vmul.f32 0.00390625, %v12790_v56  ;;  %v12793_v30 = vld [vmem:[#allocation28_spill] sm:$0xff]  ;;  %v9567_v56 = vmul.f32 0.00390625, %v587_v41 }
 0x170   :  { %v9467_v18 = vpop.xlane.xlu0 %598  ;;  %12781 = vst [vmem:[#allocation14_spill] sm:$0xff] %v9514_v63  ;;  %v1235_v40 = vsel %vm1062_vm7, %v1234_v6, %v1230_v37  ;;  %v1283_v48 = vrot.slane %v9514_v63, %v8984_v32  ;;  %v9539_v0 = vmul.f32 0.00390625, %v12786_v55  ;;  %v1249_v6 = vrot.slane %v9522_v22, %v9091_v42 }
 0x171   :  { %v1240_v37 = vsel %vm1069_vm8, %v1239_v58, %v1235_v40  ;;  %12789 = vst [vmem:[#allocation24_spill] sm:$0xff] %v9547_v11  ;;  %v9556_v55 = vmul.f32 0.00390625, %v9414_v33  ;;  %v1279_v22 = vsel %vm1013_vm0, %v1278_v35, %v1274_v13  ;;  %v1288_v58 = vrot.slane %v9534_v20, %v8993_v47  ;;  %12795 = vst [vmem:[#allocation26_spill] sm:$0xff] %v9567_v56  ;;  %v12796_v33 = vld [vmem:[#allocation31_spill] sm:$0xff] }
 0x172   :  { %12787 = vst [vmem:[#allocation19_spill] sm:$0xff] %v9539_v0  ;;  %v1245_v63 = vsel %vm1076_vm9, %v1244_v49, %v1240_v37  ;;  %v9565_v40 = vmul.f32 0.00390625, %v12793_v30  ;;  %v1284_v50 = vsel %vm1020_vm1, %v1283_v48, %v1279_v22  ;;  %v1293_v49 = vrot.slane %v9539_v0, %v9007_v31  ;;  %v12802_v30 = vld [vmem:[#allocation22_spill] sm:$0xff] }
 0x173   :  { %v9475_v3 = vpop.xlane.xlu1 %607  ;;  %12791 = vst [vmem:[#allocation25_spill] sm:$0xff] %v9556_v55  ;;  %v9573_v37 = vmul.f32 0.00390625, %v12796_v33  ;;  %v9578_v35 = vsel %vm1083_vm10, %v1249_v6, %v1245_v63  ;;  %v1515_v22 = vrot.slane %v9556_v55, %v8961_v23  ;;  %v1511_v48 = vrot.slane %v9559_v45, %v8971_v27 }
 0x174   :  { %v9483_v10 = vpop.xlane.xlu0 %604  ;;  %12794 = vst [vmem:[#allocation18_spill] sm:$0xff] %v9565_v40  ;;  %v9589_v33 = vmul.f32 0.00390625, %v9429_v52  ;;  %v1298_v63 = vrot.slane %v9565_v40, %v9020_v14  ;;  %v1289_v6 = vsel %vm1027_vm2, %v1288_v58, %v1284_v50  ;;  %v9599_v13 = vmul.f32 0.00390625, %v9452_v60  ;;  %v12804_v52 = vld [vmem:[#allocation30_spill] sm:$0xff] }
 0x175   :  { %12797 = vst [vmem:[#allocation29_spill] sm:$0xff] %v9573_v37  ;;  %v9602_v55 = vmul.f32 0.00390625, %v12802_v30  ;;  %v1294_v45 = vsel %vm1034_vm3, %v1293_v49, %v1289_v6  ;;  %v9606_v36 = vmul.f32 0.00390625, %v12804_v52  ;;  %v9611_v50 = vmul.f32 0.00390625, %v9443_v25  ;;  %v12808_v49 = vld [vmem:[#allocation23_spill] sm:$0xff] }
 0x176   :  { %12799 = vst [vmem:[#allocation21_spill] sm:$0xff] %v9589_v33  ;;  %12801 = vst [vmem:[#allocation31_spill] sm:$0xff] %v9599_v13  ;;  %v9620_v6 = vmul.f32 0.00390625, %v12808_v49  ;;  %v1516_v52 = vsel %vm1013_vm0, %v1515_v22, %v1511_v48  ;;  %v1299_v25 = vsel %vm1041_vm4, %v1298_v63, %v1294_v45  ;;  %v12812_v48 = vld [vmem:[#allocation33_spill] sm:$0xff] }
 0x177   :  { %v9491_v26 = vpop.xlane.xlu1 %613  ;;  %12803 = vst [vmem:[#allocation22_spill] sm:$0xff] %v9602_v55  ;;  %12805 = vst [vmem:[#allocation30_spill] sm:$0xff] %v9606_v36  ;;  %v1308_v49 = vrot.slane %v9606_v36, %v9038_v29  ;;  %v1535_v63 = vrot.slane %v9611_v50, %v9020_v14 }
 0x178   :  { %v9499_v46 = vpop.xlane.xlu0 %610  ;;  %12806 = vst [vmem:[#allocation116_spill] sm:$0xff] %v9611_v50  ;;  %12809 = vst [vmem:[#allocation23_spill] sm:$0xff] %v9620_v6 }
 0x17b   :  { %v9516_v21 = vpop.xlane.xlu1 %619 }
 0x17c   :  { %v9524_v1 = vpop.xlane.xlu0 %616 }
 0x17f   :  { %v9541_v53 = vpop.xlane.xlu1 %625 }
 0x180   :  { %v9552_v17 = vpop.xlane.xlu0 %622 }
 0x183   :  { %v632_v61 = vpop.xlane.xlu1 %631 }
 0x184   :  { %v9582_v41 = vmul.f32 0.00390625, %v632_v61  ;;  %v629_v20 = vpop.xlane.xlu0 %628  ;;  %v1520_v61 = vrot.slane %v9567_v56, %v8984_v32 }
 0x185   :  { %v9591_v0 = vmul.f32 0.00390625, %v629_v20  ;;  %v1303_v20 = vrot.slane %v9573_v37, %v9031_v38  ;;  %v1525_v37 = vrot.slane %v9589_v33, %v8993_v47 }
 0x186   :  { %12798 = vst [vmem:[#allocation20_spill] sm:$0xff] %v9582_v41  ;;  %v1594_v58 = vrot.slane %v9582_v41, %v8961_v23  ;;  %v1521_v41 = vsel %vm1020_vm1, %v1520_v61, %v1516_v52  ;;  %v9638_v23 = vmul.f32 0.00390625, %v12812_v48 }
 0x187   :  { %12800 = vst [vmem:[#allocation28_spill] sm:$0xff] %v9591_v0  ;;  %v638_v40 = vpop.xlane.xlu1 %637  ;;  %v1590_v60 = vrot.slane %v9591_v0, %v8971_v27  ;;  %v1530_v0 = vrot.slane %v9599_v13, %v9007_v31  ;;  %v1304_v22 = vsel %vm1048_vm5, %v1303_v20, %v1299_v25  ;;  %v1526_v20 = vsel %vm1027_vm2, %v1525_v37, %v1521_v41  ;;  %v12820_v41 = vld [vmem:[#allocation34_spill] sm:$0xff]  ;;  %v12862_v13 = vld [vmem:[#allocation41_spill] sm:$0xff] }
 0x188   :  { %v635_v30 = vpop.xlane.xlu0 %634  ;;  %v9617_v56 = vmul.f32 0.00390625, %v638_v40  ;;  %v9632_v40 = vmul.f32 0.00390625, %v9467_v18  ;;  %12813 = vst [vmem:[#allocation33_spill] sm:$0xff] %v9638_v23  ;;  %v9651_v25 = vmul.f32 0.00390625, %v9459_v19  ;;  %v1309_v37 = vsel %vm1055_vm6, %v1308_v49, %v1304_v22 }
 0x189   :  { %v9625_v4 = vmul.f32 0.00390625, %v635_v30  ;;  %v1595_v61 = vsel %vm1013_vm0, %v1594_v58, %v1590_v60  ;;  %v1531_v58 = vsel %vm1034_vm3, %v1530_v0, %v1526_v20  ;;  %v1313_v19 = vrot.slane %v9638_v23, %v9049_v57 }
 0x18a   :  { %12807 = vst [vmem:[#allocation117_spill] sm:$0xff] %v9617_v56  ;;  %12811 = vst [vmem:[#allocation119_spill] sm:$0xff] %v9632_v40  ;;  %v1604_v18 = vrot.slane %v9617_v56, %v8993_v47  ;;  %v1540_v60 = vrot.slane %v9632_v40, %v9031_v38  ;;  %v9674_v0 = vmul.f32 0.00390625, %v9475_v3  ;;  %v1545_v22 = vrot.slane %v9651_v25, %v9038_v29  ;;  %v12825_v47 = vld [vmem:[#allocation35_spill] sm:$0xff] }
 0x18b   :  { %12810 = vst [vmem:[#allocation118_spill] sm:$0xff] %v9625_v4  ;;  %v1599_v30 = vrot.slane %v9625_v4, %v8984_v32  ;;  %v644_v45 = vpop.xlane.xlu1 %643  ;;  %12815 = vst [vmem:[#allocation121_spill] sm:$0xff] %v9651_v25  ;;  %v12817_v32 = vld [vmem:[#allocation32_spill] sm:$0xff]  ;;  %v9688_v3 = vmul.f32 0.00390625, %v12825_v47  ;;  %v12861_v40 = vld [vmem:[#allocation43_spill] sm:$0xff] }
 0x18c   :  { %v641_v52 = vpop.xlane.xlu0 %640  ;;  %v9647_v27 = vmul.f32 0.00390625, %v644_v45  ;;  %v9657_v36 = vmul.f32 0.00390625, %v12817_v32  ;;  %v9663_v45 = vmul.f32 0.00390625, %v9483_v10  ;;  %12822 = vst [vmem:[#allocation124_spill] sm:$0xff] %v9674_v0 }
 0x18d   :  { %v1600_v48 = vsel %vm1020_vm1, %v1599_v30, %v1595_v61  ;;  %v9654_v4 = vmul.f32 0.00390625, %v641_v52  ;;  %v9669_v30 = vmul.f32 0.00390625, %v12820_v41  ;;  %v1536_v41 = vsel %vm1041_vm4, %v1535_v63, %v1531_v58  ;;  %12826 = vst [vmem:[#allocation35_spill] sm:$0xff] %v9688_v3 }
 0x18e   :  { %12814 = vst [vmem:[#allocation120_spill] sm:$0xff] %v9647_v27  ;;  %12818 = vst [vmem:[#allocation32_spill] sm:$0xff] %v9657_v36  ;;  %v1605_v52 = vsel %vm1027_vm2, %v1604_v18, %v1600_v48  ;;  %v1614_v10 = vrot.slane %v9647_v27, %v9020_v14  ;;  %v1541_v18 = vsel %vm1048_vm5, %v1540_v60, %v1536_v41 }
 0x18f   :  { %12816 = vst [vmem:[#allocation122_spill] sm:$0xff] %v9654_v4  ;;  %12819 = vst [vmem:[#allocation123_spill] sm:$0xff] %v9663_v45  ;;  %v1609_v32 = vrot.slane %v9654_v4, %v9007_v31  ;;  %v650_v61 = vpop.xlane.xlu1 %649  ;;  %v1550_v48 = vrot.slane %v9663_v45, %v9049_v57  ;;  %v1318_v27 = vrot.slane %v9657_v36, %v9067_v12  ;;  %v12845_v31 = vld [vmem:[#allocation38_spill] sm:$0xff] }
 0x190   :  { %12821 = vst [vmem:[#allocation34_spill] sm:$0xff] %v9669_v30  ;;  %v647_v20 = vpop.xlane.xlu0 %646  ;;  %v9679_v49 = vmul.f32 0.00390625, %v650_v61  ;;  %v9694_v61 = vmul.f32 0.00390625, %v9499_v46  ;;  %v1314_v63 = vsel %vm1062_vm7, %v1313_v19, %v1309_v37  ;;  %v1328_v58 = vrot.slane %v9669_v30, %v9091_v42 }
 0x191   :  { %v1610_v56 = vsel %vm1034_vm3, %v1609_v32, %v1605_v52  ;;  %v9685_v4 = vmul.f32 0.00390625, %v647_v20  ;;  %v1555_v60 = vrot.slane %v9674_v0, %v9067_v12  ;;  %v1546_v37 = vsel %vm1055_vm6, %v1545_v22, %v1541_v18  ;;  %v12832_v18 = vld [vmem:[#allocation36_spill] sm:$0xff] }
 0x192   :  { %12823 = vst [vmem:[#allocation125_spill] sm:$0xff] %v9679_v49  ;;  %12827 = vst [vmem:[#allocation127_spill] sm:$0xff] %v9694_v61  ;;  %v1615_v52 = vsel %vm1041_vm4, %v1614_v10, %v1610_v56  ;;  %v1624_v46 = vrot.slane %v9679_v49, %v9038_v29  ;;  %v9712_v19 = vmul.f32 0.00390625, %v9491_v26  ;;  %v1551_v56 = vsel %vm1062_vm7, %v1550_v48, %v1546_v37  ;;  %v12834_v49 = vld [vmem:[#allocation37_spill] sm:$0xff] }
 0x193   :  { %12824 = vst [vmem:[#allocation126_spill] sm:$0xff] %v9685_v4  ;;  %v1619_v47 = vrot.slane %v9685_v4, %v9031_v38  ;;  %v656_v32 = vpop.xlane.xlu1 %655  ;;  %v1323_v38 = vrot.slane %v9688_v3, %v9078_v24  ;;  %v1560_v10 = vrot.slane %v9694_v61, %v9078_v24  ;;  %v1319_v22 = vsel %vm1069_vm8, %v1318_v27, %v1314_v63 }
 0x194   :  { %v653_v20 = vpop.xlane.xlu0 %652  ;;  %v9708_v41 = vmul.f32 0.00390625, %v656_v32  ;;  %12829 = vst [vmem:[#allocation129_spill] sm:$0xff] %v9712_v19  ;;  %v9723_v32 = vmul.f32 0.00390625, %v9524_v1  ;;  %v9727_v26 = vmul.f32 0.00390625, %v12832_v18  ;;  %v9735_v48 = vmul.f32 0.00390625, %v9516_v21 }
 0x195   :  { %v1620_v14 = vsel %vm1048_vm5, %v1619_v47, %v1615_v52  ;;  %v9715_v4 = vmul.f32 0.00390625, %v653_v20  ;;  %v9730_v47 = vmul.f32 0.00390625, %v12834_v49  ;;  %v1565_v63 = vrot.slane %v9712_v19, %v9091_v42 }
 0x196   :  { %12828 = vst [vmem:[#allocation128_spill] sm:$0xff] %v9708_v41  ;;  %12831 = vst [vmem:[#allocation131_spill] sm:$0xff] %v9723_v32  ;;  %v1625_v37 = vsel %vm1055_vm6, %v1624_v46, %v1620_v14  ;;  %v1634_v1 = vrot.slane %v9708_v41, %v9067_v12  ;;  %v1556_v49 = vsel %vm1069_vm8, %v1555_v60, %v1551_v56  ;;  %v9753_v46 = vmul.f32 0.00390625, %v9552_v17  ;;  %v12840_v56 = vld [vmem:[#allocation39_spill] sm:$0xff] }
 0x197   :  { %12830 = vst [vmem:[#allocation130_spill] sm:$0xff] %v9715_v4  ;;  %12833 = vst [vmem:[#allocation36_spill] sm:$0xff] %v9727_v26  ;;  %v1629_v52 = vrot.slane %v9715_v4, %v9049_v57  ;;  %v662_v20 = vpop.xlane.xlu1 %661  ;;  %v1324_v21 = vsel %vm1076_vm9, %v1323_v38, %v1319_v22  ;;  %v1561_v57 = vsel %vm1076_vm9, %v1560_v10, %v1556_v49 }
 0x198   :  { %12835 = vst [vmem:[#allocation37_spill] sm:$0xff] %v9730_v47  ;;  %12836 = vst [vmem:[#allocation132_spill] sm:$0xff] %v9735_v48  ;;  %v659_v29 = vpop.xlane.xlu0 %658  ;;  %v9740_v27 = vmul.f32 0.00390625, %v662_v20  ;;  %v1570_v14 = vrot.slane %v9723_v32, %v9112_v15  ;;  %v1338_v20 = vrot.slane %v9727_v26, %v9122_v51  ;;  %v1333_v60 = vrot.slane %v9730_v47, %v9112_v15 }
 0x199   :  { %v1630_v18 = vsel %vm1062_vm7, %v1629_v52, %v1625_v37  ;;  %v9746_v4 = vmul.f32 0.00390625, %v659_v29  ;;  %12839 = vst [vmem:[#allocation135_spill] sm:$0xff] %v9753_v46  ;;  %v9760_v52 = vmul.f32 0.00390625, %v12840_v56  ;;  %v1575_v10 = vrot.slane %v9735_v48, %v9122_v51 }
 0x19a   :  { %12837 = vst [vmem:[#allocation133_spill] sm:$0xff] %v9740_v27  ;;  %v1635_v22 = vsel %vm1069_vm8, %v1634_v1, %v1630_v18  ;;  %v1644_v17 = vrot.slane %v9740_v27, %v9091_v42  ;;  %v1566_v41 = vsel %vm1083_vm10, %v1565_v63, %v1561_v57  ;;  %v9773_v56 = vmul.f32 0.00390625, %v9541_v53 }
 0x19b   :  { %12838 = vst [vmem:[#allocation134_spill] sm:$0xff] %v9746_v4  ;;  %12841 = vst [vmem:[#allocation39_spill] sm:$0xff] %v9760_v52  ;;  %v1639_v38 = vrot.slane %v9746_v4, %v9078_v24  ;;  %v668_v29 = vpop.xlane.xlu1 %667  ;;  %v1329_v24 = vsel %vm1083_vm10, %v1328_v58, %v1324_v21  ;;  %v9780_v26 = vmul.f32 0.00390625, %v12845_v31  ;;  %v1571_v1 = vsel %vm12649_vm11, %v1570_v14, %v1566_v41 }
 0x19c   :  { %v665_v37 = vpop.xlane.xlu0 %664  ;;  %v9769_v49 = vmul.f32 0.00390625, %v668_v29  ;;  %12843 = vst [vmem:[#allocation137_spill] sm:$0xff] %v9773_v56  ;;  %v1580_v18 = vrot.slane %v9753_v46, %v9145_v7  ;;  %v12847_v57 = vrot.slane %v9550_v8, %v9112_v15  ;;  %v1334_v63 = vsel %vm12649_vm11, %v1333_v60, %v1329_v24 }
 0x19d   :  { %v1640_v12 = vsel %vm1076_vm9, %v1639_v38, %v1635_v22  ;;  %v9776_v4 = vmul.f32 0.00390625, %v665_v37  ;;  %12846 = vst [vmem:[#allocation38_spill] sm:$0xff] %v9780_v26  ;;  %v1343_v38 = vrot.slane %v9760_v52, %v9145_v7  ;;  %v1264_v41 = vrot.slane %v9620_v6, %v9145_v7  ;;  %v12877_v6 = vld [vmem:[#allocation57_spill] sm:$0xff] }
 0x19e   :  { %12842 = vst [vmem:[#allocation136_spill] sm:$0xff] %v9769_v49  ;;  %v1255_v53 = vsel %vm12649_vm11, %v12847_v57, %v9578_v35  ;;  %v1645_v21 = vsel %vm1083_vm10, %v1644_v17, %v1640_v12  ;;  %v1654_v14 = vrot.slane %v9769_v49, %v9122_v51  ;;  %v1585_v24 = vrot.slane %v9773_v56, %v9163_v34 }
 0x19f   :  { %12844 = vst [vmem:[#allocation138_spill] sm:$0xff] %v9776_v4  ;;  %v1649_v31 = vrot.slane %v9776_v4, %v9112_v15  ;;  %v674_v58 = vpop.xlane.xlu1 %673  ;;  %v1576_v37 = vsel %vm1097_vm12, %v1575_v10, %v1571_v1  ;;  %v1348_v57 = vrot.slane %v9780_v26, %v9163_v34  ;;  %v1339_v17 = vsel %vm1097_vm12, %v1338_v20, %v1334_v63 }
 0x1a0   :  { %v671_v29 = vpop.xlane.xlu0 %670  ;;  %v9800_v22 = vmul.f32 0.00390625, %v674_v58  ;;  %v1581_v58 = vsel %vm1104_vm13, %v1580_v18, %v1576_v37  ;;  %v1269_v49 = vrot.slane %v9602_v55, %v9163_v34  ;;  %v12850_v10 = vrot.slane %v9547_v11, %v9122_v51 }
 0x1a1   :  { %v1650_v35 = vsel %vm12649_vm11, %v1649_v31, %v1645_v21  ;;  %v9805_v60 = vmul.f32 0.00390625, %v671_v29  ;;  %v1344_v21 = vsel %vm1104_vm13, %v1343_v38, %v1339_v17  ;;  %v1586_v18 = vsel %vm1111_vm14, %v1585_v24, %v1581_v58  ;;  %v1822_v58 = vld [vmem:[%s12438_s3 + $0x30] sm:$0xff] }
 0x1a2   :  { %12848 = vst [vmem:[#allocation139_spill] sm:$0xff] %v9800_v22  ;;  %v1664_v12 = vrot.slane %v9800_v22, %v9163_v34  ;;  %v1260_v1 = vsel %vm1097_vm12, %v12850_v10, %v1255_v53  ;;  %v1655_v29 = vsel %vm1097_vm12, %v1654_v14, %v1650_v35  ;;  %v1349_v63 = vsel %vm1111_vm14, %v1348_v57, %v1344_v21  ;;  %v1817_v53 = vld [vmem:[%s12438_s3 + $0x8] sm:$0xff]  ;;  %v1819_v14 = vld [vmem:[%s12438_s3 + $0x18] sm:$0xff]  ;;  %v1820_v35 = vld [vmem:[%s12438_s3 + $0x20] sm:$0xff] }
 0x1a3   :  { %12849 = vst [vmem:[#allocation140_spill] sm:$0xff] %v9805_v60  ;;  %v1659_v31 = vrot.slane %v9805_v60, %v9145_v7  ;;  %v1265_v22 = vsel %vm1104_vm13, %v1264_v41, %v1260_v1  ;;  %v1821_v41 = vld [vmem:[%s12438_s3 + $0x28] sm:$0xff]  ;;  %v1827_v1 = vld [vmem:[%s12438_s3 + $0x58] sm:$0xff]  ;;  %v8588_v52 = vmov 0   ;;  %v8589_v46 = vmov 1983009808  }
 0x1a4   :  { %v1270_v38 = vsel %vm1111_vm14, %v1269_v49, %v1265_v22  ;;  %v8495_v24 = vpack.c.bf16 %v1821_v41, %v1817_v53  ;;  %v1823_v49 = vld [vmem:[%s12438_s3 + $0x38] sm:$0xff]  ;;  %v1816_v22 = vld [vmem:[%s12438_s3] sm:$0xff]  ;;  %v1825_v21 = vld [vmem:[%s12438_s3 + $0x48] sm:$0xff]  ;;  %8518 = vset.pattern.permute.xlu0 %v8588_v52  ;;  %8519 = vset.pattern.permute.xlu1 %v8588_v52  ;;  %v2950_v19 = vunpack.c.l.s4 %v8589_v46 }
 0x1a5   :  { %v1660_v20 = vsel %vm1104_vm13, %v1659_v31, %v1655_v29  ;;  %v1669_v17 = vsel %vm12555_vm15, %v1586_v18, %v1270_v38  ;;  %v8497_v57 = vpack.c.bf16 %v1820_v35, %v1816_v22  ;;  %v1829_v10 = vld [vmem:[%s12438_s3 + $0x68] sm:$0xff]  ;;  %v1824_v18 = vld [vmem:[%s12438_s3 + $0x40] sm:$0xff]  ;;  %v1830_v53 = vld [vmem:[%s12438_s3 + $0x70] sm:$0xff] }
 0x1a6   :  { %v1665_v37 = vsel %vm1111_vm14, %v1664_v12, %v1660_v20  ;;  %v1818_v12 = vld [vmem:[%s12438_s3 + $0x10] sm:$0xff]  ;;  %8496 = vmatprep.subr.bf16.mxu0 %v8495_v24  ;;  %v8499_v29 = vpack.c.bf16 %v1829_v10, %v1825_v21  ;;  %v1831_v20 = vld [vmem:[%s12438_s3 + $0x78] sm:$0xff]  ;;  %v8354_v35 = vld [vmem:[%s12437_s2] ss:$0 sm:$0xff]  ;;  %v9884_v10 = vsub.s32 0, %v8944_v62  ;;  %v2951_v61 = vunpack.c.0.s8 %v2950_v19  ;;  %s8590_s2 = smov [#allocation5]  }
 0x1a7   :  { %v1670_v60 = vsel %vm12555_vm15, %v1665_v37, %v1349_v63  ;;  %v8505_v31 = vpack.c.bf16 %v1822_v58, %v1818_v12  ;;  %8498 = vmatpush1.bf16.msra.mxu0 %v8497_v57  ;;  %v1828_v63 = vld [vmem:[%s12438_s3 + $0x60] sm:$0xff]  ;;  %v8507_v37 = vpack.c.bf16 %v1831_v20, %v1827_v1  ;;  %vm1854_vm15 = vcmask 261120  }
 0x1a8   :  { %1809 = vmatprep.mubr.f32.mxu1 %v1670_v60  ;;  %v8503_v60 = vpack.c.bf16 %v1823_v49, %v1819_v14  ;;  %v8501_v38 = vpack.c.bf16 %v1828_v63, %v1824_v18  ;;  %8500 = vmatprep.subr.bf16.mxu0 %v8499_v29  ;;  %v8587_v14 = vmov 0.0   ;;  %v9889_v1 = vld [vmem:[%s12439_s4] sm:$0xf]  ;;  %v10003_v33 = vsub.s32 %v2951_v61, %v8944_v62  ;;  %s8345_s4 = sshll.u32 %s8590_s2, 4  ;;  %s8346_s4 = int_to_ptr.vmem [resolvable:$true] %s8345_s4 }
 0x1a9   :  { %1810 = vmatmul.mubr.f32.vlgmr.msra.gmra.mrb[0].mxu1 %v1669_v17  ;;  %v1826_v17 = vld [vmem:[%s12438_s3 + $0x50] sm:$0xff]  ;;  %1922 = vmatprep.mubr.f32.mxu0 %v8587_v14  ;;  %v1837_v29 = vrot.slane %v9889_v1, %v9884_v10  ;;  %s8558_s11 = scalar_lea.vmem %s8346_s4, 128  ;;  %p8563_p9 = scmp.lt.s32.totalorder %s8346_s4, %s8346_s4 }
 0x1aa   :  { %8504 = vmatprep.subr.bf16.mxu1 %v8503_v60  ;;  %v8509_v41 = vpack.c.bf16 %v1830_v53, %v1826_v17  ;;  %1993 = vmatprep.mubr.f32.mxu1 %v8587_v14  ;;  %v1844_v53 = vsub.s32 2, %v8944_v62  ;;  %p8559_p8 = scmp.ne.s32.totalorder %s8346_s4, %s8558_s11  ;;  %p8564_p10 = scmp.lt.s32.totalorder %s8558_s11, %s8558_s11 }
 0x1ab   :  { %8506 = vmatpush1.bf16.msra.mxu1 %v8505_v31  ;;  %8502 = vmatpush1.bf16.msra.mxu0 %v8501_v38 }
 0x1ac   :  { %8508 = vmatprep.subr.bf16.mxu1 %v8507_v37  ;;  %v1845_v14 = vrot.slane %v9889_v1, %v1844_v53  ;;  %p8565_p11 = por %p8564_p10, %p8563_p9 }
 0x1ae   :  { %p8566_p12 = pnand %p8565_p11, %p8559_p8 }
 0x1af   :  { %8510 = vmatpush1.bf16.msra.mxu1 %v8509_v41 }
 0x23c   :  { %v8393_v24 = vpop.f32.mrb[0].mxu0 }
 0x23d   :  { %v8394_v49 = vpop.f32.mrb[1].mxu0 }
 0x23e   :  { %v8395_v22 = vadd.f32 %v8394_v49, %v8393_v24 }
 0x240   :  { %v1742_v12 = vadd.f32 %v8395_v22, %v8354_v35 }
 0x27c   :  { %v8428_v60 = vpop.f32.mrb[0].mxu1 }
 0x27d   :  { %v8429_v57 = vpop.f32.mrb[1].mxu1 }
 0x27e   :  { %v8430_v58 = vadd.f32 %v8429_v57, %v8428_v60 }
 0x280   :  { %v1812_v31 = vadd.f32 %v8430_v58, %v1742_v12 }
 0x282   :  { %v1815_v21 = vmax.f32 %v1812_v31, 0.0 }
 0x284   :  { %8355 = vmatmul.mubr.msk.f32.vlgmr.msra.gmra.mrb[2].mxu0 %vm1854_vm15, %v1815_v21  ;;  %8356 = vmatmul.mubr.msk.f32.vlgmr.msra.gmra.mrb[2].mxu1 %vm1854_vm15, %v1815_v21  ;;  %v9902_v21 = vsub.s32 1, %v8944_v62  ;;  %vm13519_vm15 = vcmask 1041409  }
 0x357   :  { %v1924_v20 = vpop.f32.mrb[2].mxu0  ;;  %v1995_v18 = vpop.f32.mrb[2].mxu1 }
 0x358   :  { %v1925_v63 = vadd.f32 %v1924_v20, %v1837_v29  ;;  %v9893_v37 = vpop.f32.mrb[3].mxu0  ;;  %v9895_v38 = vpop.f32.mrb[3].mxu1  ;;  %v1996_v49 = vadd.f32 %v1995_v18, %v1845_v14  ;;  %v1841_v20 = vrot.slane %v9889_v1, %v9902_v21 }
 0x35a   :  { %v8357_v17 = vmul.f32 -1.442695, %v1925_v63  ;;  %v8359_v22 = vmul.f32 -1.442695, %v1996_v49  ;;  %v1927_v18 = vadd.f32 %v9893_v37, %v1841_v20  ;;  %v1848_v37 = vsub.s32 3, %v8944_v62  ;;  %v12866_v62 = vld [vmem:[#allocation49_spill] sm:$0xff] }
 0x35c   :  { %8520 = vpow2.f32 %v8357_v17  ;;  %v8358_v63 = vmul.f32 -1.442695, %v1927_v18  ;;  %v1849_v14 = vrot.slane %v9889_v1, %v1848_v37 }
 0x366   :  { %v8521_v41 = vpop.eup %8520 }
 0x367   :  { %v2012_v24 = vadd.f32 1.0, %v8521_v41 }
 0x369   :  { %8522 = vrcp.f32 %v2012_v24 }
 0x36a   :  { %8524 = vpow2.f32 %v8359_v22  ;;  %v1998_v22 = vadd.f32 %v9895_v38, %v1849_v14 }
 0x373   :  { %v8523_v35 = vpop.eup %8522 }
 0x374   :  { %v2031_v60 = vrot.slane %v8523_v35, %v9884_v10  ;;  %v8525_v57 = vpop.eup %8524  ;;  %v2299_v29 = vrot.slane %v8523_v35, %v9902_v21 }
 0x375   :  { %v2014_v12 = vadd.f32 1.0, %v8525_v57 }
 0x376   :  { %2037 = vbcast.lane.b32.xlu1 %v2031_v60, 264  ;;  %2033 = vbcast.lane.b32.xlu0 %v2031_v60, 256 }
 0x377   :  { %8526 = vrcp.f32 %v2014_v12  ;;  %v8360_v12 = vmul.f32 -1.442695, %v1998_v22 }
 0x378   :  { %8528 = vpow2.f32 %v8358_v63 }
 0x37a   :  { %2041 = vbcast.lane.b32.xlu1 %v2031_v60, 272  ;;  %2049 = vbcast.lane.b32.xlu0 %v2031_v60, 288 }
 0x37e   :  { %2045 = vbcast.lane.b32.xlu1 %v2031_v60, 280  ;;  %2057 = vbcast.lane.b32.xlu0 %v2031_v60, 304 }
 0x381   :  { %v8527_v58 = vpop.eup %8526 }
 0x382   :  { %2053 = vbcast.lane.b32.xlu1 %v2031_v60, 296  ;;  %2065 = vbcast.lane.b32.xlu0 %v2031_v60, 320  ;;  %v2165_v31 = vrot.slane %v8527_v58, %v9884_v10  ;;  %v2433_v17 = vrot.slane %v8527_v58, %v9902_v21  ;;  %v8529_v53 = vpop.eup %8528 }
 0x383   :  { %v2013_v41 = vadd.f32 1.0, %v8529_v53 }
 0x385   :  { %8530 = vrcp.f32 %v2013_v41 }
 0x386   :  { %2061 = vbcast.lane.b32.xlu1 %v2031_v60, 312  ;;  %2073 = vbcast.lane.b32.xlu0 %v2031_v60, 336  ;;  %8532 = vpow2.f32 %v8360_v12 }
 0x38a   :  { %2069 = vbcast.lane.b32.xlu1 %v2031_v60, 328  ;;  %2081 = vbcast.lane.b32.xlu0 %v2031_v60, 352 }
 0x38e   :  { %2077 = vbcast.lane.b32.xlu1 %v2031_v60, 344  ;;  %2089 = vbcast.lane.b32.xlu0 %v2031_v60, 368 }
 0x38f   :  { %v9920_v57 = vpop.eup %8530 }
 0x390   :  { %v8533_v41 = vpop.eup %8532  ;;  %v9998_v50 = vrot.slane %v9920_v57, %v9902_v21 }
 0x391   :  { %v2015_v37 = vadd.f32 1.0, %v8533_v41 }
 0x392   :  { %2085 = vbcast.lane.b32.xlu1 %v2031_v60, 360  ;;  %2167 = vbcast.lane.b32.xlu0 %v2165_v31, 256 }
 0x393   :  { %8534 = vrcp.f32 %v2015_v37 }
 0x396   :  { %2093 = vbcast.lane.b32.xlu1 %v2031_v60, 376  ;;  %2175 = vbcast.lane.b32.xlu0 %v2165_v31, 272 }
 0x39a   :  { %2171 = vbcast.lane.b32.xlu1 %v2165_v31, 264  ;;  %2183 = vbcast.lane.b32.xlu0 %v2165_v31, 288 }
 0x39d   :  { %v9956_v7 = vpop.eup %8534 }
 0x39e   :  { %2179 = vbcast.lane.b32.xlu1 %v2165_v31, 280  ;;  %2191 = vbcast.lane.b32.xlu0 %v2165_v31, 304  ;;  %v2232_v42 = vrot.slane %v9956_v7, %v9884_v10 }
 0x3a2   :  { %2187 = vbcast.lane.b32.xlu1 %v2165_v31, 296  ;;  %2199 = vbcast.lane.b32.xlu0 %v2165_v31, 320 }
 0x3a6   :  { %2195 = vbcast.lane.b32.xlu1 %v2165_v31, 312  ;;  %2207 = vbcast.lane.b32.xlu0 %v2165_v31, 336 }
 0x3aa   :  { %2203 = vbcast.lane.b32.xlu1 %v2165_v31, 328  ;;  %2215 = vbcast.lane.b32.xlu0 %v2165_v31, 352 }
 0x3ae   :  { %2211 = vbcast.lane.b32.xlu1 %v2165_v31, 344  ;;  %2223 = vbcast.lane.b32.xlu0 %v2165_v31, 368 }
 0x3b2   :  { %2219 = vbcast.lane.b32.xlu1 %v2165_v31, 360  ;;  %2301 = vbcast.lane.b32.xlu0 %v2299_v29, 256 }
 0x3b6   :  { %2227 = vbcast.lane.b32.xlu1 %v2165_v31, 376  ;;  %2309 = vbcast.lane.b32.xlu0 %v2299_v29, 272  ;;  %v2098_v31 = vrot.slane %v9920_v57, %v9884_v10 }
 0x3ba   :  { %2305 = vbcast.lane.b32.xlu1 %v2299_v29, 264  ;;  %2317 = vbcast.lane.b32.xlu0 %v2299_v29, 288 }
 0x3be   :  { %2313 = vbcast.lane.b32.xlu1 %v2299_v29, 280  ;;  %2325 = vbcast.lane.b32.xlu0 %v2299_v29, 304 }
 0x3c2   :  { %2321 = vbcast.lane.b32.xlu1 %v2299_v29, 296  ;;  %2333 = vbcast.lane.b32.xlu0 %v2299_v29, 320 }
 0x3c6   :  { %2329 = vbcast.lane.b32.xlu1 %v2299_v29, 312  ;;  %2341 = vbcast.lane.b32.xlu0 %v2299_v29, 336 }
 0x3ca   :  { %2337 = vbcast.lane.b32.xlu1 %v2299_v29, 328  ;;  %2349 = vbcast.lane.b32.xlu0 %v2299_v29, 352 }
 0x3ce   :  { %2345 = vbcast.lane.b32.xlu1 %v2299_v29, 344  ;;  %2357 = vbcast.lane.b32.xlu0 %v2299_v29, 368 }
 0x3d2   :  { %2353 = vbcast.lane.b32.xlu1 %v2299_v29, 360  ;;  %2435 = vbcast.lane.b32.xlu0 %v2433_v17, 256 }
 0x3d6   :  { %2361 = vbcast.lane.b32.xlu1 %v2299_v29, 376  ;;  %2443 = vbcast.lane.b32.xlu0 %v2433_v17, 272 }
 0x3da   :  { %2439 = vbcast.lane.b32.xlu1 %v2433_v17, 264  ;;  %2451 = vbcast.lane.b32.xlu0 %v2433_v17, 288 }
 0x3de   :  { %2447 = vbcast.lane.b32.xlu1 %v2433_v17, 280  ;;  %2459 = vbcast.lane.b32.xlu0 %v2433_v17, 304 }
 0x3e2   :  { %2455 = vbcast.lane.b32.xlu1 %v2433_v17, 296  ;;  %2467 = vbcast.lane.b32.xlu0 %v2433_v17, 320 }
 0x3e6   :  { %2463 = vbcast.lane.b32.xlu1 %v2433_v17, 312  ;;  %2475 = vbcast.lane.b32.xlu0 %v2433_v17, 336 }
 0x3e8   :  { %v9911_v24 = vpop.permute.xlu1 %2037  ;;  %v9913_v49 = vpop.permute.xlu0 %2033 }
 0x3e9   :  { %v2692_v46 = vmul.f32 %v9913_v49, %v12861_v40 }
 0x3ea   :  { %2471 = vbcast.lane.b32.xlu1 %v2433_v17, 328  ;;  %2483 = vbcast.lane.b32.xlu0 %v2433_v17, 352 }
 0x3ec   :  { %v9916_v35 = vpop.permute.xlu1 %2041  ;;  %v9918_v60 = vpop.permute.xlu0 %2049 }
 0x3ed   :  { %v2696_v61 = vmul.f32 %v9918_v60, %v12866_v62 }
 0x3ee   :  { %2479 = vbcast.lane.b32.xlu1 %v2433_v17, 344  ;;  %2491 = vbcast.lane.b32.xlu0 %v2433_v17, 368 }
 0x3f0   :  { %v9922_v58 = vpop.permute.xlu1 %2045  ;;  %v9924_v1 = vpop.permute.xlu0 %2057 }
 0x3f2   :  { %2487 = vbcast.lane.b32.xlu1 %v2433_v17, 360  ;;  %2100 = vbcast.lane.b32.xlu0 %v2098_v31, 256 }
 0x3f4   :  { %v9928_v38 = vpop.permute.xlu1 %2053  ;;  %v9930_v29 = vpop.permute.xlu0 %2065 }
 0x3f6   :  { %2495 = vbcast.lane.b32.xlu1 %v2433_v17, 376  ;;  %2108 = vbcast.lane.b32.xlu0 %v2098_v31, 272 }
 0x3f8   :  { %v9932_v20 = vpop.permute.xlu1 %2061  ;;  %v9934_v18 = vpop.permute.xlu0 %2073 }
 0x3fa   :  { %2104 = vbcast.lane.b32.xlu1 %v2098_v31, 264  ;;  %2116 = vbcast.lane.b32.xlu0 %v2098_v31, 288 }
 0x3fc   :  { %v9936_v63 = vpop.permute.xlu1 %2069  ;;  %v9938_v53 = vpop.permute.xlu0 %2081 }
 0x3fe   :  { %2112 = vbcast.lane.b32.xlu1 %v2098_v31, 280  ;;  %2124 = vbcast.lane.b32.xlu0 %v2098_v31, 304 }
 0x400   :  { %v9940_v14 = vpop.permute.xlu1 %2077  ;;  %v9942_v22 = vpop.permute.xlu0 %2089 }
 0x402   :  { %2120 = vbcast.lane.b32.xlu1 %v2098_v31, 296  ;;  %2132 = vbcast.lane.b32.xlu0 %v2098_v31, 320 }
 0x404   :  { %v9944_v17 = vpop.permute.xlu1 %2085  ;;  %v9946_v12 = vpop.permute.xlu0 %2167 }
 0x406   :  { %2128 = vbcast.lane.b32.xlu1 %v2098_v31, 312  ;;  %2140 = vbcast.lane.b32.xlu0 %v2098_v31, 336 }
 0x408   :  { %v9948_v4 = vpop.permute.xlu1 %2093  ;;  %v9950_v27 = vpop.permute.xlu0 %2175 }
 0x40a   :  { %2136 = vbcast.lane.b32.xlu1 %v2098_v31, 328  ;;  %2148 = vbcast.lane.b32.xlu0 %v2098_v31, 352 }
 0x40c   :  { %v9952_v41 = vpop.permute.xlu1 %2171  ;;  %v9954_v34 = vpop.permute.xlu0 %2183 }
 0x40e   :  { %2144 = vbcast.lane.b32.xlu1 %v2098_v31, 344  ;;  %2156 = vbcast.lane.b32.xlu0 %v2098_v31, 368 }
 0x410   :  { %v9958_v37 = vpop.permute.xlu1 %2179  ;;  %v9960_v51 = vpop.permute.xlu0 %2191 }
 0x412   :  { %2152 = vbcast.lane.b32.xlu1 %v2098_v31, 360  ;;  %2234 = vbcast.lane.b32.xlu0 %v2232_v42, 256 }
 0x414   :  { %v9964_v15 = vpop.permute.xlu1 %2187  ;;  %v9966_v26 = vpop.permute.xlu0 %2199 }
 0x416   :  { %2160 = vbcast.lane.b32.xlu1 %v2098_v31, 376  ;;  %2242 = vbcast.lane.b32.xlu0 %v2232_v42, 272 }
 0x418   :  { %v9968_v30 = vpop.permute.xlu1 %2195  ;;  %v9970_v47 = vpop.permute.xlu0 %2207 }
 0x41a   :  { %2238 = vbcast.lane.b32.xlu1 %v2232_v42, 264  ;;  %2250 = vbcast.lane.b32.xlu0 %v2232_v42, 288 }
 0x41c   :  { %v9972_v36 = vpop.permute.xlu1 %2203  ;;  %v9974_v10 = vpop.permute.xlu0 %2215 }
 0x41e   :  { %2246 = vbcast.lane.b32.xlu1 %v2232_v42, 280  ;;  %2258 = vbcast.lane.b32.xlu0 %v2232_v42, 304 }
 0x420   :  { %v9976_v3 = vpop.permute.xlu1 %2211  ;;  %v9978_v23 = vpop.permute.xlu0 %2223 }
 0x421   :  { %12851 = vst [vmem:[#allocation141_spill] sm:$0xff] %v9976_v3  ;;  %12852 = vst [vmem:[#allocation142_spill] sm:$0xff] %v9978_v23 }
 0x422   :  { %2254 = vbcast.lane.b32.xlu1 %v2232_v42, 296  ;;  %2266 = vbcast.lane.b32.xlu0 %v2232_v42, 320 }
 0x424   :  { %v9980_v52 = vpop.permute.xlu1 %2219  ;;  %v9982_v31 = vpop.permute.xlu0 %2301 }
 0x425   :  { %12853 = vst [vmem:[#allocation143_spill] sm:$0xff] %v9980_v52  ;;  %12854 = vst [vmem:[#allocation144_spill] sm:$0xff] %v9982_v31  ;;  %v3023_v52 = vrot.slane %v2696_v61, %v10003_v33 }
 0x426   :  { %2262 = vbcast.lane.b32.xlu1 %v2232_v42, 312  ;;  %2274 = vbcast.lane.b32.xlu0 %v2232_v42, 336 }
 0x428   :  { %v9984_v56 = vpop.permute.xlu1 %2227  ;;  %v9986_v48 = vpop.permute.xlu0 %2309 }
 0x429   :  { %12855 = vst [vmem:[#allocation145_spill] sm:$0xff] %v9984_v56  ;;  %12856 = vst [vmem:[#allocation146_spill] sm:$0xff] %v9986_v48  ;;  %v12865_v48 = vld [vmem:[#allocation45_spill] sm:$0xff] }
 0x42a   :  { %2270 = vbcast.lane.b32.xlu1 %v2232_v42, 328  ;;  %2282 = vbcast.lane.b32.xlu0 %v2232_v42, 352  ;;  %v2694_v40 = vmul.f32 %v9916_v35, %v12865_v48  ;;  %v3016_v48 = vcombine.high %v2696_v61, %v2696_v61  ;;  %v12869_v35 = vld [vmem:[#allocation47_spill] sm:$0xff] }
 0x42b   :  { %v2695_v60 = vmul.f32 %v9922_v58, %v12869_v35 }
 0x42c   :  { %v9988_v32 = vpop.permute.xlu1 %2305  ;;  %v9990_v0 = vpop.permute.xlu0 %2317  ;;  %v2982_v56 = vcombine.high %v2694_v40, %v2694_v40  ;;  %v3030_v35 = vrot.slane %v3016_v48, %v10003_v33 }
 0x42d   :  { %12857 = vst [vmem:[#allocation147_spill] sm:$0xff] %v9988_v32  ;;  %12858 = vst [vmem:[#allocation148_spill] sm:$0xff] %v9990_v0  ;;  %v2693_v0 = vmul.f32 %v9911_v24, %v12862_v13  ;;  %v2955_v13 = vrot.slane %v2692_v46, %v10003_v33  ;;  %v2999_v11 = vcombine.high %v2695_v60, %v2695_v60 }
 0x42e   :  { %2278 = vbcast.lane.b32.xlu1 %v2232_v42, 344  ;;  %2290 = vbcast.lane.b32.xlu0 %v2232_v42, 368 }
 0x42f   :  { %v2965_v32 = vcombine.high %v2693_v0, %v2693_v0  ;;  %v2972_v57 = vrot.slane %v2693_v0, %v10003_v33 }
 0x430   :  { %v9992_v25 = vpop.permute.xlu1 %2313  ;;  %v9994_v45 = vpop.permute.xlu0 %2325 }
 0x431   :  { %12859 = vst [vmem:[#allocation149_spill] sm:$0xff] %v9992_v25  ;;  %12860 = vst [vmem:[#allocation150_spill] sm:$0xff] %v9994_v45  ;;  %v2948_v45 = vcombine.high %v2692_v46, %v2692_v46  ;;  %v2980_v0 = vcombine.high %v2972_v57, %v2972_v57  ;;  %v2963_v46 = vcombine.high %v2955_v13, %v2955_v13 }
 0x432   :  { %2286 = vbcast.lane.b32.xlu1 %v2232_v42, 360  ;;  %2368 = vbcast.lane.b32.xlu0 %v9998_v50, 256 }
 0x433   :  { %v10036_v31 = vcombine.low %v2972_v57, %v2980_v0  ;;  %v5124_v57 = vcombine.low %v2955_v13, %v2963_v46  ;;  %v3031_v13 = vcombine.high %v3023_v52, %v3023_v52  ;;  %v3032_v46 = vcombine.high %v3030_v35, %v3030_v35 }
 0x434   :  { %v10008_v19 = vpop.permute.xlu1 %2321  ;;  %v10010_v25 = vpop.permute.xlu0 %2333 }
 0x435   :  { %12863 = vst [vmem:[#allocation43_spill] sm:$0xff] %v10008_v19  ;;  %12864 = vst [vmem:[#allocation41_spill] sm:$0xff] %v10010_v25  ;;  %v2962_v25 = vrot.slane %v2948_v45, %v10003_v33  ;;  %v2979_v19 = vrot.slane %v2965_v32, %v10003_v33 }
 0x436   :  { %2294 = vbcast.lane.b32.xlu1 %v2232_v42, 376  ;;  %2376 = vbcast.lane.b32.xlu0 %v9998_v50, 272  ;;  %v2989_v42 = vrot.slane %v2694_v40, %v10003_v33  ;;  %v2996_v40 = vrot.slane %v2982_v56, %v10003_v33  ;;  %v3006_v56 = vrot.slane %v2695_v60, %v10003_v33 }
 0x437   :  { %v2964_v45 = vcombine.high %v2962_v25, %v2962_v25  ;;  %v2981_v55 = vcombine.high %v2979_v19, %v2979_v19 }
 0x438   :  { %v10019_v24 = vpop.permute.xlu1 %2329  ;;  %v10021_v49 = vpop.permute.xlu0 %2341  ;;  %v2997_v58 = vcombine.high %v2989_v42, %v2989_v42 }
 0x439   :  { %12867 = vst [vmem:[#allocation45_spill] sm:$0xff] %v10019_v24  ;;  %12868 = vst [vmem:[#allocation49_spill] sm:$0xff] %v10021_v49  ;;  %v12872_v24 = vld [vmem:[#allocation53_spill] sm:$0xff]  ;;  %v5125_v0 = vcombine.low %v2962_v25, %v2964_v45  ;;  %v3013_v25 = vrot.slane %v2999_v11, %v10003_v33 }
 0x43a   :  { %2372 = vbcast.lane.b32.xlu1 %v9998_v50, 264  ;;  %2384 = vbcast.lane.b32.xlu0 %v9998_v50, 288  ;;  %v2698_v32 = vmul.f32 %v9924_v1, %v12872_v24  ;;  %12873 = vst [vmem:[#allocation53_spill] sm:$0xff] %v10036_v31  ;;  %v10047_v1 = vrot.slane %v9956_v7, %v9902_v21 }
 0x43b   :  { %v2998_v21 = vcombine.high %v2996_v40, %v2996_v40  ;;  %v10062_v60 = vcombine.low %v2989_v42, %v2997_v58  ;;  %v5139_v11 = vrot.slane %v5125_v0, %v10003_v33 }
 0x43c   :  { %v10030_v62 = vpop.permute.xlu1 %2337  ;;  %v10032_v49 = vpop.permute.xlu0 %2349  ;;  %v3050_v23 = vcombine.high %v2698_v32, %v2698_v32  ;;  %v3057_v48 = vrot.slane %v2698_v32, %v10003_v33  ;;  %v5132_v32 = vrot.slane %v5124_v57, %v10003_v33 }
 0x43d   :  { %12870 = vst [vmem:[#allocation47_spill] sm:$0xff] %v10030_v62  ;;  %12871 = vst [vmem:[#allocation151_spill] sm:$0xff] %v10032_v49  ;;  %v12874_v62 = vld [vmem:[#allocation51_spill] sm:$0xff]  ;;  %v10076_v31 = vcombine.low %v2996_v40, %v2998_v21 }
 0x43e   :  { %2380 = vbcast.lane.b32.xlu1 %v9998_v50, 280  ;;  %v2697_v49 = vmul.f32 %v9928_v38, %v12874_v62  ;;  %2392 = vbcast.lane.b32.xlu0 %v9998_v50, 304  ;;  %v2700_v38 = vmul.f32 %v9930_v29, %v12877_v6  ;;  %v10057_v62 = vcombine.low %v2979_v19, %v2981_v55  ;;  %v12879_v29 = vld [vmem:[#allocation55_spill] sm:$0xff] }
 0x43f   :  { %v3014_v6 = vcombine.high %v3006_v56, %v3006_v56  ;;  %v2699_v19 = vmul.f32 %v9932_v20, %v12879_v29  ;;  %v3064_v42 = vrot.slane %v3050_v23, %v10003_v33  ;;  %v3065_v58 = vcombine.high %v3057_v48, %v3057_v48 }
 0x440   :  { %v10050_v24 = vpop.permute.xlu1 %2345  ;;  %v10052_v61 = vpop.permute.xlu0 %2357  ;;  %12878 = vst [vmem:[#allocation57_spill] sm:$0xff] %v10057_v62  ;;  %v3033_v45 = vcombine.high %v2697_v49, %v2697_v49  ;;  %v3040_v55 = vrot.slane %v2697_v49, %v10003_v33  ;;  %v10078_v62 = vcombine.low %v3023_v52, %v3031_v13  ;;  %v3091_v57 = vrot.slane %v2700_v38, %v10003_v33  ;;  %v12882_v49 = vld [vmem:[#allocation61_spill] sm:$0xff] }
 0x441   :  { %12875 = vst [vmem:[#allocation51_spill] sm:$0xff] %v10050_v24  ;;  %12876 = vst [vmem:[#allocation152_spill] sm:$0xff] %v10052_v61  ;;  %v3084_v24 = vcombine.high %v2700_v38, %v2700_v38  ;;  %v2702_v3 = vmul.f32 %v9934_v18, %v12882_v49  ;;  %v10086_v29 = vcombine.low %v3030_v35, %v3032_v46  ;;  %v12883_v38 = vld [vmem:[#allocation59_spill] sm:$0xff] }
 0x442   :  { %2388 = vbcast.lane.b32.xlu1 %v9998_v50, 296  ;;  %2400 = vbcast.lane.b32.xlu0 %v9998_v50, 320  ;;  %v3015_v23 = vcombine.high %v3013_v25, %v3013_v25  ;;  %v10090_v40 = vcombine.low %v3006_v56, %v3014_v6  ;;  %v3048_v52 = vcombine.high %v3040_v55, %v3040_v55 }
 0x443   :  { %v3067_v0 = vcombine.high %v2699_v19, %v2699_v19  ;;  %v2701_v21 = vmul.f32 %v9936_v63, %v12883_v38  ;;  %v3066_v49 = vcombine.high %v3064_v42, %v3064_v42  ;;  %v10098_v20 = vcombine.low %v3057_v48, %v3065_v58 }
 0x444   :  { %v10070_v7 = vpop.permute.xlu1 %2353  ;;  %v10072_v61 = vpop.permute.xlu0 %2435  ;;  %v3098_v35 = vrot.slane %v3084_v24, %v10003_v33  ;;  %v3074_v46 = vrot.slane %v2699_v19, %v10003_v33  ;;  %v3118_v6 = vcombine.high %v2702_v3, %v2702_v3  ;;  %v10107_v63 = vcombine.low %v3013_v25, %v3015_v23 }
 0x445   :  { %12880 = vst [vmem:[#allocation55_spill] sm:$0xff] %v10070_v7  ;;  %12881 = vst [vmem:[#allocation153_spill] sm:$0xff] %v10072_v61  ;;  %v3047_v61 = vrot.slane %v3033_v45, %v10003_v33  ;;  %v3099_v45 = vcombine.high %v3091_v57, %v3091_v57  ;;  %v10105_v7 = vcombine.low %v5132_v32, %v5139_v11 }
 0x446   :  { %2396 = vbcast.lane.b32.xlu1 %v9998_v50, 312  ;;  %2408 = vbcast.lane.b32.xlu0 %v9998_v50, 336  ;;  %12885 = vst [vmem:[#allocation59_spill] sm:$0xff] %v10098_v20  ;;  %v2704_v48 = vmul.f32 %v9938_v53, %v9139_v54  ;;  %v10115_v19 = vcombine.low %v3040_v55, %v3048_v52  ;;  %v12888_v52 = vld [vmem:[#allocation66_spill] sm:$0xff] }
 0x447   :  { %v3049_v38 = vcombine.high %v3047_v61, %v3047_v61  ;;  %v3081_v58 = vrot.slane %v3067_v0, %v10003_v33  ;;  %v3101_v56 = vcombine.high %v2701_v21, %v2701_v21  ;;  %v10122_v11 = vcombine.low %v3064_v42, %v3066_v49 }
 0x448   :  { %v10094_v18 = vpop.permute.xlu1 %2361  ;;  %v10096_v13 = vpop.permute.xlu0 %2443  ;;  %v3100_v54 = vcombine.high %v3098_v35, %v3098_v35  ;;  %v3082_v53 = vcombine.high %v3074_v46, %v3074_v46  ;;  %v10126_v23 = vcombine.low %v3091_v57, %v3099_v45  ;;  %v3132_v24 = vrot.slane %v3118_v6, %v10003_v33 }
 0x449   :  { %12884 = vst [vmem:[#allocation61_spill] sm:$0xff] %v10096_v13  ;;  %v3125_v13 = vrot.slane %v2702_v3, %v10003_v33  ;;  %v3108_v55 = vrot.slane %v2701_v21, %v10003_v33  ;;  %v2703_v0 = vmul.f32 %v9940_v14, %v12888_v52  ;;  %v3152_v49 = vcombine.high %v2704_v48, %v2704_v48 }
 0x44a   :  { %2404 = vbcast.lane.b32.xlu1 %v9998_v50, 328  ;;  %2416 = vbcast.lane.b32.xlu0 %v9998_v50, 352  ;;  %v3083_v45 = vcombine.high %v3081_v58, %v3081_v58  ;;  %v3115_v6 = vrot.slane %v3101_v56, %v10003_v33  ;;  %v2706_v21 = vmul.f32 %v9942_v22, %v9216_v2 }
 0x44b   :  { %v3133_v42 = vcombine.high %v3125_v13, %v3125_v13  ;;  %v2724_v3 = vmul.f32 %v9946_v12, %v9437_v9  ;;  %v3134_v57 = vcombine.high %v3132_v24, %v3132_v24  ;;  %v3116_v20 = vcombine.high %v3108_v55, %v3108_v55 }
 0x44c   :  { %v10118_v32 = vpop.permute.xlu1 %2439  ;;  %v10120_v25 = vpop.permute.xlu0 %2451  ;;  %v3135_v2 = vcombine.high %v2703_v0, %v2703_v0  ;;  %v3117_v9 = vcombine.high %v3115_v6, %v3115_v6  ;;  %v3193_v12 = vrot.slane %v2706_v21, %v10003_v33 }
 0x44d   :  { %12886 = vst [vmem:[#allocation154_spill] sm:$0xff] %v10118_v32  ;;  %12887 = vst [vmem:[#allocation155_spill] sm:$0xff] %v10120_v25  ;;  %v10133_v32 = vcombine.low %v3047_v61, %v3049_v38  ;;  %v3159_v25 = vrot.slane %v2704_v48, %v10003_v33  ;;  %v10146_v61 = vcombine.low %v3098_v35, %v3100_v54 }
 0x44e   :  { %2412 = vbcast.lane.b32.xlu1 %v9998_v50, 344  ;;  %2424 = vbcast.lane.b32.xlu0 %v9998_v50, 368  ;;  %v10148_v38 = vcombine.low %v3074_v46, %v3082_v53  ;;  %v2705_v48 = vmul.f32 %v9944_v17, %v9136_v44  ;;  %v10157_v22 = vcombine.low %v3125_v13, %v3133_v42 }
 0x44f   :  { %v3166_v35 = vrot.slane %v3152_v49, %v10003_v33  ;;  %v3167_v46 = vcombine.high %v3159_v25, %v3159_v25  ;;  %v3142_v54 = vrot.slane %v2703_v0, %v10003_v33  ;;  %v10162_v44 = vcombine.low %v3081_v58, %v3083_v45 }
 0x450   :  { %v10142_v14 = vpop.permute.xlu1 %2447  ;;  %v10144_v52 = vpop.permute.xlu0 %2459  ;;  %v3186_v17 = vcombine.high %v2706_v21, %v2706_v21  ;;  %v3169_v42 = vcombine.high %v2705_v48, %v2705_v48  ;;  %v3176_v49 = vrot.slane %v2705_v48, %v10003_v33  ;;  %v10172_v0 = vcombine.low %v3132_v24, %v3134_v57 }
 0x451   :  { %12889 = vst [vmem:[#allocation66_spill] sm:$0xff] %v10142_v14  ;;  %12890 = vst [vmem:[#allocation156_spill] sm:$0xff] %v10144_v52  ;;  %v3492_v52 = vcombine.high %v2724_v3, %v2724_v3  ;;  %v10174_v14 = vcombine.low %v3108_v55, %v3116_v20  ;;  %v3149_v58 = vrot.slane %v3135_v2, %v10003_v33 }
 0x452   :  { %2420 = vbcast.lane.b32.xlu1 %v9998_v50, 360  ;;  %2502 = vbcast.lane.b32.xlu0 %v10047_v1, 256  ;;  %v3499_v45 = vrot.slane %v2724_v3, %v10003_v33  ;;  %v3150_v13 = vcombine.high %v3142_v54, %v3142_v54  ;;  %v10184_v48 = vcombine.low %v3115_v6, %v3117_v9 }
 0x453   :  { %v3200_v20 = vrot.slane %v3186_v17, %v10003_v33  ;;  %v3201_v24 = vcombine.high %v3193_v12, %v3193_v12  ;;  %v2707_v55 = vmul.f32 %v9948_v4, %v9198_v16  ;;  %v3183_v57 = vrot.slane %v3169_v42, %v10003_v33 }
 0x454   :  { %v10165_v53 = vpop.permute.xlu1 %2455  ;;  %v10167_v56 = vpop.permute.xlu0 %2467  ;;  %v3184_v2 = vcombine.high %v3176_v49, %v3176_v49  ;;  %v3151_v9 = vcombine.high %v3149_v58, %v3149_v58  ;;  %v3507_v17 = vcombine.high %v3499_v45, %v3499_v45  ;;  %v2725_v16 = vmul.f32 %v9952_v41, %v9434_v5 }
 0x455   :  { %12891 = vst [vmem:[#allocation157_spill] sm:$0xff] %v10165_v53  ;;  %12892 = vst [vmem:[#allocation158_spill] sm:$0xff] %v10167_v56  ;;  %v3168_v56 = vcombine.high %v3166_v35, %v3166_v35  ;;  %v10181_v53 = vcombine.low %v3159_v25, %v3167_v46  ;;  %v3506_v25 = vrot.slane %v3492_v52, %v10003_v33 }
 0x456   :  { %2428 = vbcast.lane.b32.xlu1 %v9998_v50, 376  ;;  %2510 = vbcast.lane.b32.xlu0 %v10047_v1, 272  ;;  %v2726_v46 = vmul.f32 %v9950_v27, %v9441_v28  ;;  %v10206_v21 = vcombine.low %v3142_v54, %v3150_v13  ;;  %v2728_v28 = vmul.f32 %v9954_v34, %v9457_v59 }
 0x457   :  { %v10202_v4 = vcombine.low %v3166_v35, %v3168_v56  ;;  %v3202_v27 = vcombine.high %v3200_v20, %v3200_v20  ;;  %v10211_v52 = vcombine.low %v3193_v12, %v3201_v24  ;;  %v3203_v6 = vcombine.high %v2707_v55, %v2707_v55 }
 0x458   :  { %v10189_v3 = vpop.permute.xlu1 %2463  ;;  %v10191_v50 = vpop.permute.xlu0 %2475  ;;  %v3210_v5 = vrot.slane %v2707_v55, %v10003_v33  ;;  %v3185_v35 = vcombine.high %v3183_v57, %v3183_v57  ;;  %v3508_v54 = vcombine.high %v3506_v25, %v3506_v25  ;;  %v3526_v13 = vcombine.high %v2726_v46, %v2726_v46 }
 0x459   :  { %12893 = vst [vmem:[#allocation159_spill] sm:$0xff] %v10189_v3  ;;  %12894 = vst [vmem:[#allocation160_spill] sm:$0xff] %v10191_v50  ;;  %v10218_v50 = vcombine.low %v3176_v49, %v3184_v2  ;;  %v10220_v42 = vcombine.low %v3149_v58, %v3151_v9  ;;  %v10222_v34 = vcombine.low %v3499_v45, %v3507_v17 }
 0x45a   :  { %2506 = vbcast.lane.b32.xlu1 %v10047_v1, 264  ;;  %2518 = vbcast.lane.b32.xlu0 %v10047_v1, 288  ;;  %12895 = vst [vmem:[#allocation161_spill] sm:$0xff] %v10211_v52  ;;  %v3533_v59 = vrot.slane %v2726_v46, %v10003_v33  ;;  %v3509_v12 = vcombine.high %v2725_v16, %v2725_v16 }
 0x45b   :  { %12898 = vst [vmem:[#allocation164_spill] sm:$0xff] %v10222_v34  ;;  %v3516_v24 = vrot.slane %v2725_v16, %v10003_v33  ;;  %v3560_v55 = vcombine.high %v2728_v28, %v2728_v28  ;;  %v2727_v49 = vmul.f32 %v9958_v37, %v9450_v43  ;;  %v10233_v45 = vcombine.low %v3200_v20, %v3202_v27 }
 0x45c   :  { %v10214_v41 = vpop.permute.xlu1 %2471  ;;  %v10216_v56 = vpop.permute.xlu0 %2483  ;;  %v3217_v2 = vrot.slane %v3203_v6, %v10003_v33  ;;  %v3218_v46 = vcombine.high %v3210_v5, %v3210_v5  ;;  %v3540_v43 = vrot.slane %v3526_v13, %v10003_v33  ;;  %v2730_v37 = vmul.f32 %v9960_v51, %v9473_v39  ;;  %v12902_v39 = vld [vmem:[#allocation8_spill] sm:$0xff] }
 0x45d   :  { %12896 = vst [vmem:[#allocation162_spill] sm:$0xff] %v10214_v41  ;;  %12897 = vst [vmem:[#allocation163_spill] sm:$0xff] %v10216_v56  ;;  %v3567_v41 = vrot.slane %v2728_v28, %v10003_v33  ;;  %v10242_v28 = vcombine.low %v3183_v57, %v3185_v35  ;;  %v10249_v27 = vcombine.low %v3506_v25, %v3508_v54 }
 0x45e   :  { %2514 = vbcast.lane.b32.xlu1 %v10047_v1, 280  ;;  %2526 = vbcast.lane.b32.xlu0 %v10047_v1, 304  ;;  %v3541_v6 = vcombine.high %v3533_v59, %v3533_v59  ;;  %v3523_v58 = vrot.slane %v3509_v12, %v10003_v33  ;;  %v3574_v16 = vrot.slane %v3560_v55, %v10003_v33 }
 0x45f   :  { %12901 = vst [vmem:[#allocation167_spill] sm:$0xff] %v10249_v27  ;;  %v3575_v57 = vcombine.high %v3567_v41, %v3567_v41  ;;  %v3543_v35 = vcombine.high %v2727_v49, %v2727_v49  ;;  %v3219_v13 = vcombine.high %v3217_v2, %v3217_v2  ;;  %v3550_v51 = vrot.slane %v2727_v49, %v10003_v33 }
 0x460   :  { %v10236_v9 = vpop.permute.xlu1 %2479  ;;  %v10238_v17 = vpop.permute.xlu0 %2491  ;;  %v2729_v25 = vmul.f32 %v9964_v15, %v12902_v39  ;;  %v3542_v20 = vcombine.high %v3540_v43, %v3540_v43  ;;  %v3594_v56 = vcombine.high %v2730_v37, %v2730_v37  ;;  %v10268_v52 = vcombine.low %v3533_v59, %v3541_v6 }
 0x461   :  { %12899 = vst [vmem:[#allocation165_spill] sm:$0xff] %v10236_v9  ;;  %12900 = vst [vmem:[#allocation166_spill] sm:$0xff] %v10238_v17  ;;  %v3524_v17 = vcombine.high %v3516_v24, %v3516_v24  ;;  %v10255_v9 = vcombine.low %v3210_v5, %v3218_v46  ;;  %v3525_v5 = vcombine.high %v3523_v58, %v3523_v58  ;;  %v12906_v46 = vld [vmem:[#allocation11_spill] sm:$0xff] }
 0x462   :  { %2522 = vbcast.lane.b32.xlu1 %v10047_v1, 296  ;;  %2534 = vbcast.lane.b32.xlu0 %v10047_v1, 320  ;;  %12905 = vst [vmem:[#allocation169_spill] sm:$0xff] %v10268_v52  ;;  %v3601_v49 = vrot.slane %v2730_v37, %v10003_v33  ;;  %v2732_v15 = vmul.f32 %v9966_v26, %v12906_v46 }
 0x463   :  { %v10274_v39 = vcombine.low %v3516_v24, %v3524_v17  ;;  %v3576_v12 = vcombine.high %v3574_v16, %v3574_v16  ;;  %v10280_v27 = vcombine.low %v3217_v2, %v3219_v13  ;;  %v3558_v37 = vcombine.high %v3550_v51, %v3550_v51  ;;  %v12910_v17 = vld [vmem:[#allocation9_spill] sm:$0xff] }
 0x464   :  { %v10260_v54 = vpop.permute.xlu1 %2487  ;;  %v10264_v55 = vpop.permute.xlu0 %2100  ;;  %v3577_v6 = vcombine.high %v2729_v25, %v2729_v25  ;;  %v10286_v26 = vcombine.low %v3540_v43, %v3542_v20  ;;  %v3608_v24 = vrot.slane %v3594_v56, %v10003_v33  ;;  %v10296_v13 = vcombine.low %v3523_v58, %v3525_v5  ;;  %v12914_v5 = vld [vmem:[#allocation10_spill] sm:$0xff] }
 0x465   :  { %12903 = vst [vmem:[#allocation8_spill] sm:$0xff] %v10260_v54  ;;  %12904 = vst [vmem:[#allocation168_spill] sm:$0xff] %v10264_v55  ;;  %v10276_v54 = vcombine.low %v3567_v41, %v3575_v57  ;;  %v3557_v55 = vrot.slane %v3543_v35, %v10003_v33  ;;  %v3584_v41 = vrot.slane %v2729_v25, %v10003_v33  ;;  %v12912_v25 = vld [vmem:[#allocation13_spill] sm:$0xff] }
 0x466   :  { %2530 = vbcast.lane.b32.xlu1 %v10047_v1, 312  ;;  %2542 = vbcast.lane.b32.xlu0 %v10047_v1, 336  ;;  %12909 = vst [vmem:[#allocation171_spill] sm:$0xff] %v10286_v26  ;;  %v2731_v57 = vmul.f32 %v9968_v30, %v12910_v17  ;;  %v3609_v46 = vcombine.high %v3601_v49, %v3601_v49 }
 0x467   :  { %12907 = vst [vmem:[#allocation11_spill] sm:$0xff] %v10276_v54  ;;  %v3628_v59 = vcombine.high %v2732_v15, %v2732_v15  ;;  %v3559_v56 = vcombine.high %v3557_v55, %v3557_v55  ;;  %v3635_v20 = vrot.slane %v2732_v15, %v10003_v33  ;;  %v2734_v30 = vmul.f32 %v9970_v47, %v12912_v25  ;;  %v12918_v25 = vld [vmem:[#allocation17_spill] sm:$0xff]  ;;  %v12924_v54 = vld [vmem:[#allocation23_spill] sm:$0xff] }
 0x468   :  { %v10284_v34 = vpop.permute.xlu1 %2495  ;;  %v10292_v35 = vpop.permute.xlu0 %2108  ;;  %v10305_v17 = vcombine.low %v3574_v16, %v3576_v12  ;;  %v10307_v2 = vcombine.low %v3550_v51, %v3558_v37  ;;  %v3591_v58 = vrot.slane %v3577_v6, %v10003_v33  ;;  %v3610_v43 = vcombine.high %v3608_v24, %v3608_v24 }
 0x469   :  { %12908 = vst [vmem:[#allocation170_spill] sm:$0xff] %v10284_v34  ;;  %12911 = vst [vmem:[#allocation9_spill] sm:$0xff] %v10292_v35  ;;  %v2733_v34 = vmul.f32 %v9972_v36, %v12914_v5  ;;  %v3592_v52 = vcombine.high %v3584_v41, %v3584_v41  ;;  %v3611_v26 = vcombine.high %v2731_v57, %v2731_v57 }
 0x46a   :  { %2538 = vbcast.lane.b32.xlu1 %v10047_v1, 328  ;;  %2550 = vbcast.lane.b32.xlu0 %v10047_v1, 352  ;;  %12913 = vst [vmem:[#allocation13_spill] sm:$0xff] %v10305_v17  ;;  %v3618_v15 = vrot.slane %v2731_v57, %v10003_v33  ;;  %v10319_v16 = vcombine.low %v3601_v49, %v3609_v46  ;;  %v12919_v57 = vld [vmem:[#allocation141_spill] sm:$0xff] }
 0x46b   :  { %v3642_v51 = vrot.slane %v3628_v59, %v10003_v33  ;;  %v2736_v12 = vmul.f32 %v9974_v10, %v9550_v8  ;;  %v10325_v36 = vcombine.low %v3557_v55, %v3559_v56  ;;  %v3643_v37 = vcombine.high %v3635_v20, %v3635_v20 }
 0x46c   :  { %v10312_v35 = vpop.permute.xlu1 %2104  ;;  %v10315_v3 = vpop.permute.xlu0 %2116  ;;  %12917 = vst [vmem:[#allocation173_spill] sm:$0xff] %v10319_v16  ;;  %v3662_v6 = vcombine.high %v2734_v30, %v2734_v30  ;;  %v2735_v5 = vmul.f32 %v12919_v57, %v12918_v25  ;;  %v3593_v46 = vcombine.high %v3591_v58, %v3591_v58  ;;  %v3669_v59 = vrot.slane %v2734_v30, %v10003_v33  ;;  %v12925_v30 = vld [vmem:[#allocation142_spill] sm:$0xff] }
 0x46d   :  { %12915 = vst [vmem:[#allocation10_spill] sm:$0xff] %v10312_v35  ;;  %12916 = vst [vmem:[#allocation172_spill] sm:$0xff] %v10315_v3  ;;  %v3645_v47 = vcombine.high %v2733_v34, %v2733_v34  ;;  %v10335_v8 = vcombine.low %v3608_v24, %v3610_v43  ;;  %v10337_v10 = vcombine.low %v3584_v41, %v3592_v52 }
 0x46e   :  { %2546 = vbcast.lane.b32.xlu1 %v10047_v1, 344  ;;  %2558 = vbcast.lane.b32.xlu0 %v10047_v1, 368  ;;  %v3625_v55 = vrot.slane %v3611_v26, %v10003_v33  ;;  %v3626_v56 = vcombine.high %v3618_v15, %v3618_v15  ;;  %v3652_v57 = vrot.slane %v2733_v34, %v10003_v33 }
 0x46f   :  { %12921 = vst [vmem:[#allocation141_spill] sm:$0xff] %v10335_v8  ;;  %12922 = vst [vmem:[#allocation174_spill] sm:$0xff] %v10337_v10  ;;  %v3696_v49 = vcombine.high %v2736_v12, %v2736_v12  ;;  %v2738_v17 = vmul.f32 %v12925_v30, %v12924_v54  ;;  %v3644_v24 = vcombine.high %v3642_v51, %v3642_v51  ;;  %v12934_v8 = vld [vmem:[#allocation143_spill] sm:$0xff] }
 0x470   :  { %v10333_v3 = vpop.permute.xlu1 %2112  ;;  %v10340_v35 = vpop.permute.xlu0 %2124  ;;  %v3676_v52 = vrot.slane %v3662_v6, %v10003_v33  ;;  %v3703_v41 = vrot.slane %v2736_v12, %v10003_v33  ;;  %v3679_v26 = vcombine.high %v2735_v5, %v2735_v5  ;;  %v10351_v43 = vcombine.low %v3591_v58, %v3593_v46 }
 0x471   :  { %12920 = vst [vmem:[#allocation17_spill] sm:$0xff] %v10333_v3  ;;  %12923 = vst [vmem:[#allocation175_spill] sm:$0xff] %v10340_v35  ;;  %v10353_v35 = vcombine.low %v3635_v20, %v3643_v37  ;;  %v3677_v25 = vcombine.high %v3669_v59, %v3669_v59  ;;  %v3659_v34 = vrot.slane %v3645_v47, %v10003_v33 }
 0x472   :  { %2554 = vbcast.lane.b32.xlu1 %v10047_v1, 360  ;;  %7301 = vperm.xlu0 %8518, %v10105_v7   ;;  %12926 = vst [vmem:[#allocation23_spill] sm:$0xff] %v10351_v43  ;;  %v3627_v30 = vcombine.high %v3625_v55, %v3625_v55  ;;  %v10360_v16 = vcombine.low %v3618_v15, %v3626_v56 }
 0x473   :  { %12927 = vst [vmem:[#allocation142_spill] sm:$0xff] %v10353_v35  ;;  %v3686_v12 = vrot.slane %v2735_v5, %v10003_v33  ;;  %v3660_v7 = vcombine.high %v3652_v57, %v3652_v57  ;;  %v3710_v58 = vrot.slane %v3696_v49, %v10003_v33  ;;  %v3730_v20 = vcombine.high %v2738_v17, %v2738_v17 }
 0x474   :  { %v10356_v3 = vpop.permute.xlu1 %2120  ;;  %12929 = vst [vmem:[#allocation177_spill] sm:$0xff] %v10360_v16  ;;  %v10363_v6 = vpop.permute.xlu0 %2132  ;;  %v3737_v37 = vrot.slane %v2738_v17, %v10003_v33  ;;  %v10368_v47 = vcombine.low %v3642_v51, %v3644_v24  ;;  %v3678_v46 = vcombine.high %v3676_v52, %v3676_v52  ;;  %v3693_v54 = vrot.slane %v3679_v26, %v10003_v33  ;;  %v12937_v24 = vld [vmem:[#allocation73_spill] sm:$0xff] }
 0x475   :  { %12928 = vst [vmem:[#allocation176_spill] sm:$0xff] %v10356_v3  ;;  %12930 = vst [vmem:[#allocation178_spill] sm:$0xff] %v10363_v6  ;;  %v3711_v3 = vcombine.high %v3703_v41, %v3703_v41  ;;  %v10373_v5 = vcombine.low %v3669_v59, %v3677_v25  ;;  %v3661_v56 = vcombine.high %v3659_v34, %v3659_v34  ;;  %v12933_v6 = vld [vmem:[#allocation24_spill] sm:$0xff] }
 0x476   :  { %2562 = vbcast.lane.b32.xlu1 %v10047_v1, 376  ;;  %12931 = vst [vmem:[#allocation179_spill] sm:$0xff] %v10368_v47  ;;  %v2737_v49 = vmul.f32 %v12934_v8, %v12933_v6  ;;  %v10379_v17 = vcombine.low %v3625_v55, %v3627_v30  ;;  %v3694_v51 = vcombine.high %v3686_v12, %v3686_v12  ;;  %v12938_v47 = vld [vmem:[#allocation144_spill] sm:$0xff]  ;;  %v12942_v30 = vld [vmem:[#allocation22_spill] sm:$0xff] }
 0x477   :  { %12932 = vst [vmem:[#allocation180_spill] sm:$0xff] %v10373_v5  ;;  %v2756_v26 = vmul.f32 %v12938_v47, %v12937_v24  ;;  %v10387_v15 = vcombine.low %v3652_v57, %v3660_v7  ;;  %v3712_v59 = vcombine.high %v3710_v58, %v3710_v58  ;;  %v3744_v25 = vrot.slane %v3730_v20, %v10003_v33  ;;  %v12944_v57 = vld [vmem:[#allocation75_spill] sm:$0xff]  ;;  %v12945_v7 = vld [vmem:[#allocation146_spill] sm:$0xff] }
 0x478   :  { %v10377_v10 = vpop.permute.xlu1 %2128  ;;  %12936 = vst [vmem:[#allocation143_spill] sm:$0xff] %v10379_v17  ;;  %v10385_v43 = vpop.permute.xlu0 %2140  ;;  %v3745_v35 = vcombine.high %v3737_v37, %v3737_v37  ;;  %v10390_v8 = vcombine.low %v3676_v52, %v3678_v46  ;;  %v10392_v6 = vcombine.low %v3703_v41, %v3711_v3  ;;  %v3695_v55 = vcombine.high %v3693_v54, %v3693_v54  ;;  %v12961_v5 = vld [vmem:[#allocation86_spill] sm:$0xff] }
 0x479   :  { %12935 = vst [vmem:[#allocation24_spill] sm:$0xff] %v10377_v10  ;;  %12939 = vst [vmem:[#allocation73_spill] sm:$0xff] %v10385_v43  ;;  %v12943_v10 = vld [vmem:[#allocation145_spill] sm:$0xff]  ;;  %v10398_v47 = vcombine.low %v3659_v34, %v3661_v56  ;;  %v3713_v24 = vcombine.high %v2737_v49, %v2737_v49  ;;  %v2758_v43 = vmul.f32 %v12945_v7, %v12944_v57 }
 0x47a   :  { %12940 = vst [vmem:[#allocation144_spill] sm:$0xff] %v10390_v8  ;;  %12941 = vst [vmem:[#allocation181_spill] sm:$0xff] %v10392_v6  ;;  %v2739_v1 = vmul.f32 %v12943_v10, %v12942_v30  ;;  %v10404_v20 = vcombine.low %v3686_v12, %v3694_v51  ;;  %v3720_v3 = vrot.slane %v2737_v49, %v10003_v33  ;;  %v12953_v10 = vld [vmem:[#allocation147_spill] sm:$0xff]  ;;  %v12962_v8 = vld [vmem:[#allocation150_spill] sm:$0xff] }
 0x47b   :  { %v4036_v52 = vcombine.high %v2756_v26, %v2756_v26  ;;  %v4043_v41 = vrot.slane %v2756_v26, %v10003_v33  ;;  %v10412_v34 = vcombine.low %v3710_v58, %v3712_v59  ;;  %v3746_v56 = vcombine.high %v3744_v25, %v3744_v25 }
 0x47c   :  { %v10402_v17 = vpop.permute.xlu1 %2136  ;;  %12947 = vst [vmem:[#allocation145_spill] sm:$0xff] %v10404_v20  ;;  %v10408_v46 = vpop.permute.xlu0 %2148  ;;  %v10414_v30 = vcombine.low %v3737_v37, %v3745_v35  ;;  %v10418_v12 = vcombine.low %v3693_v54, %v3695_v55  ;;  %v3747_v51 = vcombine.high %v2739_v1, %v2739_v1  ;;  %v3754_v49 = vrot.slane %v2739_v1, %v10003_v33 }
 0x47d   :  { %12946 = vst [vmem:[#allocation22_spill] sm:$0xff] %v10402_v17  ;;  %12948 = vst [vmem:[#allocation75_spill] sm:$0xff] %v10408_v46  ;;  %v3727_v26 = vrot.slane %v3713_v24, %v10003_v33  ;;  %v4070_v7 = vcombine.high %v2758_v43, %v2758_v43  ;;  %v4077_v16 = vrot.slane %v2758_v43, %v10003_v33  ;;  %v12952_v46 = vld [vmem:[#allocation72_spill] sm:$0xff]  ;;  %v12957_v43 = vld [vmem:[#allocation81_spill] sm:$0xff] }
 0x47e   :  { %12949 = vst [vmem:[#allocation146_spill] sm:$0xff] %v10412_v34  ;;  %12950 = vst [vmem:[#allocation182_spill] sm:$0xff] %v10414_v30  ;;  %v2757_v58 = vmul.f32 %v12953_v10, %v12952_v46  ;;  %v3728_v37 = vcombine.high %v3720_v3, %v3720_v3  ;;  %v4050_v54 = vrot.slane %v4036_v52, %v10003_v33  ;;  %v12958_v17 = vld [vmem:[#allocation148_spill] sm:$0xff]  ;;  %v12959_v46 = vld [vmem:[#allocation79_spill] sm:$0xff] }
 0x47f   :  { %12951 = vst [vmem:[#allocation183_spill] sm:$0xff] %v10418_v12  ;;  %v4051_v55 = vcombine.high %v4043_v41, %v4043_v41  ;;  %v10432_v1 = vcombine.low %v3744_v25, %v3746_v56  ;;  %v2760_v6 = vmul.f32 %v12958_v17, %v12957_v43  ;;  %v12960_v10 = vld [vmem:[#allocation149_spill] sm:$0xff]  ;;  %v3761_v34 = vrot.slane %v3747_v51, %v10003_v33 }
 0x480   :  { %v10425_v59 = vpop.permute.xlu1 %2144  ;;  %v10430_v57 = vpop.permute.xlu0 %2156  ;;  %v3762_v35 = vcombine.high %v3754_v49, %v3754_v49  ;;  %v2762_v52 = vmul.f32 %v12962_v8, %v12961_v5  ;;  %v12964_v25 = vrot.slane %v10090_v40, %v10003_v33  ;;  %v3729_v24 = vcombine.high %v3727_v26, %v3727_v26 }
 0x481   :  { %12954 = vst [vmem:[#allocation72_spill] sm:$0xff] %v10425_v59  ;;  %12955 = vst [vmem:[#allocation147_spill] sm:$0xff] %v10430_v57  ;;  %v2759_v59 = vmul.f32 %v12960_v10, %v12959_v46  ;;  %v12963_v57 = vrot.slane %v10107_v63, %v10003_v33  ;;  %v4084_v30 = vrot.slane %v4070_v7, %v10003_v33 }
 0x482   :  { %12956 = vst [vmem:[#allocation184_spill] sm:$0xff] %v10432_v1  ;;  %v4085_v17 = vcombine.high %v4077_v16, %v4077_v16  ;;  %v4053_v43 = vcombine.high %v2757_v58, %v2757_v58  ;;  %v10452_v46 = vcombine.low %v3720_v3, %v3728_v37  ;;  %v4052_v51 = vcombine.high %v4050_v54, %v4050_v54 }
 0x483   :  { %v5191_v56 = vcombine.low %v12964_v25, %v12963_v57  ;;  %v10454_v10 = vcombine.low %v4043_v41, %v4051_v55  ;;  %v4060_v5 = vrot.slane %v2757_v58, %v10003_v33  ;;  %v4104_v8 = vcombine.high %v2760_v6, %v2760_v6 }
 0x484   :  { %v10450_v1 = vpop.permute.xlu1 %2152  ;;  %12966 = vst [vmem:[#allocation148_spill] sm:$0xff] %v10452_v46  ;;  %v10457_v63 = vpop.permute.xlu0 %2234  ;;  %v4111_v40 = vrot.slane %v2760_v6, %v10003_v33  ;;  %v4087_v57 = vcombine.high %v2759_v59, %v2759_v59  ;;  %v4094_v7 = vrot.slane %v2759_v59, %v10003_v33  ;;  %v3763_v25 = vcombine.high %v3761_v34, %v3761_v34  ;;  %v12975_v6 = vld [vmem:[#allocation83_spill] sm:$0xff] }
 0x485   :  { %12965 = vst [vmem:[#allocation81_spill] sm:$0xff] %v10450_v1  ;;  %12967 = vst [vmem:[#allocation79_spill] sm:$0xff] %v10454_v10  ;;  %7310 = vperm.xlu0 %8518, %v5191_v56   ;;  %v10461_v20 = vcombine.low %v3754_v49, %v3762_v35  ;;  %v4138_v1 = vcombine.high %v2762_v52, %v2762_v52  ;;  %v4145_v3 = vrot.slane %v2762_v52, %v10003_v33 }
 0x486   :  { %12968 = vst [vmem:[#allocation149_spill] sm:$0xff] %v10457_v63  ;;  %v10464_v37 = vcombine.low %v3727_v26, %v3729_v24  ;;  %v4086_v41 = vcombine.high %v4084_v30, %v4084_v30  ;;  %v10466_v55 = vcombine.low %v4077_v16, %v4085_v17  ;;  %v4067_v58 = vrot.slane %v4053_v43, %v10003_v33 }
 0x487   :  { %v10473_v63 = vcombine.low %v4050_v54, %v4052_v51  ;;  %v4068_v59 = vcombine.high %v4060_v5, %v4060_v5  ;;  %v4118_v26 = vrot.slane %v4104_v8, %v10003_v33  ;;  %v4119_v24 = vcombine.high %v4111_v40, %v4111_v40  ;;  %v12976_v54 = vld [vmem:[#allocation43_spill] sm:$0xff]  ;;  %v12979_v8 = vld [vmem:[#allocation41_spill] sm:$0xff] }
 0x488   :  { %12969 = vst [vmem:[#allocation86_spill] sm:$0xff] %v10464_v37  ;;  %12970 = vst [vmem:[#allocation150_spill] sm:$0xff] %v10466_v55  ;;  %v10469_v56 = vpop.permute.xlu1 %2160  ;;  %v10477_v35 = vpop.permute.xlu0 %2242  ;;  %v4101_v16 = vrot.slane %v4087_v57, %v10003_v33  ;;  %v4102_v52 = vcombine.high %v4094_v7, %v4094_v7  ;;  %v10481_v17 = vcombine.low %v3761_v34, %v3763_v25  ;;  %v12982_v25 = vld [vmem:[#allocation45_spill] sm:$0xff] }
 0x489   :  { %12971 = vst [vmem:[#allocation185_spill] sm:$0xff] %v10469_v56  ;;  %12972 = vst [vmem:[#allocation186_spill] sm:$0xff] %v10473_v63  ;;  %v4152_v43 = vrot.slane %v4138_v1, %v10003_v33  ;;  %v4153_v56 = vcombine.high %v4145_v3, %v4145_v3  ;;  %v2761_v51 = vmul.f32 %v12976_v54, %v12975_v6  ;;  %v12978_v63 = vld [vmem:[#allocation92_spill] sm:$0xff]  ;;  %v12981_v1 = vld [vmem:[#allocation89_spill] sm:$0xff] }
 0x48a   :  { %12973 = vst [vmem:[#allocation187_spill] sm:$0xff] %v10477_v35  ;;  %12974 = vst [vmem:[#allocation188_spill] sm:$0xff] %v10481_v17  ;;  %v10488_v10 = vcombine.low %v4084_v30, %v4086_v41  ;;  %v4069_v35 = vcombine.high %v4067_v58, %v4067_v58  ;;  %v2764_v46 = vmul.f32 %v12979_v8, %v12978_v63  ;;  %v12983_v6 = vld [vmem:[#allocation98_spill] sm:$0xff]  ;;  %v12984_v54 = vld [vmem:[#allocation49_spill] sm:$0xff] }
 0x48b   :  { %v10496_v57 = vcombine.low %v4060_v5, %v4068_v59  ;;  %v2763_v17 = vmul.f32 %v12982_v25, %v12981_v1  ;;  %v2766_v12 = vmul.f32 %v12984_v54, %v12983_v6  ;;  %v4120_v30 = vcombine.high %v4118_v26, %v4118_v26  ;;  %v12989_v6 = vld [vmem:[#allocation57_spill] sm:$0xff] }
 0x48c   :  { %12977 = vst [vmem:[#allocation83_spill] sm:$0xff] %v10488_v10  ;;  %v10492_v37 = vpop.permute.xlu1 %2238  ;;  %v10502_v49 = vpop.permute.xlu0 %2250  ;;  %v10504_v41 = vcombine.low %v4111_v40, %v4119_v24  ;;  %v4103_v10 = vcombine.high %v4101_v16, %v4101_v16  ;;  %v10506_v63 = vcombine.low %v4094_v7, %v4102_v52  ;;  %v4154_v8 = vcombine.high %v4152_v43, %v4152_v43 }
 0x48d   :  { %12980 = vst [vmem:[#allocation43_spill] sm:$0xff] %v10492_v37  ;;  %12985 = vst [vmem:[#allocation92_spill] sm:$0xff] %v10502_v49  ;;  %v10508_v37 = vcombine.low %v4145_v3, %v4153_v56  ;;  %v4121_v34 = vcombine.high %v2761_v51, %v2761_v51  ;;  %v4128_v5 = vrot.slane %v2761_v51, %v10003_v33 }
 0x48e   :  { %12986 = vst [vmem:[#allocation41_spill] sm:$0xff] %v10504_v41  ;;  %12987 = vst [vmem:[#allocation89_spill] sm:$0xff] %v10506_v63  ;;  %v10511_v59 = vcombine.low %v4067_v58, %v4069_v35  ;;  %v4172_v1 = vcombine.high %v2764_v46, %v2764_v46  ;;  %v4179_v25 = vrot.slane %v2764_v46, %v10003_v33 }
 0x48f   :  { %12988 = vst [vmem:[#allocation45_spill] sm:$0xff] %v10508_v37  ;;  %v5156_v54 = vrot.slane %v12989_v6, %v10003_v33  ;;  %v4155_v7 = vcombine.high %v2763_v17, %v2763_v17  ;;  %v4162_v3 = vrot.slane %v2763_v17, %v10003_v33  ;;  %v4206_v56 = vcombine.high %v2766_v12, %v2766_v12  ;;  %v13004_v37 = vld [vmem:[#allocation100_spill] sm:$0xff] }
 0x490   :  { %v10516_v49 = vpop.permute.xlu1 %2246  ;;  %v10521_v24 = vpop.permute.xlu0 %2258  ;;  %v10523_v52 = vcombine.low %v4118_v26, %v4120_v30  ;;  %v10527_v46 = vcombine.low %v4101_v16, %v4103_v10  ;;  %v10531_v51 = vcombine.low %v4152_v43, %v4154_v8  ;;  %v4135_v6 = vrot.slane %v4121_v34, %v10003_v33  ;;  %v12995_v26 = vld [vmem:[#allocation53_spill] sm:$0xff] }
 0x491   :  { %12990 = vst [vmem:[#allocation98_spill] sm:$0xff] %v10516_v49  ;;  %12991 = vst [vmem:[#allocation49_spill] sm:$0xff] %v10521_v24  ;;  %v4136_v40 = vcombine.high %v4128_v5, %v4128_v5  ;;  %v4213_v17 = vrot.slane %v2766_v12, %v10003_v33  ;;  %v4186_v49 = vrot.slane %v4172_v1, %v10003_v33 }
 0x492   :  { %12992 = vst [vmem:[#allocation57_spill] sm:$0xff] %v10523_v52  ;;  %12993 = vst [vmem:[#allocation189_spill] sm:$0xff] %v10527_v46  ;;  %v4187_v24 = vcombine.high %v4179_v25, %v4179_v25  ;;  %v12996_v30 = vrot.slane %v12995_v26, %v10003_v33  ;;  %v5224_v10 = vrot.slane %v10133_v32, %v10003_v33  ;;  %v12999_v26 = vld [vmem:[#allocation94_spill] sm:$0xff] }
 0x493   :  { %12994 = vst [vmem:[#allocation190_spill] sm:$0xff] %v10531_v51  ;;  %v4169_v43 = vrot.slane %v4155_v7, %v10003_v33  ;;  %v4170_v8 = vcombine.high %v4162_v3, %v4162_v3  ;;  %v4220_v34 = vrot.slane %v4206_v56, %v10003_v33  ;;  %v5173_v12 = vrot.slane %v10076_v31, %v10003_v33  ;;  %v13002_v51 = vld [vmem:[#allocation102_spill] sm:$0xff] }
 0x494   :  { %v5157_v52 = vcombine.low %v12996_v30, %v5156_v54  ;;  %v10541_v16 = vpop.permute.xlu1 %2254  ;;  %v10547_v58 = vpop.permute.xlu0 %2266  ;;  %v13000_v54 = vld [vmem:[#allocation47_spill] sm:$0xff]  ;;  %v13001_v32 = vrot.slane %v10115_v19, %v10003_v33  ;;  %v5258_v7 = vrot.slane %v10162_v44, %v10003_v33  ;;  %v4137_v56 = vcombine.high %v4135_v6, %v4135_v6 }
 0x495   :  { %12997 = vst [vmem:[#allocation53_spill] sm:$0xff] %v10541_v16  ;;  %12998 = vst [vmem:[#allocation191_spill] sm:$0xff] %v10547_v58  ;;  %v2765_v30 = vmul.f32 %v13000_v54, %v12999_v26  ;;  %v10558_v16 = vcombine.low %v4128_v5, %v4136_v40  ;;  %v4221_v31 = vcombine.high %v4213_v17, %v4213_v17  ;;  %v13003_v58 = vld [vmem:[#allocation151_spill] sm:$0xff]  ;;  %v13007_v40 = vld [vmem:[#allocation108_spill] sm:$0xff] }
 0x496   :  { %7304 = vperm.xlu1 %8519, %v5157_v52   ;;  %v5225_v35 = vcombine.low %v13001_v32, %v5224_v10  ;;  %v2768_v41 = vmul.f32 %v13003_v58, %v13002_v51  ;;  %v4188_v55 = vcombine.high %v4186_v49, %v4186_v49  ;;  %v10562_v1 = vcombine.low %v4179_v25, %v4187_v24  ;;  %v13005_v26 = vld [vmem:[#allocation51_spill] sm:$0xff]  ;;  %v13008_v32 = vld [vmem:[#allocation152_spill] sm:$0xff] }
 0x497   :  { %v2767_v52 = vmul.f32 %v13005_v26, %v13004_v37  ;;  %v13006_v19 = vrot.slane %v10062_v60, %v10003_v33  ;;  %v4171_v54 = vcombine.high %v4169_v43, %v4169_v43  ;;  %v10569_v44 = vcombine.low %v4162_v3, %v4170_v8 }
 0x498   :  { %7316 = vperm.xlu0 %8518, %v5225_v35   ;;  %v4222_v5 = vcombine.high %v4220_v34, %v4220_v34  ;;  %v2770_v63 = vmul.f32 %v13008_v32, %v13007_v40  ;;  %v10573_v46 = vpop.permute.xlu1 %2262  ;;  %v4189_v58 = vcombine.high %v2765_v30, %v2765_v30  ;;  %v4196_v25 = vrot.slane %v2765_v30, %v10003_v33 }
 0x499   :  { %v5174_v10 = vcombine.low %v13006_v19, %v5173_v12  ;;  %13009 = vst [vmem:[#allocation94_spill] sm:$0xff] %v10573_v46  ;;  %v13010_v37 = vrot.slane %v10148_v38, %v10003_v33  ;;  %v5207_v60 = vrot.slane %v10086_v29, %v10003_v33  ;;  %v10581_v35 = vcombine.low %v4135_v6, %v4137_v56  ;;  %v10587_v12 = vpop.permute.xlu0 %2274 }
 0x49a   :  { %v10585_v51 = vcombine.low %v4213_v17, %v4221_v31  ;;  %v4240_v8 = vcombine.high %v2768_v41, %v2768_v41  ;;  %13011 = vst [vmem:[#allocation47_spill] sm:$0xff] %v10587_v12  ;;  %v10589_v26 = vcombine.low %v4186_v49, %v4188_v55  ;;  %v4247_v38 = vrot.slane %v2768_v41, %v10003_v33  ;;  %v13019_v41 = vld [vmem:[#allocation153_spill] sm:$0xff] }
 0x49b   :  { %7307 = vperm.xlu1 %8519, %v5174_v10   ;;  %v5259_v24 = vcombine.low %v13010_v37, %v5258_v7  ;;  %v4223_v7 = vcombine.high %v2767_v52, %v2767_v52  ;;  %v10594_v29 = vcombine.low %v4169_v43, %v4171_v54  ;;  %v4230_v6 = vrot.slane %v2767_v52, %v10003_v33 }
 0x49c   :  { %v4274_v56 = vcombine.high %v2770_v63, %v2770_v63  ;;  %v4281_v17 = vrot.slane %v2770_v63, %v10003_v33  ;;  %v4203_v31 = vrot.slane %v4189_v58, %v10003_v33  ;;  %v4204_v19 = vcombine.high %v4196_v25, %v4196_v25  ;;  %v10611_v54 = vpop.permute.xlu1 %2270  ;;  %v13015_v58 = vld [vmem:[#allocation55_spill] sm:$0xff] }
 0x49d   :  { %7322 = vperm.xlu0 %8518, %v5259_v24   ;;  %v13012_v55 = vrot.slane %v10078_v62, %v10003_v33  ;;  %v5292_v10 = vrot.slane %v10184_v48, %v10003_v33  ;;  %v10606_v43 = vcombine.low %v4220_v34, %v4222_v5  ;;  %v4254_v63 = vrot.slane %v4240_v8, %v10003_v33  ;;  %v13014_v62 = vld [vmem:[#allocation105_spill] sm:$0xff] }
 0x49e   :  { %13013 = vst [vmem:[#allocation102_spill] sm:$0xff] %v10611_v54  ;;  %v4255_v40 = vcombine.high %v4247_v38, %v4247_v38  ;;  %v4237_v32 = vrot.slane %v4223_v7, %v10003_v33  ;;  %v2769_v37 = vmul.f32 %v13015_v58, %v13014_v62  ;;  %v13016_v48 = vrot.slane %v10174_v14, %v10003_v33  ;;  %v13018_v7 = vld [vmem:[#allocation27_spill] sm:$0xff]  ;;  %v13021_v58 = vld [vmem:[#allocation26_spill] sm:$0xff] }
 0x49f   :  { %v5208_v49 = vcombine.low %v13012_v55, %v5207_v60  ;;  %v4238_v34 = vcombine.high %v4230_v6, %v4230_v6  ;;  %v4288_v5 = vrot.slane %v4274_v56, %v10003_v33  ;;  %v4289_v60 = vcombine.high %v4281_v17, %v4281_v17  ;;  %v10622_v55 = vpop.permute.xlu0 %2282 }
 0x4a0   :  { %v5293_v24 = vcombine.low %v13016_v48, %v5292_v10  ;;  %v5241_v8 = vrot.slane %v10122_v11, %v10003_v33  ;;  %13017 = vst [vmem:[#allocation151_spill] sm:$0xff] %v10622_v55  ;;  %v4205_v52 = vcombine.high %v4203_v31, %v4203_v31  ;;  %v10624_v30 = vcombine.low %v4196_v25, %v4204_v19  ;;  %v13020_v10 = vld [vmem:[#allocation111_spill] sm:$0xff]  ;;  %v13022_v48 = vld [vmem:[#allocation61_spill] sm:$0xff] }
 0x4a1   :  { %7313 = vperm.xlu1 %8519, %v5208_v49   ;;  %v2788_v62 = vmul.f32 %v13019_v41, %v13018_v7  ;;  %v5326_v14 = vrot.slane %v10220_v42, %v10003_v33  ;;  %v4256_v49 = vcombine.high %v4254_v63, %v4254_v63  ;;  %v2771_v56 = vmul.f32 %v10094_v18, %v13020_v10  ;;  %v13023_v11 = vld [vmem:[#allocation59_spill] sm:$0xff]  ;;  %v10647_v10 = vpop.permute.xlu1 %2278 }
 0x4a2   :  { %7328 = vperm.xlu0 %8518, %v5293_v24   ;;  %v2790_v3 = vmul.f32 %v13022_v48, %v13021_v58  ;;  %v13024_v55 = vrot.slane %v13023_v11, %v10003_v33  ;;  %v10637_v25 = vcombine.low %v4247_v38, %v4255_v40  ;;  %v4239_v19 = vcombine.high %v4237_v32, %v4237_v32  ;;  %v13039_v38 = vld [vmem:[#allocation119_spill] sm:$0xff] }
 0x4a3   :  { %v4257_v12 = vcombine.high %v2769_v37, %v2769_v37  ;;  %v13025_v41 = vrot.slane %v10206_v21, %v10003_v33  ;;  %v10642_v42 = vcombine.low %v4230_v6, %v4238_v34  ;;  %v4290_v7 = vcombine.high %v4288_v5, %v4288_v5  ;;  %13026 = vst [vmem:[#allocation100_spill] sm:$0xff] %v10647_v10  ;;  %v13086_v10 = vld [vmem:[#allocation177_spill] sm:$0xff] }
 0x4a4   :  { %v5242_v54 = vcombine.low %v13024_v55, %v5241_v8  ;;  %v10644_v46 = vcombine.low %v4281_v17, %v4289_v60  ;;  %v4264_v18 = vrot.slane %v2769_v37, %v10003_v33  ;;  %v10649_v58 = vcombine.low %v4203_v31, %v4205_v52  ;;  %v10657_v60 = vpop.permute.xlu0 %2290 }
 0x4a5   :  { %v5327_v24 = vcombine.low %v13025_v41, %v5326_v14  ;;  %v4580_v40 = vcombine.high %v2788_v62, %v2788_v62  ;;  %v4587_v8 = vrot.slane %v2788_v62, %v10003_v33  ;;  %v10654_v21 = vcombine.low %v4254_v63, %v4256_v49  ;;  %13027 = vst [vmem:[#allocation51_spill] sm:$0xff] %v10657_v60  ;;  %v10683_v41 = vpop.permute.xlu1 %2286 }
 0x4a6   :  { %7319 = vperm.xlu1 %8519, %v5242_v54   ;;  %v4291_v6 = vcombine.high %v2771_v56, %v2771_v56  ;;  %v4298_v17 = vrot.slane %v2771_v56, %v10003_v33  ;;  %v4614_v34 = vcombine.high %v2790_v3, %v2790_v3  ;;  %v4271_v54 = vrot.slane %v4257_v12, %v10003_v33 }
 0x4a7   :  { %7334 = vperm.xlu0 %8518, %v5327_v24   ;;  %v4621_v31 = vrot.slane %v2790_v3, %v10003_v33  ;;  %v5275_v52 = vrot.slane %v10146_v61, %v10003_v33  ;;  %v5360_v37 = vrot.slane %v10242_v28, %v10003_v33  ;;  %v10667_v55 = vcombine.low %v4237_v32, %v4239_v19  ;;  %v13036_v32 = vld [vmem:[#allocation155_spill] sm:$0xff] }
 0x4a8   :  { %v4272_v14 = vcombine.high %v4264_v18, %v4264_v18  ;;  %v4594_v49 = vrot.slane %v4580_v40, %v10003_v33  ;;  %v4595_v12 = vcombine.high %v4587_v8, %v4587_v8  ;;  %v13028_v3 = vrot.slane %v10126_v23, %v10003_v33  ;;  %13030 = vst [vmem:[#allocation108_spill] sm:$0xff] %v10683_v41 }
 0x4a9   :  { %v13029_v61 = vrot.slane %v10218_v50, %v10003_v33  ;;  %v10678_v48 = vcombine.low %v4288_v5, %v4290_v7  ;;  %v4305_v11 = vrot.slane %v4291_v6, %v10003_v33  ;;  %v4306_v19 = vcombine.high %v4298_v17, %v4298_v17  ;;  %v13031_v50 = vld [vmem:[#allocation25_spill] sm:$0xff] }
 0x4aa   :  { %v5276_v56 = vcombine.low %v13028_v3, %v5275_v52  ;;  %v4273_v24 = vcombine.high %v4271_v54, %v4271_v54  ;;  %v4628_v40 = vrot.slane %v4614_v34, %v10003_v33  ;;  %v4629_v63 = vcombine.high %v4621_v31, %v4621_v31  ;;  %v13032_v52 = vld [vmem:[#allocation154_spill] sm:$0xff]  ;;  %v13035_v34 = vld [vmem:[#allocation31_spill] sm:$0xff] }
 0x4ab   :  { %v5361_v28 = vcombine.low %v13029_v61, %v5360_v37  ;;  %v10686_v23 = vcombine.low %v4264_v18, %v4272_v14  ;;  %v2789_v5 = vmul.f32 %v13032_v52, %v13031_v50  ;;  %v5309_v7 = vrot.slane %v10172_v0, %v10003_v33  ;;  %v10694_v37 = vpop.permute.xlu0 %2368  ;;  %v13038_v18 = vld [vmem:[#allocation66_spill] sm:$0xff]  ;;  %v13040_v50 = vld [vmem:[#allocation156_spill] sm:$0xff] }
 0x4ac   :  { %7325 = vperm.xlu1 %8519, %v5276_v56   ;;  %v5394_v6 = vrot.slane %v10280_v27, %v10003_v33  ;;  %13033 = vst [vmem:[#allocation152_spill] sm:$0xff] %v10694_v37  ;;  %v4596_v3 = vcombine.high %v4594_v49, %v4594_v49  ;;  %v10696_v61 = vcombine.low %v4587_v8, %v4595_v12 }
 0x4ad   :  { %7340 = vperm.xlu0 %8518, %v5361_v28   ;;  %v2792_v56 = vmul.f32 %v13036_v32, %v13035_v34  ;;  %v13037_v28 = vld [vmem:[#allocation21_spill] sm:$0xff]  ;;  %v4307_v62 = vcombine.high %v4305_v11, %v4305_v11  ;;  %v2794_v52 = vmul.f32 %v13040_v50, %v13039_v38  ;;  %v13041_v0 = vrot.slane %v10157_v22, %v10003_v33  ;;  %v10719_v22 = vpop.permute.xlu1 %2294 }
 0x4ae   :  { %13034 = vst [vmem:[#allocation105_spill] sm:$0xff] %v10696_v61  ;;  %v2791_v14 = vmul.f32 %v13038_v18, %v13037_v28  ;;  %v13042_v27 = vrot.slane %v10255_v9, %v10003_v33  ;;  %v10710_v8 = vcombine.low %v4271_v54, %v4273_v24  ;;  %v10712_v12 = vcombine.low %v4298_v17, %v4306_v19  ;;  %v13055_v28 = vld [vmem:[#allocation159_spill] sm:$0xff] }
 0x4af   :  { %v5310_v41 = vcombine.low %v13041_v0, %v5309_v7  ;;  %v4630_v32 = vcombine.high %v4628_v40, %v4628_v40  ;;  %v10714_v34 = vcombine.low %v4621_v31, %v4629_v63  ;;  %v4597_v18 = vcombine.high %v2789_v5, %v2789_v5  ;;  %13044 = vst [vmem:[#allocation27_spill] sm:$0xff] %v10719_v22 }
 0x4b0   :  { %v5395_v37 = vcombine.low %v13042_v27, %v5394_v6  ;;  %v4604_v38 = vrot.slane %v2789_v5, %v10003_v33  ;;  %v10721_v7 = vcombine.low %v4594_v49, %v4596_v3  ;;  %v4648_v9 = vcombine.high %v2792_v56, %v2792_v56  ;;  %v10729_v5 = vpop.permute.xlu0 %2376 }
 0x4b1   :  { %13043 = vst [vmem:[#allocation55_spill] sm:$0xff] %v10714_v34  ;;  %7331 = vperm.xlu1 %8519, %v5310_v41   ;;  %v4655_v54 = vrot.slane %v2792_v56, %v10003_v33  ;;  %v4631_v17 = vcombine.high %v2791_v14, %v2791_v14  ;;  %v4638_v19 = vrot.slane %v2791_v14, %v10003_v33  ;;  %13045 = vst [vmem:[#allocation153_spill] sm:$0xff] %v10729_v5 }
 0x4b2   :  { %7346 = vperm.xlu0 %8518, %v5395_v37   ;;  %v4682_v31 = vcombine.high %v2794_v52, %v2794_v52  ;;  %v5343_v63 = vrot.slane %v10202_v4, %v10003_v33  ;;  %v5700_v24 = vrot.slane %v10296_v13, %v10003_v33  ;;  %v10733_v49 = vcombine.low %v4305_v11, %v4307_v62 }
 0x4b3   :  { %v4689_v37 = vrot.slane %v2794_v52, %v10003_v33  ;;  %v4611_v3 = vrot.slane %v4597_v18, %v10003_v33  ;;  %v4612_v56 = vcombine.high %v4604_v38, %v4604_v38  ;;  %v13046_v4 = vrot.slane %v10181_v53, %v10003_v33  ;;  %v10752_v53 = vpop.permute.xlu1 %2372 }
 0x4b4   :  { %v13047_v13 = vrot.slane %v10274_v39, %v10003_v33  ;;  %v10745_v0 = vcombine.low %v4628_v40, %v4630_v32  ;;  %v4662_v11 = vrot.slane %v4648_v9, %v10003_v33  ;;  %v4663_v27 = vcombine.high %v4655_v54, %v4655_v54  ;;  %13049 = vst [vmem:[#allocation26_spill] sm:$0xff] %v10752_v53  ;;  %v13050_v39 = vld [vmem:[#allocation116_spill] sm:$0xff]  ;;  %v13052_v32 = vld [vmem:[#allocation123_spill] sm:$0xff] }
 0x4b5   :  { %v5344_v14 = vcombine.low %v13046_v4, %v5343_v63  ;;  %v4645_v52 = vrot.slane %v4631_v17, %v10003_v33  ;;  %v4646_v18 = vcombine.high %v4638_v19, %v4638_v19  ;;  %v4696_v41 = vrot.slane %v4682_v31, %v10003_v33  ;;  %v13053_v4 = vld [vmem:[#allocation158_spill] sm:$0xff]  ;;  %v13054_v17 = vld [vmem:[#allocation121_spill] sm:$0xff] }
 0x4b6   :  { %v5701_v50 = vcombine.low %v13047_v13, %v5700_v24  ;;  %13048 = vst [vmem:[#allocation111_spill] sm:$0xff] %v10745_v0  ;;  %v4697_v63 = vcombine.high %v4689_v37, %v4689_v37  ;;  %v13051_v24 = vld [vmem:[#allocation157_spill] sm:$0xff]  ;;  %v2796_v13 = vmul.f32 %v13053_v4, %v13052_v32  ;;  %v5377_v9 = vrot.slane %v10233_v45, %v10003_v33 }
 0x4b7   :  { %7337 = vperm.xlu1 %8519, %v5344_v14   ;;  %v2793_v40 = vmul.f32 %v13051_v24, %v13050_v39  ;;  %v4613_v62 = vcombine.high %v4611_v3, %v4611_v3  ;;  %v10760_v6 = vcombine.low %v4604_v38, %v4612_v56  ;;  %v2795_v31 = vmul.f32 %v13055_v28, %v13054_v17  ;;  %v13058_v39 = vld [vmem:[#allocation127_spill] sm:$0xff]  ;;  %v13059_v24 = vld [vmem:[#allocation160_spill] sm:$0xff]  ;;  %v13060_v4 = vld [vmem:[#allocation161_spill] sm:$0xff] }
 0x4b8   :  { %7400 = vperm.xlu0 %8518, %v5701_v50   ;;  %v5734_v14 = vrot.slane %v10325_v36, %v10003_v33  ;;  %v10766_v50 = vpop.permute.xlu0 %2384  ;;  %v4664_v53 = vcombine.high %v4662_v11, %v4662_v11  ;;  %v10768_v5 = vcombine.low %v4655_v54, %v4663_v27  ;;  %v2798_v32 = vmul.f32 %v13059_v24, %v13058_v39 }
 0x4b9   :  { %13056 = vst [vmem:[#allocation61_spill] sm:$0xff] %v10766_v50  ;;  %v13061_v45 = vrot.slane %v13060_v4, %v10003_v33  ;;  %v4647_v38 = vcombine.high %v4645_v52, %v4645_v52  ;;  %v10775_v56 = vcombine.low %v4638_v19, %v4646_v18  ;;  %v4698_v34 = vcombine.high %v4696_v41, %v4696_v41  ;;  %v13064_v18 = vld [vmem:[#allocation167_spill] sm:$0xff]  ;;  %v13068_v4 = vld [vmem:[#allocation164_spill] sm:$0xff] }
 0x4ba   :  { %13057 = vst [vmem:[#allocation59_spill] sm:$0xff] %v10768_v5  ;;  %v13062_v28 = vrot.slane %v10307_v2, %v10003_v33  ;;  %v10780_v17 = vcombine.low %v4689_v37, %v4697_v63  ;;  %v4665_v50 = vcombine.high %v2793_v40, %v2793_v40  ;;  %v4672_v54 = vrot.slane %v2793_v40, %v10003_v33  ;;  %v10790_v2 = vpop.permute.xlu1 %2380  ;;  %v13066_v40 = vld [vmem:[#allocation23_spill] sm:$0xff]  ;;  %v13082_v5 = vld [vmem:[#allocation129_spill] sm:$0xff] }
 0x4bb   :  { %v5378_v22 = vcombine.low %v13061_v45, %v5377_v9  ;;  %v4716_v27 = vcombine.high %v2796_v13, %v2796_v13  ;;  %v10783_v39 = vcombine.low %v4611_v3, %v4613_v62  ;;  %v4723_v19 = vrot.slane %v2796_v13, %v10003_v33  ;;  %13065 = vst [vmem:[#allocation154_spill] sm:$0xff] %v10790_v2  ;;  %v13071_v2 = vld [vmem:[#allocation174_spill] sm:$0xff] }
 0x4bc   :  { %v5735_v36 = vcombine.low %v13062_v28, %v5734_v14  ;;  %13063 = vst [vmem:[#allocation25_spill] sm:$0xff] %v10780_v17  ;;  %v5683_v24 = vrot.slane %v13064_v18, %v10003_v33  ;;  %v4699_v37 = vcombine.high %v2795_v31, %v2795_v31  ;;  %v4706_v63 = vrot.slane %v2795_v31, %v10003_v33  ;;  %v13079_v17 = vld [vmem:[#allocation131_spill] sm:$0xff] }
 0x4bd   :  { %7343 = vperm.xlu1 %8519, %v5378_v22   ;;  %v4750_v14 = vcombine.high %v2798_v32, %v2798_v32  ;;  %v5768_v22 = vrot.slane %v13066_v40, %v10003_v33  ;;  %v10795_v3 = vcombine.low %v4662_v11, %v4664_v53  ;;  %v4757_v13 = vrot.slane %v2798_v32, %v10003_v33 }
 0x4be   :  { %7406 = vperm.xlu0 %8518, %v5735_v36   ;;  %v13069_v45 = vrot.slane %v13068_v4, %v10003_v33  ;;  %v10803_v36 = vpop.permute.xlu0 %2392  ;;  %v4679_v18 = vrot.slane %v4665_v50, %v10003_v33  ;;  %v4680_v31 = vcombine.high %v4672_v54, %v4672_v54  ;;  %v4730_v9 = vrot.slane %v4716_v27, %v10003_v33 }
 0x4bf   :  { %13067 = vst [vmem:[#allocation31_spill] sm:$0xff] %v10795_v3  ;;  %13070 = vst [vmem:[#allocation155_spill] sm:$0xff] %v10803_v36  ;;  %v13072_v11 = vrot.slane %v13071_v2, %v10003_v33  ;;  %v10810_v40 = vcombine.low %v4645_v52, %v4647_v38  ;;  %v10814_v62 = vcombine.low %v4696_v41, %v4698_v34  ;;  %v13075_v52 = vld [vmem:[#allocation162_spill] sm:$0xff]  ;;  %v13077_v34 = vld [vmem:[#allocation143_spill] sm:$0xff] }
 0x4c0   :  { %v5684_v28 = vcombine.low %v13069_v45, %v5683_v24  ;;  %v4731_v4 = vcombine.high %v4723_v19, %v4723_v19  ;;  %v4713_v50 = vrot.slane %v4699_v37, %v10003_v33  ;;  %v4714_v45 = vcombine.high %v4706_v63, %v4706_v63  ;;  %v13083_v3 = vld [vmem:[#allocation165_spill] sm:$0xff] }
 0x4c1   :  { %v5769_v53 = vcombine.low %v13072_v11, %v5768_v22  ;;  %13073 = vst [vmem:[#allocation21_spill] sm:$0xff] %v10814_v62  ;;  %v4764_v27 = vrot.slane %v4750_v14, %v10003_v33  ;;  %v4765_v2 = vcombine.high %v4757_v13, %v4757_v13  ;;  %v13074_v22 = vld [vmem:[#allocation124_spill] sm:$0xff]  ;;  %v13076_v11 = vld [vmem:[#allocation171_spill] sm:$0xff]  ;;  %v5802_v41 = vrot.slane %v13077_v34, %v10003_v33 }
 0x4c2   :  { %7397 = vperm.xlu1 %8519, %v5684_v28   ;;  %v2797_v38 = vmul.f32 %v13075_v52, %v13074_v22  ;;  %v5717_v32 = vrot.slane %v13076_v11, %v10003_v33  ;;  %v10826_v28 = vpop.permute.xlu1 %2388  ;;  %v4681_v36 = vcombine.high %v4679_v18, %v4679_v18  ;;  %v10828_v24 = vcombine.low %v4672_v54, %v4680_v31  ;;  %v13080_v62 = vld [vmem:[#allocation163_spill] sm:$0xff]  ;;  %v13084_v52 = vld [vmem:[#allocation169_spill] sm:$0xff]  ;;  %v10842_v0 = vpop.permute.xlu0 %2400 }
 0x4c3   :  { %7412 = vperm.xlu0 %8518, %v5769_v53   ;;  %13078 = vst [vmem:[#allocation66_spill] sm:$0xff] %v10826_v28  ;;  %v4732_v37 = vcombine.high %v4730_v9, %v4730_v9  ;;  %v2800_v14 = vmul.f32 %v13080_v62, %v13079_v17  ;;  %v10832_v53 = vcombine.low %v4723_v19, %v4731_v4  ;;  %13088 = vst [vmem:[#allocation156_spill] sm:$0xff] %v10842_v0  ;;  %v13089_v17 = vld [vmem:[#allocation135_spill] sm:$0xff]  ;;  %v13090_v19 = vld [vmem:[#allocation166_spill] sm:$0xff] }
 0x4c4   :  { %v2799_v22 = vmul.f32 %v13083_v3, %v13082_v5  ;;  %v13085_v11 = vrot.slane %v13084_v52, %v10003_v33  ;;  %v13087_v34 = vrot.slane %v13086_v10, %v10003_v33  ;;  %v4715_v54 = vcombine.high %v4713_v50, %v4713_v50  ;;  %v13091_v3 = vld [vmem:[#allocation13_spill] sm:$0xff]  ;;  %v13105_v10 = vld [vmem:[#allocation8_spill] sm:$0xff] }
 0x4c5   :  { %13081 = vst [vmem:[#allocation119_spill] sm:$0xff] %v10832_v53  ;;  %v10844_v31 = vcombine.low %v4706_v63, %v4714_v45  ;;  %v4766_v61 = vcombine.high %v4764_v27, %v4764_v27  ;;  %v2802_v62 = vmul.f32 %v13090_v19, %v13089_v17  ;;  %v4733_v4 = vcombine.high %v2797_v38, %v2797_v38 }
 0x4c6   :  { %v5718_v60 = vcombine.low %v13085_v11, %v5717_v32  ;;  %v5803_v28 = vcombine.low %v13087_v34, %v5802_v41  ;;  %v4740_v5 = vrot.slane %v2797_v38, %v10003_v33  ;;  %v5751_v32 = vrot.slane %v13091_v3, %v10003_v33  ;;  %v13093_v34 = vld [vmem:[#allocation11_spill] sm:$0xff] }
 0x4c7   :  { %v10851_v52 = vcombine.low %v4679_v18, %v4681_v36  ;;  %v10855_v41 = vcombine.low %v4757_v13, %v4765_v2  ;;  %v4784_v63 = vcombine.high %v2800_v14, %v2800_v14  ;;  %v4791_v45 = vrot.slane %v2800_v14, %v10003_v33 }
 0x4c8   :  { %7403 = vperm.xlu1 %8519, %v5718_v60   ;;  %7418 = vperm.xlu0 %8518, %v5803_v28   ;;  %v4767_v11 = vcombine.high %v2799_v22, %v2799_v22  ;;  %v13094_v17 = vrot.slane %v13093_v34, %v10003_v33  ;;  %v5836_v60 = vrot.slane %v10398_v47, %v10003_v33  ;;  %v10863_v28 = vpop.permute.xlu1 %2396  ;;  %v10876_v34 = vpop.permute.xlu0 %2408 }
 0x4c9   :  { %13092 = vst [vmem:[#allocation116_spill] sm:$0xff] %v10855_v41  ;;  %13095 = vst [vmem:[#allocation157_spill] sm:$0xff] %v10863_v28  ;;  %v10865_v36 = vcombine.low %v4730_v9, %v4732_v37  ;;  %v10869_v13 = vcombine.low %v4713_v50, %v4715_v54  ;;  %v4774_v2 = vrot.slane %v2799_v22, %v10003_v33  ;;  %v13100_v50 = vld [vmem:[#allocation63_spill] sm:$0xff]  ;;  %v13101_v54 = vld [vmem:[#allocation168_spill] sm:$0xff] }
 0x4ca   :  { %v5752_v38 = vcombine.low %v13094_v17, %v5751_v32  ;;  %v4747_v14 = vrot.slane %v4733_v4, %v10003_v33  ;;  %v4748_v19 = vcombine.high %v4740_v5, %v4740_v5  ;;  %v4818_v3 = vcombine.high %v2802_v62, %v2802_v62  ;;  %13098 = vst [vmem:[#allocation158_spill] sm:$0xff] %v10876_v34  ;;  %v13102_v4 = vld [vmem:[#allocation141_spill] sm:$0xff] }
 0x4cb   :  { %13096 = vst [vmem:[#allocation123_spill] sm:$0xff] %v10865_v36  ;;  %v13097_v32 = vrot.slane %v10387_v15, %v10003_v33  ;;  %v10881_v37 = vrot.slane %v2802_v62, %v10003_v33  ;;  %v2708_v22 = vmul.f32 %v13101_v54, %v13100_v50  ;;  %v5785_v17 = vrot.slane %v13102_v4, %v10003_v33  ;;  %v13104_v62 = vld [vmem:[#allocation132_spill] sm:$0xff]  ;;  %v13106_v28 = vld [vmem:[#allocation65_spill] sm:$0xff] }
 0x4cc   :  { %7409 = vperm.xlu1 %8519, %v5752_v38   ;;  %v10887_v18 = vcombine.low %v4764_v27, %v4766_v61  ;;  %v4798_v38 = vrot.slane %v4784_v63, %v10003_v33  ;;  %v4799_v15 = vcombine.high %v4791_v45, %v4791_v45  ;;  %v4782_v9 = vcombine.high %v4774_v2, %v4774_v2  ;;  %v13107_v50 = vld [vmem:[#allocation9_spill] sm:$0xff]  ;;  %v13111_v63 = vld [vmem:[#allocation170_spill] sm:$0xff] }
 0x4cd   :  { %v5837_v47 = vcombine.low %v13097_v32, %v5836_v60  ;;  %13099 = vst [vmem:[#allocation121_spill] sm:$0xff] %v10881_v37  ;;  %v4781_v60 = vrot.slane %v4767_v11, %v10003_v33  ;;  %v2801_v34 = vmul.f32 %v13105_v10, %v13104_v62  ;;  %v2710_v54 = vmul.f32 %v13107_v50, %v13106_v28  ;;  %v13110_v27 = vld [vmem:[#allocation137_spill] sm:$0xff] }
 0x4ce   :  { %13103 = vst [vmem:[#allocation159_spill] sm:$0xff] %v10887_v18  ;;  %v4749_v0 = vcombine.high %v4747_v14, %v4747_v14  ;;  %v10897_v4 = vcombine.low %v4740_v5, %v4748_v19  ;;  %v10900_v61 = vrot.slane %v4818_v3, %v10003_v33  ;;  %v10904_v11 = vmul.f32 %v13111_v63, %v13110_v27  ;;  %v13114_v10 = vld [vmem:[#allocation173_spill] sm:$0xff]  ;;  %v13116_v5 = vld [vmem:[#allocation183_spill] sm:$0xff]  ;;  %v10918_v63 = vpop.permute.xlu0 %2416 }
 0x4cf   :  { %7424 = vperm.xlu0 %8518, %v5837_v47   ;;  %v10906_v47 = vpop.permute.xlu1 %2404  ;;  %v3220_v41 = vcombine.high %v2708_v22, %v2708_v22  ;;  %v13115_v62 = vrot.slane %v13114_v10, %v10003_v33  ;;  %v5870_v19 = vrot.slane %v13116_v5, %v10003_v33  ;;  %v4800_v50 = vcombine.high %v4798_v38, %v4798_v38  ;;  %v13120_v32 = vld [vmem:[#allocation145_spill] sm:$0xff] }
 0x4d0   :  { %13108 = vst [vmem:[#allocation127_spill] sm:$0xff] %v10897_v4  ;;  %13109 = vst [vmem:[#allocation160_spill] sm:$0xff] %v10900_v61  ;;  %v10915_v3 = vcombine.low %v4791_v45, %v4799_v15  ;;  %v4783_v18 = vcombine.high %v4781_v60, %v4781_v60  ;;  %v3227_v27 = vrot.slane %v2708_v22, %v10003_v33  ;;  %v13123_v15 = vld [vmem:[#allocation62_spill] sm:$0xff] }
 0x4d1   :  { %13112 = vst [vmem:[#allocation161_spill] sm:$0xff] %v10904_v11  ;;  %13113 = vst [vmem:[#allocation167_spill] sm:$0xff] %v10906_v47  ;;  %v5786_v28 = vcombine.low %v13115_v62, %v5785_v17  ;;  %v10920_v47 = vcombine.low %v4774_v2, %v4782_v9  ;;  %v3254_v53 = vcombine.high %v2710_v54, %v2710_v54  ;;  %v13122_v17 = vld [vmem:[#allocation179_spill] sm:$0xff]  ;;  %v13144_v11 = vld [vmem:[#allocation180_spill] sm:$0xff] }
 0x4d2   :  { %13117 = vst [vmem:[#allocation23_spill] sm:$0xff] %v10915_v3  ;;  %13118 = vst [vmem:[#allocation164_spill] sm:$0xff] %v10918_v63  ;;  %v13121_v37 = vrot.slane %v13120_v32, %v10003_v33  ;;  %v5819_v62 = vrot.slane %v13122_v17, %v10003_v33  ;;  %v10927_v5 = vcombine.low %v4747_v14, %v4749_v0  ;;  %v13127_v0 = vld [vmem:[#allocation86_spill] sm:$0xff]  ;;  %v13133_v63 = vld [vmem:[#allocation68_spill] sm:$0xff] }
 0x4d3   :  { %13119 = vst [vmem:[#allocation174_spill] sm:$0xff] %v10920_v47  ;;  %7415 = vperm.xlu1 %8519, %v5786_v28   ;;  %v3261_v2 = vrot.slane %v2710_v54, %v10003_v33  ;;  %v3234_v9 = vrot.slane %v3220_v41, %v10003_v33  ;;  %v13124_v28 = vld [vmem:[#allocation10_spill] sm:$0xff]  ;;  %v5904_v14 = vrot.slane %v13127_v0, %v10003_v33  ;;  %v10947_v61 = vpop.permute.xlu1 %2412 }
 0x4d4   :  { %v5871_v10 = vcombine.low %v13121_v37, %v5870_v19  ;;  %v2709_v3 = vmul.f32 %v13124_v28, %v13123_v15  ;;  %v13125_v37 = vld [vmem:[#allocation142_spill] sm:$0xff]  ;;  %v10942_v17 = vcombine.low %v4798_v38, %v4800_v50  ;;  %v4801_v45 = vcombine.high %v2801_v34, %v2801_v34  ;;  %13130 = vst [vmem:[#allocation171_spill] sm:$0xff] %v10947_v61  ;;  %v13139_v61 = vld [vmem:[#allocation175_spill] sm:$0xff] }
 0x4d5   :  { %v13126_v32 = vrot.slane %v13125_v37, %v10003_v33  ;;  %v10945_v22 = vrot.slane %v2801_v34, %v10003_v33  ;;  %v3235_v54 = vcombine.high %v3227_v27, %v3227_v27  ;;  %v3268_v41 = vrot.slane %v3254_v53, %v10003_v33  ;;  %v13131_v15 = vld [vmem:[#allocation70_spill] sm:$0xff]  ;;  %v13134_v37 = vld [vmem:[#allocation17_spill] sm:$0xff]  ;;  %v13140_v53 = vld [vmem:[#allocation144_spill] sm:$0xff] }
 0x4d6   :  { %7430 = vperm.xlu0 %8518, %v5871_v10   ;;  %13128 = vst [vmem:[#allocation124_spill] sm:$0xff] %v10942_v17  ;;  %v13132_v10 = vld [vmem:[#allocation172_spill] sm:$0xff]  ;;  %v10957_v0 = vcombine.low %v4781_v60, %v4783_v18  ;;  %v13138_v17 = vld [vmem:[#allocation77_spill] sm:$0xff]  ;;  %v5853_v4 = vrot.slane %v13140_v53, %v10003_v33  ;;  %v10970_v18 = vrot.slane %v4801_v45, %v10003_v33 }
 0x4d7   :  { %v5820_v19 = vcombine.low %v13126_v32, %v5819_v62  ;;  %13129 = vst [vmem:[#allocation162_spill] sm:$0xff] %v10945_v22  ;;  %v2712_v28 = vmul.f32 %v13132_v10, %v13131_v15  ;;  %v2711_v62 = vmul.f32 %v13134_v37, %v13133_v63  ;;  %v13135_v32 = vld [vmem:[#allocation148_spill] sm:$0xff]  ;;  %v2714_v36 = vmul.f32 %v13139_v61, %v13138_v17  ;;  %v10965_v15 = vpop.permute.xlu0 %2424  ;;  %v10984_v60 = vpop.permute.xlu1 %2420 }
 0x4d8   :  { %v13136_v38 = vrot.slane %v13135_v32, %v10003_v33  ;;  %13137 = vst [vmem:[#allocation143_spill] sm:$0xff] %v10957_v0  ;;  %13141 = vst [vmem:[#allocation131_spill] sm:$0xff] %v10965_v15  ;;  %v3236_v10 = vcombine.high %v3234_v9, %v3234_v9  ;;  %v3237_v37 = vcombine.high %v2709_v3, %v2709_v3 }
 0x4d9   :  { %7421 = vperm.xlu1 %8519, %v5820_v19   ;;  %v3269_v19 = vcombine.high %v3261_v2, %v3261_v2  ;;  %13142 = vst [vmem:[#allocation163_spill] sm:$0xff] %v10970_v18  ;;  %v3244_v61 = vrot.slane %v2709_v3, %v10003_v33  ;;  %v3270_v17 = vcombine.high %v3268_v41, %v3268_v41  ;;  %v13146_v18 = vld [vmem:[#allocation188_spill] sm:$0xff]  ;;  %13147 = vst [vmem:[#allocation165_spill] sm:$0xff] %v10984_v60 }
 0x4da   :  { %v5905_v50 = vcombine.low %v13136_v38, %v5904_v14  ;;  %v10974_v14 = vcombine.low %v3227_v27, %v3235_v54  ;;  %v3288_v32 = vcombine.high %v2712_v28, %v2712_v28  ;;  %v3295_v38 = vrot.slane %v2712_v28, %v10003_v33 }
 0x4db   :  { %v3271_v53 = vcombine.high %v2711_v62, %v2711_v62  ;;  %v3278_v63 = vrot.slane %v2711_v62, %v10003_v33  ;;  %v3322_v34 = vcombine.high %v2714_v36, %v2714_v36  ;;  %v5938_v15 = vrot.slane %v13146_v18, %v10003_v33  ;;  %v13151_v18 = vld [vmem:[#allocation146_spill] sm:$0xff] }
 0x4dc   :  { %7436 = vperm.xlu0 %8518, %v5905_v50   ;;  %13143 = vst [vmem:[#allocation129_spill] sm:$0xff] %v10974_v14  ;;  %v13145_v50 = vrot.slane %v13144_v11, %v10003_v33  ;;  %v10986_v27 = vcombine.low %v3234_v9, %v3236_v10  ;;  %v10988_v3 = vcombine.low %v3261_v2, %v3269_v19  ;;  %v10999_v9 = vpop.permute.xlu0 %2502  ;;  %v13155_v14 = vld [vmem:[#allocation181_spill] sm:$0xff] }
 0x4dd   :  { %v3251_v54 = vrot.slane %v3237_v37, %v10003_v33  ;;  %v3329_v28 = vrot.slane %v2714_v36, %v10003_v33  ;;  %v3252_v22 = vcombine.high %v3244_v61, %v3244_v61  ;;  %13152 = vst [vmem:[#allocation135_spill] sm:$0xff] %v10999_v9  ;;  %v3302_v2 = vrot.slane %v3288_v32, %v10003_v33  ;;  %v13153_v36 = vld [vmem:[#allocation74_spill] sm:$0xff]  ;;  %v13154_v37 = vld [vmem:[#allocation176_spill] sm:$0xff] }
 0x4de   :  { %v5854_v45 = vcombine.low %v13145_v50, %v5853_v4  ;;  %13148 = vst [vmem:[#allocation169_spill] sm:$0xff] %v10986_v27  ;;  %13149 = vst [vmem:[#allocation177_spill] sm:$0xff] %v10988_v3  ;;  %v13150_v4 = vrot.slane %v10461_v20, %v10003_v33  ;;  %v5887_v50 = vrot.slane %v13151_v18, %v10003_v33  ;;  %v13158_v27 = vld [vmem:[#allocation87_spill] sm:$0xff]  ;;  %v13182_v3 = vld [vmem:[#allocation104_spill] sm:$0xff] }
 0x4df   :  { %v3303_v10 = vcombine.high %v3295_v38, %v3295_v38  ;;  %v3285_v19 = vrot.slane %v3271_v53, %v10003_v33  ;;  %v2713_v60 = vmul.f32 %v13154_v37, %v13153_v36  ;;  %v3286_v62 = vcombine.high %v3278_v63, %v3278_v63  ;;  %v13159_v53 = vld [vmem:[#allocation178_spill] sm:$0xff] }
 0x4e0   :  { %7427 = vperm.xlu1 %8519, %v5854_v45   ;;  %v5939_v11 = vcombine.low %v13150_v4, %v5938_v15  ;;  %v3336_v45 = vrot.slane %v3322_v34, %v10003_v33  ;;  %v13156_v20 = vrot.slane %v13155_v14, %v10003_v33  ;;  %v6244_v4 = vrot.slane %v10511_v59, %v10003_v33  ;;  %v13160_v34 = vld [vmem:[#allocation82_spill] sm:$0xff] }
 0x4e1   :  { %v11011_v18 = vcombine.low %v3268_v41, %v3270_v17  ;;  %v3253_v32 = vcombine.high %v3251_v54, %v3251_v54  ;;  %v3337_v9 = vcombine.high %v3329_v28, %v3329_v28  ;;  %v2716_v47 = vmul.f32 %v13159_v53, %v13158_v27  ;;  %v11024_v41 = vpop.permute.xlu1 %2428  ;;  %v13165_v27 = vld [vmem:[#allocation184_spill] sm:$0xff] }
 0x4e2   :  { %7442 = vperm.xlu0 %8518, %v5939_v11   ;;  %v5888_v15 = vcombine.low %v13156_v20, %v5887_v50  ;;  %v11017_v37 = vcombine.low %v3244_v61, %v3252_v22  ;;  %v13161_v11 = vld [vmem:[#allocation24_spill] sm:$0xff]  ;;  %v13162_v14 = vrot.slane %v10496_v57, %v10003_v33  ;;  %13163 = vst [vmem:[#allocation13_spill] sm:$0xff] %v11024_v41 }
 0x4e3   :  { %13157 = vst [vmem:[#allocation166_spill] sm:$0xff] %v11011_v18  ;;  %v2715_v0 = vmul.f32 %v13161_v11, %v13160_v34  ;;  %v3304_v17 = vcombine.high %v3302_v2, %v3302_v2  ;;  %v11026_v50 = vcombine.low %v3295_v38, %v3303_v10  ;;  %v3287_v20 = vcombine.high %v3285_v19, %v3285_v19 }
 0x4e4   :  { %7433 = vperm.xlu1 %8519, %v5888_v15   ;;  %v6245_v59 = vcombine.low %v13162_v14, %v6244_v4  ;;  %v5921_v53 = vrot.slane %v13165_v27, %v10003_v33  ;;  %v11030_v36 = vcombine.low %v3278_v63, %v3286_v62  ;;  %v3338_v22 = vcombine.high %v3336_v45, %v3336_v45  ;;  %v11033_v15 = vpop.permute.xlu0 %2510  ;;  %v13168_v62 = vld [vmem:[#allocation97_spill] sm:$0xff] }
 0x4e5   :  { %13164 = vst [vmem:[#allocation11_spill] sm:$0xff] %v11026_v50  ;;  %v3305_v61 = vcombine.high %v2713_v60, %v2713_v60  ;;  %v3312_v34 = vrot.slane %v2713_v60, %v10003_v33  ;;  %13166 = vst [vmem:[#allocation63_spill] sm:$0xff] %v11033_v15  ;;  %v11035_v57 = vcombine.low %v3251_v54, %v3253_v32  ;;  %v13169_v27 = vld [vmem:[#allocation73_spill] sm:$0xff]  ;;  %v13171_v32 = vld [vmem:[#allocation182_spill] sm:$0xff] }
 0x4e6   :  { %7496 = vperm.xlu0 %8518, %v6245_v59   ;;  %v11037_v4 = vcombine.low %v3329_v28, %v3337_v9  ;;  %v3356_v11 = vcombine.high %v2716_v47, %v2716_v47  ;;  %v3363_v38 = vrot.slane %v2716_v47, %v10003_v33  ;;  %v3339_v14 = vcombine.high %v2715_v0, %v2715_v0  ;;  %v13173_v47 = vld [vmem:[#allocation189_spill] sm:$0xff] }
 0x4e7   :  { %v3346_v63 = vrot.slane %v2715_v0, %v10003_v33  ;;  %v2718_v41 = vmul.f32 %v13169_v27, %v13168_v62  ;;  %v11045_v60 = vcombine.low %v3302_v2, %v3304_v17  ;;  %v13172_v28 = vrot.slane %v13171_v32, %v10003_v33  ;;  %v11059_v2 = vpop.permute.xlu1 %2506  ;;  %v13175_v54 = vld [vmem:[#allocation89_spill] sm:$0xff] }
 0x4e8   :  { %13167 = vst [vmem:[#allocation168_spill] sm:$0xff] %v11037_v4  ;;  %v6278_v59 = vrot.slane %v13173_v47, %v10003_v33  ;;  %v11054_v15 = vcombine.low %v3285_v19, %v3287_v20  ;;  %v3319_v10 = vrot.slane %v3305_v61, %v10003_v33  ;;  %v3320_v62 = vcombine.high %v3312_v34, %v3312_v34  ;;  %v11070_v50 = vpop.permute.xlu0 %2518 }
 0x4e9   :  { %13170 = vst [vmem:[#allocation141_spill] sm:$0xff] %v11045_v60  ;;  %v5922_v9 = vcombine.low %v13172_v28, %v5921_v53  ;;  %13174 = vst [vmem:[#allocation132_spill] sm:$0xff] %v11059_v2  ;;  %v3370_v17 = vrot.slane %v3356_v11, %v10003_v33  ;;  %v3371_v27 = vcombine.high %v3363_v38, %v3363_v38  ;;  %v13177_v28 = vld [vmem:[#allocation186_spill] sm:$0xff]  ;;  %v13180_v2 = vld [vmem:[#allocation91_spill] sm:$0xff] }
 0x4ea   :  { %v13176_v53 = vrot.slane %v13175_v54, %v10003_v33  ;;  %v6227_v19 = vrot.slane %v13177_v28, %v10003_v33  ;;  %v11067_v20 = vcombine.low %v3336_v45, %v3338_v22  ;;  %v3353_v47 = vrot.slane %v3339_v14, %v10003_v33  ;;  %13179 = vst [vmem:[#allocation65_spill] sm:$0xff] %v11070_v50  ;;  %v13181_v60 = vld [vmem:[#allocation22_spill] sm:$0xff]  ;;  %v13184_v54 = vld [vmem:[#allocation79_spill] sm:$0xff] }
 0x4eb   :  { %7439 = vperm.xlu1 %8519, %v5922_v9   ;;  %v3354_v0 = vcombine.high %v3346_v63, %v3346_v63  ;;  %v3390_v61 = vcombine.high %v2718_v41, %v2718_v41  ;;  %v2717_v11 = vmul.f32 %v13181_v60, %v13180_v2  ;;  %v13183_v9 = vld [vmem:[#allocation75_spill] sm:$0xff]  ;;  %v6312_v45 = vrot.slane %v10581_v35, %v10003_v33 }
 0x4ec   :  { %v6279_v32 = vcombine.low %v13176_v53, %v6278_v59  ;;  %13178 = vst [vmem:[#allocation8_spill] sm:$0xff] %v11067_v20  ;;  %v2720_v18 = vmul.f32 %v13183_v9, %v13182_v3  ;;  %v13185_v59 = vrot.slane %v13184_v54, %v10003_v33  ;;  %v3321_v14 = vcombine.high %v3319_v10, %v3319_v10  ;;  %v13187_v3 = vld [vmem:[#allocation93_spill] sm:$0xff] }
 0x4ed   :  { %v11083_v28 = vcombine.low %v3312_v34, %v3320_v62  ;;  %v3397_v50 = vrot.slane %v2718_v41, %v10003_v33  ;;  %v3372_v60 = vcombine.high %v3370_v17, %v3370_v17  ;;  %v11086_v2 = vcombine.low %v3363_v38, %v3371_v27  ;;  %v13190_v34 = vld [vmem:[#allocation83_spill] sm:$0xff]  ;;  %v11098_v41 = vpop.permute.xlu1 %2514 }
 0x4ee   :  { %7502 = vperm.xlu0 %8518, %v6279_v32   ;;  %v6228_v53 = vcombine.low %v13185_v59, %v6227_v19  ;;  %v13188_v32 = vld [vmem:[#allocation72_spill] sm:$0xff]  ;;  %v13189_v19 = vrot.slane %v10558_v16, %v10003_v33  ;;  %v3355_v35 = vcombine.high %v3353_v47, %v3353_v47  ;;  %v11093_v59 = vcombine.low %v3346_v63, %v3354_v0  ;;  %v13192_v0 = vld [vmem:[#allocation109_spill] sm:$0xff] }
 0x4ef   :  { %13186 = vst [vmem:[#allocation9_spill] sm:$0xff] %v11086_v2  ;;  %v2719_v9 = vmul.f32 %v13188_v32, %v13187_v3  ;;  %v3404_v22 = vrot.slane %v3390_v61, %v10003_v33  ;;  %v6261_v62 = vrot.slane %v13190_v34, %v10003_v33  ;;  %13191 = vst [vmem:[#allocation137_spill] sm:$0xff] %v11098_v41  ;;  %v13193_v61 = vld [vmem:[#allocation147_spill] sm:$0xff]  ;;  %v11108_v32 = vpop.permute.xlu0 %2526 }
 0x4f0   :  { %7493 = vperm.xlu1 %8519, %v6228_v53   ;;  %v6313_v54 = vcombine.low %v13189_v19, %v6312_v45  ;;  %v3373_v38 = vcombine.high %v2717_v11, %v2717_v11  ;;  %v3380_v27 = vrot.slane %v2717_v11, %v10003_v33  ;;  %v3424_v4 = vcombine.high %v2720_v18, %v2720_v18  ;;  %v13199_v2 = vld [vmem:[#allocation103_spill] sm:$0xff] }
 0x4f1   :  { %v3431_v53 = vrot.slane %v2720_v18, %v10003_v33  ;;  %v11102_v3 = vcombine.low %v3319_v10, %v3321_v14  ;;  %v3405_v63 = vcombine.high %v3397_v50, %v3397_v50  ;;  %v2722_v45 = vmul.f32 %v13193_v61, %v13192_v0  ;;  %13194 = vst [vmem:[#allocation170_spill] sm:$0xff] %v11108_v32  ;;  %v13197_v14 = vld [vmem:[#allocation150_spill] sm:$0xff] }
 0x4f2   :  { %7508 = vperm.xlu0 %8518, %v6313_v54   ;;  %v11110_v19 = vcombine.low %v3370_v17, %v3372_v60  ;;  %v3407_v34 = vcombine.high %v2719_v9, %v2719_v9  ;;  %v3414_v18 = vrot.slane %v2719_v9, %v10003_v33  ;;  %v11115_v54 = vcombine.low %v3353_v47, %v3355_v35 }
 0x4f3   :  { %v3406_v10 = vcombine.high %v3404_v22, %v3404_v22  ;;  %v13198_v16 = vrot.slane %v13197_v14, %v10003_v33  ;;  %v6346_v0 = vrot.slane %v10594_v29, %v10003_v33  ;;  %v3387_v61 = vrot.slane %v3373_v38, %v10003_v33  ;;  %v11131_v14 = vpop.permute.xlu1 %2522 }
 0x4f4   :  { %13195 = vst [vmem:[#allocation173_spill] sm:$0xff] %v11110_v19  ;;  %13196 = vst [vmem:[#allocation183_spill] sm:$0xff] %v11115_v54  ;;  %v3388_v17 = vcombine.high %v3380_v27, %v3380_v27  ;;  %v3438_v60 = vrot.slane %v3424_v4, %v10003_v33  ;;  %v3439_v32 = vcombine.high %v3431_v53, %v3431_v53  ;;  %v13200_v19 = vld [vmem:[#allocation81_spill] sm:$0xff] }
 0x4f5   :  { %v6262_v41 = vcombine.low %v13198_v16, %v6261_v62  ;;  %v3458_v11 = vcombine.high %v2722_v45, %v2722_v45  ;;  %v2721_v9 = vmul.f32 %v13200_v19, %v13199_v2  ;;  %v13201_v47 = vrot.slane %v10569_v44, %v10003_v33  ;;  %v13202_v62 = vld [vmem:[#allocation57_spill] sm:$0xff]  ;;  %13203 = vst [vmem:[#allocation145_spill] sm:$0xff] %v11131_v14  ;;  %v11146_v14 = vpop.permute.xlu0 %2534 }
 0x4f6   :  { %v6295_v16 = vrot.slane %v13202_v62, %v10003_v33  ;;  %v11135_v38 = vcombine.low %v3397_v50, %v3405_v63  ;;  %v3421_v4 = vrot.slane %v3407_v34, %v10003_v33  ;;  %v3422_v20 = vcombine.high %v3414_v18, %v3414_v18  ;;  %v13205_v19 = vld [vmem:[#allocation149_spill] sm:$0xff]  ;;  %13208 = vst [vmem:[#allocation179_spill] sm:$0xff] %v11146_v14 }
 0x4f7   :  { %7499 = vperm.xlu1 %8519, %v6262_v41   ;;  %v6347_v35 = vcombine.low %v13201_v47, %v6346_v0  ;;  %v3465_v2 = vrot.slane %v2722_v45, %v10003_v33  ;;  %v13204_v41 = vld [vmem:[#allocation15_spill] sm:$0xff]  ;;  %v13206_v44 = vld [vmem:[#allocation41_spill] sm:$0xff]  ;;  %v6380_v62 = vrot.slane %v10649_v58, %v10003_v33  ;;  %v3389_v50 = vcombine.high %v3387_v61, %v3387_v61  ;;  %v11167_v14 = vpop.permute.xlu1 %2530 }
 0x4f8   :  { %v2740_v54 = vmul.f32 %v13205_v19, %v13204_v41  ;;  %v13207_v0 = vrot.slane %v13206_v44, %v10003_v33  ;;  %v11148_v63 = vcombine.low %v3380_v27, %v3388_v17  ;;  %v3440_v34 = vcombine.high %v3438_v60, %v3438_v60  ;;  %v13212_v27 = vld [vmem:[#allocation185_spill] sm:$0xff]  ;;  %13214 = vst [vmem:[#allocation10_spill] sm:$0xff] %v11167_v14 }
 0x4f9   :  { %7514 = vperm.xlu0 %8518, %v6347_v35   ;;  %v11150_v29 = vcombine.low %v3431_v53, %v3439_v32  ;;  %v11152_v45 = vcombine.low %v3404_v22, %v3406_v10  ;;  %v3472_v41 = vrot.slane %v3458_v11, %v10003_v33  ;;  %v3441_v35 = vcombine.high %v2721_v9, %v2721_v9  ;;  %v13213_v53 = vld [vmem:[#allocation190_spill] sm:$0xff]  ;;  %v11181_v58 = vpop.permute.xlu0 %2542  ;;  %v13219_v14 = vld [vmem:[#allocation45_spill] sm:$0xff] }
 0x4fa   :  { %v6296_v47 = vcombine.low %v13207_v0, %v6295_v16  ;;  %v13210_v16 = vrot.slane %v10624_v30, %v10003_v33  ;;  %v3423_v44 = vcombine.high %v3421_v4, %v3421_v4  ;;  %v13211_v0 = vld [vmem:[#allocation113_spill] sm:$0xff]  ;;  %v6329_v32 = vrot.slane %v13213_v53, %v10003_v33  ;;  %v13217_v53 = vld [vmem:[#allocation187_spill] sm:$0xff]  ;;  %13218 = vst [vmem:[#allocation86_spill] sm:$0xff] %v11181_v58 }
 0x4fb   :  { %13209 = vst [vmem:[#allocation62_spill] sm:$0xff] %v11150_v29  ;;  %v2723_v17 = vmul.f32 %v13212_v27, %v13211_v0  ;;  %v11164_v22 = vcombine.low %v3414_v18, %v3422_v20  ;;  %v3473_v10 = vcombine.high %v3465_v2, %v3465_v2  ;;  %v3448_v11 = vrot.slane %v2721_v9, %v10003_v33  ;;  %v13216_v9 = vld [vmem:[#allocation14_spill] sm:$0xff]  ;;  %v11205_v29 = vpop.permute.xlu1 %2538 }
 0x4fc   :  { %7505 = vperm.xlu1 %8519, %v6296_v47   ;;  %v6381_v19 = vcombine.low %v13210_v16, %v6380_v62  ;;  %v3764_v47 = vcombine.high %v2740_v54, %v2740_v54  ;;  %v11169_v30 = vcombine.low %v3387_v61, %v3389_v50  ;;  %v11173_v16 = vcombine.low %v3438_v60, %v3440_v34 }
 0x4fd   :  { %v3474_v27 = vcombine.high %v3472_v41, %v3472_v41  ;;  %v3455_v20 = vrot.slane %v3441_v35, %v10003_v33  ;;  %v3771_v18 = vrot.slane %v2740_v54, %v10003_v33  ;;  %v11183_v61 = vcombine.low %v3421_v4, %v3423_v44  ;;  %v13221_v4 = vld [vmem:[#allocation12_spill] sm:$0xff]  ;;  %v13222_v44 = vld [vmem:[#allocation43_spill] sm:$0xff]  ;;  %13224 = vst [vmem:[#allocation70_spill] sm:$0xff] %v11205_v29  ;;  %v11221_v29 = vpop.permute.xlu0 %2550 }
 0x4fe   :  { %7520 = vperm.xlu0 %8518, %v6381_v19   ;;  %13215 = vst [vmem:[#allocation142_spill] sm:$0xff] %v11173_v16  ;;  %v2742_v19 = vmul.f32 %v13217_v53, %v13216_v9  ;;  %v3475_v50 = vcombine.high %v2723_v17, %v2723_v17  ;;  %v13220_v60 = vrot.slane %v13219_v14, %v10003_v33  ;;  %v13226_v16 = vld [vmem:[#allocation92_spill] sm:$0xff]  ;;  %13230 = vst [vmem:[#allocation172_spill] sm:$0xff] %v11221_v29 }
 0x4ff   :  { %v6414_v0 = vrot.slane %v10667_v55, %v10003_v33  ;;  %v11192_v62 = vcombine.low %v3465_v2, %v3473_v10  ;;  %v3456_v54 = vcombine.high %v3448_v11, %v3448_v11  ;;  %v3778_v9 = vrot.slane %v3764_v47, %v10003_v33  ;;  %v13225_v47 = vld [vmem:[#allocation19_spill] sm:$0xff] }
 0x500   :  { %v6330_v34 = vcombine.low %v13220_v60, %v6329_v32  ;;  %v3482_v53 = vrot.slane %v2723_v17, %v10003_v33  ;;  %v2741_v58 = vmul.f32 %v13222_v44, %v13221_v4  ;;  %v13223_v14 = vrot.slane %v10642_v42, %v10003_v33  ;;  %v13228_v44 = vld [vmem:[#allocation16_spill] sm:$0xff] }
 0x501   :  { %v6363_v55 = vrot.slane %v10589_v26, %v10003_v33  ;;  %v11203_v60 = vcombine.low %v3472_v41, %v3474_v27  ;;  %v3457_v2 = vcombine.high %v3455_v20, %v3455_v20  ;;  %v3779_v10 = vcombine.high %v3771_v18, %v3771_v18 }
 0x502   :  { %7511 = vperm.xlu1 %8519, %v6330_v34   ;;  %v6415_v32 = vcombine.low %v13223_v14, %v6414_v0  ;;  %v3798_v35 = vcombine.high %v2742_v19, %v2742_v19  ;;  %v3489_v17 = vrot.slane %v3475_v50, %v10003_v33  ;;  %v2744_v4 = vmul.f32 %v13226_v16, %v13225_v47  ;;  %v13229_v14 = vld [vmem:[#allocation98_spill] sm:$0xff] }
 0x503   :  { %v13227_v42 = vrot.slane %v10562_v1, %v10003_v33  ;;  %v6448_v26 = vrot.slane %v10710_v8, %v10003_v33  ;;  %v11217_v27 = vcombine.low %v3448_v11, %v3456_v54  ;;  %v3780_v34 = vcombine.high %v3778_v9, %v3778_v9 }
 0x504   :  { %7526 = vperm.xlu0 %8518, %v6415_v32   ;;  %v2743_v50 = vmul.f32 %v13229_v14, %v13228_v44  ;;  %v3490_v16 = vcombine.high %v3482_v53, %v3482_v53  ;;  %v3805_v32 = vrot.slane %v2742_v19, %v10003_v33  ;;  %v3781_v47 = vcombine.high %v2741_v58, %v2741_v58 }
 0x505   :  { %v6364_v0 = vcombine.low %v13227_v42, %v6363_v55  ;;  %v13231_v1 = vrot.slane %v10686_v23, %v10003_v33  ;;  %v11227_v55 = vcombine.low %v3455_v20, %v3457_v2  ;;  %v11229_v42 = vcombine.low %v3771_v18, %v3779_v10  ;;  %v13233_v18 = vld [vmem:[#allocation29_spill] sm:$0xff] }
 0x506   :  { %v3812_v11 = vrot.slane %v3798_v35, %v10003_v33  ;;  %v6397_v54 = vrot.slane %v10606_v43, %v10003_v33  ;;  %v3491_v44 = vcombine.high %v3489_v17, %v3489_v17  ;;  %v3788_v14 = vrot.slane %v2741_v58, %v10003_v33  ;;  %v13234_v2 = vld [vmem:[#allocation49_spill] sm:$0xff]  ;;  %v11242_v35 = vpop.permute.xlu1 %2546 }
 0x507   :  { %7517 = vperm.xlu1 %8519, %v6364_v0   ;;  %v6449_v8 = vcombine.low %v13231_v1, %v6448_v26  ;;  %13232 = vst [vmem:[#allocation68_spill] sm:$0xff] %v11229_v42  ;;  %v3832_v41 = vcombine.high %v2744_v4, %v2744_v4  ;;  %v3839_v19 = vrot.slane %v2744_v4, %v10003_v33  ;;  %13235 = vst [vmem:[#allocation17_spill] sm:$0xff] %v11242_v35  ;;  %v13242_v42 = vld [vmem:[#allocation191_spill] sm:$0xff] }
 0x508   :  { %v11238_v0 = vcombine.low %v3778_v9, %v3780_v34  ;;  %v3815_v20 = vcombine.high %v2743_v50, %v2743_v50  ;;  %v2746_v10 = vmul.f32 %v13234_v2, %v13233_v18  ;;  %v11244_v26 = vcombine.low %v3482_v53, %v3490_v16  ;;  %v11255_v2 = vpop.permute.xlu0 %2558 }
 0x509   :  { %7532 = vperm.xlu0 %8518, %v6449_v8   ;;  %v3813_v43 = vcombine.high %v3805_v32, %v3805_v32  ;;  %v3795_v58 = vrot.slane %v3781_v47, %v10003_v33  ;;  %v3822_v1 = vrot.slane %v2743_v50, %v10003_v33  ;;  %v3814_v8 = vcombine.high %v3812_v11, %v3812_v11 }
 0x50a   :  { %v13236_v9 = vrot.slane %v10585_v51, %v10003_v33  ;;  %v6482_v18 = vrot.slane %v10733_v49, %v10003_v33  ;;  %13237 = vst [vmem:[#allocation148_spill] sm:$0xff] %v11255_v2  ;;  %v11257_v53 = vcombine.low %v3489_v17, %v3491_v44  ;;  %v3796_v16 = vcombine.high %v3788_v14, %v3788_v14  ;;  %v13240_v2 = vld [vmem:[#allocation53_spill] sm:$0xff] }
 0x50b   :  { %v3846_v47 = vrot.slane %v3832_v41, %v10003_v33  ;;  %v3847_v23 = vcombine.high %v3839_v19, %v3839_v19  ;;  %v3829_v50 = vrot.slane %v3815_v20, %v10003_v33  ;;  %v3866_v29 = vcombine.high %v2746_v10, %v2746_v10  ;;  %v13239_v41 = vld [vmem:[#allocation18_spill] sm:$0xff]  ;;  %v13241_v20 = vld [vmem:[#allocation33_spill] sm:$0xff] }
 0x50c   :  { %v6398_v34 = vcombine.low %v13236_v9, %v6397_v54  ;;  %v13238_v4 = vrot.slane %v10712_v12, %v10003_v33  ;;  %v6431_v54 = vrot.slane %v10654_v21, %v10003_v33  ;;  %v11268_v17 = vcombine.low %v3805_v32, %v3813_v43  ;;  %v11281_v32 = vpop.permute.xlu0 %7301 }
 0x50d   :  { %v3797_v44 = vcombine.high %v3795_v58, %v3795_v58  ;;  %v3830_v9 = vcombine.high %v3822_v1, %v3822_v1  ;;  %v2745_v35 = vmul.f32 %v13240_v2, %v13239_v41  ;;  %v13243_v12 = vrot.slane %v10637_v25, %v10003_v33  ;;  %13245 = vst [vmem:[#allocation175_spill] sm:$0xff] %v11281_v32 }
 0x50e   :  { %7523 = vperm.xlu1 %8519, %v6398_v34   ;;  %v6483_v51 = vcombine.low %v13238_v4, %v6482_v18  ;;  %v2748_v34 = vmul.f32 %v13242_v42, %v13241_v20  ;;  %v6788_v21 = vrot.slane %v10783_v39, %v10003_v33  ;;  %v11279_v18 = vpop.permute.xlu1 %2554  ;;  %v11283_v43 = vcombine.low %v3812_v11, %v3814_v8  ;;  %v13248_v8 = vld [vmem:[#allocation94_spill] sm:$0xff] }
 0x50f   :  { %v6432_v4 = vcombine.low %v13243_v12, %v6431_v54  ;;  %13244 = vst [vmem:[#allocation77_spill] sm:$0xff] %v11279_v18  ;;  %v11285_v49 = vcombine.low %v3788_v14, %v3796_v16  ;;  %v3848_v2 = vcombine.high %v3846_v47, %v3846_v47  ;;  %v11287_v41 = vcombine.low %v3839_v19, %v3847_v23  ;;  %v13247_v14 = vld [vmem:[#allocation30_spill] sm:$0xff] }
 0x510   :  { %7538 = vperm.xlu0 %8518, %v6483_v51   ;;  %v3831_v42 = vcombine.high %v3829_v50, %v3829_v50  ;;  %v3873_v51 = vrot.slane %v2746_v10, %v10003_v33  ;;  %v3880_v25 = vrot.slane %v3866_v29, %v10003_v33  ;;  %v13246_v39 = vrot.slane %v10760_v6, %v10003_v33  ;;  %v13254_v6 = vld [vmem:[#allocation32_spill] sm:$0xff] }
 0x511   :  { %v11296_v11 = vcombine.low %v3795_v58, %v3797_v44  ;;  %v2747_v16 = vmul.f32 %v13248_v8, %v13247_v14  ;;  %v6465_v19 = vrot.slane %v10678_v48, %v10003_v33  ;;  %v11302_v23 = vcombine.low %v3822_v1, %v3830_v9  ;;  %v13249_v44 = vld [vmem:[#allocation35_spill] sm:$0xff] }
 0x512   :  { %7529 = vperm.xlu1 %8519, %v6432_v4   ;;  %v6789_v54 = vcombine.low %v13246_v39, %v6788_v21  ;;  %v3849_v10 = vcombine.high %v2745_v35, %v2745_v35  ;;  %v3856_v29 = vrot.slane %v2745_v35, %v10003_v33  ;;  %v3900_v12 = vcombine.high %v2748_v34, %v2748_v34  ;;  %v13250_v21 = vld [vmem:[#allocation47_spill] sm:$0xff]  ;;  %v11316_v35 = vpop.permute.xlu1 %2562 }
 0x513   :  { %v11307_v4 = vcombine.low %v3846_v47, %v3848_v2  ;;  %v2750_v39 = vmul.f32 %v13250_v21, %v13249_v44  ;;  %v11313_v14 = vcombine.low %v3829_v50, %v3831_v42  ;;  %v3881_v48 = vcombine.high %v3873_v51, %v3873_v51  ;;  %13251 = vst [vmem:[#allocation144_spill] sm:$0xff] %v11316_v35  ;;  %v13258_v50 = vld [vmem:[#allocation37_spill] sm:$0xff]  ;;  %v13259_v35 = vld [vmem:[#allocation151_spill] sm:$0xff] }
 0x514   :  { %7592 = vperm.xlu0 %8518, %v6789_v54   ;;  %v3882_v1 = vcombine.high %v3880_v25, %v3880_v25  ;;  %v3907_v9 = vrot.slane %v2748_v34, %v10003_v33  ;;  %v11318_v54 = vpop.permute.xlu0 %7310  ;;  %v3883_v8 = vcombine.high %v2747_v16, %v2747_v16  ;;  %v3890_v47 = vrot.slane %v2747_v16, %v10003_v33 }
 0x515   :  { %13252 = vst [vmem:[#allocation180_spill] sm:$0xff] %v11318_v54  ;;  %v13253_v2 = vrot.slane %v10644_v46, %v10003_v33  ;;  %v6822_v44 = vrot.slane %v10810_v40, %v10003_v33  ;;  %v3863_v42 = vrot.slane %v3849_v10, %v10003_v33  ;;  %v3864_v34 = vcombine.high %v3856_v29, %v3856_v29  ;;  %v13255_v54 = vld [vmem:[#allocation102_spill] sm:$0xff] }
 0x516   :  { %v3914_v21 = vrot.slane %v3900_v12, %v10003_v33  ;;  %v3934_v20 = vcombine.high %v2750_v39, %v2750_v39  ;;  %v2749_v32 = vmul.f32 %v13255_v54, %v13254_v6  ;;  %v13256_v46 = vrot.slane %v10775_v56, %v10003_v33  ;;  %v11343_v18 = vpop.permute.xlu1 %7304  ;;  %v13261_v54 = vld [vmem:[#allocation105_spill] sm:$0xff] }
 0x517   :  { %v6466_v58 = vcombine.low %v13253_v2, %v6465_v19  ;;  %v6771_v40 = vrot.slane %v10721_v7, %v10003_v33  ;;  %v11337_v19 = vcombine.low %v3873_v51, %v3881_v48  ;;  %v11339_v2 = vcombine.low %v3880_v25, %v3882_v1  ;;  %13260 = vst [vmem:[#allocation146_spill] sm:$0xff] %v11343_v18  ;;  %v13269_v18 = vld [vmem:[#allocation100_spill] sm:$0xff] }
 0x518   :  { %v6823_v16 = vcombine.low %v13256_v46, %v6822_v44  ;;  %v3915_v10 = vcombine.high %v3907_v9, %v3907_v9  ;;  %v2752_v12 = vmul.f32 %v13259_v35, %v13258_v50  ;;  %v3897_v6 = vrot.slane %v3883_v8, %v10003_v33  ;;  %v11354_v35 = vpop.permute.xlu0 %7316 }
 0x519   :  { %7535 = vperm.xlu1 %8519, %v6466_v58   ;;  %13257 = vst [vmem:[#allocation188_spill] sm:$0xff] %v11337_v19  ;;  %v3898_v58 = vcombine.high %v3890_v47, %v3890_v47  ;;  %v13262_v56 = vrot.slane %v13261_v54, %v10003_v33  ;;  %v6856_v7 = vrot.slane %v10851_v52, %v10003_v33  ;;  %13263 = vst [vmem:[#allocation74_spill] sm:$0xff] %v11354_v35 }
 0x51a   :  { %7598 = vperm.xlu0 %8518, %v6823_v16   ;;  %v3865_v51 = vcombine.high %v3863_v42, %v3863_v42  ;;  %v11351_v25 = vcombine.low %v3856_v29, %v3864_v34  ;;  %v3916_v48 = vcombine.high %v3914_v21, %v3914_v21  ;;  %v3941_v1 = vrot.slane %v2750_v39, %v10003_v33  ;;  %v13266_v39 = vld [vmem:[#allocation111_spill] sm:$0xff] }
 0x51b   :  { %v6772_v44 = vcombine.low %v13262_v56, %v6771_v40  ;;  %v3948_v50 = vrot.slane %v3934_v20, %v10003_v33  ;;  %v3917_v8 = vcombine.high %v2749_v32, %v2749_v32  ;;  %v3924_v46 = vrot.slane %v2749_v32, %v10003_v33  ;;  %v11367_v56 = vpop.permute.xlu1 %7307 }
 0x51c   :  { %v13264_v16 = vrot.slane %v10828_v24, %v10003_v33  ;;  %v11363_v29 = vcombine.low %v3907_v9, %v3915_v10  ;;  %v3968_v34 = vcombine.high %v2752_v12, %v2752_v12  ;;  %v6805_v54 = vrot.slane %v13266_v39, %v10003_v33  ;;  %13267 = vst [vmem:[#allocation181_spill] sm:$0xff] %v11367_v56  ;;  %v11380_v39 = vpop.permute.xlu0 %7322  ;;  %v13271_v56 = vld [vmem:[#allocation39_spill] sm:$0xff] }
 0x51d   :  { %7589 = vperm.xlu1 %8519, %v6772_v44   ;;  %v3899_v20 = vcombine.high %v3897_v6, %v3897_v6  ;;  %v11369_v35 = vcombine.low %v3890_v47, %v3898_v58  ;;  %v3975_v32 = vrot.slane %v2752_v12, %v10003_v33  ;;  %v13268_v44 = vld [vmem:[#allocation34_spill] sm:$0xff]  ;;  %v11378_v10 = vcombine.low %v3914_v21, %v3916_v48  ;;  %v13272_v12 = vld [vmem:[#allocation51_spill] sm:$0xff] }
 0x51e   :  { %v6857_v40 = vcombine.low %v13264_v16, %v6856_v7  ;;  %13265 = vst [vmem:[#allocation176_spill] sm:$0xff] %v11363_v29  ;;  %v2751_v24 = vmul.f32 %v13269_v18, %v13268_v44  ;;  %v11374_v7 = vcombine.low %v3863_v42, %v3865_v51  ;;  %v3949_v16 = vcombine.high %v3941_v1, %v3941_v1  ;;  %v13273_v51 = vld [vmem:[#allocation55_spill] sm:$0xff]  ;;  %v13281_v29 = vld [vmem:[#allocation108_spill] sm:$0xff] }
 0x51f   :  { %13270 = vst [vmem:[#allocation87_spill] sm:$0xff] %v11380_v39  ;;  %v3950_v52 = vcombine.high %v3948_v50, %v3948_v50  ;;  %v3931_v47 = vrot.slane %v3917_v8, %v10003_v33  ;;  %v3932_v58 = vcombine.high %v3924_v46, %v3924_v46  ;;  %v2754_v19 = vmul.f32 %v13272_v12, %v13271_v56 }
 0x520   :  { %7604 = vperm.xlu0 %8518, %v6857_v40   ;;  %v3982_v42 = vrot.slane %v3968_v34, %v10003_v33  ;;  %v13274_v40 = vrot.slane %v13273_v51, %v10003_v33  ;;  %v6890_v48 = vrot.slane %v10869_v13, %v10003_v33  ;;  %v11393_v44 = vcombine.low %v3897_v6, %v3899_v20  ;;  %v11405_v13 = vpop.permute.xlu1 %7313 }
 0x521   :  { %v3983_v9 = vcombine.high %v3975_v32, %v3975_v32  ;;  %v3951_v39 = vcombine.high %v2751_v24, %v2751_v24  ;;  %v11397_v56 = vcombine.low %v3941_v1, %v3949_v16  ;;  %v3958_v12 = vrot.slane %v2751_v24, %v10003_v33  ;;  %13278 = vst [vmem:[#allocation82_spill] sm:$0xff] %v11405_v13  ;;  %v13280_v16 = vld [vmem:[#allocation36_spill] sm:$0xff] }
 0x522   :  { %v6806_v21 = vcombine.low %v13274_v40, %v6805_v54  ;;  %v13276_v34 = vrot.slane %v10844_v31, %v10003_v33  ;;  %v13277_v54 = vld [vmem:[#allocation31_spill] sm:$0xff]  ;;  %v11407_v6 = vcombine.low %v3948_v50, %v3950_v52  ;;  %v3933_v20 = vcombine.high %v3931_v47, %v3931_v47 }
 0x523   :  { %13275 = vst [vmem:[#allocation178_spill] sm:$0xff] %v11397_v56  ;;  %v6839_v40 = vrot.slane %v13277_v54, %v10003_v33  ;;  %v11409_v18 = vcombine.low %v3924_v46, %v3932_v58  ;;  %v4002_v8 = vcombine.high %v2754_v19, %v2754_v19  ;;  %v3984_v1 = vcombine.high %v3982_v42, %v3982_v42  ;;  %v11418_v54 = vpop.permute.xlu0 %7328  ;;  %v13286_v58 = vld [vmem:[#allocation21_spill] sm:$0xff] }
 0x524   :  { %7595 = vperm.xlu1 %8519, %v6806_v21   ;;  %v6891_v51 = vcombine.low %v13276_v34, %v6890_v48  ;;  %13279 = vst [vmem:[#allocation24_spill] sm:$0xff] %v11407_v6  ;;  %v2753_v24 = vmul.f32 %v13281_v29, %v13280_v16  ;;  %v13282_v21 = vld [vmem:[#allocation59_spill] sm:$0xff]  ;;  %v6924_v34 = vrot.slane %v10927_v5, %v10003_v33  ;;  %13284 = vst [vmem:[#allocation184_spill] sm:$0xff] %v11418_v54  ;;  %v13288_v16 = vld [vmem:[#allocation152_spill] sm:$0xff] }
 0x525   :  { %v13283_v31 = vrot.slane %v13282_v21, %v10003_v33  ;;  %v11420_v50 = vcombine.low %v3975_v32, %v3983_v9  ;;  %v3965_v46 = vrot.slane %v3951_v39, %v10003_v33  ;;  %v4009_v52 = vrot.slane %v2754_v19, %v10003_v33 }
 0x526   :  { %7610 = vperm.xlu0 %8518, %v6891_v51   ;;  %v6873_v13 = vrot.slane %v13286_v58, %v10003_v33  ;;  %v3966_v29 = vcombine.high %v3958_v12, %v3958_v12  ;;  %v13287_v51 = vld [vmem:[#allocation80_spill] sm:$0xff]  ;;  %v5428_v32 = vrot.slane %v11035_v57, %v10003_v33  ;;  %v11435_v39 = vcombine.low %v3931_v47, %v3933_v20  ;;  %v13300_v47 = vld [vmem:[#allocation85_spill] sm:$0xff] }
 0x527   :  { %v6840_v48 = vcombine.low %v13283_v31, %v6839_v40  ;;  %13285 = vst [vmem:[#allocation97_spill] sm:$0xff] %v11420_v50  ;;  %v2772_v6 = vmul.f32 %v13288_v16, %v13287_v51  ;;  %v13289_v40 = vld [vmem:[#allocation127_spill] sm:$0xff]  ;;  %v4016_v31 = vrot.slane %v4002_v8, %v10003_v33  ;;  %v11440_v58 = vcombine.low %v3982_v42, %v3984_v1  ;;  %v13296_v8 = vld [vmem:[#allocation38_spill] sm:$0xff] }
 0x528   :  { %v13290_v21 = vrot.slane %v13289_v40, %v10003_v33  ;;  %v3992_v51 = vrot.slane %v2753_v24, %v10003_v33  ;;  %v11446_v40 = vpop.permute.xlu1 %7319  ;;  %v3967_v20 = vcombine.high %v3965_v46, %v3965_v46  ;;  %v4017_v9 = vcombine.high %v4009_v52, %v4009_v52  ;;  %v13297_v42 = vld [vmem:[#allocation27_spill] sm:$0xff] }
 0x529   :  { %7601 = vperm.xlu1 %8519, %v6840_v48   ;;  %13291 = vst [vmem:[#allocation73_spill] sm:$0xff] %v11440_v58  ;;  %v3985_v48 = vcombine.high %v2753_v24, %v2753_v24  ;;  %13294 = vst [vmem:[#allocation182_spill] sm:$0xff] %v11446_v40  ;;  %v2755_v1 = vmul.f32 %v13297_v42, %v13296_v8  ;;  %v11454_v19 = vcombine.low %v3958_v12, %v3966_v29  ;;  %v13301_v40 = vld [vmem:[#allocation153_spill] sm:$0xff]  ;;  %v13304_v42 = vld [vmem:[#allocation159_spill] sm:$0xff] }
 0x52a   :  { %v6925_v5 = vcombine.low %v13290_v21, %v6924_v34  ;;  %v13292_v34 = vld [vmem:[#allocation25_spill] sm:$0xff]  ;;  %v11448_v21 = vpop.permute.xlu0 %7334  ;;  %v4308_v24 = vcombine.high %v2772_v6, %v2772_v6  ;;  %v4315_v54 = vrot.slane %v2772_v6, %v10003_v33  ;;  %v2774_v50 = vmul.f32 %v13301_v40, %v13300_v47 }
 0x52b   :  { %v13293_v16 = vrot.slane %v13292_v34, %v10003_v33  ;;  %13295 = vst [vmem:[#allocation189_spill] sm:$0xff] %v11448_v21  ;;  %v13299_v34 = vld [vmem:[#allocation123_spill] sm:$0xff]  ;;  %v4018_v21 = vcombine.high %v4016_v31, %v4016_v31  ;;  %v5462_v8 = vrot.slane %v11054_v15, %v10003_v33  ;;  %v3999_v12 = vrot.slane %v3985_v48, %v10003_v33 }
 0x52c   :  { %7616 = vperm.xlu0 %8518, %v6925_v5   ;;  %v13298_v5 = vrot.slane %v11017_v37, %v10003_v33  ;;  %v4000_v29 = vcombine.high %v3992_v51, %v3992_v51  ;;  %v11474_v6 = vcombine.low %v4009_v52, %v4017_v9  ;;  %v4019_v58 = vcombine.high %v2755_v1, %v2755_v1 }
 0x52d   :  { %v6874_v57 = vcombine.low %v13293_v16, %v6873_v13  ;;  %v6907_v16 = vrot.slane %v13299_v34, %v10003_v33  ;;  %v11472_v34 = vcombine.low %v3965_v46, %v3967_v20  ;;  %v4026_v40 = vrot.slane %v2755_v1, %v10003_v33  ;;  %v11485_v46 = vpop.permute.xlu1 %7325 }
 0x52e   :  { %v5429_v13 = vcombine.low %v13298_v5, %v5428_v32  ;;  %v6941_v5 = vrot.slane %v13304_v42, %v10003_v33  ;;  %13305 = vst [vmem:[#allocation89_spill] sm:$0xff] %v11474_v6  ;;  %v4322_v48 = vrot.slane %v4308_v24, %v10003_v33  ;;  %v13306_v47 = vrot.slane %v11030_v36, %v10003_v33  ;;  %v11487_v52 = vpop.permute.xlu0 %7340  ;;  %v13312_v36 = vld [vmem:[#allocation116_spill] sm:$0xff]  ;;  %v13330_v6 = vld [vmem:[#allocation155_spill] sm:$0xff] }
 0x52f   :  { %7607 = vperm.xlu1 %8519, %v6874_v57   ;;  %v13302_v57 = vld [vmem:[#allocation119_spill] sm:$0xff]  ;;  %13307 = vst [vmem:[#allocation186_spill] sm:$0xff] %v11485_v46  ;;  %13308 = vst [vmem:[#allocation91_spill] sm:$0xff] %v11487_v52  ;;  %v11489_v9 = vcombine.low %v4016_v31, %v4018_v21  ;;  %v4323_v20 = vcombine.high %v4315_v54, %v4315_v54  ;;  %v4342_v1 = vcombine.high %v2774_v50, %v2774_v50  ;;  %v13315_v46 = vld [vmem:[#allocation90_spill] sm:$0xff] }
 0x530   :  { %7352 = vperm.xlu0 %8518, %v5429_v13   ;;  %v13303_v37 = vrot.slane %v13302_v57, %v10003_v33  ;;  %v5463_v13 = vcombine.low %v13306_v47, %v5462_v8  ;;  %v13310_v57 = vld [vmem:[#allocation78_spill] sm:$0xff]  ;;  %v4001_v24 = vcombine.high %v3999_v12, %v3999_v12  ;;  %v13313_v8 = vrot.slane %v13312_v36, %v10003_v33 }
 0x531   :  { %13309 = vst [vmem:[#allocation22_spill] sm:$0xff] %v11489_v9  ;;  %v4033_v52 = vrot.slane %v4019_v58, %v10003_v33  ;;  %v4034_v31 = vcombine.high %v4026_v40, %v4026_v40  ;;  %v4349_v21 = vrot.slane %v2774_v50, %v10003_v33  ;;  %v13316_v9 = vld [vmem:[#allocation61_spill] sm:$0xff]  ;;  %v11511_v36 = vcombine.low %v4315_v54, %v4323_v20 }
 0x532   :  { %v6908_v32 = vcombine.low %v13303_v37, %v6907_v16  ;;  %v5496_v16 = vrot.slane %v11102_v3, %v10003_v33  ;;  %v13311_v37 = vld [vmem:[#allocation26_spill] sm:$0xff]  ;;  %v6942_v47 = vcombine.low %v13313_v8, %v6941_v5  ;;  %v13314_v3 = vld [vmem:[#allocation143_spill] sm:$0xff]  ;;  %v2776_v56 = vmul.f32 %v13316_v9, %v13315_v46  ;;  %v11515_v46 = vpop.permute.xlu1 %7331  ;;  %v11517_v9 = vpop.permute.xlu0 %7346  ;;  %v13324_v20 = vld [vmem:[#allocation169_spill] sm:$0xff] }
 0x533   :  { %v2773_v42 = vmul.f32 %v13311_v37, %v13310_v57  ;;  %v6958_v15 = vrot.slane %v13314_v3, %v10003_v33  ;;  %v13318_v57 = vld [vmem:[#allocation183_spill] sm:$0xff]  ;;  %13319 = vst [vmem:[#allocation104_spill] sm:$0xff] %v11511_v36  ;;  %v4356_v58 = vrot.slane %v4342_v1, %v10003_v33  ;;  %13320 = vst [vmem:[#allocation75_spill] sm:$0xff] %v11515_v46 }
 0x534   :  { %7613 = vperm.xlu1 %8519, %v6908_v32   ;;  %v11493_v32 = vcombine.low %v3992_v51, %v4000_v29  ;;  %7358 = vperm.xlu0 %8518, %v5463_v13   ;;  %v4324_v29 = vcombine.high %v4322_v48, %v4322_v48  ;;  %v13317_v13 = vrot.slane %v11083_v28, %v10003_v33 }
 0x535   :  { %v5530_v37 = vrot.slane %v13318_v57, %v10003_v33  ;;  %v4325_v50 = vcombine.high %v2773_v42, %v2773_v42  ;;  %v4332_v8 = vrot.slane %v2773_v42, %v10003_v33  ;;  %13321 = vst [vmem:[#allocation79_spill] sm:$0xff] %v11517_v9  ;;  %v11519_v3 = vcombine.low %v3999_v12, %v4001_v24  ;;  %v13325_v12 = vld [vmem:[#allocation84_spill] sm:$0xff]  ;;  %v13326_v24 = vld [vmem:[#allocation154_spill] sm:$0xff] }
 0x536   :  { %v5497_v5 = vcombine.low %v13317_v13, %v5496_v16  ;;  %v13322_v16 = vld [vmem:[#allocation174_spill] sm:$0xff]  ;;  %v5411_v1 = vrot.slane %v13324_v20, %v10003_v33  ;;  %v4035_v13 = vcombine.high %v4033_v52, %v4033_v52  ;;  %v11528_v57 = vcombine.low %v4026_v40, %v4034_v31  ;;  %v13329_v20 = vld [vmem:[#allocation96_spill] sm:$0xff] }
 0x537   :  { %v4357_v42 = vcombine.high %v4349_v21, %v4349_v21  ;;  %v4376_v51 = vcombine.high %v2776_v56, %v2776_v56  ;;  %v4383_v9 = vrot.slane %v2776_v56, %v10003_v33  ;;  %v2775_v46 = vmul.f32 %v13326_v24, %v13325_v12  ;;  %v13333_v24 = vld [vmem:[#allocation166_spill] sm:$0xff]  ;;  %v11557_v56 = vpop.permute.xlu1 %7337 }
 0x538   :  { %7619 = vperm.xlu1 %8519, %v6942_v47   ;;  %7364 = vperm.xlu0 %8518, %v5497_v5   ;;  %v13323_v47 = vrot.slane %v13322_v16, %v10003_v33  ;;  %v13327_v5 = vrot.slane %v11093_v59, %v10003_v33  ;;  %v11538_v16 = vcombine.low %v4322_v48, %v4324_v29  ;;  %v13340_v29 = vld [vmem:[#allocation66_spill] sm:$0xff] }
 0x539   :  { %v4339_v40 = vrot.slane %v4325_v50, %v10003_v33  ;;  %v4340_v31 = vcombine.high %v4332_v8, %v4332_v8  ;;  %v2778_v12 = vmul.f32 %v13330_v6, %v13329_v20  ;;  %v11550_v48 = vcombine.low %v4033_v52, %v4035_v13  ;;  %13335 = vst [vmem:[#allocation83_spill] sm:$0xff] %v11557_v56  ;;  %v11559_v6 = vpop.permute.xlu0 %7400 }
 0x53a   :  { %v6959_v54 = vcombine.low %v13323_v47, %v6958_v15  ;;  %v5531_v28 = vcombine.low %v13327_v5, %v5530_v37  ;;  %v5564_v15 = vrot.slane %v11169_v30, %v10003_v33  ;;  %13328 = vst [vmem:[#allocation93_spill] sm:$0xff] %v11538_v16  ;;  %v4358_v47 = vcombine.high %v4356_v58, %v4356_v58 }
 0x53b   :  { %v5445_v30 = vrot.slane %v13333_v24, %v10003_v33  ;;  %v11554_v50 = vcombine.low %v4349_v21, %v4357_v42  ;;  %v4390_v5 = vrot.slane %v4376_v51, %v10003_v33  ;;  %v4359_v20 = vcombine.high %v2775_v46, %v2775_v46  ;;  %v13339_v24 = vld [vmem:[#allocation88_spill] sm:$0xff] }
 0x53c   :  { %7622 = vperm.xlu1 %8519, %v6959_v54   ;;  %7370 = vperm.xlu0 %8518, %v5531_v28   ;;  %v13331_v54 = vld [vmem:[#allocation129_spill] sm:$0xff]  ;;  %v4391_v28 = vcombine.high %v4383_v9, %v4383_v9  ;;  %v5598_v52 = vrot.slane %v11183_v61, %v10003_v33  ;;  %v11566_v13 = vcombine.low %v4356_v58, %v4358_v47 }
 0x53d   :  { %v13332_v59 = vrot.slane %v13331_v54, %v10003_v33  ;;  %13334 = vst [vmem:[#allocation72_spill] sm:$0xff] %v11554_v50  ;;  %v4341_v21 = vcombine.high %v4339_v40, %v4339_v40  ;;  %v11568_v42 = vcombine.low %v4332_v8, %v4340_v31  ;;  %v4366_v51 = vrot.slane %v2775_v46, %v10003_v33  ;;  %v13344_v47 = vld [vmem:[#allocation101_spill] sm:$0xff]  ;;  %v13345_v46 = vld [vmem:[#allocation156_spill] sm:$0xff] }
 0x53e   :  { %13337 = vst [vmem:[#allocation109_spill] sm:$0xff] %v11566_v13  ;;  %v2777_v56 = vmul.f32 %v13340_v29, %v13339_v24  ;;  %v4392_v58 = vcombine.high %v4390_v5, %v4390_v5  ;;  %v4417_v8 = vrot.slane %v2778_v12, %v10003_v33  ;;  %v2780_v31 = vmul.f32 %v13345_v46, %v13344_v47  ;;  %v11591_v24 = vpop.permute.xlu1 %7343 }
 0x53f   :  { %v5412_v37 = vcombine.low %v13332_v59, %v5411_v1  ;;  %v13336_v1 = vrot.slane %v11148_v63, %v10003_v33  ;;  %13338 = vst [vmem:[#allocation147_spill] sm:$0xff] %v11568_v42  ;;  %v4410_v59 = vcombine.high %v2778_v12, %v2778_v12  ;;  %v11583_v13 = vcombine.low %v4383_v9, %v4391_v28  ;;  %v13349_v9 = vld [vmem:[#allocation95_spill] sm:$0xff]  ;;  %v13350_v28 = vld [vmem:[#allocation157_spill] sm:$0xff]  ;;  %v13369_v42 = vld [vmem:[#allocation164_spill] sm:$0xff] }
 0x540   :  { %v4373_v29 = vrot.slane %v4359_v20, %v10003_v33  ;;  %13348 = vst [vmem:[#allocation103_spill] sm:$0xff] %v11591_v24  ;;  %v2779_v47 = vmul.f32 %v13350_v28, %v13349_v9  ;;  %v11599_v20 = vpop.permute.xlu0 %7406  ;;  %v4425_v61 = vcombine.high %v4417_v8, %v4417_v8  ;;  %v4400_v12 = vrot.slane %v2777_v56, %v10003_v33 }
 0x541   :  { %7349 = vperm.xlu1 %8519, %v5412_v37   ;;  %v5565_v54 = vcombine.low %v13336_v1, %v5564_v15  ;;  %v13341_v37 = vld [vmem:[#allocation177_spill] sm:$0xff]  ;;  %13346 = vst [vmem:[#allocation150_spill] sm:$0xff] %v11583_v13  ;;  %v4444_v24 = vcombine.high %v2780_v31, %v2780_v31  ;;  %v4451_v28 = vrot.slane %v2780_v31, %v10003_v33 }
 0x542   :  { %v13342_v36 = vrot.slane %v13341_v37, %v10003_v33  ;;  %v13343_v15 = vld [vmem:[#allocation141_spill] sm:$0xff]  ;;  %v11593_v37 = vcombine.low %v4339_v40, %v4341_v21  ;;  %v13353_v40 = vld [vmem:[#allocation8_spill] sm:$0xff]  ;;  %v4375_v9 = vcombine.high %v4373_v29, %v4373_v29 }
 0x543   :  { %7376 = vperm.xlu0 %8518, %v5565_v54   ;;  %v5479_v1 = vrot.slane %v13343_v15, %v10003_v33  ;;  %v5632_v54 = vrot.slane %v11227_v55, %v10003_v33  ;;  %v4374_v15 = vcombine.high %v4366_v51, %v4366_v51  ;;  %v5513_v21 = vrot.slane %v13353_v40, %v10003_v33 }
 0x544   :  { %v5446_v63 = vcombine.low %v13342_v36, %v5445_v30  ;;  %v13347_v36 = vrot.slane %v11164_v22, %v10003_v33  ;;  %v4393_v22 = vcombine.high %v2777_v56, %v2777_v56  ;;  %v13358_v56 = vld [vmem:[#allocation158_spill] sm:$0xff]  ;;  %v11636_v13 = vcombine.low %v4373_v29, %v4375_v9  ;;  %v13364_v29 = vld [vmem:[#allocation99_spill] sm:$0xff] }
 0x545   :  { %v13365_v9 = vld [vmem:[#allocation167_spill] sm:$0xff] }
 0x546   :  { %7355 = vperm.xlu1 %8519, %v5446_v63   ;;  %v5599_v30 = vcombine.low %v13347_v36, %v5598_v52  ;;  %v4424_v63 = vrot.slane %v4410_v59, %v10003_v33  ;;  %v13351_v52 = vld [vmem:[#allocation11_spill] sm:$0xff]  ;;  %v11607_v36 = vcombine.low %v4390_v5, %v4392_v58  ;;  %v13355_v59 = vrot.slane %v11217_v27, %v10003_v33  ;;  %v13359_v27 = vld [vmem:[#allocation168_spill] sm:$0xff] }
 0x547   :  { %v13352_v55 = vrot.slane %v13351_v52, %v10003_v33  ;;  %v11618_v5 = vcombine.low %v4366_v51, %v4374_v15  ;;  %v4427_v58 = vcombine.high %v2779_v47, %v2779_v47  ;;  %v11630_v52 = vpop.permute.xlu0 %7412  ;;  %v11632_v51 = vcombine.low %v4417_v8, %v4425_v61  ;;  %13362 = vst [vmem:[#allocation15_spill] sm:$0xff] %v11636_v13  ;;  %v13368_v13 = vld [vmem:[#allocation112_spill] sm:$0xff] }
 0x548   :  { %7382 = vperm.xlu0 %8518, %v5599_v30   ;;  %13354 = vst [vmem:[#allocation81_spill] sm:$0xff] %v11607_v36  ;;  %v5633_v30 = vcombine.low %v13355_v59, %v5632_v54  ;;  %v11622_v36 = vpop.permute.xlu1 %7397  ;;  %v4426_v31 = vcombine.high %v4424_v63, %v4424_v63  ;;  %v13360_v54 = vrot.slane %v13359_v27, %v10003_v33 }
 0x549   :  { %v5480_v46 = vcombine.low %v13352_v55, %v5479_v1  ;;  %v5666_v1 = vrot.slane %v11257_v53, %v10003_v33  ;;  %13356 = vst [vmem:[#allocation57_spill] sm:$0xff] %v11618_v5  ;;  %v13357_v55 = vld [vmem:[#allocation107_spill] sm:$0xff]  ;;  %v13361_v53 = vld [vmem:[#allocation173_spill] sm:$0xff]  ;;  %v4408_v15 = vcombine.high %v4400_v12, %v4400_v12  ;;  %v5972_v27 = vrot.slane %v11296_v11, %v10003_v33 }
 0x54a   :  { %v2782_v40 = vmul.f32 %v13358_v56, %v13357_v55  ;;  %v5514_v59 = vcombine.low %v13360_v54, %v5513_v21  ;;  %v5547_v50 = vrot.slane %v13361_v53, %v10003_v33  ;;  %v4458_v55 = vrot.slane %v4444_v24, %v10003_v33 }
 0x54b   :  { %7361 = vperm.xlu1 %8519, %v5480_v46   ;;  %v4407_v46 = vrot.slane %v4393_v22, %v10003_v33  ;;  %v4434_v56 = vrot.slane %v2779_v47, %v10003_v33  ;;  %v4459_v22 = vcombine.high %v4451_v28, %v4451_v28  ;;  %v4441_v8 = vrot.slane %v4427_v58, %v10003_v33 }
 0x54c   :  { %7388 = vperm.xlu0 %8518, %v5633_v30   ;;  %v13363_v30 = vrot.slane %v11244_v26, %v10003_v33  ;;  %v4478_v54 = vcombine.high %v2782_v40, %v2782_v40  ;;  %v4485_v24 = vrot.slane %v2782_v40, %v10003_v33  ;;  %v2781_v53 = vmul.f32 %v13365_v9, %v13364_v29  ;;  %v7404_v5 = vpop.permute.xlu1 %7403 }
 0x54d   :  { %v4409_v47 = vcombine.high %v4407_v46, %v4407_v46  ;;  %v5581_v11 = vrot.slane %v11152_v45, %v10003_v33  ;;  %v11656_v61 = vcombine.low %v4400_v12, %v4408_v15  ;;  %v4460_v58 = vcombine.high %v4458_v55, %v4458_v55  ;;  %v13383_v12 = vld [vmem:[#allocation131_spill] sm:$0xff] }
 0x54e   :  { %v5667_v21 = vcombine.low %v13363_v30, %v5666_v1  ;;  %v11654_v30 = vcombine.low %v4424_v63, %v4426_v31  ;;  %v4442_v16 = vcombine.high %v4434_v56, %v4434_v56  ;;  %v11658_v40 = vcombine.low %v4451_v28, %v4459_v22  ;;  %v11667_v63 = vpop.permute.xlu0 %7418 }
 0x54f   :  { %7367 = vperm.xlu1 %8519, %v5514_v59   ;;  %v13366_v59 = vld [vmem:[#allocation9_spill] sm:$0xff]  ;;  %v2784_v29 = vmul.f32 %v13369_v42, %v13368_v13  ;;  %v6006_v45 = vrot.slane %v11313_v14, %v10003_v33  ;;  %v4443_v31 = vcombine.high %v4441_v8, %v4441_v8  ;;  %v4492_v28 = vrot.slane %v4478_v54, %v10003_v33 }
 0x550   :  { %7394 = vperm.xlu0 %8518, %v5667_v21   ;;  %v13367_v26 = vrot.slane %v13366_v59, %v10003_v33  ;;  %v13370_v21 = vrot.slane %v11285_v49, %v10003_v33  ;;  %v4493_v15 = vcombine.high %v4485_v24, %v4485_v24  ;;  %v11672_v22 = vcombine.low %v4407_v46, %v4409_v47 }
 0x551   :  { %v4461_v13 = vcombine.high %v2781_v53, %v2781_v53  ;;  %v13371_v49 = vrot.slane %v11135_v38, %v10003_v33  ;;  %v11681_v59 = vcombine.low %v4458_v55, %v4460_v58  ;;  %v4468_v54 = vrot.slane %v2781_v53, %v10003_v33  ;;  %v13374_v58 = vld [vmem:[#allocation62_spill] sm:$0xff] }
 0x552   :  { %v5548_v1 = vcombine.low %v13367_v26, %v5547_v50  ;;  %v5973_v50 = vcombine.low %v13370_v21, %v5972_v27  ;;  %v13372_v27 = vld [vmem:[#allocation142_spill] sm:$0xff]  ;;  %v11683_v26 = vcombine.low %v4434_v56, %v4442_v16  ;;  %v4512_v47 = vcombine.high %v2784_v29, %v2784_v29  ;;  %v7410_v21 = vpop.permute.xlu1 %7409 }
 0x553   :  { %v5582_v42 = vcombine.low %v13371_v49, %v5581_v11  ;;  %v5615_v14 = vrot.slane %v13372_v27, %v10003_v33  ;;  %v13373_v38 = vrot.slane %v11302_v23, %v10003_v33  ;;  %v6040_v11 = vrot.slane %v11374_v7, %v10003_v33  ;;  %v13379_v27 = vld [vmem:[#allocation44_spill] sm:$0xff] }
 0x554   :  { %7373 = vperm.xlu1 %8519, %v5548_v1   ;;  %7448 = vperm.xlu0 %8518, %v5973_v50   ;;  %v11693_v50 = vcombine.low %v4441_v8, %v4443_v31  ;;  %v4494_v55 = vcombine.high %v4492_v28, %v4492_v28  ;;  %v11695_v16 = vcombine.low %v4485_v24, %v4493_v15  ;;  %v11706_v8 = vpop.permute.xlu0 %7424  ;;  %v13378_v15 = vld [vmem:[#allocation171_spill] sm:$0xff]  ;;  %v13385_v24 = vld [vmem:[#allocation48_spill] sm:$0xff] }
 0x555   :  { %v6007_v1 = vcombine.low %v13373_v38, %v6006_v45  ;;  %v4519_v56 = vrot.slane %v2784_v29, %v10003_v33  ;;  %v4475_v53 = vrot.slane %v4461_v13, %v10003_v33  ;;  %v13375_v49 = vrot.slane %v13374_v58, %v10003_v33  ;;  %v13376_v45 = vld [vmem:[#allocation42_spill] sm:$0xff]  ;;  %v13381_v58 = vld [vmem:[#allocation40_spill] sm:$0xff] }
 0x556   :  { %v5649_v23 = vrot.slane %v11203_v60, %v10003_v33  ;;  %v7845_v7 = vrot.slane %v11622_v36, %v13376_v45  ;;  %v4476_v31 = vcombine.high %v4468_v54, %v4468_v54  ;;  %v13377_v29 = vld [vmem:[#allocation106_spill] sm:$0xff]  ;;  %v7854_v38 = vrot.slane %v7404_v5, %v13379_v27  ;;  %v13382_v5 = vld [vmem:[#allocation115_spill] sm:$0xff] }
 0x557   :  { %v2783_v13 = vmul.f32 %v13378_v15, %v13377_v29  ;;  %v13380_v60 = vrot.slane %v11351_v25, %v10003_v33  ;;  %v7849_v36 = vrot.slane %v11559_v6, %v13381_v58  ;;  %v11721_v46 = vcombine.low %v4492_v28, %v4494_v55  ;;  %v7416_v28 = vpop.permute.xlu1 %7415 }
 0x558   :  { %7379 = vperm.xlu1 %8519, %v5582_v42   ;;  %7454 = vperm.xlu0 %8518, %v6007_v1   ;;  %v5616_v42 = vcombine.low %v13375_v49, %v5615_v14  ;;  %v4526_v1 = vrot.slane %v4512_v47, %v10003_v33  ;;  %v6074_v49 = vrot.slane %v11393_v44, %v10003_v33 }
 0x559   :  { %v6041_v14 = vcombine.low %v13380_v60, %v6040_v11  ;;  %v4527_v15 = vcombine.high %v4519_v56, %v4519_v56  ;;  %v2786_v47 = vmul.f32 %v13383_v12, %v13382_v5  ;;  %v13384_v25 = vrot.slane %v11192_v62, %v10003_v33 }
 0x55a   :  { %v5955_v6 = vrot.slane %v11238_v0, %v10003_v33  ;;  %v7850_v44 = vsel %vm1013_vm0, %v7849_v36, %v7845_v7  ;;  %v11733_v55 = vcombine.low %v4468_v54, %v4476_v31  ;;  %v4495_v60 = vcombine.high %v2783_v13, %v2783_v13  ;;  %v11744_v7 = vpop.permute.xlu0 %7430 }
 0x55b   :  { %v5650_v11 = vcombine.low %v13384_v25, %v5649_v23  ;;  %v7855_v29 = vsel %vm1020_vm1, %v7854_v38, %v7850_v44  ;;  %v7864_v9 = vrot.slane %v7410_v21, %v13385_v24  ;;  %v4528_v12 = vcombine.high %v4526_v1, %v4526_v1  ;;  %v13387_v23 = vld [vmem:[#allocation46_spill] sm:$0xff]  ;;  %v13392_v44 = vld [vmem:[#allocation165_spill] sm:$0xff] }
 0x55c   :  { %7385 = vperm.xlu1 %8519, %v5616_v42   ;;  %v4477_v42 = vcombine.high %v4475_v53, %v4475_v53  ;;  %7460 = vperm.xlu0 %8518, %v6041_v14   ;;  %v13386_v14 = vrot.slane %v11369_v35, %v10003_v33  ;;  %v7859_v5 = vrot.slane %v11599_v20, %v13387_v23  ;;  %v13388_v35 = vld [vmem:[#allocation68_spill] sm:$0xff] }
 0x55d   :  { %v6108_v0 = vrot.slane %v11435_v39, %v10003_v33  ;;  %v11746_v54 = vcombine.low %v4519_v56, %v4527_v15  ;;  %v4502_v31 = vrot.slane %v2783_v13, %v10003_v33  ;;  %v4546_v38 = vcombine.high %v2786_v47, %v2786_v47 }
 0x55e   :  { %v6075_v62 = vcombine.low %v13386_v14, %v6074_v49  ;;  %v4553_v21 = vrot.slane %v2786_v47, %v10003_v33  ;;  %v11750_v36 = vcombine.low %v4475_v53, %v4477_v42  ;;  %v13389_v49 = vrot.slane %v13388_v35, %v10003_v33  ;;  %v13390_v47 = vld [vmem:[#allocation52_spill] sm:$0xff]  ;;  %v7422_v42 = vpop.permute.xlu1 %7421 }
 0x55f   :  { %v5989_v20 = vrot.slane %v11283_v43, %v10003_v33  ;;  %v7860_v39 = vsel %vm1027_vm2, %v7859_v5, %v7855_v29  ;;  %v4509_v13 = vrot.slane %v4495_v60, %v10003_v33  ;;  %v7874_v53 = vrot.slane %v7416_v28, %v13390_v47 }
 0x560   :  { %7391 = vperm.xlu1 %8519, %v5650_v11   ;;  %7466 = vperm.xlu0 %8518, %v6075_v62   ;;  %v5956_v25 = vcombine.low %v13389_v49, %v5955_v6  ;;  %v7865_v15 = vsel %vm1034_vm3, %v7864_v9, %v7860_v39  ;;  %v13391_v11 = vld [vmem:[#allocation110_spill] sm:$0xff]  ;;  %v13393_v6 = vrot.slane %v11409_v18, %v10003_v33  ;;  %v11775_v49 = vpop.permute.xlu0 %7436  ;;  %v13395_v39 = vld [vmem:[#allocation28_spill] sm:$0xff] }
 0x561   :  { %v2785_v14 = vmul.f32 %v13392_v44, %v13391_v11  ;;  %v13394_v62 = vld [vmem:[#allocation50_spill] sm:$0xff]  ;;  %v6142_v5 = vrot.slane %v11472_v34, %v10003_v33  ;;  %v11772_v60 = vcombine.low %v4526_v1, %v4528_v12  ;;  %v4510_v9 = vcombine.high %v4502_v31, %v4502_v31  ;;  %v13398_v44 = vld [vmem:[#allocation56_spill] sm:$0xff] }
 0x562   :  { %v6109_v43 = vcombine.low %v13393_v6, %v6108_v0  ;;  %v7869_v29 = vrot.slane %v11630_v52, %v13394_v62  ;;  %v4560_v28 = vrot.slane %v4546_v38, %v10003_v33  ;;  %v4561_v35 = vcombine.high %v4553_v21, %v4553_v21 }
 0x563   :  { %v13397_v18 = vrot.slane %v11268_v17, %v10003_v33  ;;  %v6023_v52 = vrot.slane %v11307_v4, %v10003_v33  ;;  %v4511_v12 = vcombine.high %v4509_v13, %v4509_v13  ;;  %v7884_v6 = vrot.slane %v7422_v42, %v13398_v44  ;;  %v7428_v42 = vpop.permute.xlu1 %7427 }
 0x564   :  { %7445 = vperm.xlu1 %8519, %v5956_v25   ;;  %v13396_v25 = vld [vmem:[#allocation135_spill] sm:$0xff]  ;;  %7472 = vperm.xlu0 %8518, %v6109_v43   ;;  %v7870_v34 = vsel %vm1041_vm4, %v7869_v29, %v7865_v15  ;;  %v4529_v56 = vcombine.high %v2785_v14, %v2785_v14  ;;  %v13399_v43 = vrot.slane %v11454_v19, %v10003_v33 }
 0x565   :  { %v2804_v11 = vmul.f32 %v13396_v25, %v13395_v39  ;;  %v5990_v0 = vcombine.low %v13397_v18, %v5989_v20  ;;  %v7875_v38 = vsel %vm1048_vm5, %v7874_v53, %v7870_v34  ;;  %v13400_v20 = vld [vmem:[#allocation54_spill] sm:$0xff]  ;;  %v6176_v4 = vrot.slane %v11519_v3, %v10003_v33 }
 0x566   :  { %v6143_v17 = vcombine.low %v13399_v43, %v6142_v5  ;;  %v7879_v39 = vrot.slane %v11667_v63, %v13400_v20  ;;  %v11796_v15 = vcombine.low %v4502_v31, %v4510_v9  ;;  %v4562_v29 = vcombine.high %v4560_v28, %v4560_v28  ;;  %v13403_v9 = vld [vmem:[#allocation60_spill] sm:$0xff]  ;;  %v13406_v43 = vld [vmem:[#allocation114_spill] sm:$0xff] }
 0x567   :  { %v11798_v25 = vcombine.low %v4553_v21, %v4561_v35  ;;  %v4536_v53 = vrot.slane %v2785_v14, %v10003_v33  ;;  %v4852_v18 = vcombine.high %v2804_v11, %v2804_v11  ;;  %v13402_v19 = vrot.slane %v11287_v41, %v10003_v33  ;;  %v11812_v35 = vpop.permute.xlu0 %7442 }
 0x568   :  { %7451 = vperm.xlu1 %8519, %v5990_v0   ;;  %7478 = vperm.xlu0 %8518, %v6143_v17   ;;  %v6057_v63 = vrot.slane %v11339_v2, %v10003_v33  ;;  %v7880_v0 = vsel %vm1055_vm6, %v7879_v39, %v7875_v38  ;;  %v11807_v3 = vcombine.low %v4509_v13, %v4511_v12  ;;  %v13405_v2 = vld [vmem:[#allocation58_spill] sm:$0xff]  ;;  %v13407_v17 = vld [vmem:[#allocation13_spill] sm:$0xff]  ;;  %v7434_v39 = vpop.permute.xlu1 %7433 }
 0x569   :  { %13401 = vst [vmem:[#allocation149_spill] sm:$0xff] %v11798_v25  ;;  %v6024_v5 = vcombine.low %v13402_v19, %v6023_v52  ;;  %v4859_v31 = vrot.slane %v2804_v11, %v10003_v33  ;;  %v7885_v21 = vsel %vm1062_vm7, %v7884_v6, %v7880_v0  ;;  %v7894_v14 = vrot.slane %v7428_v42, %v13403_v9  ;;  %v13423_v11 = vld [vmem:[#allocation132_spill] sm:$0xff] }
 0x56a   :  { %v4543_v34 = vrot.slane %v4529_v56, %v10003_v33  ;;  %v13404_v41 = vrot.slane %v11493_v32, %v10003_v33  ;;  %v7889_v38 = vrot.slane %v11706_v8, %v13405_v2  ;;  %v6210_v13 = vrot.slane %v11550_v48, %v10003_v33  ;;  %v13408_v32 = vld [vmem:[#allocation188_spill] sm:$0xff] }
 0x56b   :  { %v11824_v12 = vcombine.low %v4560_v28, %v4562_v29  ;;  %v4544_v6 = vcombine.high %v4536_v53, %v4536_v53  ;;  %v2787_v56 = vmul.f32 %v13407_v17, %v13406_v43  ;;  %v11829_v42 = vrot.slane %v4852_v18, %v10003_v33  ;;  %v13410_v29 = vld [vmem:[#allocation118_spill] sm:$0xff]  ;;  %v13412_v43 = vld [vmem:[#allocation67_spill] sm:$0xff] }
 0x56c   :  { %7457 = vperm.xlu1 %8519, %v6024_v5   ;;  %v6177_v52 = vcombine.low %v13404_v41, %v6176_v4  ;;  %v13409_v8 = vrot.slane %v13408_v32, %v10003_v33  ;;  %v6091_v48 = vrot.slane %v11378_v10, %v10003_v33  ;;  %v7890_v19 = vsel %vm1069_vm8, %v7889_v38, %v7885_v21  ;;  %v13411_v5 = vld [vmem:[#allocation63_spill] sm:$0xff]  ;;  %v7497_v21 = vpop.permute.xlu0 %7496 }
 0x56d   :  { %v4867_v28 = vcombine.high %v4859_v31, %v4859_v31  ;;  %v2806_v0 = vmul.f32 %v13411_v5, %v13410_v29  ;;  %v7895_v41 = vsel %vm1076_vm9, %v7894_v14, %v7890_v19  ;;  %v7904_v17 = vrot.slane %v7434_v39, %v13412_v43  ;;  %v13417_v19 = vld [vmem:[#allocation24_spill] sm:$0xff] }
 0x56e   :  { %7484 = vperm.xlu0 %8518, %v6177_v52   ;;  %v6058_v4 = vcombine.low %v13409_v8, %v6057_v63  ;;  %v4545_v18 = vcombine.high %v4543_v34, %v4543_v34  ;;  %v13413_v52 = vrot.slane %v11528_v57, %v10003_v33  ;;  %v13414_v63 = vld [vmem:[#allocation64_spill] sm:$0xff]  ;;  %v6516_v10 = vrot.slane %v11593_v37, %v10003_v33 }
 0x56f   :  { %v7899_v8 = vrot.slane %v11744_v7, %v13414_v63  ;;  %v11850_v29 = vcombine.low %v4536_v53, %v4544_v6  ;;  %v4563_v14 = vcombine.high %v2787_v56, %v2787_v56  ;;  %v4570_v39 = vrot.slane %v2787_v56, %v10003_v33  ;;  %v13415_v57 = vld [vmem:[#allocation176_spill] sm:$0xff] }
 0x570   :  { %7463 = vperm.xlu1 %8519, %v6058_v4   ;;  %v6211_v32 = vcombine.low %v13413_v52, %v6210_v13  ;;  %v4868_v4 = vcombine.high %v11829_v42, %v11829_v42  ;;  %v13416_v13 = vrot.slane %v13415_v57, %v10003_v33  ;;  %v6125_v37 = vrot.slane %v13417_v19, %v10003_v33  ;;  %v13421_v19 = vld [vmem:[#allocation15_spill] sm:$0xff] }
 0x571   :  { %v7900_v5 = vsel %vm1083_vm10, %v7899_v8, %v7895_v41  ;;  %v11861_v52 = vcombine.low %v4859_v31, %v4867_v28  ;;  %v4886_v53 = vcombine.high %v2806_v0, %v2806_v0  ;;  %v4893_v6 = vrot.slane %v2806_v0, %v10003_v33  ;;  %v7440_v31 = vpop.permute.xlu1 %7439  ;;  %v13422_v0 = vld [vmem:[#allocation20_spill] sm:$0xff] }
 0x572   :  { %7490 = vperm.xlu0 %8518, %v6211_v32   ;;  %v6092_v7 = vcombine.low %v13416_v13, %v6091_v48  ;;  %v7905_v56 = vsel %vm12649_vm11, %v7904_v17, %v7900_v5  ;;  %v11865_v38 = vcombine.low %v4543_v34, %v4545_v18  ;;  %v13418_v32 = vld [vmem:[#allocation147_spill] sm:$0xff]  ;;  %v13420_v48 = vld [vmem:[#allocation69_spill] sm:$0xff]  ;;  %v6550_v41 = vrot.slane %v13421_v19, %v10003_v33 }
 0x573   :  { %v13419_v1 = vrot.slane %v13418_v32, %v10003_v33  ;;  %v7909_v13 = vrot.slane %v11775_v49, %v13420_v48  ;;  %v4577_v28 = vrot.slane %v4563_v14, %v10003_v33  ;;  %v4578_v8 = vcombine.high %v4570_v39, %v4570_v39  ;;  %v13424_v34 = vld [vmem:[#allocation71_spill] sm:$0xff]  ;;  %v13428_v32 = vld [vmem:[#allocation73_spill] sm:$0xff]  ;;  %v11886_v14 = vpop.permute.xlu0 %7502 }
 0x574   :  { %7469 = vperm.xlu1 %8519, %v6092_v7   ;;  %v2805_v17 = vmul.f32 %v13423_v11, %v13422_v0  ;;  %v7914_v18 = vrot.slane %v7440_v31, %v13424_v34  ;;  %v13425_v7 = vld [vmem:[#allocation178_spill] sm:$0xff]  ;;  %v6159_v19 = vrot.slane %v13428_v32, %v10003_v33  ;;  %v4900_v48 = vrot.slane %v4886_v53, %v10003_v33  ;;  %v13430_v31 = vld [vmem:[#allocation65_spill] sm:$0xff] }
 0x575   :  { %v6517_v57 = vcombine.low %v13419_v1, %v6516_v10  ;;  %v13426_v5 = vrot.slane %v13425_v7, %v10003_v33  ;;  %v13427_v10 = vld [vmem:[#allocation76_spill] sm:$0xff]  ;;  %v7910_v25 = vsel %vm1097_vm12, %v7909_v13, %v7905_v56  ;;  %v4901_v11 = vcombine.high %v4893_v6, %v4893_v6  ;;  %v13429_v0 = vld [vmem:[#allocation122_spill] sm:$0xff]  ;;  %v7494_v53 = vpop.permute.xlu1 %7493 }
 0x576   :  { %v7919_v49 = vrot.slane %v11812_v35, %v13427_v10  ;;  %v7915_v34 = vsel %vm1104_vm13, %v7914_v18, %v7910_v25  ;;  %v13431_v35 = vld [vmem:[#allocation57_spill] sm:$0xff]  ;;  %v6584_v56 = vrot.slane %v11672_v22, %v10003_v33  ;;  %v4869_v32 = vcombine.high %v2805_v17, %v2805_v17  ;;  %v13436_v22 = vld [vmem:[#allocation22_spill] sm:$0xff] }
 0x577   :  { %7544 = vperm.xlu0 %8518, %v6517_v57   ;;  %v6126_v1 = vcombine.low %v13426_v5, %v6125_v37  ;;  %v2808_v57 = vmul.f32 %v13430_v31, %v13429_v0  ;;  %v13432_v7 = vrot.slane %v13431_v35, %v10003_v33  ;;  %v4876_v0 = vrot.slane %v2805_v17, %v10003_v33  ;;  %v13434_v35 = vld [vmem:[#allocation97_spill] sm:$0xff] }
 0x578   :  { %v11900_v13 = vsel %vm1111_vm14, %v7919_v49, %v7915_v34  ;;  %v8007_v25 = vrot.slane %v7497_v21, %v13381_v58  ;;  %v8003_v18 = vrot.slane %v7494_v53, %v13376_v45  ;;  %v4579_v31 = vcombine.high %v4577_v28, %v4577_v28  ;;  %v7509_v21 = vpop.permute.xlu0 %7508 }
 0x579   :  { %7475 = vperm.xlu1 %8519, %v6126_v1   ;;  %v6551_v5 = vcombine.low %v13432_v7, %v6550_v41  ;;  %13433 = vst [vmem:[#allocation41_spill] sm:$0xff] %v11900_v13  ;;  %v11905_v1 = vcombine.low %v4570_v39, %v4578_v8  ;;  %v13435_v41 = vrot.slane %v13434_v35, %v10003_v33  ;;  %v13440_v35 = vld [vmem:[#allocation137_spill] sm:$0xff] }
 0x57a   :  { %v6193_v34 = vrot.slane %v13436_v22, %v10003_v33  ;;  %v4902_v49 = vcombine.high %v4900_v48, %v4900_v48  ;;  %v11912_v37 = vcombine.low %v4893_v6, %v4901_v11  ;;  %v4920_v13 = vcombine.high %v2808_v57, %v2808_v57 }
 0x57b   :  { %7550 = vperm.xlu0 %8518, %v6551_v5   ;;  %v6160_v7 = vcombine.low %v13435_v41, %v6159_v19  ;;  %v8008_v17 = vsel %vm1013_vm0, %v8007_v25, %v8003_v18  ;;  %v11916_v53 = vcombine.low %v11829_v42, %v4868_v4  ;;  %v4927_v39 = vrot.slane %v2808_v57, %v10003_v33  ;;  %v13439_v18 = vld [vmem:[#allocation117_spill] sm:$0xff] }
 0x57c   :  { %13437 = vst [vmem:[#allocation113_spill] sm:$0xff] %v11912_v37  ;;  %v13438_v8 = vrot.slane %v11656_v61, %v10003_v33  ;;  %v6618_v5 = vrot.slane %v11693_v50, %v10003_v33  ;;  %v4883_v11 = vrot.slane %v4869_v32, %v10003_v33  ;;  %v4884_v25 = vcombine.high %v4876_v0, %v4876_v0  ;;  %v13441_v61 = vld [vmem:[#allocation89_spill] sm:$0xff]  ;;  %v13450_v32 = vld [vmem:[#allocation120_spill] sm:$0xff] }
 0x57d   :  { %7481 = vperm.xlu1 %8519, %v6160_v7   ;;  %v2807_v42 = vmul.f32 %v13440_v35, %v13439_v18  ;;  %v11929_v4 = vcombine.low %v4577_v28, %v4579_v31  ;;  %v13443_v50 = vld [vmem:[#allocation93_spill] sm:$0xff]  ;;  %v11938_v22 = vcombine.low %v4900_v48, %v4902_v49  ;;  %v13444_v28 = vld [vmem:[#allocation126_spill] sm:$0xff]  ;;  %v7500_v35 = vpop.permute.xlu1 %7499  ;;  %v4935_v6 = vcombine.high %v4927_v39, %v4927_v39 }
 0x57e   :  { %v6585_v19 = vcombine.low %v13438_v8, %v6584_v56  ;;  %v13442_v56 = vrot.slane %v13441_v61, %v10003_v33  ;;  %v6499_v7 = vrot.slane %v13443_v50, %v10003_v33  ;;  %v4934_v8 = vrot.slane %v4920_v13, %v10003_v33  ;;  %v13445_v31 = vld [vmem:[#allocation170_spill] sm:$0xff]  ;;  %v13451_v57 = vld [vmem:[#allocation145_spill] sm:$0xff] }
 0x57f   :  { %v2810_v18 = vmul.f32 %v13445_v31, %v13444_v28  ;;  %v6652_v61 = vrot.slane %v11750_v36, %v10003_v33  ;;  %v8012_v48 = vrot.slane %v7500_v35, %v13379_v27  ;;  %v4885_v49 = vcombine.high %v4883_v11, %v4883_v11  ;;  %v11955_v28 = vpop.permute.xlu0 %7514  ;;  %v13447_v31 = vld [vmem:[#allocation104_spill] sm:$0xff]  ;;  %v13449_v36 = vld [vmem:[#allocation109_spill] sm:$0xff] }
 0x580   :  { %7556 = vperm.xlu0 %8518, %v6585_v19   ;;  %v6194_v41 = vcombine.low %v13442_v56, %v6193_v34  ;;  %v13446_v19 = vrot.slane %v11683_v26, %v10003_v33  ;;  %v11951_v56 = vcombine.low %v4876_v0, %v4884_v25  ;;  %v4903_v50 = vcombine.high %v2807_v42, %v2807_v42 }
 0x581   :  { %v8017_v13 = vrot.slane %v11886_v14, %v13387_v23  ;;  %v13448_v26 = vrot.slane %v13447_v31, %v10003_v33  ;;  %v8013_v35 = vsel %vm1020_vm1, %v8012_v48, %v8008_v17  ;;  %v4936_v0 = vcombine.high %v4934_v8, %v4934_v8  ;;  %v7506_v14 = vpop.permute.xlu1 %7505 }
 0x582   :  { %7487 = vperm.xlu1 %8519, %v6194_v41   ;;  %v6619_v34 = vcombine.low %v13446_v19, %v6618_v5  ;;  %v4910_v41 = vrot.slane %v2807_v42, %v10003_v33  ;;  %v6533_v19 = vrot.slane %v13449_v36, %v10003_v33  ;;  %v4954_v25 = vcombine.high %v2810_v18, %v2810_v18 }
 0x583   :  { %v6500_v5 = vcombine.low %v13448_v26, %v6499_v7  ;;  %v2809_v27 = vmul.f32 %v13451_v57, %v13450_v32  ;;  %v8018_v23 = vsel %vm1027_vm2, %v8017_v13, %v8013_v35  ;;  %v11967_v37 = vcombine.low %v4927_v39, %v4935_v6  ;;  %v13453_v6 = vld [vmem:[#allocation72_spill] sm:$0xff] }
 0x584   :  { %7562 = vperm.xlu0 %8518, %v6619_v34   ;;  %v13452_v42 = vrot.slane %v11733_v55, %v10003_v33  ;;  %v6686_v34 = vrot.slane %v11807_v3, %v10003_v33  ;;  %v8022_v17 = vrot.slane %v7506_v14, %v13385_v24  ;;  %v11975_v48 = vcombine.low %v4883_v11, %v4885_v49 }
 0x585   :  { %v4917_v31 = vrot.slane %v4903_v50, %v10003_v33  ;;  %v4961_v57 = vrot.slane %v2810_v18, %v10003_v33  ;;  %v8027_v32 = vrot.slane %v7509_v21, %v13394_v62  ;;  %v4918_v39 = vcombine.high %v4910_v41, %v4910_v41  ;;  %v13456_v50 = vld [vmem:[#allocation125_spill] sm:$0xff]  ;;  %v13457_v18 = vld [vmem:[#allocation10_spill] sm:$0xff] }
 0x586   :  { %7541 = vperm.xlu1 %8519, %v6500_v5   ;;  %v6653_v7 = vcombine.low %v13452_v42, %v6652_v61  ;;  %v13454_v13 = vrot.slane %v13453_v6, %v10003_v33  ;;  %v13455_v61 = vld [vmem:[#allocation81_spill] sm:$0xff]  ;;  %v8023_v3 = vsel %vm1034_vm3, %v8022_v17, %v8018_v23  ;;  %v7521_v5 = vpop.permute.xlu0 %7520  ;;  %v11987_v11 = vrot.slane %v4954_v25, %v10003_v33  ;;  %v13460_v6 = vld [vmem:[#allocation179_spill] sm:$0xff] }
 0x587   :  { %v6567_v26 = vrot.slane %v13455_v61, %v10003_v33  ;;  %v4937_v49 = vcombine.high %v2809_v27, %v2809_v27  ;;  %v2811_v36 = vmul.f32 %v13457_v18, %v13456_v50  ;;  %v8028_v21 = vsel %vm1041_vm4, %v8027_v32, %v8023_v3  ;;  %v13459_v32 = vld [vmem:[#allocation130_spill] sm:$0xff]  ;;  %v13463_v18 = vld [vmem:[#allocation128_spill] sm:$0xff] }
 0x588   :  { %7568 = vperm.xlu0 %8518, %v6653_v7   ;;  %v6534_v55 = vcombine.low %v13454_v13, %v6533_v19  ;;  %v7053_v35 = vrot.slane %v11951_v56, %v10003_v33  ;;  %v11994_v14 = vcombine.low %v4934_v8, %v4936_v0  ;;  %v13458_v19 = vrot.slane %v11796_v15, %v10003_v33  ;;  %v13461_v0 = vld [vmem:[#allocation150_spill] sm:$0xff] }
 0x589   :  { %v6720_v25 = vrot.slane %v11865_v38, %v10003_v33  ;;  %v7104_v42 = vrot.slane %v11967_v37, %v10003_v33  ;;  %v4969_v7 = vcombine.high %v4961_v57, %v4961_v57  ;;  %v4944_v17 = vrot.slane %v2809_v27, %v10003_v33 }
 0x58a   :  { %7547 = vperm.xlu1 %8519, %v6534_v55   ;;  %v6687_v23 = vcombine.low %v13458_v19, %v6686_v34  ;;  %v2812_v13 = vmul.f32 %v13460_v6, %v13459_v32  ;;  %v4919_v56 = vcombine.high %v4917_v31, %v4917_v31  ;;  %v12006_v8 = vcombine.low %v4910_v41, %v4918_v39  ;;  %v7512_v55 = vpop.permute.xlu1 %7511  ;;  %v13464_v41 = vld [vmem:[#allocation70_spill] sm:$0xff]  ;;  %v12026_v32 = vpop.permute.xlu0 %7526 }
 0x58b   :  { %v13462_v15 = vrot.slane %v13461_v0, %v10003_v33  ;;  %v6601_v38 = vrot.slane %v11654_v30, %v10003_v33  ;;  %v4970_v61 = vcombine.high %v11987_v11, %v11987_v11  ;;  %v4951_v27 = vrot.slane %v4937_v49, %v10003_v33 }
 0x58c   :  { %7574 = vperm.xlu0 %8518, %v6687_v23   ;;  %v4971_v3 = vcombine.high %v2811_v36, %v2811_v36  ;;  %v8032_v50 = vrot.slane %v7512_v55, %v13390_v47  ;;  %v2813_v39 = vmul.f32 %v13464_v41, %v13463_v18  ;;  %v8037_v19 = vrot.slane %v11955_v28, %v13400_v20  ;;  %v13468_v41 = vld [vmem:[#allocation86_spill] sm:$0xff] }
 0x58d   :  { %v6568_v34 = vcombine.low %v13462_v15, %v6567_v26  ;;  %v13465_v26 = vrot.slane %v11850_v29, %v10003_v33  ;;  %v6754_v23 = vrot.slane %v11929_v4, %v10003_v33  ;;  %v12028_v49 = vcombine.low %v4961_v57, %v4969_v7  ;;  %v13467_v7 = vld [vmem:[#allocation134_spill] sm:$0xff] }
 0x58e   :  { %v4952_v6 = vcombine.high %v4944_v17, %v4944_v17  ;;  %v4988_v0 = vcombine.high %v2812_v13, %v2812_v13  ;;  %v8033_v15 = vsel %vm1048_vm5, %v8032_v50, %v8028_v21  ;;  %v7080_v55 = vcombine.low %v4917_v31, %v4919_v56 }
 0x58f   :  { %7553 = vperm.xlu1 %8519, %v6568_v34   ;;  %v6721_v30 = vcombine.low %v13465_v26, %v6720_v25  ;;  %v13466_v28 = vrot.slane %v11632_v51, %v10003_v33  ;;  %v6635_v29 = vrot.slane %v11681_v59, %v10003_v33  ;;  %v7518_v25 = vpop.permute.xlu1 %7517  ;;  %v8038_v4 = vsel %vm1055_vm6, %v8037_v19, %v8033_v15  ;;  %v7533_v15 = vpop.permute.xlu0 %7532 }
 0x590   :  { %v4953_v18 = vcombine.high %v4951_v27, %v4951_v27  ;;  %v4985_v57 = vrot.slane %v4971_v3, %v10003_v33  ;;  %v2814_v26 = vmul.f32 %v13468_v41, %v13467_v7  ;;  %v8042_v21 = vrot.slane %v7518_v25, %v13398_v44 }
 0x591   :  { %7580 = vperm.xlu0 %8518, %v6721_v30   ;;  %v6602_v34 = vcombine.low %v13466_v28, %v6601_v38  ;;  %v5005_v31 = vcombine.high %v2813_v39, %v2813_v39  ;;  %v8047_v56 = vrot.slane %v7521_v5, %v13405_v2  ;;  %v13469_v51 = vrot.slane %v11905_v1, %v10003_v33 }
 0x592   :  { %v7060_v59 = vrot.slane %v11975_v48, %v10003_v33  ;;  %v7087_v50 = vrot.slane %v12006_v8, %v10003_v33  ;;  %v7113_v3 = vcombine.low %v4944_v17, %v4952_v6  ;;  %v12050_v19 = vrot.slane %v2812_v13, %v10003_v33  ;;  %v13471_v6 = vld [vmem:[#allocation133_spill] sm:$0xff] }
 0x593   :  { %7559 = vperm.xlu1 %8519, %v6602_v34   ;;  %v6755_v38 = vcombine.low %v13469_v51, %v6754_v23  ;;  %v8043_v30 = vsel %vm1062_vm7, %v8042_v21, %v8038_v4  ;;  %v4978_v5 = vrot.slane %v2811_v36, %v10003_v33  ;;  %v13470_v1 = vrot.slane %v11658_v40, %v10003_v33  ;;  %v13472_v34 = vld [vmem:[#allocation17_spill] sm:$0xff]  ;;  %v13474_v21 = vld [vmem:[#allocation172_spill] sm:$0xff]  ;;  %v7524_v51 = vpop.permute.xlu1 %7523 }
 0x594   :  { %v6669_v48 = vrot.slane %v11721_v46, %v10003_v33  ;;  %v8048_v28 = vsel %vm1069_vm8, %v8047_v56, %v8043_v30  ;;  %v12061_v17 = vrot.slane %v4988_v0, %v10003_v33  ;;  %v4987_v13 = vcombine.high %v4985_v57, %v4985_v57  ;;  %v13473_v0 = vld [vmem:[#allocation138_spill] sm:$0xff] }
 0x595   :  { %7586 = vperm.xlu0 %8518, %v6755_v38   ;;  %v6636_v23 = vcombine.low %v13470_v1, %v6635_v29  ;;  %v5022_v8 = vcombine.high %v2814_v26, %v2814_v26  ;;  %v2815_v25 = vmul.f32 %v13472_v34, %v13471_v6  ;;  %v7114_v4 = vcombine.low %v4951_v27, %v4953_v18 }
 0x596   :  { %v5019_v36 = vrot.slane %v5005_v31, %v10003_v33  ;;  %v7061_v7 = vcombine.low %v7053_v35, %v7060_v59  ;;  %v7094_v40 = vrot.slane %v7080_v55, %v10003_v33  ;;  %v7121_v29 = vrot.slane %v7113_v3, %v10003_v33  ;;  %v7539_v3 = vpop.permute.xlu0 %7538 }
 0x597   :  { %7565 = vperm.xlu1 %8519, %v6636_v23   ;;  %v5029_v46 = vrot.slane %v2814_v26, %v10003_v33  ;;  %v5012_v41 = vrot.slane %v2813_v39, %v10003_v33  ;;  %v2816_v56 = vmul.f32 %v13474_v21, %v13473_v0  ;;  %v4986_v38 = vcombine.high %v4978_v5, %v4978_v5  ;;  %v13478_v0 = vld [vmem:[#allocation77_spill] sm:$0xff] }
 0x598   :  { %v13475_v27 = vrot.slane %v11695_v16, %v10003_v33  ;;  %v8052_v35 = vrot.slane %v7524_v51, %v13403_v9  ;;  %v6703_v55 = vrot.slane %v11772_v60, %v10003_v33  ;;  %v7148_v31 = vcombine.low %v4985_v57, %v4987_v13  ;;  %v13479_v51 = vld [vmem:[#allocation69_spill] sm:$0xff] }
 0x599   :  { %7640 = vperm.xlu0 %8518, %v7061_v7   ;;  %v5036_v26 = vrot.slane %v5022_v8, %v10003_v33  ;;  %v5039_v59 = vcombine.high %v2815_v25, %v2815_v25  ;;  %v8057_v39 = vrot.slane %v12026_v32, %v13414_v63  ;;  %v5021_v30 = vcombine.high %v5019_v36, %v5019_v36  ;;  %v7530_v7 = vpop.permute.xlu1 %7529 }
 0x59a   :  { %v6670_v18 = vcombine.low %v13475_v27, %v6669_v48  ;;  %v7095_v1 = vcombine.low %v7087_v50, %v7094_v40  ;;  %v8053_v23 = vsel %vm1076_vm9, %v8052_v35, %v8048_v28  ;;  %v7128_v16 = vrot.slane %v7114_v4, %v10003_v33  ;;  %v13477_v40 = vld [vmem:[#allocation136_spill] sm:$0xff] }
 0x59b   :  { %v5037_v48 = vcombine.high %v5029_v46, %v5029_v46  ;;  %v5020_v6 = vcombine.high %v5012_v41, %v5012_v41  ;;  %v5056_v34 = vcombine.high %v2816_v56, %v2816_v56  ;;  %v8058_v60 = vsel %vm1083_vm10, %v8057_v39, %v8053_v23  ;;  %v13483_v23 = vld [vmem:[#allocation148_spill] sm:$0xff] }
 0x59c   :  { %7571 = vperm.xlu1 %8519, %v6670_v18   ;;  %v7147_v57 = vcombine.low %v4978_v5, %v4986_v38  ;;  %v13476_v13 = vrot.slane %v11746_v54, %v10003_v33  ;;  %v8062_v8 = vrot.slane %v7530_v7, %v13412_v43  ;;  %v6737_v50 = vrot.slane %v11824_v12, %v10003_v33  ;;  %v7593_v54 = vpop.permute.xlu0 %7592 }
 0x59d   :  { %7646 = vperm.xlu0 %8518, %v7095_v1   ;;  %v5038_v28 = vcombine.high %v5036_v26, %v5036_v26  ;;  %v5053_v4 = vrot.slane %v5039_v59, %v10003_v33  ;;  %v2817_v21 = vmul.f32 %v13478_v0, %v13477_v40  ;;  %v8067_v27 = vrot.slane %v7533_v15, %v13479_v51 }
 0x59e   :  { %v6704_v32 = vcombine.low %v13476_v13, %v6703_v55  ;;  %v7182_v18 = vcombine.low %v5019_v36, %v5021_v30  ;;  %v7129_v5 = vcombine.low %v7121_v29, %v7128_v16  ;;  %v8063_v38 = vsel %vm12649_vm11, %v8062_v8, %v8058_v60  ;;  %v13480_v29 = vld [vmem:[#allocation149_spill] sm:$0xff]  ;;  %v7536_v60 = vpop.permute.xlu1 %7535  ;;  %v13484_v8 = vld [vmem:[#allocation71_spill] sm:$0xff] }
 0x59f   :  { %v7162_v35 = vrot.slane %v7148_v31, %v10003_v33  ;;  %v12100_v12 = vcombine.low %v11987_v11, %v4970_v61  ;;  %v7181_v55 = vcombine.low %v5012_v41, %v5020_v6  ;;  %v5070_v59 = vrot.slane %v5056_v34, %v10003_v33  ;;  %v13482_v41 = vld [vmem:[#allocation140_spill] sm:$0xff] }
 0x5a0   :  { %7577 = vperm.xlu1 %8519, %v6704_v32   ;;  %v8068_v39 = vsel %vm1097_vm12, %v8067_v27, %v8063_v38  ;;  %v7155_v15 = vrot.slane %v7147_v57, %v10003_v33  ;;  %v5046_v36 = vrot.slane %v2815_v25, %v10003_v33  ;;  %v13481_v30 = vrot.slane %v13480_v29, %v10003_v33  ;;  %v12120_v27 = vpop.permute.xlu0 %7598  ;;  %v13486_v38 = vld [vmem:[#allocation139_spill] sm:$0xff] }
 0x5a1   :  { %7652 = vperm.xlu0 %8518, %v7129_v5   ;;  %v7043_v1 = vrot.slane %v11916_v53, %v10003_v33  ;;  %v5004_v11 = vcombine.high %v12061_v17, %v12061_v17  ;;  %v5055_v61 = vcombine.high %v5053_v4, %v5053_v4  ;;  %v2818_v16 = vmul.f32 %v13483_v23, %v13482_v41 }
 0x5a2   :  { %v6738_v31 = vcombine.low %v13481_v30, %v6737_v50  ;;  %v5073_v6 = vcombine.high %v2817_v21, %v2817_v21  ;;  %v7198_v34 = vcombine.low %v5029_v46, %v5037_v48  ;;  %v7199_v7 = vcombine.low %v5036_v26, %v5038_v28  ;;  %v7590_v29 = vpop.permute.xlu1 %7589 }
 0x5a3   :  { %v7163_v25 = vcombine.low %v7155_v15, %v7162_v35  ;;  %v7196_v57 = vrot.slane %v7182_v18, %v10003_v33  ;;  %v7189_v13 = vrot.slane %v7181_v55, %v10003_v33  ;;  %v5063_v32 = vrot.slane %v2816_v56, %v10003_v33  ;;  %v13487_v35 = vld [vmem:[#allocation144_spill] sm:$0xff] }
 0x5a4   :  { %7583 = vperm.xlu1 %8519, %v6738_v31   ;;  %v5072_v53 = vcombine.high %v5070_v59, %v5070_v59  ;;  %v8072_v50 = vrot.slane %v7536_v60, %v13484_v8  ;;  %v5054_v40 = vcombine.high %v5046_v36, %v5046_v36  ;;  %v8077_v0 = vrot.slane %v7539_v3, %v13427_v10  ;;  %v7605_v60 = vpop.permute.xlu0 %7604 }
 0x5a5   :  { %7658 = vperm.xlu0 %8518, %v7163_v25   ;;  %v13485_v46 = vrot.slane %v11861_v52, %v10003_v33  ;;  %v7077_v48 = vrot.slane %v11938_v22, %v10003_v33  ;;  %v7216_v28 = vcombine.low %v5053_v4, %v5055_v61  ;;  %v5090_v18 = vcombine.high %v2818_v16, %v2818_v16  ;;  %v13488_v61 = vld [vmem:[#allocation113_spill] sm:$0xff] }
 0x5a6   :  { %v5087_v56 = vrot.slane %v5073_v6, %v10003_v33  ;;  %v8073_v5 = vsel %vm1104_vm13, %v8072_v50, %v8068_v39  ;;  %v2819_v55 = vmul.f32 %v13487_v35, %v13486_v38  ;;  %v7197_v15 = vcombine.low %v7189_v13, %v7196_v57  ;;  %v13490_v50 = vld [vmem:[#allocation163_spill] sm:$0xff] }
 0x5a7   :  { %v7044_v26 = vcombine.low %v13485_v46, %v7043_v1  ;;  %v12132_v3 = vsel %vm1111_vm14, %v8077_v0, %v8073_v5  ;;  %v7213_v52 = vrot.slane %v7199_v7, %v10003_v33  ;;  %v5071_v30 = vcombine.high %v5063_v32, %v5063_v32  ;;  %v7596_v5 = vpop.permute.xlu1 %7595 }
 0x5a8   :  { %v5080_v22 = vrot.slane %v2817_v21, %v10003_v33  ;;  %v8165_v4 = vrot.slane %v7593_v54, %v13381_v58  ;;  %v8161_v31 = vrot.slane %v7590_v29, %v13376_v45  ;;  %v7206_v39 = vrot.slane %v7198_v34, %v10003_v33  ;;  %v13492_v29 = vld [vmem:[#allocation46_spill] sm:$0xff] }
 0x5a9   :  { %7637 = vperm.xlu1 %8519, %v7044_v26   ;;  %v7215_v1 = vcombine.low %v5046_v36, %v5054_v40  ;;  %7664 = vperm.xlu0 %8518, %v7197_v15   ;;  %v13489_v41 = vrot.slane %v13488_v61, %v10003_v33  ;;  %v7111_v6 = vrot.slane %v11994_v14, %v10003_v33 }
 0x5aa   :  { %v5003_v7 = vcombine.high %v12050_v19, %v12050_v19  ;;  %v5104_v21 = vrot.slane %v5090_v18, %v10003_v33  ;;  %v5089_v25 = vcombine.high %v5087_v56, %v5087_v56  ;;  %v8166_v54 = vsel %vm1013_vm0, %v8165_v4, %v8161_v31  ;;  %v13493_v31 = vld [vmem:[#allocation161_spill] sm:$0xff] }
 0x5ab   :  { %v7078_v23 = vcombine.low %v13489_v41, %v7077_v48  ;;  %v7233_v57 = vcombine.low %v5070_v59, %v5072_v53  ;;  %v5107_v34 = vcombine.high %v2819_v55, %v2819_v55  ;;  %v7214_v36 = vcombine.low %v7206_v39, %v7213_v52  ;;  %v7611_v52 = vpop.permute.xlu0 %7610  ;;  %v7602_v41 = vpop.permute.xlu1 %7601 }
 0x5ac   :  { %v7230_v13 = vrot.slane %v7216_v28, %v10003_v33  ;;  %v4817_v40 = vcombine.high %v13490_v50, %v13490_v50  ;;  %v7232_v0 = vcombine.low %v5063_v32, %v5071_v30  ;;  %v5097_v14 = vrot.slane %v2818_v16, %v10003_v33 }
 0x5ad   :  { %7643 = vperm.xlu1 %8519, %v7078_v23   ;;  %v5088_v46 = vcombine.high %v5080_v22, %v5080_v22  ;;  %v7165_v26 = vcombine.low %v12061_v17, %v5004_v11  ;;  %v7223_v48 = vrot.slane %v7215_v1, %v10003_v33  ;;  %7667 = vperm.xlu0 %8518, %v7214_v36   ;;  %v13491_v11 = vld [vmem:[#allocation44_spill] sm:$0xff] }
 0x5ae   :  { %v7112_v59 = vcombine.low %v7104_v42, %v7111_v6  ;;  %v7145_v53 = vrot.slane %v12100_v12, %v10003_v33  ;;  %v7138_v28 = vrot.slane %v12028_v49, %v10003_v33  ;;  %v7164_v32 = vcombine.low %v12050_v19, %v5003_v7 }
 0x5af   :  { %v5106_v18 = vcombine.high %v5104_v21, %v5104_v21  ;;  %v7250_v16 = vcombine.low %v5087_v56, %v5089_v25  ;;  %v5121_v17 = vrot.slane %v5107_v34, %v10003_v33  ;;  %v8170_v38 = vrot.slane %v7596_v5, %v13491_v11  ;;  %v7617_v36 = vpop.permute.xlu0 %7616 }
 0x5b0   :  { %v7231_v35 = vcombine.low %v7223_v48, %v7230_v13  ;;  %v7247_v37 = vrot.slane %v7233_v57, %v10003_v33  ;;  %v7240_v42 = vrot.slane %v7232_v0, %v10003_v33  ;;  %v5105_v15 = vcombine.high %v5097_v14, %v5097_v14  ;;  %v13496_v48 = vld [vmem:[#allocation23_spill] sm:$0xff] }
 0x5b1   :  { %7649 = vperm.xlu1 %8519, %v7112_v59   ;;  %v7249_v12 = vcombine.low %v5080_v22, %v5088_v46  ;;  %v8175_v49 = vrot.slane %v12120_v27, %v13492_v29  ;;  %v5114_v19 = vrot.slane %v2819_v55, %v10003_v33  ;;  %v8171_v56 = vsel %vm1020_vm1, %v8170_v38, %v8166_v54  ;;  %v13495_v46 = vld [vmem:[#allocation124_spill] sm:$0xff] }
 0x5b2   :  { %7670 = vperm.xlu0 %8518, %v7231_v35   ;;  %v7146_v30 = vcombine.low %v7138_v28, %v7145_v53  ;;  %v7179_v4 = vrot.slane %v7165_v26, %v10003_v33  ;;  %v13494_v39 = vcombine.high %v13493_v31, %v13493_v31  ;;  %v7172_v61 = vrot.slane %v7164_v32, %v10003_v33  ;;  %v13497_v53 = vld [vmem:[#allocation162_spill] sm:$0xff]  ;;  %v13499_v38 = vld [vmem:[#allocation160_spill] sm:$0xff] }
 0x5b3   :  { %v7267_v22 = vcombine.low %v5104_v21, %v5106_v18  ;;  %v8176_v27 = vsel %vm1027_vm2, %v8175_v49, %v8171_v56  ;;  %v5123_v23 = vcombine.high %v5121_v17, %v5121_v17  ;;  %v8180_v55 = vrot.slane %v7602_v41, %v13385_v24  ;;  %v7353_v49 = vpop.permute.xlu0 %7352 }
 0x5b4   :  { %v4849_v1 = vrot.slane %v13494_v39, %v10003_v33  ;;  %v7248_v6 = vcombine.low %v7240_v42, %v7247_v37  ;;  %v7264_v7 = vrot.slane %v7250_v16, %v10003_v33  ;;  %v6978_v25 = vcombine.low %v13490_v50, %v4817_v40 }
 0x5b5   :  { %7655 = vperm.xlu1 %8519, %v7146_v30   ;;  %v7266_v54 = vcombine.low %v5097_v14, %v5105_v15  ;;  %v7257_v57 = vrot.slane %v7249_v12, %v10003_v33  ;;  %v8185_v34 = vrot.slane %v7605_v60, %v13394_v62  ;;  %v5122_v13 = vcombine.high %v5114_v19, %v5114_v19  ;;  %v7608_v14 = vpop.permute.xlu1 %7607 }
 0x5b6   :  { %v8181_v21 = vsel %vm1034_vm3, %v8180_v55, %v8176_v27  ;;  %7673 = vperm.xlu0 %8518, %v7248_v6   ;;  %v7180_v0 = vcombine.low %v7172_v61, %v7179_v4  ;;  %v6975_v26 = vrot.slane %v13495_v46, %v10003_v33  ;;  %v6968_v59 = vrot.slane %v13496_v48, %v10003_v33 }
 0x5b7   :  { %v13498_v50 = vcombine.high %v13497_v53, %v13497_v53  ;;  %v4842_v60 = vrot.slane %v13493_v31, %v10003_v33  ;;  %v8186_v28 = vsel %vm1041_vm4, %v8185_v34, %v8181_v21  ;;  %v7284_v32 = vcombine.low %v5121_v17, %v5123_v23  ;;  %v13501_v31 = vld [vmem:[#allocation121_spill] sm:$0xff] }
 0x5b8   :  { %v8190_v18 = vrot.slane %v7608_v14, %v13390_v47  ;;  %v7265_v16 = vcombine.low %v7257_v57, %v7264_v7  ;;  %v7281_v5 = vrot.slane %v7267_v22, %v10003_v33  ;;  %v13500_v35 = vcombine.high %v13499_v38, %v13499_v38 }
 0x5b9   :  { %v6977_v40 = vcombine.low %v13497_v53, %v13498_v50  ;;  %7661 = vperm.xlu1 %8519, %v7180_v0   ;;  %v4851_v42 = vcombine.high %v4849_v1, %v4849_v1  ;;  %v7274_v15 = vrot.slane %v7266_v54, %v10003_v33  ;;  %v8195_v12 = vrot.slane %v7611_v52, %v13400_v20  ;;  %v7614_v41 = vpop.permute.xlu1 %7613 }
 0x5ba   :  { %v6995_v37 = vcombine.low %v13499_v38, %v13500_v35  ;;  %v7283_v56 = vcombine.low %v5114_v19, %v5122_v13  ;;  %v8191_v17 = vsel %vm1048_vm5, %v8190_v18, %v8186_v28  ;;  %7676 = vperm.xlu0 %8518, %v7265_v16   ;;  %v6976_v30 = vcombine.low %v6968_v59, %v6975_v26 }
 0x5bb   :  { %v6992_v4 = vrot.slane %v6978_v25, %v10003_v33  ;;  %v13502_v39 = vcombine.high %v13501_v31, %v13501_v31  ;;  %v4850_v22 = vcombine.high %v4842_v60, %v4842_v60  ;;  %v8196_v27 = vsel %vm1055_vm6, %v8195_v12, %v8191_v17  ;;  %v7359_v25 = vpop.permute.xlu0 %7358 }
 0x5bc   :  { %v6985_v23 = vrot.slane %v6977_v40, %v10003_v33  ;;  %v8200_v52 = vrot.slane %v7614_v41, %v13398_v44  ;;  %v7282_v19 = vcombine.low %v7274_v15, %v7281_v5  ;;  %v7298_v55 = vrot.slane %v7284_v32, %v10003_v33 }
 0x5bd   :  { %v6994_v61 = vcombine.low %v13501_v31, %v13502_v39  ;;  %7625 = vperm.xlu1 %8519, %v6976_v30   ;;  %v7012_v6 = vcombine.low %v4849_v1, %v4851_v42  ;;  %v8205_v7 = vrot.slane %v7617_v36, %v13405_v2  ;;  %v7291_v54 = vrot.slane %v7283_v56, %v10003_v33  ;;  %v7620_v21 = vpop.permute.xlu1 %7619 }
 0x5be   :  { %v8201_v57 = vsel %vm1062_vm7, %v8200_v52, %v8196_v27  ;;  %7679 = vperm.xlu0 %8518, %v7282_v19   ;;  %v6993_v34 = vcombine.low %v6985_v23, %v6992_v4  ;;  %v7009_v13 = vrot.slane %v6995_v37, %v10003_v33  ;;  %v7011_v26 = vcombine.low %v4842_v60, %v4850_v22 }
 0x5bf   :  { %v8206_v0 = vsel %vm1069_vm8, %v8205_v7, %v8201_v57  ;;  %v7002_v46 = vrot.slane %v6994_v61, %v10003_v33  ;;  %v8210_v48 = vrot.slane %v7620_v21, %v13403_v9  ;;  %v7299_v1 = vcombine.low %v7291_v54, %v7298_v55  ;;  %v7365_v36 = vpop.permute.xlu0 %7364 }
 0x5c0   :  { %v7026_v50 = vrot.slane %v7012_v6, %v10003_v33  ;;  %v7019_v14 = vrot.slane %v7011_v26, %v10003_v33  ;;  %v7770_v5 = vrot.slane %v7353_v49, %v13381_v58  ;;  %v7780_v12 = vrot.slane %v7359_v25, %v13492_v29 }
 0x5c1   :  { %7628 = vperm.xlu1 %8519, %v6993_v34   ;;  %v8211_v59 = vsel %vm1076_vm9, %v8210_v48, %v8206_v0  ;;  %v7010_v53 = vcombine.low %v7002_v46, %v7009_v13  ;;  %v7623_v40 = vpop.permute.xlu1 %7622  ;;  %v7790_v49 = vrot.slane %v7365_v36, %v13394_v62 }
 0x5c2   :  { %7682 = vperm.xlu0 %8518, %v7299_v1   ;;  %v8215_v28 = vrot.slane %v7623_v40, %v13414_v63  ;;  %v7027_v18 = vcombine.low %v7019_v14, %v7026_v50 }
 0x5c3   :  { %v7371_v32 = vpop.permute.xlu0 %7370 }
 0x5c4   :  { %v12224_v60 = vsel %vm1083_vm10, %v8215_v28, %v8211_v59  ;;  %v7800_v23 = vrot.slane %v7371_v32, %v13400_v20 }
 0x5c5   :  { %7631 = vperm.xlu1 %8519, %v7010_v53   ;;  %v7350_v16 = vpop.permute.xlu1 %7349 }
 0x5c6   :  { %v7766_v38 = vrot.slane %v7350_v16, %v13376_v45 }
 0x5c7   :  { %v7377_v35 = vpop.permute.xlu0 %7376 }
 0x5c8   :  { %v7771_v37 = vsel %vm1013_vm0, %v7770_v5, %v7766_v38  ;;  %v7810_v25 = vrot.slane %v7377_v35, %v13405_v2 }
 0x5c9   :  { %7634 = vperm.xlu1 %8519, %v7027_v18   ;;  %v7356_v42 = vpop.permute.xlu1 %7355 }
 0x5ca   :  { %v7775_v15 = vrot.slane %v7356_v42, %v13491_v11 }
 0x5cb   :  { %v7383_v56 = vpop.permute.xlu0 %7382 }
 0x5cc   :  { %v7776_v17 = vsel %vm1020_vm1, %v7775_v15, %v7771_v37  ;;  %v7820_v0 = vrot.slane %v7383_v56, %v13414_v63 }
 0x5cd   :  { %v7362_v30 = vpop.permute.xlu1 %7361  ;;  %v7781_v4 = vsel %vm1027_vm2, %v7780_v12, %v7776_v17 }
 0x5ce   :  { %v7785_v31 = vrot.slane %v7362_v30, %v13385_v24 }
 0x5cf   :  { %v7389_v39 = vpop.permute.xlu0 %7388 }
 0x5d0   :  { %v7786_v61 = vsel %vm1034_vm3, %v7785_v31, %v7781_v4  ;;  %v7830_v59 = vrot.slane %v7389_v39, %v13479_v51 }
 0x5d1   :  { %v7368_v22 = vpop.permute.xlu1 %7367  ;;  %v7791_v41 = vsel %vm1041_vm4, %v7790_v49, %v7786_v61 }
 0x5d2   :  { %v7795_v27 = vrot.slane %v7368_v22, %v13390_v47 }
 0x5d3   :  { %v7395_v52 = vpop.permute.xlu0 %7394 }
 0x5d4   :  { %v7796_v19 = vsel %vm1048_vm5, %v7795_v27, %v7791_v41  ;;  %v7840_v32 = vrot.slane %v7395_v52, %v13427_v10 }
 0x5d5   :  { %v7374_v55 = vpop.permute.xlu1 %7373  ;;  %v7801_v6 = vsel %vm1055_vm6, %v7800_v23, %v7796_v19 }
 0x5d6   :  { %v7805_v7 = vrot.slane %v7374_v55, %v13398_v44 }
 0x5d7   :  { %v7449_v54 = vpop.permute.xlu0 %7448 }
 0x5d8   :  { %v7806_v57 = vsel %vm1062_vm7, %v7805_v7, %v7801_v6  ;;  %v7928_v35 = vrot.slane %v7449_v54, %v13381_v58 }
 0x5d9   :  { %v7380_v34 = vpop.permute.xlu1 %7379  ;;  %v7811_v13 = vsel %vm1069_vm8, %v7810_v25, %v7806_v57 }
 0x5da   :  { %v7815_v21 = vrot.slane %v7380_v34, %v13403_v9 }
 0x5db   :  { %v7455_v46 = vpop.permute.xlu0 %7454 }
 0x5dc   :  { %v7816_v26 = vsel %vm1076_vm9, %v7815_v21, %v7811_v13  ;;  %v7938_v17 = vrot.slane %v7455_v46, %v13492_v29 }
 0x5dd   :  { %v7386_v48 = vpop.permute.xlu1 %7385  ;;  %v7821_v1 = vsel %vm1083_vm10, %v7820_v0, %v7816_v26 }
 0x5de   :  { %v7825_v36 = vrot.slane %v7386_v48, %v13412_v43 }
 0x5df   :  { %v7461_v53 = vpop.permute.xlu0 %7460 }
 0x5e0   :  { %v7826_v50 = vsel %vm12649_vm11, %v7825_v36, %v7821_v1  ;;  %v7948_v61 = vrot.slane %v7461_v53, %v13394_v62 }
 0x5e1   :  { %v7392_v40 = vpop.permute.xlu1 %7391  ;;  %v7831_v14 = vsel %vm1097_vm12, %v7830_v59, %v7826_v50 }
 0x5e2   :  { %v7835_v28 = vrot.slane %v7392_v40, %v13484_v8 }
 0x5e3   :  { %v7467_v18 = vpop.permute.xlu0 %7466 }
 0x5e4   :  { %v7836_v16 = vsel %vm1104_vm13, %v7835_v28, %v7831_v14  ;;  %v7958_v19 = vrot.slane %v7467_v18, %v13400_v20 }
 0x5e5   :  { %v12257_v5 = vsel %vm1111_vm14, %v7840_v32, %v7836_v16  ;;  %v7446_v38 = vpop.permute.xlu1 %7445 }
 0x5e6   :  { %v7924_v37 = vrot.slane %v7446_v38, %v13376_v45 }
 0x5e7   :  { %v7473_v42 = vpop.permute.xlu0 %7472 }
 0x5e8   :  { %v7929_v15 = vsel %vm1013_vm0, %v7928_v35, %v7924_v37  ;;  %v7968_v57 = vrot.slane %v7473_v42, %v13405_v2  ;;  %v13503_v37 = vld [vmem:[#allocation146_spill] sm:$0xff] }
 0x5e9   :  { %v7452_v12 = vpop.permute.xlu1 %7451  ;;  %v7691_v42 = vrot.slane %v13503_v37, %v13381_v58 }
 0x5ea   :  { %v7933_v56 = vrot.slane %v7452_v12, %v13491_v11 }
 0x5eb   :  { %v7479_v30 = vpop.permute.xlu0 %7478 }
 0x5ec   :  { %v7934_v4 = vsel %vm1020_vm1, %v7933_v56, %v7929_v15  ;;  %v7978_v26 = vrot.slane %v7479_v30, %v13414_v63  ;;  %v13504_v56 = vld [vmem:[#allocation181_spill] sm:$0xff]  ;;  %v13505_v30 = vld [vmem:[#allocation175_spill] sm:$0xff] }
 0x5ed   :  { %v7458_v31 = vpop.permute.xlu1 %7457  ;;  %v7939_v49 = vsel %vm1027_vm2, %v7938_v17, %v7934_v4  ;;  %v7696_v17 = vrot.slane %v13504_v56, %v13491_v11  ;;  %v7687_v4 = vrot.slane %v13505_v30, %v13376_v45 }
 0x5ee   :  { %v7943_v39 = vrot.slane %v7458_v31, %v13385_v24 }
 0x5ef   :  { %v7485_v22 = vpop.permute.xlu0 %7484 }
 0x5f0   :  { %v7944_v41 = vsel %vm1034_vm3, %v7943_v39, %v7939_v49  ;;  %v7988_v50 = vrot.slane %v7485_v22, %v13479_v51  ;;  %v7692_v39 = vsel %vm1013_vm0, %v7691_v42, %v7687_v4 }
 0x5f1   :  { %v7464_v27 = vpop.permute.xlu1 %7463  ;;  %v7949_v23 = vsel %vm1041_vm4, %v7948_v61, %v7944_v41  ;;  %v7697_v41 = vsel %vm1020_vm1, %v7696_v17, %v7692_v39 }
 0x5f2   :  { %v7953_v52 = vrot.slane %v7464_v27, %v13390_v47  ;;  %v13506_v27 = vld [vmem:[#allocation82_spill] sm:$0xff] }
 0x5f3   :  { %v7491_v55 = vpop.permute.xlu0 %7490 }
 0x5f4   :  { %v7954_v6 = vsel %vm1048_vm5, %v7953_v52, %v7949_v23  ;;  %v7998_v16 = vrot.slane %v7491_v55, %v13427_v10  ;;  %v7706_v23 = vrot.slane %v13506_v27, %v13385_v24 }
 0x5f5   :  { %v7470_v7 = vpop.permute.xlu1 %7469  ;;  %v7959_v25 = vsel %vm1055_vm6, %v7958_v19, %v7954_v6  ;;  %v13507_v19 = vld [vmem:[#allocation180_spill] sm:$0xff] }
 0x5f6   :  { %v7963_v54 = vrot.slane %v7470_v7, %v13398_v44  ;;  %v7701_v55 = vrot.slane %v13507_v19, %v13492_v29 }
 0x5f7   :  { %v7545_v34 = vpop.permute.xlu0 %7544 }
 0x5f8   :  { %v7964_v13 = vsel %vm1062_vm7, %v7963_v54, %v7959_v25  ;;  %v8086_v61 = vrot.slane %v7545_v34, %v13381_v58  ;;  %v7702_v54 = vsel %vm1027_vm2, %v7701_v55, %v7697_v41 }
 0x5f9   :  { %v7476_v21 = vpop.permute.xlu1 %7475  ;;  %v7969_v0 = vsel %vm1069_vm8, %v7968_v57, %v7964_v13  ;;  %v7707_v13 = vsel %vm1034_vm3, %v7706_v23, %v7702_v54 }
 0x5fa   :  { %v7973_v46 = vrot.slane %v7476_v21, %v13403_v9  ;;  %v13508_v21 = vld [vmem:[#allocation182_spill] sm:$0xff] }
 0x5fb   :  { %v7551_v48 = vpop.permute.xlu0 %7550 }
 0x5fc   :  { %v7974_v1 = vsel %vm1076_vm9, %v7973_v46, %v7969_v0  ;;  %v8096_v57 = vrot.slane %v7551_v48, %v13492_v29  ;;  %v7716_v0 = vrot.slane %v13508_v21, %v13390_v47 }
 0x5fd   :  { %v7482_v36 = vpop.permute.xlu1 %7481  ;;  %v7979_v59 = vsel %vm1083_vm10, %v7978_v26, %v7974_v1  ;;  %v13509_v26 = vld [vmem:[#allocation74_spill] sm:$0xff] }
 0x5fe   :  { %v7983_v53 = vrot.slane %v7482_v36, %v13412_v43  ;;  %v7711_v1 = vrot.slane %v13509_v26, %v13394_v62 }
 0x5ff   :  { %v7557_v40 = vpop.permute.xlu0 %7556 }
 0x600   :  { %v7984_v14 = vsel %vm12649_vm11, %v7983_v53, %v7979_v59  ;;  %v8106_v48 = vrot.slane %v7557_v40, %v13394_v62 }
 0x601   :  { %v7488_v28 = vpop.permute.xlu1 %7487  ;;  %v7989_v32 = vsel %vm1097_vm12, %v7988_v50, %v7984_v14  ;;  %v7712_v50 = vsel %vm1041_vm4, %v7711_v1, %v7707_v13 }
 0x602   :  { %v7993_v18 = vrot.slane %v7488_v28, %v13484_v8  ;;  %v7717_v28 = vsel %vm1048_vm5, %v7716_v0, %v7712_v50 }
 0x603   :  { %v7563_v38 = vpop.permute.xlu0 %7562 }
 0x604   :  { %v7994_v35 = vsel %vm1104_vm13, %v7993_v18, %v7989_v32  ;;  %v13510_v32 = vld [vmem:[#allocation186_spill] sm:$0xff]  ;;  %v8116_v40 = vrot.slane %v7563_v38, %v13400_v20 }
 0x605   :  { %v12292_v15 = vsel %vm1111_vm14, %v7998_v16, %v7994_v35  ;;  %v7542_v12 = vpop.permute.xlu1 %7541  ;;  %v7726_v18 = vrot.slane %v13510_v32, %v13398_v44  ;;  %v13511_v35 = vld [vmem:[#allocation87_spill] sm:$0xff] }
 0x606   :  { %v8082_v31 = vrot.slane %v7542_v12, %v13376_v45  ;;  %v7721_v37 = vrot.slane %v13511_v35, %v13400_v20 }
 0x607   :  { %v7569_v49 = vpop.permute.xlu0 %7568 }
 0x608   :  { %v8087_v6 = vsel %vm1013_vm0, %v8086_v61, %v8082_v31  ;;  %v7722_v17 = vsel %vm1055_vm6, %v7721_v37, %v7717_v28  ;;  %v13512_v31 = vld [vmem:[#allocation75_spill] sm:$0xff]  ;;  %v8126_v38 = vrot.slane %v7569_v49, %v13405_v2 }
 0x609   :  { %v7548_v22 = vpop.permute.xlu1 %7547  ;;  %v7727_v4 = vsel %vm1062_vm7, %v7726_v18, %v7722_v17  ;;  %v7736_v39 = vrot.slane %v13512_v31, %v13403_v9  ;;  %v13518_v17 = vld [vmem:[#allocation79_spill] sm:$0xff] }
 0x60a   :  { %v8091_v52 = vrot.slane %v7548_v22, %v13491_v11  ;;  %v13513_v22 = vld [vmem:[#allocation184_spill] sm:$0xff] }
 0x60b   :  { %v7575_v7 = vpop.permute.xlu0 %7574  ;;  %v7731_v41 = vrot.slane %v13513_v22, %v13405_v2 }
 0x60c   :  { %v8092_v25 = vsel %vm1020_vm1, %v8091_v52, %v8087_v6  ;;  %v8136_v49 = vrot.slane %v7575_v7, %v13414_v63 }
 0x60d   :  { %v8097_v36 = vsel %vm1027_vm2, %v8096_v57, %v8092_v25  ;;  %v7732_v19 = vsel %vm1069_vm8, %v7731_v41, %v7727_v4  ;;  %v13514_v25 = vld [vmem:[#allocation83_spill] sm:$0xff] }
 0x60e   :  { %v7554_v34 = vpop.permute.xlu1 %7553  ;;  %v7737_v6 = vsel %vm1076_vm9, %v7736_v39, %v7732_v19  ;;  %v7746_v54 = vrot.slane %v13514_v25, %v13412_v43 }
 0x60f   :  { %v8101_v46 = vrot.slane %v7554_v34, %v13385_v24  ;;  %v13515_v34 = vld [vmem:[#allocation189_spill] sm:$0xff] }
 0x610   :  { %v7581_v59 = vpop.permute.xlu0 %7580  ;;  %v7741_v13 = vrot.slane %v13515_v34, %v13414_v63 }
 0x611   :  { %v8102_v53 = vsel %vm1034_vm3, %v8101_v46, %v8097_v36  ;;  %v8146_v7 = vrot.slane %v7581_v59, %v13479_v51 }
 0x612   :  { %v7560_v14 = vpop.permute.xlu1 %7559  ;;  %v8107_v42 = vsel %vm1041_vm4, %v8106_v48, %v8102_v53  ;;  %v7742_v26 = vsel %vm1083_vm10, %v7741_v13, %v7737_v6  ;;  %v13516_v53 = vld [vmem:[#allocation103_spill] sm:$0xff] }
 0x613   :  { %v8111_v16 = vrot.slane %v7560_v14, %v13390_v47  ;;  %v7747_v36 = vsel %vm12649_vm11, %v7746_v54, %v7742_v26  ;;  %v7756_v50 = vrot.slane %v13516_v53, %v13484_v8  ;;  %v13517_v14 = vld [vmem:[#allocation91_spill] sm:$0xff] }
 0x614   :  { %v7587_v12 = vpop.permute.xlu0 %7586  ;;  %v7751_v28 = vrot.slane %v13517_v14, %v13479_v51 }
 0x615   :  { %v8112_v56 = vsel %vm1048_vm5, %v8111_v16, %v8107_v42 }
 0x616   :  { %v7566_v30 = vpop.permute.xlu1 %7565  ;;  %v8117_v27 = vsel %vm1055_vm6, %v8116_v40, %v8112_v56  ;;  %v7752_v35 = vsel %vm1097_vm12, %v7751_v28, %v7747_v36  ;;  %v7761_v40 = vrot.slane %v13518_v17, %v13427_v10 }
 0x617   :  { %v8121_v61 = vrot.slane %v7566_v30, %v13398_v44  ;;  %v7757_v42 = vsel %vm1104_vm13, %v7756_v50, %v7752_v35  ;;  %v8156_v30 = vrot.slane %v7587_v12, %v13427_v10 }
 0x618   :  { %v7641_v23 = vpop.permute.xlu0 %7640 }
 0x619   :  { %v8122_v52 = vsel %vm1062_vm7, %v8121_v61, %v8117_v27  ;;  %v7762_v61 = vsel %vm1111_vm14, %v7761_v40, %v7757_v42 }
 0x61a   :  { %v8127_v21 = vsel %vm1069_vm8, %v8126_v38, %v8122_v52  ;;  %v12372_v41 = vsel %vm13519_vm15, %v12132_v3, %v7762_v61  ;;  %v8244_v38 = vrot.slane %v7641_v23, %v13381_v58 }
 0x61b   :  { %v7572_v55 = vpop.permute.xlu1 %7571 }
 0x61c   :  { %v8131_v57 = vrot.slane %v7572_v55, %v13403_v9  ;;  %v7647_v0 = vpop.permute.xlu0 %7646 }
 0x61d   :  { %v8254_v3 = vrot.slane %v7647_v0, %v13492_v29 }
 0x61e   :  { %v8132_v46 = vsel %vm1076_vm9, %v8131_v57, %v8127_v21 }
 0x61f   :  { %v7578_v1 = vpop.permute.xlu1 %7577  ;;  %v8137_v32 = vsel %vm1083_vm10, %v8136_v49, %v8132_v46 }
 0x620   :  { %v8141_v48 = vrot.slane %v7578_v1, %v13412_v43  ;;  %v7653_v18 = vpop.permute.xlu0 %7652 }
 0x621   :  { %v8264_v58 = vrot.slane %v7653_v18, %v13394_v62 }
 0x622   :  { %v8142_v16 = vsel %vm12649_vm11, %v8141_v48, %v8137_v32  ;;  %vm13520_vm11 = vmmov %vm13519_vm15 }
 0x623   :  { %v7584_v37 = vpop.permute.xlu1 %7583  ;;  %v8147_v4 = vsel %vm1097_vm12, %v8146_v7, %v8142_v16 }
 0x624   :  { %v8151_v56 = vrot.slane %v7584_v37, %v13484_v8  ;;  %v7659_v31 = vpop.permute.xlu0 %7658 }
 0x625   :  { %v8274_v29 = vrot.slane %v7659_v31, %v13400_v20 }
 0x626   :  { %v8152_v39 = vsel %vm1104_vm13, %v8151_v56, %v8147_v4 }
 0x627   :  { %v8157_v22 = vsel %vm1111_vm14, %v8156_v30, %v8152_v39 }
 0x628   :  { %v7638_v59 = vpop.permute.xlu1 %7637  ;;  %v8317_v27 = vsel %vm13520_vm11, %v8157_v22, %v12257_v5  ;;  %v7665_v12 = vpop.permute.xlu0 %7664 }
 0x629   :  { %v8240_v52 = vrot.slane %v7638_v59, %v13376_v45  ;;  %v8320_v19 = vcombine.low %v12372_v41, %v8317_v27  ;;  %v8284_v1 = vrot.slane %v7665_v12, %v13405_v2  ;;  %v13524_v59 = vld [vmem:[#allocation41_spill] sm:$0xff] }
 0x62b   :  { %v8245_v25 = vsel %vm1013_vm0, %v8244_v38, %v8240_v52  ;;  %vm13521_vm0 = vcmask 851712  }
 0x62c   :  { %v7644_v55 = vpop.permute.xlu1 %7643  ;;  %v7668_v54 = vpop.permute.xlu0 %7667 }
 0x62d   :  { %v8249_v6 = vrot.slane %v7644_v55, %v13491_v11  ;;  %v8289_v62 = vrot.slane %v7668_v54, %v13403_v9 }
 0x62f   :  { %v8250_v57 = vsel %vm1020_vm1, %v8249_v6, %v8245_v25  ;;  %vm13522_vm1 = vmmov %vm13521_vm0 }
 0x630   :  { %v7650_v34 = vpop.permute.xlu1 %7649  ;;  %v8255_v45 = vsel %vm1027_vm2, %v8254_v3, %v8250_v57  ;;  %vm13523_vm2 = vmmov %vm13520_vm11 }
 0x631   :  { %v8259_v5 = vrot.slane %v7650_v34, %v13385_v24  ;;  %v7671_v13 = vpop.permute.xlu0 %7670 }
 0x633   :  { %v8260_v21 = vsel %vm1034_vm3, %v8259_v5, %v8255_v45  ;;  %vm13525_vm3 = vmmov %vm13523_vm2 }
 0x634   :  { %v7656_v23 = vpop.permute.xlu1 %7655  ;;  %v8265_v46 = vsel %vm1041_vm4, %v8264_v58, %v8260_v21 }
 0x635   :  { %v8269_v11 = vrot.slane %v7656_v23, %v13390_v47  ;;  %v7674_v26 = vpop.permute.xlu0 %7673  ;;  %v8294_v47 = vrot.slane %v7671_v13, %v13414_v63 }
 0x636   :  { %v8299_v20 = vrot.slane %v7674_v26, %v13412_v43 }
 0x637   :  { %v8270_v49 = vsel %vm1048_vm5, %v8269_v11, %v8265_v46 }
 0x638   :  { %v7662_v0 = vpop.permute.xlu1 %7661  ;;  %v8275_v36 = vsel %vm1055_vm6, %v8274_v29, %v8270_v49 }
 0x639   :  { %v8279_v24 = vrot.slane %v7662_v0, %v13398_v44  ;;  %v7677_v53 = vpop.permute.xlu0 %7676 }
 0x63a   :  { %v8304_v16 = vrot.slane %v7677_v53, %v13479_v51 }
 0x63b   :  { %v8280_v50 = vsel %vm1062_vm7, %v8279_v24, %v8275_v36 }
 0x63c   :  { %v8285_v48 = vsel %vm1069_vm8, %v8284_v1, %v8280_v50  ;;  %v7626_v14 = vpop.permute.xlu1 %7625 }
 0x63d   :  { %v8290_v28 = vsel %vm1076_vm9, %v8289_v62, %v8285_v48  ;;  %v7680_v32 = vpop.permute.xlu0 %7679  ;;  %v8220_v63 = vrot.slane %v7626_v14, %v13412_v43 }
 0x63e   :  { %v8295_v44 = vsel %vm1083_vm10, %v8294_v47, %v8290_v28  ;;  %v8309_v7 = vrot.slane %v7680_v32, %v13484_v8 }
 0x63f   :  { %v8300_v2 = vsel %vm13521_vm0, %v8299_v20, %v8295_v44  ;;  %v8221_v30 = vsel %vm13522_vm1, %v8220_v63, %v12224_v60  ;;  %v8328_v60 = vrot.slane %v8320_v19, %v10003_v33 }
 0x640   :  { %v7629_v18 = vpop.permute.xlu1 %7628  ;;  %v8305_v35 = vsel %vm1097_vm12, %v8304_v16, %v8300_v2 }
 0x641   :  { %v7683_v9 = vpop.permute.xlu0 %7682  ;;  %v8225_v42 = vrot.slane %v7629_v18, %v13479_v51  ;;  %v8310_v17 = vsel %vm1104_vm13, %v8309_v7, %v8305_v35 }
 0x642   :  { %v8314_v56 = vrot.slane %v7683_v9, %v13427_v10 }
 0x643   :  { %v8226_v31 = vsel %vm1097_vm12, %v8225_v42, %v8221_v30 }
 0x644   :  { %v7632_v37 = vpop.permute.xlu1 %7631  ;;  %v8315_v39 = vsel %vm1111_vm14, %v8314_v56, %v8310_v17 }
 0x645   :  { %v8230_v40 = vrot.slane %v7632_v37, %v13484_v8  ;;  %v8319_v22 = vsel %vm13523_vm2, %v8315_v39, %v12292_v15 }
 0x647   :  { %v8231_v61 = vsel %vm1104_vm13, %v8230_v40, %v8226_v31 }
 0x648   :  { %v7635_v4 = vpop.permute.xlu1 %7634 }
 0x649   :  { %v8235_v43 = vrot.slane %v7635_v4, %v13427_v10 }
 0x64b   :  { %v8236_v51 = vsel %vm1111_vm14, %v8235_v43, %v8231_v61 }
 0x64c   :  { %v8318_v8 = vsel %vm13525_vm3, %v8236_v51, %v13524_v59 }
 0x64d   :  { %v8321_v41 = vcombine.low %v8318_v8, %v8319_v22 }
 0x64f   :  { %v8335_v27 = vrot.slane %v8321_v41, %v10003_v33 }
 0x651   :  { %v8336_v52 = vcombine.low %v8328_v60, %v8335_v27 }
 0x653   :  { %8338 = vst [vmem:[#allocation5] sm:$0xff] %v8336_v52 }
 0x654   :  { %8569 = shalt.err (!%p8566_p12)
}
 0x655   :  { %s8570_s14 = scalar_lea.hbm %s12440_s5, 128 }
 0x656   :  { %p8571_p13 = scmp.ne.s32.totalorder %s12440_s5, %s8570_s14  ;;  %p8574_p0 = scmp.lt.u32.totalorder %s8570_s14, %s12440_s5 }
 0x658   :  { %p8576_p1 = pnand %p8574_p0, %p8571_p13 }
 0x65a   :  { %8579 = shalt.err (!%p8576_p1)
}
 0x65b   :  { %8348 = dma.vmem_to_hbm [thread:$0]  %s8346_s4, 128, %s12440_s5, [#allocation4]  }
 0x65c   :  { %8582 = dma.done.wait [#allocation4], 128  }
 0x65d   :  { %8583 = vsyncadd [#allocation4], 4294967168 }
 0x65e   :  { %8352 = vsyncpa [#allocation3], 1 }
 0x65f   :  { %8353 = vsyncpa [#allocation4], 1 }

</bundles_post_ra>
